<compile_context>
chip_gen: v6e
topology: v6e:2x2x1
jax: 0.10.0
libtpu: 0.0.40
codegen_flags: <defaults>
</compile_context>

<pallas_src>
import math

import jax
import jax.numpy as jnp
from jax import lax
from jax.experimental import pallas as pl
from jax.experimental.pallas import tpu as pltpu

D_MODEL = 128
N_HEADS = 4
HEAD_DIM = D_MODEL // N_HEADS
LN_EPS = 1e-5

# Order in which prepared (fused / folded / bf16-cast) params are fed to the kernel.
PREP_ORDER = (
    'we_cat', 'be_cat', 'wxv', 'wxt', 'wxa', 'bx',
    'mma_qkv_w', 'mma_qkv_b', 'mma_o_w', 'mma_o_b',
    'mha_q_w', 'mha_q_b', 'mha_kv_w', 'mha_kv_b', 'mha_o_w', 'mha_o_b',
    'wge', 'bge', 'wgx', 'bgx', 'ln_e', 'ln_x',
    'det_w', 'det_b',
    'lw1', 'lb1', 'lw2', 'lb2', 'gw1', 'gb1', 'gw2', 'gb2',
)


# ---------------------------------------------------------------------------
# In-kernel helpers (traced inside the Pallas kernel)
# ---------------------------------------------------------------------------
def _dot(a, w, b=None):
    """bf16 x bf16 MXU matmul with f32 accumulation (+ optional f32 bias)."""
    out = jnp.dot(a.astype(jnp.bfloat16), w.astype(jnp.bfloat16),
                  preferred_element_type=jnp.float32)
    return out if b is None else out + b


def _mh_attention(q, k, v, wo, bo):
    """Batched 4-head attention.

    q: (B, Sq, 128) bf16; k, v: (B, Sk, 128) bf16. The 1/sqrt(head_dim) scale
    is pre-folded into the Q projection weights. Per-head softmax(q k^T) @ v;
    head outputs are concatenated into one (B,Sq,128) buffer and projected
    with a SINGLE (128,128) output matmul. Softmax math stays f32.
    (Per-head 3-D batched einsums are used instead of a 4-D head-batched
    dot_general to stay on Mosaic's well-supported single-batch-dim path.)
    """
    heads = []
    for h in range(N_HEADS):
        sl = slice(h * HEAD_DIM, (h + 1) * HEAD_DIM)
        s = jnp.einsum('bqd,bkd->bqk', q[..., sl], k[..., sl],
                       preferred_element_type=jnp.float32)
        s = s - jnp.max(s, axis=-1, keepdims=True)
        p = jnp.exp(s)
        p = p * pl.reciprocal(jnp.sum(p, axis=-1, keepdims=True), approx=False)
        heads.append(jnp.einsum('bqk,bkd->bqd', p.astype(jnp.bfloat16),
                                v[..., sl], preferred_element_type=jnp.float32))
    o = jnp.concatenate(heads, axis=-1).astype(jnp.bfloat16)        # (B,Sq,128)
    bsz, sq, _ = o.shape
    out = _dot(o.reshape(bsz * sq, D_MODEL), wo, bo)                # f32
    return out.reshape(bsz, sq, D_MODEL)


def _layer_norm(x, gamma, beta):
    mu = jnp.mean(x, axis=-1, keepdims=True)
    var = jnp.mean((x - mu) ** 2, axis=-1, keepdims=True)
    return (x - mu) * lax.rsqrt(var + LN_EPS) * gamma + beta


# ---------------------------------------------------------------------------
# Fused EAM kernel: 3 event-aware branches + multi-scale detection head
# ---------------------------------------------------------------------------
def eam_kernel(e_ref, xv_ref, xt_ref, xa_ref,
               wec_ref, bec_ref, wxv_ref, wxt_ref, wxa_ref, bx_ref,
               qkvw_ref, qkvb_ref, mmaow_ref, mmaob_ref,
               mhaqw_ref, mhaqb_ref, mhakvw_ref, mhakvb_ref, mhaow_ref, mhaob_ref,
               wge_ref, bge_ref, wgx_ref, bgx_ref, lne_ref, lnx_ref,
               detw_ref, detb_ref,
               lw1_ref, lb1_ref, lw2_ref, lb2_ref,
               gw1_ref, gb1_ref, gw2_ref, gb2_ref,
               out_ref):
    e = e_ref[...]                                        # (B, Le, De) bf16
    B, Le, De = e.shape

    # Fused mlp_e for all 3 branches: ONE K=512 matmul -> (B*Le, 384).
    # (Dropout == identity in eval mode.)
    h_e_all = jnp.maximum(
        _dot(e.reshape(B * Le, De), wec_ref[...], bec_ref[...]),
        0.0).astype(jnp.bfloat16)

    def branch(b, x_ref, wx_ref):
        x = x_ref[...]                                    # (B, Lx, Dx) bf16
        Lx, Dx = x.shape[1], x.shape[2]
        S = Le + Lx

        h_e = h_e_all[:, b * D_MODEL:(b + 1) * D_MODEL]   # (B*Le, 128) bf16
        h_x = jnp.maximum(
            _dot(x.reshape(B * Lx, Dx), wx_ref[...], bx_ref[b]),
            0.0).astype(jnp.bfloat16)                     # (B*Lx, 128)

        # h_f = torch.cat([h_e, h_x], dim=1)
        h_f = jnp.concatenate([h_e.reshape(B, Le, D_MODEL),
                               h_x.reshape(B, Lx, D_MODEL)], axis=1)
        hf2 = h_f.reshape(B * S, D_MODEL)                 # (B*S, 128) bf16

        # TODO(synk): MultiModalAttention is undefined in the source; implemented
        # as standard 4-head self-attention with fused Wqkv + Wo projections.
        qkv = _dot(hf2, qkvw_ref[b], qkvb_ref[b]).astype(jnp.bfloat16)
        qkv = qkv.reshape(B, S, 3 * D_MODEL)
        q = qkv[..., :D_MODEL]
        k = qkv[..., D_MODEL:2 * D_MODEL]
        v = qkv[..., 2 * D_MODEL:]
        h_ = _mh_attention(q, k, v, mmaow_ref[b], mmaob_ref[b])   # (B,S,128) f32

        # TODO(synk): MultiHeadCrossAttention is undefined in the source; implemented
        # as (Attn(Q=query,K=key,V=key), weights, Attn(Q=value,K=key,V=key)).
        # Both query streams (h_e and h_x) share the same Wq and the same K/V,
        # so they are fused into ONE attention call with Sq = Le + Lx.
        kv2 = _dot(h_.reshape(B * S, D_MODEL), mhakvw_ref[b],
                   mhakvb_ref[b]).astype(jnp.bfloat16).reshape(B, S, 2 * D_MODEL)
        k2 = kv2[..., :D_MODEL]
        v2 = kv2[..., D_MODEL:]
        q_ex = _dot(hf2, mhaqw_ref[b],
                    mhaqb_ref[b]).astype(jnp.bfloat16).reshape(B, S, D_MODEL)
        h_out = _mh_attention(q_ex, k2, v2, mhaow_ref[b], mhaob_ref[b])

        h_e_mean = jnp.mean(h_out[:, :Le], axis=1)        # (B, 128) f32
        h_x_mean = jnp.mean(h_out[:, Le:], axis=1)        # (B, 128) f32

        g_e = _layer_norm(
            jnp.maximum(_dot(h_e_mean, wge_ref[b], bge_ref[b]), 0.0),
            lne_ref[b, 0], lne_ref[b, 1])
        g_x = _layer_norm(
            jnp.maximum(_dot(h_x_mean, wgx_ref[b], bgx_ref[b]), 0.0),
            lnx_ref[b, 0], lnx_ref[b, 1])
        return g_x, g_e

    g_v, g_e_v = branch(0, xv_ref, wxv_ref)
    g_t, g_e_t = branch(1, xt_ref, wxt_ref)
    g_a, g_e_a = branch(2, xa_ref, wxa_ref)

    # ----- MultiScaleDetectionModule -----
    # Cross-attention over a single key/value token: softmax over one key is
    # identically 1, so each branch's output is g_e @ (Wv@Wo) + (bv@Wo + bo).
    # The three pre-folded matmuls are block-fused into one K=384 matmul.
    ge_cat = jnp.concatenate([g_e_v, g_e_t, g_e_a], axis=-1)        # (B, 384)
    x_l = _dot(ge_cat, detw_ref[...], detb_ref[...])
    # lw2 / gw2 are zero-padded to (128,128) so logits land lane-dense in the
    # first 2 lanes of a (B,128) slab.
    y_l = _dot(jnp.maximum(_dot(x_l, lw1_ref[...], lb1_ref[...]), 0.0),
               lw2_ref[...], lb2_ref[...])
    g_e = (g_e_v + g_e_t + g_e_a) * (1.0 / 3.0)
    g_global = g_v + g_t + g_a + g_e
    y_g = _dot(jnp.maximum(_dot(g_global, gw1_ref[...], gb1_ref[...]), 0.0),
               gw2_ref[...], gb2_ref[...])

    out_ref[0] = y_g                                      # (B, 128)
    out_ref[1] = y_l                                      # (B, 128)


# ---------------------------------------------------------------------------
# Wrapper
# ---------------------------------------------------------------------------
def eam_model_forward(prep, visual_fea, text_fea, audio_fea, event_fea,
                      event_ord):
    del event_ord  # only used by the (stateful) memory bank, see below
    if audio_fea.ndim == 2:                 # matches the `.unsqueeze(1)` path
        audio_fea = audio_fea[:, None, :]
    B = event_fea.shape[0]

    # Activations go in as bf16 (halves input DMA; matmuls are bf16 anyway).
    data = (event_fea.astype(jnp.bfloat16), visual_fea.astype(jnp.bfloat16),
            text_fea.astype(jnp.bfloat16), audio_fea.astype(jnp.bfloat16))
    args = data + tuple(prep[k] for k in PREP_ORDER)

    def cspec(shape):
        z = (0,) * len(shape)
        return pl.BlockSpec(shape, lambda i, _z=z: _z)

    out = pl.pallas_call(
        eam_kernel,
        grid=(1,),
        in_specs=[cspec(a.shape) for a in args],
        out_specs=cspec((2, B, D_MODEL)),
        out_shape=jax.ShapeDtypeStruct((2, B, D_MODEL), jnp.float32),
        compiler_params=pltpu.CompilerParams(
            dimension_semantics=("arbitrary",)),
    )(*args)

    y_g = out[0, :, :2]
    y_l = out[1, :, :2]
    output = 0.5 * (y_l + y_g)

    # TODO(synk): EventMemoryBank is stateful Python (deques + random sampling)
    # and is never pushed to inside EAM_Model.forward, so with an empty bank
    # compute_batch_contrastive_loss is exactly 0.0.
    event_cl_loss = jnp.float32(0.0)
    return output, y_g, y_l, event_cl_loss


# ---------------------------------------------------------------------------
# Parameter initialization (PyTorch-layout, f32) + wrapper-side fusion/folding
# ---------------------------------------------------------------------------
def _nrm(key, shape):
    return 0.02 * jax.random.normal(key, shape, jnp.float32)


def init_params(key, d_event, d_visual, d_text, d_audio, d=D_MODEL):
    nb = 3  # branches: visual, text, audio
    ks = iter(jax.random.split(key, 32))
    ln = jnp.stack([jnp.ones((1, d), jnp.float32),
                    jnp.zeros((1, d), jnp.float32)], axis=0)        # (2,1,d)
    ln3 = jnp.tile(ln[None], (nb, 1, 1, 1))                          # (3,2,1,d)
    return {
        'we': _nrm(next(ks), (nb, d_event, d)),
        'be': _nrm(next(ks), (nb, 1, d)),
        'wxv': _nrm(next(ks), (d_visual, d)),
        'wxt': _nrm(next(ks), (d_text, d)),
        'wxa': _nrm(next(ks), (d_audio, d)),
        'bx': _nrm(next(ks), (nb, 1, d)),
        'mma_w': _nrm(next(ks), (nb, 4, d, d)),   # Wq, Wk, Wv, Wo
        'mma_b': _nrm(next(ks), (nb, 4, 1, d)),
        'mha_w': _nrm(next(ks), (nb, 4, d, d)),
        'mha_b': _nrm(next(ks), (nb, 4, 1, d)),
        'wge': _nrm(next(ks), (nb, d, d)),
        'bge': _nrm(next(ks), (nb, 1, d)),
        'wgx': _nrm(next(ks), (nb, d, d)),
        'bgx': _nrm(next(ks), (nb, 1, d)),
        'ln_e': ln3,
        'ln_x': ln3,
        'dwv': _nrm(next(ks), (nb, d, d)),
        'dbv': _nrm(next(ks), (nb, 1, d)),
        'dwo': _nrm(next(ks), (nb, d, d)),
        'dbo': _nrm(next(ks), (nb, 1, d)),
        'lw1': _nrm(next(ks), (d, d)),
        'lb1': _nrm(next(ks), (1, d)),
        'lw2': _nrm(next(ks), (d, 2)),
        'lb2': _nrm(next(ks), (1, 2)),
        'gw1': _nrm(next(ks), (d, d)),
        'gb1': _nrm(next(ks), (1, d)),
        'gw2': _nrm(next(ks), (d, 2)),
        'gb2': _nrm(next(ks), (1, 2)),
    }


def prepare_params(p, d=D_MODEL):
    """Wrapper-side fusion / folding: done once, in f32, then cast to bf16."""
    f32, bf16 = jnp.float32, jnp.bfloat16
    scale = 1.0 / math.sqrt(HEAD_DIM)

    # mlp_e fused across branches: (De, 3*d) / (1, 3*d)
    we_cat = jnp.concatenate([p['we'][0], p['we'][1], p['we'][2]], axis=-1)
    be_cat = jnp.concatenate([p['be'][0], p['be'][1], p['be'][2]], axis=-1)

    # Self-attention: fused QKV weight (scale folded into Q).
    mma_qkv_w = jnp.concatenate(
        [p['mma_w'][:, 0] * scale, p['mma_w'][:, 1], p['mma_w'][:, 2]], axis=-1)
    mma_qkv_b = jnp.concatenate(
        [p['mma_b'][:, 0] * scale, p['mma_b'][:, 1], p['mma_b'][:, 2]], axis=-1)

    # Cross-attention: Q (scale folded) + fused K/V weight.
    mha_q_w = p['mha_w'][:, 0] * scale
    mha_q_b = p['mha_b'][:, 0] * scale
    mha_kv_w = jnp.concatenate([p['mha_w'][:, 1], p['mha_w'][:, 2]], axis=-1)
    mha_kv_b = jnp.concatenate([p['mha_b'][:, 1], p['mha_b'][:, 2]], axis=-1)

    # Detection head single-token attention pre-folded: W_eff = Wv@Wo,
    # b_eff = bv@Wo + bo; then block-fused across branches (K=3*d).
    det_w = jnp.einsum('bij,bjk->bik', p['dwv'], p['dwo'])
    det_b = jnp.einsum('bij,bjk->bik', p['dbv'], p['dwo']) + p['dbo']
    det_w_cat = det_w.reshape(3 * d, d)
    det_b_sum = jnp.sum(det_b, axis=0)

    def pad2(w):  # zero-pad 2-wide classifier to 128 lanes (lane-dense output)
        return jnp.pad(w, ((0, 0), (0, d - w.shape[1])))

    return {
        'we_cat': we_cat.astype(bf16), 'be_cat': be_cat.astype(f32),
        'wxv': p['wxv'].astype(bf16), 'wxt': p['wxt'].astype(bf16),
        'wxa': p['wxa'].astype(bf16), 'bx': p['bx'].astype(f32),
        'mma_qkv_w': mma_qkv_w.astype(bf16), 'mma_qkv_b': mma_qkv_b.astype(f32),
        'mma_o_w': p['mma_w'][:, 3].astype(bf16),
        'mma_o_b': p['mma_b'][:, 3].astype(f32),
        'mha_q_w': mha_q_w.astype(bf16), 'mha_q_b': mha_q_b.astype(f32),
        'mha_kv_w': mha_kv_w.astype(bf16), 'mha_kv_b': mha_kv_b.astype(f32),
        'mha_o_w': p['mha_w'][:, 3].astype(bf16),
        'mha_o_b': p['mha_b'][:, 3].astype(f32),
        'wge': p['wge'].astype(bf16), 'bge': p['bge'].astype(f32),
        'wgx': p['wgx'].astype(bf16), 'bgx': p['bgx'].astype(f32),
        'ln_e': p['ln_e'].astype(f32), 'ln_x': p['ln_x'].astype(f32),
        'det_w': det_w_cat.astype(bf16), 'det_b': det_b_sum.astype(f32),
        'lw1': p['lw1'].astype(bf16), 'lb1': p['lb1'].astype(f32),
        'lw2': pad2(p['lw2']).astype(bf16), 'lb2': pad2(p['lb2']).astype(f32),
        'gw1': p['gw1'].astype(bf16), 'gb1': p['gb1'].astype(f32),
        'gw2': pad2(p['gw2']).astype(bf16), 'gb2': pad2(p['gb2']).astype(f32),
    }


if __name__ == "__main__":
    key = jax.random.PRNGKey(0)
    B, Le, Lv, Lt, La = 2, 8, 8, 8, 8
    D_TEXT = 512      # dataset='fakett'
    D_VIS, D_AUD = 512, 768

    kv, kt, ka, ke, kp = jax.random.split(key, 5)
    visual_fea = jax.random.normal(kv, (B, Lv, D_VIS), jnp.float32)
    text_fea = jax.random.normal(kt, (B, Lt, D_TEXT), jnp.float32)
    audio_fea = jax.random.normal(ka, (B, La, D_AUD), jnp.float32)
    event_fea = jax.random.normal(ke, (B, Le, D_TEXT), jnp.float32)
    event_ord = jnp.arange(B, dtype=jnp.int32)

    params = init_params(kp, D_TEXT, D_VIS, D_TEXT, D_AUD)
    prep = prepare_params(params)

    fwd = jax.jit(eam_model_forward)
    output, y_g, y_l, cl_loss = fwd(prep, visual_fea, text_fea, audio_fea,
                                    event_fea, event_ord)
    jax.block_until_ready((output, y_g, y_l, cl_loss))

    assert output.shape == (B, 2) and y_g.shape == (B, 2) and y_l.shape == (B, 2)
    assert bool(jnp.all(jnp.isfinite(output)))
    assert bool(jnp.all(jnp.isfinite(y_g))) and bool(jnp.all(jnp.isfinite(y_l)))
    print("KERNEL_OK")
</pallas_src>

<mosaic_0001>
module attributes {stable_mosaic.version = 11 : i64} {
  func.func @eam_kernel(%arg0: i32, %arg1: memref<2x8x512xbf16, #tpu.memory_space<vmem>>, %arg2: memref<2x8x512xbf16, #tpu.memory_space<vmem>>, %arg3: memref<2x8x512xbf16, #tpu.memory_space<vmem>>, %arg4: memref<2x8x768xbf16, #tpu.memory_space<vmem>>, %arg5: memref<512x384xbf16, #tpu.memory_space<vmem>>, %arg6: memref<1x384xf32, #tpu.memory_space<vmem>>, %arg7: memref<512x128xbf16, #tpu.memory_space<vmem>>, %arg8: memref<512x128xbf16, #tpu.memory_space<vmem>>, %arg9: memref<768x128xbf16, #tpu.memory_space<vmem>>, %arg10: memref<3x1x128xf32, #tpu.memory_space<vmem>>, %arg11: memref<3x128x384xbf16, #tpu.memory_space<vmem>>, %arg12: memref<3x1x384xf32, #tpu.memory_space<vmem>>, %arg13: memref<3x128x128xbf16, #tpu.memory_space<vmem>>, %arg14: memref<3x1x128xf32, #tpu.memory_space<vmem>>, %arg15: memref<3x128x128xbf16, #tpu.memory_space<vmem>>, %arg16: memref<3x1x128xf32, #tpu.memory_space<vmem>>, %arg17: memref<3x128x256xbf16, #tpu.memory_space<vmem>>, %arg18: memref<3x1x256xf32, #tpu.memory_space<vmem>>, %arg19: memref<3x128x128xbf16, #tpu.memory_space<vmem>>, %arg20: memref<3x1x128xf32, #tpu.memory_space<vmem>>, %arg21: memref<3x128x128xbf16, #tpu.memory_space<vmem>>, %arg22: memref<3x1x128xf32, #tpu.memory_space<vmem>>, %arg23: memref<3x128x128xbf16, #tpu.memory_space<vmem>>, %arg24: memref<3x1x128xf32, #tpu.memory_space<vmem>>, %arg25: memref<3x2x1x128xf32, #tpu.memory_space<vmem>>, %arg26: memref<3x2x1x128xf32, #tpu.memory_space<vmem>>, %arg27: memref<384x128xbf16, #tpu.memory_space<vmem>>, %arg28: memref<1x128xf32, #tpu.memory_space<vmem>>, %arg29: memref<128x128xbf16, #tpu.memory_space<vmem>>, %arg30: memref<1x128xf32, #tpu.memory_space<vmem>>, %arg31: memref<128x128xbf16, #tpu.memory_space<vmem>>, %arg32: memref<1x128xf32, #tpu.memory_space<vmem>>, %arg33: memref<128x128xbf16, #tpu.memory_space<vmem>>, %arg34: memref<1x128xf32, #tpu.memory_space<vmem>>, %arg35: memref<128x128xbf16, #tpu.memory_space<vmem>>, %arg36: memref<1x128xf32, #tpu.memory_space<vmem>>, %arg37: memref<2x2x128xf32, #tpu.memory_space<vmem>>) attributes {dimension_semantics = [#tpu.dimension_semantics<arbitrary>], iteration_bounds = array<i64: 1>, scalar_prefetch = 0 : i64, scratch_operands = 0 : i64, tpu.core_type = #tpu.core_type<tc>, window_params = [{pipeline_mode = #tpu.pipeline_mode<synchronous>, transform_indices = @transform_0, window_bounds = array<i64: 2, 8, 512>}, {pipeline_mode = #tpu.pipeline_mode<synchronous>, transform_indices = @transform_1, window_bounds = array<i64: 2, 8, 512>}, {pipeline_mode = #tpu.pipeline_mode<synchronous>, transform_indices = @transform_2, window_bounds = array<i64: 2, 8, 512>}, {pipeline_mode = #tpu.pipeline_mode<synchronous>, transform_indices = @transform_3, window_bounds = array<i64: 2, 8, 768>}, {pipeline_mode = #tpu.pipeline_mode<synchronous>, transform_indices = @transform_4, window_bounds = array<i64: 512, 384>}, {pipeline_mode = #tpu.pipeline_mode<synchronous>, transform_indices = @transform_5, window_bounds = array<i64: 1, 384>}, {pipeline_mode = #tpu.pipeline_mode<synchronous>, transform_indices = @transform_6, window_bounds = array<i64: 512, 128>}, {pipeline_mode = #tpu.pipeline_mode<synchronous>, transform_indices = @transform_7, window_bounds = array<i64: 512, 128>}, {pipeline_mode = #tpu.pipeline_mode<synchronous>, transform_indices = @transform_8, window_bounds = array<i64: 768, 128>}, {pipeline_mode = #tpu.pipeline_mode<synchronous>, transform_indices = @transform_9, window_bounds = array<i64: 3, 1, 128>}, {pipeline_mode = #tpu.pipeline_mode<synchronous>, transform_indices = @transform_10, window_bounds = array<i64: 3, 128, 384>}, {pipeline_mode = #tpu.pipeline_mode<synchronous>, transform_indices = @transform_11, window_bounds = array<i64: 3, 1, 384>}, {pipeline_mode = #tpu.pipeline_mode<synchronous>, transform_indices = @transform_12, window_bounds = array<i64: 3, 128, 128>}, {pipeline_mode = #tpu.pipeline_mode<synchronous>, transform_indices = @transform_13, window_bounds = array<i64: 3, 1, 128>}, {pipeline_mode = #tpu.pipeline_mode<synchronous>, transform_indices = @transform_14, window_bounds = array<i64: 3, 128, 128>}, {pipeline_mode = #tpu.pipeline_mode<synchronous>, transform_indices = @transform_15, window_bounds = array<i64: 3, 1, 128>}, {pipeline_mode = #tpu.pipeline_mode<synchronous>, transform_indices = @transform_16, window_bounds = array<i64: 3, 128, 256>}, {pipeline_mode = #tpu.pipeline_mode<synchronous>, transform_indices = @transform_17, window_bounds = array<i64: 3, 1, 256>}, {pipeline_mode = #tpu.pipeline_mode<synchronous>, transform_indices = @transform_18, window_bounds = array<i64: 3, 128, 128>}, {pipeline_mode = #tpu.pipeline_mode<synchronous>, transform_indices = @transform_19, window_bounds = array<i64: 3, 1, 128>}, {pipeline_mode = #tpu.pipeline_mode<synchronous>, transform_indices = @transform_20, window_bounds = array<i64: 3, 128, 128>}, {pipeline_mode = #tpu.pipeline_mode<synchronous>, transform_indices = @transform_21, window_bounds = array<i64: 3, 1, 128>}, {pipeline_mode = #tpu.pipeline_mode<synchronous>, transform_indices = @transform_22, window_bounds = array<i64: 3, 128, 128>}, {pipeline_mode = #tpu.pipeline_mode<synchronous>, transform_indices = @transform_23, window_bounds = array<i64: 3, 1, 128>}, {pipeline_mode = #tpu.pipeline_mode<synchronous>, transform_indices = @transform_24, window_bounds = array<i64: 3, 2, 1, 128>}, {pipeline_mode = #tpu.pipeline_mode<synchronous>, transform_indices = @transform_25, window_bounds = array<i64: 3, 2, 1, 128>}, {pipeline_mode = #tpu.pipeline_mode<synchronous>, transform_indices = @transform_26, window_bounds = array<i64: 384, 128>}, {pipeline_mode = #tpu.pipeline_mode<synchronous>, transform_indices = @transform_27, window_bounds = array<i64: 1, 128>}, {pipeline_mode = #tpu.pipeline_mode<synchronous>, transform_indices = @transform_28, window_bounds = array<i64: 128, 128>}, {pipeline_mode = #tpu.pipeline_mode<synchronous>, transform_indices = @transform_29, window_bounds = array<i64: 1, 128>}, {pipeline_mode = #tpu.pipeline_mode<synchronous>, transform_indices = @transform_30, window_bounds = array<i64: 128, 128>}, {pipeline_mode = #tpu.pipeline_mode<synchronous>, transform_indices = @transform_31, window_bounds = array<i64: 1, 128>}, {pipeline_mode = #tpu.pipeline_mode<synchronous>, transform_indices = @transform_32, window_bounds = array<i64: 128, 128>}, {pipeline_mode = #tpu.pipeline_mode<synchronous>, transform_indices = @transform_33, window_bounds = array<i64: 1, 128>}, {pipeline_mode = #tpu.pipeline_mode<synchronous>, transform_indices = @transform_34, window_bounds = array<i64: 128, 128>}, {pipeline_mode = #tpu.pipeline_mode<synchronous>, transform_indices = @transform_35, window_bounds = array<i64: 1, 128>}, {pipeline_mode = #tpu.pipeline_mode<synchronous>, transform_indices = @transform_36, window_bounds = array<i64: 2, 2, 128>}]} {
    %c0 = arith.constant 0 : index
    %c0_0 = arith.constant 0 : index
    %c0_1 = arith.constant 0 : index
    %0 = vector.load %arg1[%c0, %c0_0, %c0_1] : memref<2x8x512xbf16, #tpu.memory_space<vmem>>, vector<2x8x512xbf16>
    %1 = vector.shape_cast %0 : vector<2x8x512xbf16> to vector<16x512xbf16>
    %c0_2 = arith.constant 0 : index
    %c0_3 = arith.constant 0 : index
    %2 = vector.load %arg5[%c0_2, %c0_3] : memref<512x384xbf16, #tpu.memory_space<vmem>>, vector<512x384xbf16>
    %c0_4 = arith.constant 0 : index
    %c0_5 = arith.constant 0 : index
    %3 = vector.load %arg6[%c0_4, %c0_5] : memref<1x384xf32, #tpu.memory_space<vmem>>, vector<1x384xf32>
    %cst = arith.constant dense<0.000000e+00> : vector<16x384xf32>
    %4 = tpu.matmul %1, %2, %cst {dimension_numbers = #tpu.dot_dimension_numbers<[1], [0], [0], [1], [0, 0, 1, 1], [], []>} : vector<16x512xbf16>, vector<512x384xbf16>, vector<16x384xf32> -> vector<16x384xf32>
    %5 = vector.broadcast %3 : vector<1x384xf32> to vector<16x384xf32>
    %6 = arith.addf %4, %5 : vector<16x384xf32>
    %cst_6 = arith.constant 0.000000e+00 : f32
    %7 = vector.broadcast %cst_6 : f32 to vector<16x384xf32>
    %8 = arith.maximumf %6, %7 : vector<16x384xf32>
    %9 = arith.truncf %8 : vector<16x384xf32> to vector<16x384xbf16>
    %c0_7 = arith.constant 0 : index
    %c0_8 = arith.constant 0 : index
    %c0_9 = arith.constant 0 : index
    %10 = vector.load %arg2[%c0_7, %c0_8, %c0_9] : memref<2x8x512xbf16, #tpu.memory_space<vmem>>, vector<2x8x512xbf16>
    %11 = vector.extract_strided_slice %9 {offsets = [0, 0], sizes = [16, 128], strides = [1, 1]} : vector<16x384xbf16> to vector<16x128xbf16>
    %12 = vector.shape_cast %10 : vector<2x8x512xbf16> to vector<16x512xbf16>
    %c0_10 = arith.constant 0 : index
    %c0_11 = arith.constant 0 : index
    %13 = vector.load %arg7[%c0_10, %c0_11] : memref<512x128xbf16, #tpu.memory_space<vmem>>, vector<512x128xbf16>
    %c0_12 = arith.constant 0 : index
    %c0_13 = arith.constant 0 : index
    %c0_14 = arith.constant 0 : index
    %14 = vector.load %arg10[%c0_12, %c0_13, %c0_14] : memref<3x1x128xf32, #tpu.memory_space<vmem>>, vector<1x1x128xf32>
    %15 = vector.shape_cast %14 : vector<1x1x128xf32> to vector<1x128xf32>
    %cst_15 = arith.constant dense<0.000000e+00> : vector<16x128xf32>
    %16 = tpu.matmul %12, %13, %cst_15 {dimension_numbers = #tpu.dot_dimension_numbers<[1], [0], [0], [1], [0, 0, 1, 1], [], []>} : vector<16x512xbf16>, vector<512x128xbf16>, vector<16x128xf32> -> vector<16x128xf32>
    %17 = vector.broadcast %15 : vector<1x128xf32> to vector<16x128xf32>
    %18 = arith.addf %16, %17 : vector<16x128xf32>
    %cst_16 = arith.constant 0.000000e+00 : f32
    %19 = vector.broadcast %cst_16 : f32 to vector<16x128xf32>
    %20 = arith.maximumf %18, %19 : vector<16x128xf32>
    %21 = arith.truncf %20 : vector<16x128xf32> to vector<16x128xbf16>
    %22 = vector.shape_cast %11 : vector<16x128xbf16> to vector<2x8x128xbf16>
    %23 = vector.shape_cast %21 : vector<16x128xbf16> to vector<2x8x128xbf16>
    %24 = tpu.concatenate %22, %23 in 1 : vector<2x8x128xbf16>, vector<2x8x128xbf16> -> vector<2x16x128xbf16>
    %25 = vector.shape_cast %24 : vector<2x16x128xbf16> to vector<32x128xbf16>
    %c0_17 = arith.constant 0 : index
    %c0_18 = arith.constant 0 : index
    %c0_19 = arith.constant 0 : index
    %26 = vector.load %arg11[%c0_17, %c0_18, %c0_19] : memref<3x128x384xbf16, #tpu.memory_space<vmem>>, vector<1x128x384xbf16>
    %27 = vector.shape_cast %26 : vector<1x128x384xbf16> to vector<128x384xbf16>
    %c0_20 = arith.constant 0 : index
    %c0_21 = arith.constant 0 : index
    %c0_22 = arith.constant 0 : index
    %28 = vector.load %arg12[%c0_20, %c0_21, %c0_22] : memref<3x1x384xf32, #tpu.memory_space<vmem>>, vector<1x1x384xf32>
    %29 = vector.shape_cast %28 : vector<1x1x384xf32> to vector<1x384xf32>
    %cst_23 = arith.constant dense<0.000000e+00> : vector<32x384xf32>
    %30 = tpu.matmul %25, %27, %cst_23 {dimension_numbers = #tpu.dot_dimension_numbers<[1], [0], [0], [1], [0, 0, 1, 1], [], []>} : vector<32x128xbf16>, vector<128x384xbf16>, vector<32x384xf32> -> vector<32x384xf32>
    %31 = vector.broadcast %29 : vector<1x384xf32> to vector<32x384xf32>
    %32 = arith.addf %30, %31 : vector<32x384xf32>
    %33 = arith.truncf %32 : vector<32x384xf32> to vector<32x384xbf16>
    %34 = vector.shape_cast %33 : vector<32x384xbf16> to vector<2x16x384xbf16>
    %35 = vector.extract_strided_slice %34 {offsets = [0, 0, 0], sizes = [2, 16, 128], strides = [1, 1, 1]} : vector<2x16x384xbf16> to vector<2x16x128xbf16>
    %36 = vector.extract_strided_slice %34 {offsets = [0, 0, 128], sizes = [2, 16, 128], strides = [1, 1, 1]} : vector<2x16x384xbf16> to vector<2x16x128xbf16>
    %37 = vector.extract_strided_slice %34 {offsets = [0, 0, 256], sizes = [2, 16, 128], strides = [1, 1, 1]} : vector<2x16x384xbf16> to vector<2x16x128xbf16>
    %c0_24 = arith.constant 0 : index
    %c0_25 = arith.constant 0 : index
    %c0_26 = arith.constant 0 : index
    %38 = vector.load %arg13[%c0_24, %c0_25, %c0_26] : memref<3x128x128xbf16, #tpu.memory_space<vmem>>, vector<1x128x128xbf16>
    %39 = vector.shape_cast %38 : vector<1x128x128xbf16> to vector<128x128xbf16>
    %c0_27 = arith.constant 0 : index
    %c0_28 = arith.constant 0 : index
    %c0_29 = arith.constant 0 : index
    %40 = vector.load %arg14[%c0_27, %c0_28, %c0_29] : memref<3x1x128xf32, #tpu.memory_space<vmem>>, vector<1x1x128xf32>
    %41 = vector.shape_cast %40 : vector<1x1x128xf32> to vector<1x128xf32>
    %42 = vector.extract_strided_slice %35 {offsets = [0, 0, 0], sizes = [2, 16, 32], strides = [1, 1, 1]} : vector<2x16x128xbf16> to vector<2x16x32xbf16>
    %43 = vector.extract_strided_slice %36 {offsets = [0, 0, 0], sizes = [2, 16, 32], strides = [1, 1, 1]} : vector<2x16x128xbf16> to vector<2x16x32xbf16>
    "tpu.trace_start"() <{level = 10 : i32, message = "bqd,bkd->bqk"}> : () -> ()
    %cst_30 = arith.constant dense<0.000000e+00> : vector<2x16x16xf32>
    %44 = tpu.matmul %42, %43, %cst_30 {dimension_numbers = #tpu.dot_dimension_numbers<[2], [2], [1], [1], [0, 0, 0, 1, 1, 1], [0], [0]>} : vector<2x16x32xbf16>, vector<2x16x32xbf16>, vector<2x16x16xf32> -> vector<2x16x16xf32>
    "tpu.trace_stop"() : () -> ()
    %cst_31 = arith.constant dense<0xFF800000> : vector<2x16xf32>
    %45 = vector.multi_reduction <maximumf>, %44, %cst_31 [2] : vector<2x16x16xf32> to vector<2x16xf32>
    %46 = vector.shape_cast %45 : vector<2x16xf32> to vector<2x16x1xf32>
    %47 = vector.broadcast %46 : vector<2x16x1xf32> to vector<2x16x16xf32>
    %48 = arith.subf %44, %47 : vector<2x16x16xf32>
    %49 = math.exp %48 : vector<2x16x16xf32>
    %cst_32 = arith.constant dense<0.000000e+00> : vector<2x16xf32>
    %50 = vector.multi_reduction <add>, %49, %cst_32 [2] : vector<2x16x16xf32> to vector<2x16xf32>
    %51 = vector.shape_cast %50 : vector<2x16xf32> to vector<2x16x1xf32>
    %52 = tpu.reciprocal %51 : vector<2x16x1xf32> -> vector<2x16x1xf32>
    %53 = vector.broadcast %52 : vector<2x16x1xf32> to vector<2x16x16xf32>
    %54 = arith.mulf %49, %53 : vector<2x16x16xf32>
    %55 = arith.truncf %54 : vector<2x16x16xf32> to vector<2x16x16xbf16>
    %56 = vector.extract_strided_slice %37 {offsets = [0, 0, 0], sizes = [2, 16, 32], strides = [1, 1, 1]} : vector<2x16x128xbf16> to vector<2x16x32xbf16>
    "tpu.trace_start"() <{level = 10 : i32, message = "bqk,bkd->bqd"}> : () -> ()
    %cst_33 = arith.constant dense<0.000000e+00> : vector<2x16x32xf32>
    %57 = tpu.matmul %55, %56, %cst_33 {dimension_numbers = #tpu.dot_dimension_numbers<[2], [1], [1], [2], [0, 0, 0, 1, 1, 2], [0], [0]>} : vector<2x16x16xbf16>, vector<2x16x32xbf16>, vector<2x16x32xf32> -> vector<2x16x32xf32>
    "tpu.trace_stop"() : () -> ()
    %58 = vector.extract_strided_slice %35 {offsets = [0, 0, 32], sizes = [2, 16, 32], strides = [1, 1, 1]} : vector<2x16x128xbf16> to vector<2x16x32xbf16>
    %59 = vector.extract_strided_slice %36 {offsets = [0, 0, 32], sizes = [2, 16, 32], strides = [1, 1, 1]} : vector<2x16x128xbf16> to vector<2x16x32xbf16>
    "tpu.trace_start"() <{level = 10 : i32, message = "bqd,bkd->bqk"}> : () -> ()
    %cst_34 = arith.constant dense<0.000000e+00> : vector<2x16x16xf32>
    %60 = tpu.matmul %58, %59, %cst_34 {dimension_numbers = #tpu.dot_dimension_numbers<[2], [2], [1], [1], [0, 0, 0, 1, 1, 1], [0], [0]>} : vector<2x16x32xbf16>, vector<2x16x32xbf16>, vector<2x16x16xf32> -> vector<2x16x16xf32>
    "tpu.trace_stop"() : () -> ()
    %cst_35 = arith.constant dense<0xFF800000> : vector<2x16xf32>
    %61 = vector.multi_reduction <maximumf>, %60, %cst_35 [2] : vector<2x16x16xf32> to vector<2x16xf32>
    %62 = vector.shape_cast %61 : vector<2x16xf32> to vector<2x16x1xf32>
    %63 = vector.broadcast %62 : vector<2x16x1xf32> to vector<2x16x16xf32>
    %64 = arith.subf %60, %63 : vector<2x16x16xf32>
    %65 = math.exp %64 : vector<2x16x16xf32>
    %cst_36 = arith.constant dense<0.000000e+00> : vector<2x16xf32>
    %66 = vector.multi_reduction <add>, %65, %cst_36 [2] : vector<2x16x16xf32> to vector<2x16xf32>
    %67 = vector.shape_cast %66 : vector<2x16xf32> to vector<2x16x1xf32>
    %68 = tpu.reciprocal %67 : vector<2x16x1xf32> -> vector<2x16x1xf32>
    %69 = vector.broadcast %68 : vector<2x16x1xf32> to vector<2x16x16xf32>
    %70 = arith.mulf %65, %69 : vector<2x16x16xf32>
    %71 = arith.truncf %70 : vector<2x16x16xf32> to vector<2x16x16xbf16>
    %72 = vector.extract_strided_slice %37 {offsets = [0, 0, 32], sizes = [2, 16, 32], strides = [1, 1, 1]} : vector<2x16x128xbf16> to vector<2x16x32xbf16>
    "tpu.trace_start"() <{level = 10 : i32, message = "bqk,bkd->bqd"}> : () -> ()
    %cst_37 = arith.constant dense<0.000000e+00> : vector<2x16x32xf32>
    %73 = tpu.matmul %71, %72, %cst_37 {dimension_numbers = #tpu.dot_dimension_numbers<[2], [1], [1], [2], [0, 0, 0, 1, 1, 2], [0], [0]>} : vector<2x16x16xbf16>, vector<2x16x32xbf16>, vector<2x16x32xf32> -> vector<2x16x32xf32>
    "tpu.trace_stop"() : () -> ()
    %74 = vector.extract_strided_slice %35 {offsets = [0, 0, 64], sizes = [2, 16, 32], strides = [1, 1, 1]} : vector<2x16x128xbf16> to vector<2x16x32xbf16>
    %75 = vector.extract_strided_slice %36 {offsets = [0, 0, 64], sizes = [2, 16, 32], strides = [1, 1, 1]} : vector<2x16x128xbf16> to vector<2x16x32xbf16>
    "tpu.trace_start"() <{level = 10 : i32, message = "bqd,bkd->bqk"}> : () -> ()
    %cst_38 = arith.constant dense<0.000000e+00> : vector<2x16x16xf32>
    %76 = tpu.matmul %74, %75, %cst_38 {dimension_numbers = #tpu.dot_dimension_numbers<[2], [2], [1], [1], [0, 0, 0, 1, 1, 1], [0], [0]>} : vector<2x16x32xbf16>, vector<2x16x32xbf16>, vector<2x16x16xf32> -> vector<2x16x16xf32>
    "tpu.trace_stop"() : () -> ()
    %cst_39 = arith.constant dense<0xFF800000> : vector<2x16xf32>
    %77 = vector.multi_reduction <maximumf>, %76, %cst_39 [2] : vector<2x16x16xf32> to vector<2x16xf32>
    %78 = vector.shape_cast %77 : vector<2x16xf32> to vector<2x16x1xf32>
    %79 = vector.broadcast %78 : vector<2x16x1xf32> to vector<2x16x16xf32>
    %80 = arith.subf %76, %79 : vector<2x16x16xf32>
    %81 = math.exp %80 : vector<2x16x16xf32>
    %cst_40 = arith.constant dense<0.000000e+00> : vector<2x16xf32>
    %82 = vector.multi_reduction <add>, %81, %cst_40 [2] : vector<2x16x16xf32> to vector<2x16xf32>
    %83 = vector.shape_cast %82 : vector<2x16xf32> to vector<2x16x1xf32>
    %84 = tpu.reciprocal %83 : vector<2x16x1xf32> -> vector<2x16x1xf32>
    %85 = vector.broadcast %84 : vector<2x16x1xf32> to vector<2x16x16xf32>
    %86 = arith.mulf %81, %85 : vector<2x16x16xf32>
    %87 = arith.truncf %86 : vector<2x16x16xf32> to vector<2x16x16xbf16>
    %88 = vector.extract_strided_slice %37 {offsets = [0, 0, 64], sizes = [2, 16, 32], strides = [1, 1, 1]} : vector<2x16x128xbf16> to vector<2x16x32xbf16>
    "tpu.trace_start"() <{level = 10 : i32, message = "bqk,bkd->bqd"}> : () -> ()
    %cst_41 = arith.constant dense<0.000000e+00> : vector<2x16x32xf32>
    %89 = tpu.matmul %87, %88, %cst_41 {dimension_numbers = #tpu.dot_dimension_numbers<[2], [1], [1], [2], [0, 0, 0, 1, 1, 2], [0], [0]>} : vector<2x16x16xbf16>, vector<2x16x32xbf16>, vector<2x16x32xf32> -> vector<2x16x32xf32>
    "tpu.trace_stop"() : () -> ()
    %90 = vector.extract_strided_slice %35 {offsets = [0, 0, 96], sizes = [2, 16, 32], strides = [1, 1, 1]} : vector<2x16x128xbf16> to vector<2x16x32xbf16>
    %91 = vector.extract_strided_slice %36 {offsets = [0, 0, 96], sizes = [2, 16, 32], strides = [1, 1, 1]} : vector<2x16x128xbf16> to vector<2x16x32xbf16>
    "tpu.trace_start"() <{level = 10 : i32, message = "bqd,bkd->bqk"}> : () -> ()
    %cst_42 = arith.constant dense<0.000000e+00> : vector<2x16x16xf32>
    %92 = tpu.matmul %90, %91, %cst_42 {dimension_numbers = #tpu.dot_dimension_numbers<[2], [2], [1], [1], [0, 0, 0, 1, 1, 1], [0], [0]>} : vector<2x16x32xbf16>, vector<2x16x32xbf16>, vector<2x16x16xf32> -> vector<2x16x16xf32>
    "tpu.trace_stop"() : () -> ()
    %cst_43 = arith.constant dense<0xFF800000> : vector<2x16xf32>
    %93 = vector.multi_reduction <maximumf>, %92, %cst_43 [2] : vector<2x16x16xf32> to vector<2x16xf32>
    %94 = vector.shape_cast %93 : vector<2x16xf32> to vector<2x16x1xf32>
    %95 = vector.broadcast %94 : vector<2x16x1xf32> to vector<2x16x16xf32>
    %96 = arith.subf %92, %95 : vector<2x16x16xf32>
    %97 = math.exp %96 : vector<2x16x16xf32>
    %cst_44 = arith.constant dense<0.000000e+00> : vector<2x16xf32>
    %98 = vector.multi_reduction <add>, %97, %cst_44 [2] : vector<2x16x16xf32> to vector<2x16xf32>
    %99 = vector.shape_cast %98 : vector<2x16xf32> to vector<2x16x1xf32>
    %100 = tpu.reciprocal %99 : vector<2x16x1xf32> -> vector<2x16x1xf32>
    %101 = vector.broadcast %100 : vector<2x16x1xf32> to vector<2x16x16xf32>
    %102 = arith.mulf %97, %101 : vector<2x16x16xf32>
    %103 = arith.truncf %102 : vector<2x16x16xf32> to vector<2x16x16xbf16>
    %104 = vector.extract_strided_slice %37 {offsets = [0, 0, 96], sizes = [2, 16, 32], strides = [1, 1, 1]} : vector<2x16x128xbf16> to vector<2x16x32xbf16>
    "tpu.trace_start"() <{level = 10 : i32, message = "bqk,bkd->bqd"}> : () -> ()
    %cst_45 = arith.constant dense<0.000000e+00> : vector<2x16x32xf32>
    %105 = tpu.matmul %103, %104, %cst_45 {dimension_numbers = #tpu.dot_dimension_numbers<[2], [1], [1], [2], [0, 0, 0, 1, 1, 2], [0], [0]>} : vector<2x16x16xbf16>, vector<2x16x32xbf16>, vector<2x16x32xf32> -> vector<2x16x32xf32>
    "tpu.trace_stop"() : () -> ()
    %106 = tpu.concatenate %57, %73, %89, %105 in 2 : vector<2x16x32xf32>, vector<2x16x32xf32>, vector<2x16x32xf32>, vector<2x16x32xf32> -> vector<2x16x128xf32>
    %107 = arith.truncf %106 : vector<2x16x128xf32> to vector<2x16x128xbf16>
    %108 = vector.shape_cast %107 : vector<2x16x128xbf16> to vector<32x128xbf16>
    %cst_46 = arith.constant dense<0.000000e+00> : vector<32x128xf32>
    %109 = tpu.matmul %108, %39, %cst_46 {dimension_numbers = #tpu.dot_dimension_numbers<[1], [0], [0], [1], [0, 0, 1, 1], [], []>} : vector<32x128xbf16>, vector<128x128xbf16>, vector<32x128xf32> -> vector<32x128xf32>
    %110 = vector.broadcast %41 : vector<1x128xf32> to vector<32x128xf32>
    %111 = arith.addf %109, %110 : vector<32x128xf32>
    %112 = vector.shape_cast %111 : vector<32x128xf32> to vector<2x16x128xf32>
    %113 = vector.shape_cast %112 : vector<2x16x128xf32> to vector<32x128xf32>
    %c0_47 = arith.constant 0 : index
    %c0_48 = arith.constant 0 : index
    %c0_49 = arith.constant 0 : index
    %114 = vector.load %arg17[%c0_47, %c0_48, %c0_49] : memref<3x128x256xbf16, #tpu.memory_space<vmem>>, vector<1x128x256xbf16>
    %115 = vector.shape_cast %114 : vector<1x128x256xbf16> to vector<128x256xbf16>
    %c0_50 = arith.constant 0 : index
    %c0_51 = arith.constant 0 : index
    %c0_52 = arith.constant 0 : index
    %116 = vector.load %arg18[%c0_50, %c0_51, %c0_52] : memref<3x1x256xf32, #tpu.memory_space<vmem>>, vector<1x1x256xf32>
    %117 = vector.shape_cast %116 : vector<1x1x256xf32> to vector<1x256xf32>
    %118 = arith.truncf %113 : vector<32x128xf32> to vector<32x128xbf16>
    %cst_53 = arith.constant dense<0.000000e+00> : vector<32x256xf32>
    %119 = tpu.matmul %118, %115, %cst_53 {dimension_numbers = #tpu.dot_dimension_numbers<[1], [0], [0], [1], [0, 0, 1, 1], [], []>} : vector<32x128xbf16>, vector<128x256xbf16>, vector<32x256xf32> -> vector<32x256xf32>
    %120 = vector.broadcast %117 : vector<1x256xf32> to vector<32x256xf32>
    %121 = arith.addf %119, %120 : vector<32x256xf32>
    %122 = arith.truncf %121 : vector<32x256xf32> to vector<32x256xbf16>
    %123 = vector.shape_cast %122 : vector<32x256xbf16> to vector<2x16x256xbf16>
    %124 = vector.extract_strided_slice %123 {offsets = [0, 0, 0], sizes = [2, 16, 128], strides = [1, 1, 1]} : vector<2x16x256xbf16> to vector<2x16x128xbf16>
    %125 = vector.extract_strided_slice %123 {offsets = [0, 0, 128], sizes = [2, 16, 128], strides = [1, 1, 1]} : vector<2x16x256xbf16> to vector<2x16x128xbf16>
    %c0_54 = arith.constant 0 : index
    %c0_55 = arith.constant 0 : index
    %c0_56 = arith.constant 0 : index
    %126 = vector.load %arg15[%c0_54, %c0_55, %c0_56] : memref<3x128x128xbf16, #tpu.memory_space<vmem>>, vector<1x128x128xbf16>
    %127 = vector.shape_cast %126 : vector<1x128x128xbf16> to vector<128x128xbf16>
    %c0_57 = arith.constant 0 : index
    %c0_58 = arith.constant 0 : index
    %c0_59 = arith.constant 0 : index
    %128 = vector.load %arg16[%c0_57, %c0_58, %c0_59] : memref<3x1x128xf32, #tpu.memory_space<vmem>>, vector<1x1x128xf32>
    %129 = vector.shape_cast %128 : vector<1x1x128xf32> to vector<1x128xf32>
    %cst_60 = arith.constant dense<0.000000e+00> : vector<32x128xf32>
    %130 = tpu.matmul %25, %127, %cst_60 {dimension_numbers = #tpu.dot_dimension_numbers<[1], [0], [0], [1], [0, 0, 1, 1], [], []>} : vector<32x128xbf16>, vector<128x128xbf16>, vector<32x128xf32> -> vector<32x128xf32>
    %131 = vector.broadcast %129 : vector<1x128xf32> to vector<32x128xf32>
    %132 = arith.addf %130, %131 : vector<32x128xf32>
    %133 = arith.truncf %132 : vector<32x128xf32> to vector<32x128xbf16>
    %134 = vector.shape_cast %133 : vector<32x128xbf16> to vector<2x16x128xbf16>
    %c0_61 = arith.constant 0 : index
    %c0_62 = arith.constant 0 : index
    %c0_63 = arith.constant 0 : index
    %135 = vector.load %arg19[%c0_61, %c0_62, %c0_63] : memref<3x128x128xbf16, #tpu.memory_space<vmem>>, vector<1x128x128xbf16>
    %136 = vector.shape_cast %135 : vector<1x128x128xbf16> to vector<128x128xbf16>
    %c0_64 = arith.constant 0 : index
    %c0_65 = arith.constant 0 : index
    %c0_66 = arith.constant 0 : index
    %137 = vector.load %arg20[%c0_64, %c0_65, %c0_66] : memref<3x1x128xf32, #tpu.memory_space<vmem>>, vector<1x1x128xf32>
    %138 = vector.shape_cast %137 : vector<1x1x128xf32> to vector<1x128xf32>
    %139 = vector.extract_strided_slice %134 {offsets = [0, 0, 0], sizes = [2, 16, 32], strides = [1, 1, 1]} : vector<2x16x128xbf16> to vector<2x16x32xbf16>
    %140 = vector.extract_strided_slice %124 {offsets = [0, 0, 0], sizes = [2, 16, 32], strides = [1, 1, 1]} : vector<2x16x128xbf16> to vector<2x16x32xbf16>
    "tpu.trace_start"() <{level = 10 : i32, message = "bqd,bkd->bqk"}> : () -> ()
    %cst_67 = arith.constant dense<0.000000e+00> : vector<2x16x16xf32>
    %141 = tpu.matmul %139, %140, %cst_67 {dimension_numbers = #tpu.dot_dimension_numbers<[2], [2], [1], [1], [0, 0, 0, 1, 1, 1], [0], [0]>} : vector<2x16x32xbf16>, vector<2x16x32xbf16>, vector<2x16x16xf32> -> vector<2x16x16xf32>
    "tpu.trace_stop"() : () -> ()
    %cst_68 = arith.constant dense<0xFF800000> : vector<2x16xf32>
    %142 = vector.multi_reduction <maximumf>, %141, %cst_68 [2] : vector<2x16x16xf32> to vector<2x16xf32>
    %143 = vector.shape_cast %142 : vector<2x16xf32> to vector<2x16x1xf32>
    %144 = vector.broadcast %143 : vector<2x16x1xf32> to vector<2x16x16xf32>
    %145 = arith.subf %141, %144 : vector<2x16x16xf32>
    %146 = math.exp %145 : vector<2x16x16xf32>
    %cst_69 = arith.constant dense<0.000000e+00> : vector<2x16xf32>
    %147 = vector.multi_reduction <add>, %146, %cst_69 [2] : vector<2x16x16xf32> to vector<2x16xf32>
    %148 = vector.shape_cast %147 : vector<2x16xf32> to vector<2x16x1xf32>
    %149 = tpu.reciprocal %148 : vector<2x16x1xf32> -> vector<2x16x1xf32>
    %150 = vector.broadcast %149 : vector<2x16x1xf32> to vector<2x16x16xf32>
    %151 = arith.mulf %146, %150 : vector<2x16x16xf32>
    %152 = arith.truncf %151 : vector<2x16x16xf32> to vector<2x16x16xbf16>
    %153 = vector.extract_strided_slice %125 {offsets = [0, 0, 0], sizes = [2, 16, 32], strides = [1, 1, 1]} : vector<2x16x128xbf16> to vector<2x16x32xbf16>
    "tpu.trace_start"() <{level = 10 : i32, message = "bqk,bkd->bqd"}> : () -> ()
    %cst_70 = arith.constant dense<0.000000e+00> : vector<2x16x32xf32>
    %154 = tpu.matmul %152, %153, %cst_70 {dimension_numbers = #tpu.dot_dimension_numbers<[2], [1], [1], [2], [0, 0, 0, 1, 1, 2], [0], [0]>} : vector<2x16x16xbf16>, vector<2x16x32xbf16>, vector<2x16x32xf32> -> vector<2x16x32xf32>
    "tpu.trace_stop"() : () -> ()
    %155 = vector.extract_strided_slice %134 {offsets = [0, 0, 32], sizes = [2, 16, 32], strides = [1, 1, 1]} : vector<2x16x128xbf16> to vector<2x16x32xbf16>
    %156 = vector.extract_strided_slice %124 {offsets = [0, 0, 32], sizes = [2, 16, 32], strides = [1, 1, 1]} : vector<2x16x128xbf16> to vector<2x16x32xbf16>
    "tpu.trace_start"() <{level = 10 : i32, message = "bqd,bkd->bqk"}> : () -> ()
    %cst_71 = arith.constant dense<0.000000e+00> : vector<2x16x16xf32>
    %157 = tpu.matmul %155, %156, %cst_71 {dimension_numbers = #tpu.dot_dimension_numbers<[2], [2], [1], [1], [0, 0, 0, 1, 1, 1], [0], [0]>} : vector<2x16x32xbf16>, vector<2x16x32xbf16>, vector<2x16x16xf32> -> vector<2x16x16xf32>
    "tpu.trace_stop"() : () -> ()
    %cst_72 = arith.constant dense<0xFF800000> : vector<2x16xf32>
    %158 = vector.multi_reduction <maximumf>, %157, %cst_72 [2] : vector<2x16x16xf32> to vector<2x16xf32>
    %159 = vector.shape_cast %158 : vector<2x16xf32> to vector<2x16x1xf32>
    %160 = vector.broadcast %159 : vector<2x16x1xf32> to vector<2x16x16xf32>
    %161 = arith.subf %157, %160 : vector<2x16x16xf32>
    %162 = math.exp %161 : vector<2x16x16xf32>
    %cst_73 = arith.constant dense<0.000000e+00> : vector<2x16xf32>
    %163 = vector.multi_reduction <add>, %162, %cst_73 [2] : vector<2x16x16xf32> to vector<2x16xf32>
    %164 = vector.shape_cast %163 : vector<2x16xf32> to vector<2x16x1xf32>
    %165 = tpu.reciprocal %164 : vector<2x16x1xf32> -> vector<2x16x1xf32>
    %166 = vector.broadcast %165 : vector<2x16x1xf32> to vector<2x16x16xf32>
    %167 = arith.mulf %162, %166 : vector<2x16x16xf32>
    %168 = arith.truncf %167 : vector<2x16x16xf32> to vector<2x16x16xbf16>
    %169 = vector.extract_strided_slice %125 {offsets = [0, 0, 32], sizes = [2, 16, 32], strides = [1, 1, 1]} : vector<2x16x128xbf16> to vector<2x16x32xbf16>
    "tpu.trace_start"() <{level = 10 : i32, message = "bqk,bkd->bqd"}> : () -> ()
    %cst_74 = arith.constant dense<0.000000e+00> : vector<2x16x32xf32>
    %170 = tpu.matmul %168, %169, %cst_74 {dimension_numbers = #tpu.dot_dimension_numbers<[2], [1], [1], [2], [0, 0, 0, 1, 1, 2], [0], [0]>} : vector<2x16x16xbf16>, vector<2x16x32xbf16>, vector<2x16x32xf32> -> vector<2x16x32xf32>
    "tpu.trace_stop"() : () -> ()
    %171 = vector.extract_strided_slice %134 {offsets = [0, 0, 64], sizes = [2, 16, 32], strides = [1, 1, 1]} : vector<2x16x128xbf16> to vector<2x16x32xbf16>
    %172 = vector.extract_strided_slice %124 {offsets = [0, 0, 64], sizes = [2, 16, 32], strides = [1, 1, 1]} : vector<2x16x128xbf16> to vector<2x16x32xbf16>
    "tpu.trace_start"() <{level = 10 : i32, message = "bqd,bkd->bqk"}> : () -> ()
    %cst_75 = arith.constant dense<0.000000e+00> : vector<2x16x16xf32>
    %173 = tpu.matmul %171, %172, %cst_75 {dimension_numbers = #tpu.dot_dimension_numbers<[2], [2], [1], [1], [0, 0, 0, 1, 1, 1], [0], [0]>} : vector<2x16x32xbf16>, vector<2x16x32xbf16>, vector<2x16x16xf32> -> vector<2x16x16xf32>
    "tpu.trace_stop"() : () -> ()
    %cst_76 = arith.constant dense<0xFF800000> : vector<2x16xf32>
    %174 = vector.multi_reduction <maximumf>, %173, %cst_76 [2] : vector<2x16x16xf32> to vector<2x16xf32>
    %175 = vector.shape_cast %174 : vector<2x16xf32> to vector<2x16x1xf32>
    %176 = vector.broadcast %175 : vector<2x16x1xf32> to vector<2x16x16xf32>
    %177 = arith.subf %173, %176 : vector<2x16x16xf32>
    %178 = math.exp %177 : vector<2x16x16xf32>
    %cst_77 = arith.constant dense<0.000000e+00> : vector<2x16xf32>
    %179 = vector.multi_reduction <add>, %178, %cst_77 [2] : vector<2x16x16xf32> to vector<2x16xf32>
    %180 = vector.shape_cast %179 : vector<2x16xf32> to vector<2x16x1xf32>
    %181 = tpu.reciprocal %180 : vector<2x16x1xf32> -> vector<2x16x1xf32>
    %182 = vector.broadcast %181 : vector<2x16x1xf32> to vector<2x16x16xf32>
    %183 = arith.mulf %178, %182 : vector<2x16x16xf32>
    %184 = arith.truncf %183 : vector<2x16x16xf32> to vector<2x16x16xbf16>
    %185 = vector.extract_strided_slice %125 {offsets = [0, 0, 64], sizes = [2, 16, 32], strides = [1, 1, 1]} : vector<2x16x128xbf16> to vector<2x16x32xbf16>
    "tpu.trace_start"() <{level = 10 : i32, message = "bqk,bkd->bqd"}> : () -> ()
    %cst_78 = arith.constant dense<0.000000e+00> : vector<2x16x32xf32>
    %186 = tpu.matmul %184, %185, %cst_78 {dimension_numbers = #tpu.dot_dimension_numbers<[2], [1], [1], [2], [0, 0, 0, 1, 1, 2], [0], [0]>} : vector<2x16x16xbf16>, vector<2x16x32xbf16>, vector<2x16x32xf32> -> vector<2x16x32xf32>
    "tpu.trace_stop"() : () -> ()
    %187 = vector.extract_strided_slice %134 {offsets = [0, 0, 96], sizes = [2, 16, 32], strides = [1, 1, 1]} : vector<2x16x128xbf16> to vector<2x16x32xbf16>
    %188 = vector.extract_strided_slice %124 {offsets = [0, 0, 96], sizes = [2, 16, 32], strides = [1, 1, 1]} : vector<2x16x128xbf16> to vector<2x16x32xbf16>
    "tpu.trace_start"() <{level = 10 : i32, message = "bqd,bkd->bqk"}> : () -> ()
    %cst_79 = arith.constant dense<0.000000e+00> : vector<2x16x16xf32>
    %189 = tpu.matmul %187, %188, %cst_79 {dimension_numbers = #tpu.dot_dimension_numbers<[2], [2], [1], [1], [0, 0, 0, 1, 1, 1], [0], [0]>} : vector<2x16x32xbf16>, vector<2x16x32xbf16>, vector<2x16x16xf32> -> vector<2x16x16xf32>
    "tpu.trace_stop"() : () -> ()
    %cst_80 = arith.constant dense<0xFF800000> : vector<2x16xf32>
    %190 = vector.multi_reduction <maximumf>, %189, %cst_80 [2] : vector<2x16x16xf32> to vector<2x16xf32>
    %191 = vector.shape_cast %190 : vector<2x16xf32> to vector<2x16x1xf32>
    %192 = vector.broadcast %191 : vector<2x16x1xf32> to vector<2x16x16xf32>
    %193 = arith.subf %189, %192 : vector<2x16x16xf32>
    %194 = math.exp %193 : vector<2x16x16xf32>
    %cst_81 = arith.constant dense<0.000000e+00> : vector<2x16xf32>
    %195 = vector.multi_reduction <add>, %194, %cst_81 [2] : vector<2x16x16xf32> to vector<2x16xf32>
    %196 = vector.shape_cast %195 : vector<2x16xf32> to vector<2x16x1xf32>
    %197 = tpu.reciprocal %196 : vector<2x16x1xf32> -> vector<2x16x1xf32>
    %198 = vector.broadcast %197 : vector<2x16x1xf32> to vector<2x16x16xf32>
    %199 = arith.mulf %194, %198 : vector<2x16x16xf32>
    %200 = arith.truncf %199 : vector<2x16x16xf32> to vector<2x16x16xbf16>
    %201 = vector.extract_strided_slice %125 {offsets = [0, 0, 96], sizes = [2, 16, 32], strides = [1, 1, 1]} : vector<2x16x128xbf16> to vector<2x16x32xbf16>
    "tpu.trace_start"() <{level = 10 : i32, message = "bqk,bkd->bqd"}> : () -> ()
    %cst_82 = arith.constant dense<0.000000e+00> : vector<2x16x32xf32>
    %202 = tpu.matmul %200, %201, %cst_82 {dimension_numbers = #tpu.dot_dimension_numbers<[2], [1], [1], [2], [0, 0, 0, 1, 1, 2], [0], [0]>} : vector<2x16x16xbf16>, vector<2x16x32xbf16>, vector<2x16x32xf32> -> vector<2x16x32xf32>
    "tpu.trace_stop"() : () -> ()
    %203 = tpu.concatenate %154, %170, %186, %202 in 2 : vector<2x16x32xf32>, vector<2x16x32xf32>, vector<2x16x32xf32>, vector<2x16x32xf32> -> vector<2x16x128xf32>
    %204 = arith.truncf %203 : vector<2x16x128xf32> to vector<2x16x128xbf16>
    %205 = vector.shape_cast %204 : vector<2x16x128xbf16> to vector<32x128xbf16>
    %cst_83 = arith.constant dense<0.000000e+00> : vector<32x128xf32>
    %206 = tpu.matmul %205, %136, %cst_83 {dimension_numbers = #tpu.dot_dimension_numbers<[1], [0], [0], [1], [0, 0, 1, 1], [], []>} : vector<32x128xbf16>, vector<128x128xbf16>, vector<32x128xf32> -> vector<32x128xf32>
    %207 = vector.broadcast %138 : vector<1x128xf32> to vector<32x128xf32>
    %208 = arith.addf %206, %207 : vector<32x128xf32>
    %209 = vector.shape_cast %208 : vector<32x128xf32> to vector<2x16x128xf32>
    %210 = vector.extract_strided_slice %209 {offsets = [0, 0, 0], sizes = [2, 8, 128], strides = [1, 1, 1]} : vector<2x16x128xf32> to vector<2x8x128xf32>
    %cst_84 = arith.constant dense<0.000000e+00> : vector<2x128xf32>
    %211 = vector.multi_reduction <add>, %210, %cst_84 [1] : vector<2x8x128xf32> to vector<2x128xf32>
    %cst_85 = arith.constant 8.000000e+00 : f32
    %212 = vector.broadcast %cst_85 : f32 to vector<2x128xf32>
    %213 = arith.divf %211, %212 : vector<2x128xf32>
    %214 = vector.extract_strided_slice %209 {offsets = [0, 8, 0], sizes = [2, 8, 128], strides = [1, 1, 1]} : vector<2x16x128xf32> to vector<2x8x128xf32>
    %cst_86 = arith.constant dense<0.000000e+00> : vector<2x128xf32>
    %215 = vector.multi_reduction <add>, %214, %cst_86 [1] : vector<2x8x128xf32> to vector<2x128xf32>
    %cst_87 = arith.constant 8.000000e+00 : f32
    %216 = vector.broadcast %cst_87 : f32 to vector<2x128xf32>
    %217 = arith.divf %215, %216 : vector<2x128xf32>
    %c0_88 = arith.constant 0 : index
    %c0_89 = arith.constant 0 : index
    %c0_90 = arith.constant 0 : index
    %218 = vector.load %arg21[%c0_88, %c0_89, %c0_90] : memref<3x128x128xbf16, #tpu.memory_space<vmem>>, vector<1x128x128xbf16>
    %219 = vector.shape_cast %218 : vector<1x128x128xbf16> to vector<128x128xbf16>
    %c0_91 = arith.constant 0 : index
    %c0_92 = arith.constant 0 : index
    %c0_93 = arith.constant 0 : index
    %220 = vector.load %arg22[%c0_91, %c0_92, %c0_93] : memref<3x1x128xf32, #tpu.memory_space<vmem>>, vector<1x1x128xf32>
    %221 = vector.shape_cast %220 : vector<1x1x128xf32> to vector<1x128xf32>
    %222 = arith.truncf %213 : vector<2x128xf32> to vector<2x128xbf16>
    %cst_94 = arith.constant dense<0.000000e+00> : vector<2x128xf32>
    %223 = tpu.matmul %222, %219, %cst_94 {dimension_numbers = #tpu.dot_dimension_numbers<[1], [0], [0], [1], [0, 0, 1, 1], [], []>} : vector<2x128xbf16>, vector<128x128xbf16>, vector<2x128xf32> -> vector<2x128xf32>
    %224 = vector.broadcast %221 : vector<1x128xf32> to vector<2x128xf32>
    %225 = arith.addf %223, %224 : vector<2x128xf32>
    %cst_95 = arith.constant 0.000000e+00 : f32
    %226 = vector.broadcast %cst_95 : f32 to vector<2x128xf32>
    %227 = arith.maximumf %225, %226 : vector<2x128xf32>
    %c0_96 = arith.constant 0 : index
    %c0_97 = arith.constant 0 : index
    %c0_98 = arith.constant 0 : index
    %c0_99 = arith.constant 0 : index
    %228 = vector.load %arg25[%c0_96, %c0_97, %c0_98, %c0_99] : memref<3x2x1x128xf32, #tpu.memory_space<vmem>>, vector<1x1x1x128xf32>
    %229 = vector.shape_cast %228 : vector<1x1x1x128xf32> to vector<1x128xf32>
    %c0_100 = arith.constant 0 : index
    %c1 = arith.constant 1 : index
    %c0_101 = arith.constant 0 : index
    %c0_102 = arith.constant 0 : index
    %230 = vector.load %arg25[%c0_100, %c1, %c0_101, %c0_102] : memref<3x2x1x128xf32, #tpu.memory_space<vmem>>, vector<1x1x1x128xf32>
    %231 = vector.shape_cast %230 : vector<1x1x1x128xf32> to vector<1x128xf32>
    %cst_103 = arith.constant dense<0.000000e+00> : vector<2xf32>
    %232 = vector.multi_reduction <add>, %227, %cst_103 [1] : vector<2x128xf32> to vector<2xf32>
    %233 = vector.shape_cast %232 : vector<2xf32> to vector<2x1xf32>
    %cst_104 = arith.constant 1.280000e+02 : f32
    %234 = vector.broadcast %cst_104 : f32 to vector<2x1xf32>
    %235 = arith.divf %233, %234 : vector<2x1xf32>
    %236 = vector.broadcast %235 : vector<2x1xf32> to vector<2x128xf32>
    %237 = arith.subf %227, %236 : vector<2x128xf32>
    %238 = arith.mulf %237, %237 : vector<2x128xf32>
    %cst_105 = arith.constant dense<0.000000e+00> : vector<2xf32>
    %239 = vector.multi_reduction <add>, %238, %cst_105 [1] : vector<2x128xf32> to vector<2xf32>
    %240 = vector.shape_cast %239 : vector<2xf32> to vector<2x1xf32>
    %cst_106 = arith.constant 1.280000e+02 : f32
    %241 = vector.broadcast %cst_106 : f32 to vector<2x1xf32>
    %242 = arith.divf %240, %241 : vector<2x1xf32>
    %243 = vector.broadcast %235 : vector<2x1xf32> to vector<2x128xf32>
    %244 = arith.subf %227, %243 : vector<2x128xf32>
    %cst_107 = arith.constant 9.99999974E-6 : f32
    %245 = vector.broadcast %cst_107 : f32 to vector<2x1xf32>
    %246 = arith.addf %242, %245 : vector<2x1xf32>
    %247 = math.rsqrt %246 : vector<2x1xf32>
    %248 = vector.broadcast %247 : vector<2x1xf32> to vector<2x128xf32>
    %249 = arith.mulf %244, %248 : vector<2x128xf32>
    %250 = vector.broadcast %229 : vector<1x128xf32> to vector<2x128xf32>
    %251 = arith.mulf %249, %250 : vector<2x128xf32>
    %252 = vector.broadcast %231 : vector<1x128xf32> to vector<2x128xf32>
    %253 = arith.addf %251, %252 : vector<2x128xf32>
    %c0_108 = arith.constant 0 : index
    %c0_109 = arith.constant 0 : index
    %c0_110 = arith.constant 0 : index
    %254 = vector.load %arg23[%c0_108, %c0_109, %c0_110] : memref<3x128x128xbf16, #tpu.memory_space<vmem>>, vector<1x128x128xbf16>
    %255 = vector.shape_cast %254 : vector<1x128x128xbf16> to vector<128x128xbf16>
    %c0_111 = arith.constant 0 : index
    %c0_112 = arith.constant 0 : index
    %c0_113 = arith.constant 0 : index
    %256 = vector.load %arg24[%c0_111, %c0_112, %c0_113] : memref<3x1x128xf32, #tpu.memory_space<vmem>>, vector<1x1x128xf32>
    %257 = vector.shape_cast %256 : vector<1x1x128xf32> to vector<1x128xf32>
    %258 = arith.truncf %217 : vector<2x128xf32> to vector<2x128xbf16>
    %cst_114 = arith.constant dense<0.000000e+00> : vector<2x128xf32>
    %259 = tpu.matmul %258, %255, %cst_114 {dimension_numbers = #tpu.dot_dimension_numbers<[1], [0], [0], [1], [0, 0, 1, 1], [], []>} : vector<2x128xbf16>, vector<128x128xbf16>, vector<2x128xf32> -> vector<2x128xf32>
    %260 = vector.broadcast %257 : vector<1x128xf32> to vector<2x128xf32>
    %261 = arith.addf %259, %260 : vector<2x128xf32>
    %cst_115 = arith.constant 0.000000e+00 : f32
    %262 = vector.broadcast %cst_115 : f32 to vector<2x128xf32>
    %263 = arith.maximumf %261, %262 : vector<2x128xf32>
    %c0_116 = arith.constant 0 : index
    %c0_117 = arith.constant 0 : index
    %c0_118 = arith.constant 0 : index
    %c0_119 = arith.constant 0 : index
    %264 = vector.load %arg26[%c0_116, %c0_117, %c0_118, %c0_119] : memref<3x2x1x128xf32, #tpu.memory_space<vmem>>, vector<1x1x1x128xf32>
    %265 = vector.shape_cast %264 : vector<1x1x1x128xf32> to vector<1x128xf32>
    %c0_120 = arith.constant 0 : index
    %c1_121 = arith.constant 1 : index
    %c0_122 = arith.constant 0 : index
    %c0_123 = arith.constant 0 : index
    %266 = vector.load %arg26[%c0_120, %c1_121, %c0_122, %c0_123] : memref<3x2x1x128xf32, #tpu.memory_space<vmem>>, vector<1x1x1x128xf32>
    %267 = vector.shape_cast %266 : vector<1x1x1x128xf32> to vector<1x128xf32>
    %cst_124 = arith.constant dense<0.000000e+00> : vector<2xf32>
    %268 = vector.multi_reduction <add>, %263, %cst_124 [1] : vector<2x128xf32> to vector<2xf32>
    %269 = vector.shape_cast %268 : vector<2xf32> to vector<2x1xf32>
    %cst_125 = arith.constant 1.280000e+02 : f32
    %270 = vector.broadcast %cst_125 : f32 to vector<2x1xf32>
    %271 = arith.divf %269, %270 : vector<2x1xf32>
    %272 = vector.broadcast %271 : vector<2x1xf32> to vector<2x128xf32>
    %273 = arith.subf %263, %272 : vector<2x128xf32>
    %274 = arith.mulf %273, %273 : vector<2x128xf32>
    %cst_126 = arith.constant dense<0.000000e+00> : vector<2xf32>
    %275 = vector.multi_reduction <add>, %274, %cst_126 [1] : vector<2x128xf32> to vector<2xf32>
    %276 = vector.shape_cast %275 : vector<2xf32> to vector<2x1xf32>
    %cst_127 = arith.constant 1.280000e+02 : f32
    %277 = vector.broadcast %cst_127 : f32 to vector<2x1xf32>
    %278 = arith.divf %276, %277 : vector<2x1xf32>
    %279 = vector.broadcast %271 : vector<2x1xf32> to vector<2x128xf32>
    %280 = arith.subf %263, %279 : vector<2x128xf32>
    %cst_128 = arith.constant 9.99999974E-6 : f32
    %281 = vector.broadcast %cst_128 : f32 to vector<2x1xf32>
    %282 = arith.addf %278, %281 : vector<2x1xf32>
    %283 = math.rsqrt %282 : vector<2x1xf32>
    %284 = vector.broadcast %283 : vector<2x1xf32> to vector<2x128xf32>
    %285 = arith.mulf %280, %284 : vector<2x128xf32>
    %286 = vector.broadcast %265 : vector<1x128xf32> to vector<2x128xf32>
    %287 = arith.mulf %285, %286 : vector<2x128xf32>
    %288 = vector.broadcast %267 : vector<1x128xf32> to vector<2x128xf32>
    %289 = arith.addf %287, %288 : vector<2x128xf32>
    %c0_129 = arith.constant 0 : index
    %c0_130 = arith.constant 0 : index
    %c0_131 = arith.constant 0 : index
    %290 = vector.load %arg3[%c0_129, %c0_130, %c0_131] : memref<2x8x512xbf16, #tpu.memory_space<vmem>>, vector<2x8x512xbf16>
    %291 = vector.extract_strided_slice %9 {offsets = [0, 128], sizes = [16, 128], strides = [1, 1]} : vector<16x384xbf16> to vector<16x128xbf16>
    %292 = vector.shape_cast %290 : vector<2x8x512xbf16> to vector<16x512xbf16>
    %c0_132 = arith.constant 0 : index
    %c0_133 = arith.constant 0 : index
    %293 = vector.load %arg8[%c0_132, %c0_133] : memref<512x128xbf16, #tpu.memory_space<vmem>>, vector<512x128xbf16>
    %c1_134 = arith.constant 1 : index
    %c0_135 = arith.constant 0 : index
    %c0_136 = arith.constant 0 : index
    %294 = vector.load %arg10[%c1_134, %c0_135, %c0_136] : memref<3x1x128xf32, #tpu.memory_space<vmem>>, vector<1x1x128xf32>
    %295 = vector.shape_cast %294 : vector<1x1x128xf32> to vector<1x128xf32>
    %cst_137 = arith.constant dense<0.000000e+00> : vector<16x128xf32>
    %296 = tpu.matmul %292, %293, %cst_137 {dimension_numbers = #tpu.dot_dimension_numbers<[1], [0], [0], [1], [0, 0, 1, 1], [], []>} : vector<16x512xbf16>, vector<512x128xbf16>, vector<16x128xf32> -> vector<16x128xf32>
    %297 = vector.broadcast %295 : vector<1x128xf32> to vector<16x128xf32>
    %298 = arith.addf %296, %297 : vector<16x128xf32>
    %cst_138 = arith.constant 0.000000e+00 : f32
    %299 = vector.broadcast %cst_138 : f32 to vector<16x128xf32>
    %300 = arith.maximumf %298, %299 : vector<16x128xf32>
    %301 = arith.truncf %300 : vector<16x128xf32> to vector<16x128xbf16>
    %302 = vector.shape_cast %291 : vector<16x128xbf16> to vector<2x8x128xbf16>
    %303 = vector.shape_cast %301 : vector<16x128xbf16> to vector<2x8x128xbf16>
    %304 = tpu.concatenate %302, %303 in 1 : vector<2x8x128xbf16>, vector<2x8x128xbf16> -> vector<2x16x128xbf16>
    %305 = vector.shape_cast %304 : vector<2x16x128xbf16> to vector<32x128xbf16>
    %c1_139 = arith.constant 1 : index
    %c0_140 = arith.constant 0 : index
    %c0_141 = arith.constant 0 : index
    %306 = vector.load %arg11[%c1_139, %c0_140, %c0_141] : memref<3x128x384xbf16, #tpu.memory_space<vmem>>, vector<1x128x384xbf16>
    %307 = vector.shape_cast %306 : vector<1x128x384xbf16> to vector<128x384xbf16>
    %c1_142 = arith.constant 1 : index
    %c0_143 = arith.constant 0 : index
    %c0_144 = arith.constant 0 : index
    %308 = vector.load %arg12[%c1_142, %c0_143, %c0_144] : memref<3x1x384xf32, #tpu.memory_space<vmem>>, vector<1x1x384xf32>
    %309 = vector.shape_cast %308 : vector<1x1x384xf32> to vector<1x384xf32>
    %cst_145 = arith.constant dense<0.000000e+00> : vector<32x384xf32>
    %310 = tpu.matmul %305, %307, %cst_145 {dimension_numbers = #tpu.dot_dimension_numbers<[1], [0], [0], [1], [0, 0, 1, 1], [], []>} : vector<32x128xbf16>, vector<128x384xbf16>, vector<32x384xf32> -> vector<32x384xf32>
    %311 = vector.broadcast %309 : vector<1x384xf32> to vector<32x384xf32>
    %312 = arith.addf %310, %311 : vector<32x384xf32>
    %313 = arith.truncf %312 : vector<32x384xf32> to vector<32x384xbf16>
    %314 = vector.shape_cast %313 : vector<32x384xbf16> to vector<2x16x384xbf16>
    %315 = vector.extract_strided_slice %314 {offsets = [0, 0, 0], sizes = [2, 16, 128], strides = [1, 1, 1]} : vector<2x16x384xbf16> to vector<2x16x128xbf16>
    %316 = vector.extract_strided_slice %314 {offsets = [0, 0, 128], sizes = [2, 16, 128], strides = [1, 1, 1]} : vector<2x16x384xbf16> to vector<2x16x128xbf16>
    %317 = vector.extract_strided_slice %314 {offsets = [0, 0, 256], sizes = [2, 16, 128], strides = [1, 1, 1]} : vector<2x16x384xbf16> to vector<2x16x128xbf16>
    %c1_146 = arith.constant 1 : index
    %c0_147 = arith.constant 0 : index
    %c0_148 = arith.constant 0 : index
    %318 = vector.load %arg13[%c1_146, %c0_147, %c0_148] : memref<3x128x128xbf16, #tpu.memory_space<vmem>>, vector<1x128x128xbf16>
    %319 = vector.shape_cast %318 : vector<1x128x128xbf16> to vector<128x128xbf16>
    %c1_149 = arith.constant 1 : index
    %c0_150 = arith.constant 0 : index
    %c0_151 = arith.constant 0 : index
    %320 = vector.load %arg14[%c1_149, %c0_150, %c0_151] : memref<3x1x128xf32, #tpu.memory_space<vmem>>, vector<1x1x128xf32>
    %321 = vector.shape_cast %320 : vector<1x1x128xf32> to vector<1x128xf32>
    %322 = vector.extract_strided_slice %315 {offsets = [0, 0, 0], sizes = [2, 16, 32], strides = [1, 1, 1]} : vector<2x16x128xbf16> to vector<2x16x32xbf16>
    %323 = vector.extract_strided_slice %316 {offsets = [0, 0, 0], sizes = [2, 16, 32], strides = [1, 1, 1]} : vector<2x16x128xbf16> to vector<2x16x32xbf16>
    "tpu.trace_start"() <{level = 10 : i32, message = "bqd,bkd->bqk"}> : () -> ()
    %cst_152 = arith.constant dense<0.000000e+00> : vector<2x16x16xf32>
    %324 = tpu.matmul %322, %323, %cst_152 {dimension_numbers = #tpu.dot_dimension_numbers<[2], [2], [1], [1], [0, 0, 0, 1, 1, 1], [0], [0]>} : vector<2x16x32xbf16>, vector<2x16x32xbf16>, vector<2x16x16xf32> -> vector<2x16x16xf32>
    "tpu.trace_stop"() : () -> ()
    %cst_153 = arith.constant dense<0xFF800000> : vector<2x16xf32>
    %325 = vector.multi_reduction <maximumf>, %324, %cst_153 [2] : vector<2x16x16xf32> to vector<2x16xf32>
    %326 = vector.shape_cast %325 : vector<2x16xf32> to vector<2x16x1xf32>
    %327 = vector.broadcast %326 : vector<2x16x1xf32> to vector<2x16x16xf32>
    %328 = arith.subf %324, %327 : vector<2x16x16xf32>
    %329 = math.exp %328 : vector<2x16x16xf32>
    %cst_154 = arith.constant dense<0.000000e+00> : vector<2x16xf32>
    %330 = vector.multi_reduction <add>, %329, %cst_154 [2] : vector<2x16x16xf32> to vector<2x16xf32>
    %331 = vector.shape_cast %330 : vector<2x16xf32> to vector<2x16x1xf32>
    %332 = tpu.reciprocal %331 : vector<2x16x1xf32> -> vector<2x16x1xf32>
    %333 = vector.broadcast %332 : vector<2x16x1xf32> to vector<2x16x16xf32>
    %334 = arith.mulf %329, %333 : vector<2x16x16xf32>
    %335 = arith.truncf %334 : vector<2x16x16xf32> to vector<2x16x16xbf16>
    %336 = vector.extract_strided_slice %317 {offsets = [0, 0, 0], sizes = [2, 16, 32], strides = [1, 1, 1]} : vector<2x16x128xbf16> to vector<2x16x32xbf16>
    "tpu.trace_start"() <{level = 10 : i32, message = "bqk,bkd->bqd"}> : () -> ()
    %cst_155 = arith.constant dense<0.000000e+00> : vector<2x16x32xf32>
    %337 = tpu.matmul %335, %336, %cst_155 {dimension_numbers = #tpu.dot_dimension_numbers<[2], [1], [1], [2], [0, 0, 0, 1, 1, 2], [0], [0]>} : vector<2x16x16xbf16>, vector<2x16x32xbf16>, vector<2x16x32xf32> -> vector<2x16x32xf32>
    "tpu.trace_stop"() : () -> ()
    %338 = vector.extract_strided_slice %315 {offsets = [0, 0, 32], sizes = [2, 16, 32], strides = [1, 1, 1]} : vector<2x16x128xbf16> to vector<2x16x32xbf16>
    %339 = vector.extract_strided_slice %316 {offsets = [0, 0, 32], sizes = [2, 16, 32], strides = [1, 1, 1]} : vector<2x16x128xbf16> to vector<2x16x32xbf16>
    "tpu.trace_start"() <{level = 10 : i32, message = "bqd,bkd->bqk"}> : () -> ()
    %cst_156 = arith.constant dense<0.000000e+00> : vector<2x16x16xf32>
    %340 = tpu.matmul %338, %339, %cst_156 {dimension_numbers = #tpu.dot_dimension_numbers<[2], [2], [1], [1], [0, 0, 0, 1, 1, 1], [0], [0]>} : vector<2x16x32xbf16>, vector<2x16x32xbf16>, vector<2x16x16xf32> -> vector<2x16x16xf32>
    "tpu.trace_stop"() : () -> ()
    %cst_157 = arith.constant dense<0xFF800000> : vector<2x16xf32>
    %341 = vector.multi_reduction <maximumf>, %340, %cst_157 [2] : vector<2x16x16xf32> to vector<2x16xf32>
    %342 = vector.shape_cast %341 : vector<2x16xf32> to vector<2x16x1xf32>
    %343 = vector.broadcast %342 : vector<2x16x1xf32> to vector<2x16x16xf32>
    %344 = arith.subf %340, %343 : vector<2x16x16xf32>
    %345 = math.exp %344 : vector<2x16x16xf32>
    %cst_158 = arith.constant dense<0.000000e+00> : vector<2x16xf32>
    %346 = vector.multi_reduction <add>, %345, %cst_158 [2] : vector<2x16x16xf32> to vector<2x16xf32>
    %347 = vector.shape_cast %346 : vector<2x16xf32> to vector<2x16x1xf32>
    %348 = tpu.reciprocal %347 : vector<2x16x1xf32> -> vector<2x16x1xf32>
    %349 = vector.broadcast %348 : vector<2x16x1xf32> to vector<2x16x16xf32>
    %350 = arith.mulf %345, %349 : vector<2x16x16xf32>
    %351 = arith.truncf %350 : vector<2x16x16xf32> to vector<2x16x16xbf16>
    %352 = vector.extract_strided_slice %317 {offsets = [0, 0, 32], sizes = [2, 16, 32], strides = [1, 1, 1]} : vector<2x16x128xbf16> to vector<2x16x32xbf16>
    "tpu.trace_start"() <{level = 10 : i32, message = "bqk,bkd->bqd"}> : () -> ()
    %cst_159 = arith.constant dense<0.000000e+00> : vector<2x16x32xf32>
    %353 = tpu.matmul %351, %352, %cst_159 {dimension_numbers = #tpu.dot_dimension_numbers<[2], [1], [1], [2], [0, 0, 0, 1, 1, 2], [0], [0]>} : vector<2x16x16xbf16>, vector<2x16x32xbf16>, vector<2x16x32xf32> -> vector<2x16x32xf32>
    "tpu.trace_stop"() : () -> ()
    %354 = vector.extract_strided_slice %315 {offsets = [0, 0, 64], sizes = [2, 16, 32], strides = [1, 1, 1]} : vector<2x16x128xbf16> to vector<2x16x32xbf16>
    %355 = vector.extract_strided_slice %316 {offsets = [0, 0, 64], sizes = [2, 16, 32], strides = [1, 1, 1]} : vector<2x16x128xbf16> to vector<2x16x32xbf16>
    "tpu.trace_start"() <{level = 10 : i32, message = "bqd,bkd->bqk"}> : () -> ()
    %cst_160 = arith.constant dense<0.000000e+00> : vector<2x16x16xf32>
    %356 = tpu.matmul %354, %355, %cst_160 {dimension_numbers = #tpu.dot_dimension_numbers<[2], [2], [1], [1], [0, 0, 0, 1, 1, 1], [0], [0]>} : vector<2x16x32xbf16>, vector<2x16x32xbf16>, vector<2x16x16xf32> -> vector<2x16x16xf32>
    "tpu.trace_stop"() : () -> ()
    %cst_161 = arith.constant dense<0xFF800000> : vector<2x16xf32>
    %357 = vector.multi_reduction <maximumf>, %356, %cst_161 [2] : vector<2x16x16xf32> to vector<2x16xf32>
    %358 = vector.shape_cast %357 : vector<2x16xf32> to vector<2x16x1xf32>
    %359 = vector.broadcast %358 : vector<2x16x1xf32> to vector<2x16x16xf32>
    %360 = arith.subf %356, %359 : vector<2x16x16xf32>
    %361 = math.exp %360 : vector<2x16x16xf32>
    %cst_162 = arith.constant dense<0.000000e+00> : vector<2x16xf32>
    %362 = vector.multi_reduction <add>, %361, %cst_162 [2] : vector<2x16x16xf32> to vector<2x16xf32>
    %363 = vector.shape_cast %362 : vector<2x16xf32> to vector<2x16x1xf32>
    %364 = tpu.reciprocal %363 : vector<2x16x1xf32> -> vector<2x16x1xf32>
    %365 = vector.broadcast %364 : vector<2x16x1xf32> to vector<2x16x16xf32>
    %366 = arith.mulf %361, %365 : vector<2x16x16xf32>
    %367 = arith.truncf %366 : vector<2x16x16xf32> to vector<2x16x16xbf16>
    %368 = vector.extract_strided_slice %317 {offsets = [0, 0, 64], sizes = [2, 16, 32], strides = [1, 1, 1]} : vector<2x16x128xbf16> to vector<2x16x32xbf16>
    "tpu.trace_start"() <{level = 10 : i32, message = "bqk,bkd->bqd"}> : () -> ()
    %cst_163 = arith.constant dense<0.000000e+00> : vector<2x16x32xf32>
    %369 = tpu.matmul %367, %368, %cst_163 {dimension_numbers = #tpu.dot_dimension_numbers<[2], [1], [1], [2], [0, 0, 0, 1, 1, 2], [0], [0]>} : vector<2x16x16xbf16>, vector<2x16x32xbf16>, vector<2x16x32xf32> -> vector<2x16x32xf32>
    "tpu.trace_stop"() : () -> ()
    %370 = vector.extract_strided_slice %315 {offsets = [0, 0, 96], sizes = [2, 16, 32], strides = [1, 1, 1]} : vector<2x16x128xbf16> to vector<2x16x32xbf16>
    %371 = vector.extract_strided_slice %316 {offsets = [0, 0, 96], sizes = [2, 16, 32], strides = [1, 1, 1]} : vector<2x16x128xbf16> to vector<2x16x32xbf16>
    "tpu.trace_start"() <{level = 10 : i32, message = "bqd,bkd->bqk"}> : () -> ()
    %cst_164 = arith.constant dense<0.000000e+00> : vector<2x16x16xf32>
    %372 = tpu.matmul %370, %371, %cst_164 {dimension_numbers = #tpu.dot_dimension_numbers<[2], [2], [1], [1], [0, 0, 0, 1, 1, 1], [0], [0]>} : vector<2x16x32xbf16>, vector<2x16x32xbf16>, vector<2x16x16xf32> -> vector<2x16x16xf32>
    "tpu.trace_stop"() : () -> ()
    %cst_165 = arith.constant dense<0xFF800000> : vector<2x16xf32>
    %373 = vector.multi_reduction <maximumf>, %372, %cst_165 [2] : vector<2x16x16xf32> to vector<2x16xf32>
    %374 = vector.shape_cast %373 : vector<2x16xf32> to vector<2x16x1xf32>
    %375 = vector.broadcast %374 : vector<2x16x1xf32> to vector<2x16x16xf32>
    %376 = arith.subf %372, %375 : vector<2x16x16xf32>
    %377 = math.exp %376 : vector<2x16x16xf32>
    %cst_166 = arith.constant dense<0.000000e+00> : vector<2x16xf32>
    %378 = vector.multi_reduction <add>, %377, %cst_166 [2] : vector<2x16x16xf32> to vector<2x16xf32>
    %379 = vector.shape_cast %378 : vector<2x16xf32> to vector<2x16x1xf32>
    %380 = tpu.reciprocal %379 : vector<2x16x1xf32> -> vector<2x16x1xf32>
    %381 = vector.broadcast %380 : vector<2x16x1xf32> to vector<2x16x16xf32>
    %382 = arith.mulf %377, %381 : vector<2x16x16xf32>
    %383 = arith.truncf %382 : vector<2x16x16xf32> to vector<2x16x16xbf16>
    %384 = vector.extract_strided_slice %317 {offsets = [0, 0, 96], sizes = [2, 16, 32], strides = [1, 1, 1]} : vector<2x16x128xbf16> to vector<2x16x32xbf16>
    "tpu.trace_start"() <{level = 10 : i32, message = "bqk,bkd->bqd"}> : () -> ()
    %cst_167 = arith.constant dense<0.000000e+00> : vector<2x16x32xf32>
    %385 = tpu.matmul %383, %384, %cst_167 {dimension_numbers = #tpu.dot_dimension_numbers<[2], [1], [1], [2], [0, 0, 0, 1, 1, 2], [0], [0]>} : vector<2x16x16xbf16>, vector<2x16x32xbf16>, vector<2x16x32xf32> -> vector<2x16x32xf32>
    "tpu.trace_stop"() : () -> ()
    %386 = tpu.concatenate %337, %353, %369, %385 in 2 : vector<2x16x32xf32>, vector<2x16x32xf32>, vector<2x16x32xf32>, vector<2x16x32xf32> -> vector<2x16x128xf32>
    %387 = arith.truncf %386 : vector<2x16x128xf32> to vector<2x16x128xbf16>
    %388 = vector.shape_cast %387 : vector<2x16x128xbf16> to vector<32x128xbf16>
    %cst_168 = arith.constant dense<0.000000e+00> : vector<32x128xf32>
    %389 = tpu.matmul %388, %319, %cst_168 {dimension_numbers = #tpu.dot_dimension_numbers<[1], [0], [0], [1], [0, 0, 1, 1], [], []>} : vector<32x128xbf16>, vector<128x128xbf16>, vector<32x128xf32> -> vector<32x128xf32>
    %390 = vector.broadcast %321 : vector<1x128xf32> to vector<32x128xf32>
    %391 = arith.addf %389, %390 : vector<32x128xf32>
    %392 = vector.shape_cast %391 : vector<32x128xf32> to vector<2x16x128xf32>
    %393 = vector.shape_cast %392 : vector<2x16x128xf32> to vector<32x128xf32>
    %c1_169 = arith.constant 1 : index
    %c0_170 = arith.constant 0 : index
    %c0_171 = arith.constant 0 : index
    %394 = vector.load %arg17[%c1_169, %c0_170, %c0_171] : memref<3x128x256xbf16, #tpu.memory_space<vmem>>, vector<1x128x256xbf16>
    %395 = vector.shape_cast %394 : vector<1x128x256xbf16> to vector<128x256xbf16>
    %c1_172 = arith.constant 1 : index
    %c0_173 = arith.constant 0 : index
    %c0_174 = arith.constant 0 : index
    %396 = vector.load %arg18[%c1_172, %c0_173, %c0_174] : memref<3x1x256xf32, #tpu.memory_space<vmem>>, vector<1x1x256xf32>
    %397 = vector.shape_cast %396 : vector<1x1x256xf32> to vector<1x256xf32>
    %398 = arith.truncf %393 : vector<32x128xf32> to vector<32x128xbf16>
    %cst_175 = arith.constant dense<0.000000e+00> : vector<32x256xf32>
    %399 = tpu.matmul %398, %395, %cst_175 {dimension_numbers = #tpu.dot_dimension_numbers<[1], [0], [0], [1], [0, 0, 1, 1], [], []>} : vector<32x128xbf16>, vector<128x256xbf16>, vector<32x256xf32> -> vector<32x256xf32>
    %400 = vector.broadcast %397 : vector<1x256xf32> to vector<32x256xf32>
    %401 = arith.addf %399, %400 : vector<32x256xf32>
    %402 = arith.truncf %401 : vector<32x256xf32> to vector<32x256xbf16>
    %403 = vector.shape_cast %402 : vector<32x256xbf16> to vector<2x16x256xbf16>
    %404 = vector.extract_strided_slice %403 {offsets = [0, 0, 0], sizes = [2, 16, 128], strides = [1, 1, 1]} : vector<2x16x256xbf16> to vector<2x16x128xbf16>
    %405 = vector.extract_strided_slice %403 {offsets = [0, 0, 128], sizes = [2, 16, 128], strides = [1, 1, 1]} : vector<2x16x256xbf16> to vector<2x16x128xbf16>
    %c1_176 = arith.constant 1 : index
    %c0_177 = arith.constant 0 : index
    %c0_178 = arith.constant 0 : index
    %406 = vector.load %arg15[%c1_176, %c0_177, %c0_178] : memref<3x128x128xbf16, #tpu.memory_space<vmem>>, vector<1x128x128xbf16>
    %407 = vector.shape_cast %406 : vector<1x128x128xbf16> to vector<128x128xbf16>
    %c1_179 = arith.constant 1 : index
    %c0_180 = arith.constant 0 : index
    %c0_181 = arith.constant 0 : index
    %408 = vector.load %arg16[%c1_179, %c0_180, %c0_181] : memref<3x1x128xf32, #tpu.memory_space<vmem>>, vector<1x1x128xf32>
    %409 = vector.shape_cast %408 : vector<1x1x128xf32> to vector<1x128xf32>
    %cst_182 = arith.constant dense<0.000000e+00> : vector<32x128xf32>
    %410 = tpu.matmul %305, %407, %cst_182 {dimension_numbers = #tpu.dot_dimension_numbers<[1], [0], [0], [1], [0, 0, 1, 1], [], []>} : vector<32x128xbf16>, vector<128x128xbf16>, vector<32x128xf32> -> vector<32x128xf32>
    %411 = vector.broadcast %409 : vector<1x128xf32> to vector<32x128xf32>
    %412 = arith.addf %410, %411 : vector<32x128xf32>
    %413 = arith.truncf %412 : vector<32x128xf32> to vector<32x128xbf16>
    %414 = vector.shape_cast %413 : vector<32x128xbf16> to vector<2x16x128xbf16>
    %c1_183 = arith.constant 1 : index
    %c0_184 = arith.constant 0 : index
    %c0_185 = arith.constant 0 : index
    %415 = vector.load %arg19[%c1_183, %c0_184, %c0_185] : memref<3x128x128xbf16, #tpu.memory_space<vmem>>, vector<1x128x128xbf16>
    %416 = vector.shape_cast %415 : vector<1x128x128xbf16> to vector<128x128xbf16>
    %c1_186 = arith.constant 1 : index
    %c0_187 = arith.constant 0 : index
    %c0_188 = arith.constant 0 : index
    %417 = vector.load %arg20[%c1_186, %c0_187, %c0_188] : memref<3x1x128xf32, #tpu.memory_space<vmem>>, vector<1x1x128xf32>
    %418 = vector.shape_cast %417 : vector<1x1x128xf32> to vector<1x128xf32>
    %419 = vector.extract_strided_slice %414 {offsets = [0, 0, 0], sizes = [2, 16, 32], strides = [1, 1, 1]} : vector<2x16x128xbf16> to vector<2x16x32xbf16>
    %420 = vector.extract_strided_slice %404 {offsets = [0, 0, 0], sizes = [2, 16, 32], strides = [1, 1, 1]} : vector<2x16x128xbf16> to vector<2x16x32xbf16>
    "tpu.trace_start"() <{level = 10 : i32, message = "bqd,bkd->bqk"}> : () -> ()
    %cst_189 = arith.constant dense<0.000000e+00> : vector<2x16x16xf32>
    %421 = tpu.matmul %419, %420, %cst_189 {dimension_numbers = #tpu.dot_dimension_numbers<[2], [2], [1], [1], [0, 0, 0, 1, 1, 1], [0], [0]>} : vector<2x16x32xbf16>, vector<2x16x32xbf16>, vector<2x16x16xf32> -> vector<2x16x16xf32>
    "tpu.trace_stop"() : () -> ()
    %cst_190 = arith.constant dense<0xFF800000> : vector<2x16xf32>
    %422 = vector.multi_reduction <maximumf>, %421, %cst_190 [2] : vector<2x16x16xf32> to vector<2x16xf32>
    %423 = vector.shape_cast %422 : vector<2x16xf32> to vector<2x16x1xf32>
    %424 = vector.broadcast %423 : vector<2x16x1xf32> to vector<2x16x16xf32>
    %425 = arith.subf %421, %424 : vector<2x16x16xf32>
    %426 = math.exp %425 : vector<2x16x16xf32>
    %cst_191 = arith.constant dense<0.000000e+00> : vector<2x16xf32>
    %427 = vector.multi_reduction <add>, %426, %cst_191 [2] : vector<2x16x16xf32> to vector<2x16xf32>
    %428 = vector.shape_cast %427 : vector<2x16xf32> to vector<2x16x1xf32>
    %429 = tpu.reciprocal %428 : vector<2x16x1xf32> -> vector<2x16x1xf32>
    %430 = vector.broadcast %429 : vector<2x16x1xf32> to vector<2x16x16xf32>
    %431 = arith.mulf %426, %430 : vector<2x16x16xf32>
    %432 = arith.truncf %431 : vector<2x16x16xf32> to vector<2x16x16xbf16>
    %433 = vector.extract_strided_slice %405 {offsets = [0, 0, 0], sizes = [2, 16, 32], strides = [1, 1, 1]} : vector<2x16x128xbf16> to vector<2x16x32xbf16>
    "tpu.trace_start"() <{level = 10 : i32, message = "bqk,bkd->bqd"}> : () -> ()
    %cst_192 = arith.constant dense<0.000000e+00> : vector<2x16x32xf32>
    %434 = tpu.matmul %432, %433, %cst_192 {dimension_numbers = #tpu.dot_dimension_numbers<[2], [1], [1], [2], [0, 0, 0, 1, 1, 2], [0], [0]>} : vector<2x16x16xbf16>, vector<2x16x32xbf16>, vector<2x16x32xf32> -> vector<2x16x32xf32>
    "tpu.trace_stop"() : () -> ()
    %435 = vector.extract_strided_slice %414 {offsets = [0, 0, 32], sizes = [2, 16, 32], strides = [1, 1, 1]} : vector<2x16x128xbf16> to vector<2x16x32xbf16>
    %436 = vector.extract_strided_slice %404 {offsets = [0, 0, 32], sizes = [2, 16, 32], strides = [1, 1, 1]} : vector<2x16x128xbf16> to vector<2x16x32xbf16>
    "tpu.trace_start"() <{level = 10 : i32, message = "bqd,bkd->bqk"}> : () -> ()
    %cst_193 = arith.constant dense<0.000000e+00> : vector<2x16x16xf32>
    %437 = tpu.matmul %435, %436, %cst_193 {dimension_numbers = #tpu.dot_dimension_numbers<[2], [2], [1], [1], [0, 0, 0, 1, 1, 1], [0], [0]>} : vector<2x16x32xbf16>, vector<2x16x32xbf16>, vector<2x16x16xf32> -> vector<2x16x16xf32>
    "tpu.trace_stop"() : () -> ()
    %cst_194 = arith.constant dense<0xFF800000> : vector<2x16xf32>
    %438 = vector.multi_reduction <maximumf>, %437, %cst_194 [2] : vector<2x16x16xf32> to vector<2x16xf32>
    %439 = vector.shape_cast %438 : vector<2x16xf32> to vector<2x16x1xf32>
    %440 = vector.broadcast %439 : vector<2x16x1xf32> to vector<2x16x16xf32>
    %441 = arith.subf %437, %440 : vector<2x16x16xf32>
    %442 = math.exp %441 : vector<2x16x16xf32>
    %cst_195 = arith.constant dense<0.000000e+00> : vector<2x16xf32>
    %443 = vector.multi_reduction <add>, %442, %cst_195 [2] : vector<2x16x16xf32> to vector<2x16xf32>
    %444 = vector.shape_cast %443 : vector<2x16xf32> to vector<2x16x1xf32>
    %445 = tpu.reciprocal %444 : vector<2x16x1xf32> -> vector<2x16x1xf32>
    %446 = vector.broadcast %445 : vector<2x16x1xf32> to vector<2x16x16xf32>
    %447 = arith.mulf %442, %446 : vector<2x16x16xf32>
    %448 = arith.truncf %447 : vector<2x16x16xf32> to vector<2x16x16xbf16>
    %449 = vector.extract_strided_slice %405 {offsets = [0, 0, 32], sizes = [2, 16, 32], strides = [1, 1, 1]} : vector<2x16x128xbf16> to vector<2x16x32xbf16>
    "tpu.trace_start"() <{level = 10 : i32, message = "bqk,bkd->bqd"}> : () -> ()
    %cst_196 = arith.constant dense<0.000000e+00> : vector<2x16x32xf32>
    %450 = tpu.matmul %448, %449, %cst_196 {dimension_numbers = #tpu.dot_dimension_numbers<[2], [1], [1], [2], [0, 0, 0, 1, 1, 2], [0], [0]>} : vector<2x16x16xbf16>, vector<2x16x32xbf16>, vector<2x16x32xf32> -> vector<2x16x32xf32>
    "tpu.trace_stop"() : () -> ()
    %451 = vector.extract_strided_slice %414 {offsets = [0, 0, 64], sizes = [2, 16, 32], strides = [1, 1, 1]} : vector<2x16x128xbf16> to vector<2x16x32xbf16>
    %452 = vector.extract_strided_slice %404 {offsets = [0, 0, 64], sizes = [2, 16, 32], strides = [1, 1, 1]} : vector<2x16x128xbf16> to vector<2x16x32xbf16>
    "tpu.trace_start"() <{level = 10 : i32, message = "bqd,bkd->bqk"}> : () -> ()
    %cst_197 = arith.constant dense<0.000000e+00> : vector<2x16x16xf32>
    %453 = tpu.matmul %451, %452, %cst_197 {dimension_numbers = #tpu.dot_dimension_numbers<[2], [2], [1], [1], [0, 0, 0, 1, 1, 1], [0], [0]>} : vector<2x16x32xbf16>, vector<2x16x32xbf16>, vector<2x16x16xf32> -> vector<2x16x16xf32>
    "tpu.trace_stop"() : () -> ()
    %cst_198 = arith.constant dense<0xFF800000> : vector<2x16xf32>
    %454 = vector.multi_reduction <maximumf>, %453, %cst_198 [2] : vector<2x16x16xf32> to vector<2x16xf32>
    %455 = vector.shape_cast %454 : vector<2x16xf32> to vector<2x16x1xf32>
    %456 = vector.broadcast %455 : vector<2x16x1xf32> to vector<2x16x16xf32>
    %457 = arith.subf %453, %456 : vector<2x16x16xf32>
    %458 = math.exp %457 : vector<2x16x16xf32>
    %cst_199 = arith.constant dense<0.000000e+00> : vector<2x16xf32>
    %459 = vector.multi_reduction <add>, %458, %cst_199 [2] : vector<2x16x16xf32> to vector<2x16xf32>
    %460 = vector.shape_cast %459 : vector<2x16xf32> to vector<2x16x1xf32>
    %461 = tpu.reciprocal %460 : vector<2x16x1xf32> -> vector<2x16x1xf32>
    %462 = vector.broadcast %461 : vector<2x16x1xf32> to vector<2x16x16xf32>
    %463 = arith.mulf %458, %462 : vector<2x16x16xf32>
    %464 = arith.truncf %463 : vector<2x16x16xf32> to vector<2x16x16xbf16>
    %465 = vector.extract_strided_slice %405 {offsets = [0, 0, 64], sizes = [2, 16, 32], strides = [1, 1, 1]} : vector<2x16x128xbf16> to vector<2x16x32xbf16>
    "tpu.trace_start"() <{level = 10 : i32, message = "bqk,bkd->bqd"}> : () -> ()
    %cst_200 = arith.constant dense<0.000000e+00> : vector<2x16x32xf32>
    %466 = tpu.matmul %464, %465, %cst_200 {dimension_numbers = #tpu.dot_dimension_numbers<[2], [1], [1], [2], [0, 0, 0, 1, 1, 2], [0], [0]>} : vector<2x16x16xbf16>, vector<2x16x32xbf16>, vector<2x16x32xf32> -> vector<2x16x32xf32>
    "tpu.trace_stop"() : () -> ()
    %467 = vector.extract_strided_slice %414 {offsets = [0, 0, 96], sizes = [2, 16, 32], strides = [1, 1, 1]} : vector<2x16x128xbf16> to vector<2x16x32xbf16>
    %468 = vector.extract_strided_slice %404 {offsets = [0, 0, 96], sizes = [2, 16, 32], strides = [1, 1, 1]} : vector<2x16x128xbf16> to vector<2x16x32xbf16>
    "tpu.trace_start"() <{level = 10 : i32, message = "bqd,bkd->bqk"}> : () -> ()
    %cst_201 = arith.constant dense<0.000000e+00> : vector<2x16x16xf32>
    %469 = tpu.matmul %467, %468, %cst_201 {dimension_numbers = #tpu.dot_dimension_numbers<[2], [2], [1], [1], [0, 0, 0, 1, 1, 1], [0], [0]>} : vector<2x16x32xbf16>, vector<2x16x32xbf16>, vector<2x16x16xf32> -> vector<2x16x16xf32>
    "tpu.trace_stop"() : () -> ()
    %cst_202 = arith.constant dense<0xFF800000> : vector<2x16xf32>
    %470 = vector.multi_reduction <maximumf>, %469, %cst_202 [2] : vector<2x16x16xf32> to vector<2x16xf32>
    %471 = vector.shape_cast %470 : vector<2x16xf32> to vector<2x16x1xf32>
    %472 = vector.broadcast %471 : vector<2x16x1xf32> to vector<2x16x16xf32>
    %473 = arith.subf %469, %472 : vector<2x16x16xf32>
    %474 = math.exp %473 : vector<2x16x16xf32>
    %cst_203 = arith.constant dense<0.000000e+00> : vector<2x16xf32>
    %475 = vector.multi_reduction <add>, %474, %cst_203 [2] : vector<2x16x16xf32> to vector<2x16xf32>
    %476 = vector.shape_cast %475 : vector<2x16xf32> to vector<2x16x1xf32>
    %477 = tpu.reciprocal %476 : vector<2x16x1xf32> -> vector<2x16x1xf32>
    %478 = vector.broadcast %477 : vector<2x16x1xf32> to vector<2x16x16xf32>
    %479 = arith.mulf %474, %478 : vector<2x16x16xf32>
    %480 = arith.truncf %479 : vector<2x16x16xf32> to vector<2x16x16xbf16>
    %481 = vector.extract_strided_slice %405 {offsets = [0, 0, 96], sizes = [2, 16, 32], strides = [1, 1, 1]} : vector<2x16x128xbf16> to vector<2x16x32xbf16>
    "tpu.trace_start"() <{level = 10 : i32, message = "bqk,bkd->bqd"}> : () -> ()
    %cst_204 = arith.constant dense<0.000000e+00> : vector<2x16x32xf32>
    %482 = tpu.matmul %480, %481, %cst_204 {dimension_numbers = #tpu.dot_dimension_numbers<[2], [1], [1], [2], [0, 0, 0, 1, 1, 2], [0], [0]>} : vector<2x16x16xbf16>, vector<2x16x32xbf16>, vector<2x16x32xf32> -> vector<2x16x32xf32>
    "tpu.trace_stop"() : () -> ()
    %483 = tpu.concatenate %434, %450, %466, %482 in 2 : vector<2x16x32xf32>, vector<2x16x32xf32>, vector<2x16x32xf32>, vector<2x16x32xf32> -> vector<2x16x128xf32>
    %484 = arith.truncf %483 : vector<2x16x128xf32> to vector<2x16x128xbf16>
    %485 = vector.shape_cast %484 : vector<2x16x128xbf16> to vector<32x128xbf16>
    %cst_205 = arith.constant dense<0.000000e+00> : vector<32x128xf32>
    %486 = tpu.matmul %485, %416, %cst_205 {dimension_numbers = #tpu.dot_dimension_numbers<[1], [0], [0], [1], [0, 0, 1, 1], [], []>} : vector<32x128xbf16>, vector<128x128xbf16>, vector<32x128xf32> -> vector<32x128xf32>
    %487 = vector.broadcast %418 : vector<1x128xf32> to vector<32x128xf32>
    %488 = arith.addf %486, %487 : vector<32x128xf32>
    %489 = vector.shape_cast %488 : vector<32x128xf32> to vector<2x16x128xf32>
    %490 = vector.extract_strided_slice %489 {offsets = [0, 0, 0], sizes = [2, 8, 128], strides = [1, 1, 1]} : vector<2x16x128xf32> to vector<2x8x128xf32>
    %cst_206 = arith.constant dense<0.000000e+00> : vector<2x128xf32>
    %491 = vector.multi_reduction <add>, %490, %cst_206 [1] : vector<2x8x128xf32> to vector<2x128xf32>
    %cst_207 = arith.constant 8.000000e+00 : f32
    %492 = vector.broadcast %cst_207 : f32 to vector<2x128xf32>
    %493 = arith.divf %491, %492 : vector<2x128xf32>
    %494 = vector.extract_strided_slice %489 {offsets = [0, 8, 0], sizes = [2, 8, 128], strides = [1, 1, 1]} : vector<2x16x128xf32> to vector<2x8x128xf32>
    %cst_208 = arith.constant dense<0.000000e+00> : vector<2x128xf32>
    %495 = vector.multi_reduction <add>, %494, %cst_208 [1] : vector<2x8x128xf32> to vector<2x128xf32>
    %cst_209 = arith.constant 8.000000e+00 : f32
    %496 = vector.broadcast %cst_209 : f32 to vector<2x128xf32>
    %497 = arith.divf %495, %496 : vector<2x128xf32>
    %c1_210 = arith.constant 1 : index
    %c0_211 = arith.constant 0 : index
    %c0_212 = arith.constant 0 : index
    %498 = vector.load %arg21[%c1_210, %c0_211, %c0_212] : memref<3x128x128xbf16, #tpu.memory_space<vmem>>, vector<1x128x128xbf16>
    %499 = vector.shape_cast %498 : vector<1x128x128xbf16> to vector<128x128xbf16>
    %c1_213 = arith.constant 1 : index
    %c0_214 = arith.constant 0 : index
    %c0_215 = arith.constant 0 : index
    %500 = vector.load %arg22[%c1_213, %c0_214, %c0_215] : memref<3x1x128xf32, #tpu.memory_space<vmem>>, vector<1x1x128xf32>
    %501 = vector.shape_cast %500 : vector<1x1x128xf32> to vector<1x128xf32>
    %502 = arith.truncf %493 : vector<2x128xf32> to vector<2x128xbf16>
    %cst_216 = arith.constant dense<0.000000e+00> : vector<2x128xf32>
    %503 = tpu.matmul %502, %499, %cst_216 {dimension_numbers = #tpu.dot_dimension_numbers<[1], [0], [0], [1], [0, 0, 1, 1], [], []>} : vector<2x128xbf16>, vector<128x128xbf16>, vector<2x128xf32> -> vector<2x128xf32>
    %504 = vector.broadcast %501 : vector<1x128xf32> to vector<2x128xf32>
    %505 = arith.addf %503, %504 : vector<2x128xf32>
    %cst_217 = arith.constant 0.000000e+00 : f32
    %506 = vector.broadcast %cst_217 : f32 to vector<2x128xf32>
    %507 = arith.maximumf %505, %506 : vector<2x128xf32>
    %c1_218 = arith.constant 1 : index
    %c0_219 = arith.constant 0 : index
    %c0_220 = arith.constant 0 : index
    %c0_221 = arith.constant 0 : index
    %508 = vector.load %arg25[%c1_218, %c0_219, %c0_220, %c0_221] : memref<3x2x1x128xf32, #tpu.memory_space<vmem>>, vector<1x1x1x128xf32>
    %509 = vector.shape_cast %508 : vector<1x1x1x128xf32> to vector<1x128xf32>
    %c1_222 = arith.constant 1 : index
    %c1_223 = arith.constant 1 : index
    %c0_224 = arith.constant 0 : index
    %c0_225 = arith.constant 0 : index
    %510 = vector.load %arg25[%c1_222, %c1_223, %c0_224, %c0_225] : memref<3x2x1x128xf32, #tpu.memory_space<vmem>>, vector<1x1x1x128xf32>
    %511 = vector.shape_cast %510 : vector<1x1x1x128xf32> to vector<1x128xf32>
    %cst_226 = arith.constant dense<0.000000e+00> : vector<2xf32>
    %512 = vector.multi_reduction <add>, %507, %cst_226 [1] : vector<2x128xf32> to vector<2xf32>
    %513 = vector.shape_cast %512 : vector<2xf32> to vector<2x1xf32>
    %cst_227 = arith.constant 1.280000e+02 : f32
    %514 = vector.broadcast %cst_227 : f32 to vector<2x1xf32>
    %515 = arith.divf %513, %514 : vector<2x1xf32>
    %516 = vector.broadcast %515 : vector<2x1xf32> to vector<2x128xf32>
    %517 = arith.subf %507, %516 : vector<2x128xf32>
    %518 = arith.mulf %517, %517 : vector<2x128xf32>
    %cst_228 = arith.constant dense<0.000000e+00> : vector<2xf32>
    %519 = vector.multi_reduction <add>, %518, %cst_228 [1] : vector<2x128xf32> to vector<2xf32>
    %520 = vector.shape_cast %519 : vector<2xf32> to vector<2x1xf32>
    %cst_229 = arith.constant 1.280000e+02 : f32
    %521 = vector.broadcast %cst_229 : f32 to vector<2x1xf32>
    %522 = arith.divf %520, %521 : vector<2x1xf32>
    %523 = vector.broadcast %515 : vector<2x1xf32> to vector<2x128xf32>
    %524 = arith.subf %507, %523 : vector<2x128xf32>
    %cst_230 = arith.constant 9.99999974E-6 : f32
    %525 = vector.broadcast %cst_230 : f32 to vector<2x1xf32>
    %526 = arith.addf %522, %525 : vector<2x1xf32>
    %527 = math.rsqrt %526 : vector<2x1xf32>
    %528 = vector.broadcast %527 : vector<2x1xf32> to vector<2x128xf32>
    %529 = arith.mulf %524, %528 : vector<2x128xf32>
    %530 = vector.broadcast %509 : vector<1x128xf32> to vector<2x128xf32>
    %531 = arith.mulf %529, %530 : vector<2x128xf32>
    %532 = vector.broadcast %511 : vector<1x128xf32> to vector<2x128xf32>
    %533 = arith.addf %531, %532 : vector<2x128xf32>
    %c1_231 = arith.constant 1 : index
    %c0_232 = arith.constant 0 : index
    %c0_233 = arith.constant 0 : index
    %534 = vector.load %arg23[%c1_231, %c0_232, %c0_233] : memref<3x128x128xbf16, #tpu.memory_space<vmem>>, vector<1x128x128xbf16>
    %535 = vector.shape_cast %534 : vector<1x128x128xbf16> to vector<128x128xbf16>
    %c1_234 = arith.constant 1 : index
    %c0_235 = arith.constant 0 : index
    %c0_236 = arith.constant 0 : index
    %536 = vector.load %arg24[%c1_234, %c0_235, %c0_236] : memref<3x1x128xf32, #tpu.memory_space<vmem>>, vector<1x1x128xf32>
    %537 = vector.shape_cast %536 : vector<1x1x128xf32> to vector<1x128xf32>
    %538 = arith.truncf %497 : vector<2x128xf32> to vector<2x128xbf16>
    %cst_237 = arith.constant dense<0.000000e+00> : vector<2x128xf32>
    %539 = tpu.matmul %538, %535, %cst_237 {dimension_numbers = #tpu.dot_dimension_numbers<[1], [0], [0], [1], [0, 0, 1, 1], [], []>} : vector<2x128xbf16>, vector<128x128xbf16>, vector<2x128xf32> -> vector<2x128xf32>
    %540 = vector.broadcast %537 : vector<1x128xf32> to vector<2x128xf32>
    %541 = arith.addf %539, %540 : vector<2x128xf32>
    %cst_238 = arith.constant 0.000000e+00 : f32
    %542 = vector.broadcast %cst_238 : f32 to vector<2x128xf32>
    %543 = arith.maximumf %541, %542 : vector<2x128xf32>
    %c1_239 = arith.constant 1 : index
    %c0_240 = arith.constant 0 : index
    %c0_241 = arith.constant 0 : index
    %c0_242 = arith.constant 0 : index
    %544 = vector.load %arg26[%c1_239, %c0_240, %c0_241, %c0_242] : memref<3x2x1x128xf32, #tpu.memory_space<vmem>>, vector<1x1x1x128xf32>
    %545 = vector.shape_cast %544 : vector<1x1x1x128xf32> to vector<1x128xf32>
    %c1_243 = arith.constant 1 : index
    %c1_244 = arith.constant 1 : index
    %c0_245 = arith.constant 0 : index
    %c0_246 = arith.constant 0 : index
    %546 = vector.load %arg26[%c1_243, %c1_244, %c0_245, %c0_246] : memref<3x2x1x128xf32, #tpu.memory_space<vmem>>, vector<1x1x1x128xf32>
    %547 = vector.shape_cast %546 : vector<1x1x1x128xf32> to vector<1x128xf32>
    %cst_247 = arith.constant dense<0.000000e+00> : vector<2xf32>
    %548 = vector.multi_reduction <add>, %543, %cst_247 [1] : vector<2x128xf32> to vector<2xf32>
    %549 = vector.shape_cast %548 : vector<2xf32> to vector<2x1xf32>
    %cst_248 = arith.constant 1.280000e+02 : f32
    %550 = vector.broadcast %cst_248 : f32 to vector<2x1xf32>
    %551 = arith.divf %549, %550 : vector<2x1xf32>
    %552 = vector.broadcast %551 : vector<2x1xf32> to vector<2x128xf32>
    %553 = arith.subf %543, %552 : vector<2x128xf32>
    %554 = arith.mulf %553, %553 : vector<2x128xf32>
    %cst_249 = arith.constant dense<0.000000e+00> : vector<2xf32>
    %555 = vector.multi_reduction <add>, %554, %cst_249 [1] : vector<2x128xf32> to vector<2xf32>
    %556 = vector.shape_cast %555 : vector<2xf32> to vector<2x1xf32>
    %cst_250 = arith.constant 1.280000e+02 : f32
    %557 = vector.broadcast %cst_250 : f32 to vector<2x1xf32>
    %558 = arith.divf %556, %557 : vector<2x1xf32>
    %559 = vector.broadcast %551 : vector<2x1xf32> to vector<2x128xf32>
    %560 = arith.subf %543, %559 : vector<2x128xf32>
    %cst_251 = arith.constant 9.99999974E-6 : f32
    %561 = vector.broadcast %cst_251 : f32 to vector<2x1xf32>
    %562 = arith.addf %558, %561 : vector<2x1xf32>
    %563 = math.rsqrt %562 : vector<2x1xf32>
    %564 = vector.broadcast %563 : vector<2x1xf32> to vector<2x128xf32>
    %565 = arith.mulf %560, %564 : vector<2x128xf32>
    %566 = vector.broadcast %545 : vector<1x128xf32> to vector<2x128xf32>
    %567 = arith.mulf %565, %566 : vector<2x128xf32>
    %568 = vector.broadcast %547 : vector<1x128xf32> to vector<2x128xf32>
    %569 = arith.addf %567, %568 : vector<2x128xf32>
    %c0_252 = arith.constant 0 : index
    %c0_253 = arith.constant 0 : index
    %c0_254 = arith.constant 0 : index
    %570 = vector.load %arg4[%c0_252, %c0_253, %c0_254] : memref<2x8x768xbf16, #tpu.memory_space<vmem>>, vector<2x8x768xbf16>
    %571 = vector.extract_strided_slice %9 {offsets = [0, 256], sizes = [16, 128], strides = [1, 1]} : vector<16x384xbf16> to vector<16x128xbf16>
    %572 = vector.shape_cast %570 : vector<2x8x768xbf16> to vector<16x768xbf16>
    %c0_255 = arith.constant 0 : index
    %c0_256 = arith.constant 0 : index
    %573 = vector.load %arg9[%c0_255, %c0_256] : memref<768x128xbf16, #tpu.memory_space<vmem>>, vector<768x128xbf16>
    %c2 = arith.constant 2 : index
    %c0_257 = arith.constant 0 : index
    %c0_258 = arith.constant 0 : index
    %574 = vector.load %arg10[%c2, %c0_257, %c0_258] : memref<3x1x128xf32, #tpu.memory_space<vmem>>, vector<1x1x128xf32>
    %575 = vector.shape_cast %574 : vector<1x1x128xf32> to vector<1x128xf32>
    %cst_259 = arith.constant dense<0.000000e+00> : vector<16x128xf32>
    %576 = tpu.matmul %572, %573, %cst_259 {dimension_numbers = #tpu.dot_dimension_numbers<[1], [0], [0], [1], [0, 0, 1, 1], [], []>} : vector<16x768xbf16>, vector<768x128xbf16>, vector<16x128xf32> -> vector<16x128xf32>
    %577 = vector.broadcast %575 : vector<1x128xf32> to vector<16x128xf32>
    %578 = arith.addf %576, %577 : vector<16x128xf32>
    %cst_260 = arith.constant 0.000000e+00 : f32
    %579 = vector.broadcast %cst_260 : f32 to vector<16x128xf32>
    %580 = arith.maximumf %578, %579 : vector<16x128xf32>
    %581 = arith.truncf %580 : vector<16x128xf32> to vector<16x128xbf16>
    %582 = vector.shape_cast %571 : vector<16x128xbf16> to vector<2x8x128xbf16>
    %583 = vector.shape_cast %581 : vector<16x128xbf16> to vector<2x8x128xbf16>
    %584 = tpu.concatenate %582, %583 in 1 : vector<2x8x128xbf16>, vector<2x8x128xbf16> -> vector<2x16x128xbf16>
    %585 = vector.shape_cast %584 : vector<2x16x128xbf16> to vector<32x128xbf16>
    %c2_261 = arith.constant 2 : index
    %c0_262 = arith.constant 0 : index
    %c0_263 = arith.constant 0 : index
    %586 = vector.load %arg11[%c2_261, %c0_262, %c0_263] : memref<3x128x384xbf16, #tpu.memory_space<vmem>>, vector<1x128x384xbf16>
    %587 = vector.shape_cast %586 : vector<1x128x384xbf16> to vector<128x384xbf16>
    %c2_264 = arith.constant 2 : index
    %c0_265 = arith.constant 0 : index
    %c0_266 = arith.constant 0 : index
    %588 = vector.load %arg12[%c2_264, %c0_265, %c0_266] : memref<3x1x384xf32, #tpu.memory_space<vmem>>, vector<1x1x384xf32>
    %589 = vector.shape_cast %588 : vector<1x1x384xf32> to vector<1x384xf32>
    %cst_267 = arith.constant dense<0.000000e+00> : vector<32x384xf32>
    %590 = tpu.matmul %585, %587, %cst_267 {dimension_numbers = #tpu.dot_dimension_numbers<[1], [0], [0], [1], [0, 0, 1, 1], [], []>} : vector<32x128xbf16>, vector<128x384xbf16>, vector<32x384xf32> -> vector<32x384xf32>
    %591 = vector.broadcast %589 : vector<1x384xf32> to vector<32x384xf32>
    %592 = arith.addf %590, %591 : vector<32x384xf32>
    %593 = arith.truncf %592 : vector<32x384xf32> to vector<32x384xbf16>
    %594 = vector.shape_cast %593 : vector<32x384xbf16> to vector<2x16x384xbf16>
    %595 = vector.extract_strided_slice %594 {offsets = [0, 0, 0], sizes = [2, 16, 128], strides = [1, 1, 1]} : vector<2x16x384xbf16> to vector<2x16x128xbf16>
    %596 = vector.extract_strided_slice %594 {offsets = [0, 0, 128], sizes = [2, 16, 128], strides = [1, 1, 1]} : vector<2x16x384xbf16> to vector<2x16x128xbf16>
    %597 = vector.extract_strided_slice %594 {offsets = [0, 0, 256], sizes = [2, 16, 128], strides = [1, 1, 1]} : vector<2x16x384xbf16> to vector<2x16x128xbf16>
    %c2_268 = arith.constant 2 : index
    %c0_269 = arith.constant 0 : index
    %c0_270 = arith.constant 0 : index
    %598 = vector.load %arg13[%c2_268, %c0_269, %c0_270] : memref<3x128x128xbf16, #tpu.memory_space<vmem>>, vector<1x128x128xbf16>
    %599 = vector.shape_cast %598 : vector<1x128x128xbf16> to vector<128x128xbf16>
    %c2_271 = arith.constant 2 : index
    %c0_272 = arith.constant 0 : index
    %c0_273 = arith.constant 0 : index
    %600 = vector.load %arg14[%c2_271, %c0_272, %c0_273] : memref<3x1x128xf32, #tpu.memory_space<vmem>>, vector<1x1x128xf32>
    %601 = vector.shape_cast %600 : vector<1x1x128xf32> to vector<1x128xf32>
    %602 = vector.extract_strided_slice %595 {offsets = [0, 0, 0], sizes = [2, 16, 32], strides = [1, 1, 1]} : vector<2x16x128xbf16> to vector<2x16x32xbf16>
    %603 = vector.extract_strided_slice %596 {offsets = [0, 0, 0], sizes = [2, 16, 32], strides = [1, 1, 1]} : vector<2x16x128xbf16> to vector<2x16x32xbf16>
    "tpu.trace_start"() <{level = 10 : i32, message = "bqd,bkd->bqk"}> : () -> ()
    %cst_274 = arith.constant dense<0.000000e+00> : vector<2x16x16xf32>
    %604 = tpu.matmul %602, %603, %cst_274 {dimension_numbers = #tpu.dot_dimension_numbers<[2], [2], [1], [1], [0, 0, 0, 1, 1, 1], [0], [0]>} : vector<2x16x32xbf16>, vector<2x16x32xbf16>, vector<2x16x16xf32> -> vector<2x16x16xf32>
    "tpu.trace_stop"() : () -> ()
    %cst_275 = arith.constant dense<0xFF800000> : vector<2x16xf32>
    %605 = vector.multi_reduction <maximumf>, %604, %cst_275 [2] : vector<2x16x16xf32> to vector<2x16xf32>
    %606 = vector.shape_cast %605 : vector<2x16xf32> to vector<2x16x1xf32>
    %607 = vector.broadcast %606 : vector<2x16x1xf32> to vector<2x16x16xf32>
    %608 = arith.subf %604, %607 : vector<2x16x16xf32>
    %609 = math.exp %608 : vector<2x16x16xf32>
    %cst_276 = arith.constant dense<0.000000e+00> : vector<2x16xf32>
    %610 = vector.multi_reduction <add>, %609, %cst_276 [2] : vector<2x16x16xf32> to vector<2x16xf32>
    %611 = vector.shape_cast %610 : vector<2x16xf32> to vector<2x16x1xf32>
    %612 = tpu.reciprocal %611 : vector<2x16x1xf32> -> vector<2x16x1xf32>
    %613 = vector.broadcast %612 : vector<2x16x1xf32> to vector<2x16x16xf32>
    %614 = arith.mulf %609, %613 : vector<2x16x16xf32>
    %615 = arith.truncf %614 : vector<2x16x16xf32> to vector<2x16x16xbf16>
    %616 = vector.extract_strided_slice %597 {offsets = [0, 0, 0], sizes = [2, 16, 32], strides = [1, 1, 1]} : vector<2x16x128xbf16> to vector<2x16x32xbf16>
    "tpu.trace_start"() <{level = 10 : i32, message = "bqk,bkd->bqd"}> : () -> ()
    %cst_277 = arith.constant dense<0.000000e+00> : vector<2x16x32xf32>
    %617 = tpu.matmul %615, %616, %cst_277 {dimension_numbers = #tpu.dot_dimension_numbers<[2], [1], [1], [2], [0, 0, 0, 1, 1, 2], [0], [0]>} : vector<2x16x16xbf16>, vector<2x16x32xbf16>, vector<2x16x32xf32> -> vector<2x16x32xf32>
    "tpu.trace_stop"() : () -> ()
    %618 = vector.extract_strided_slice %595 {offsets = [0, 0, 32], sizes = [2, 16, 32], strides = [1, 1, 1]} : vector<2x16x128xbf16> to vector<2x16x32xbf16>
    %619 = vector.extract_strided_slice %596 {offsets = [0, 0, 32], sizes = [2, 16, 32], strides = [1, 1, 1]} : vector<2x16x128xbf16> to vector<2x16x32xbf16>
    "tpu.trace_start"() <{level = 10 : i32, message = "bqd,bkd->bqk"}> : () -> ()
    %cst_278 = arith.constant dense<0.000000e+00> : vector<2x16x16xf32>
    %620 = tpu.matmul %618, %619, %cst_278 {dimension_numbers = #tpu.dot_dimension_numbers<[2], [2], [1], [1], [0, 0, 0, 1, 1, 1], [0], [0]>} : vector<2x16x32xbf16>, vector<2x16x32xbf16>, vector<2x16x16xf32> -> vector<2x16x16xf32>
    "tpu.trace_stop"() : () -> ()
    %cst_279 = arith.constant dense<0xFF800000> : vector<2x16xf32>
    %621 = vector.multi_reduction <maximumf>, %620, %cst_279 [2] : vector<2x16x16xf32> to vector<2x16xf32>
    %622 = vector.shape_cast %621 : vector<2x16xf32> to vector<2x16x1xf32>
    %623 = vector.broadcast %622 : vector<2x16x1xf32> to vector<2x16x16xf32>
    %624 = arith.subf %620, %623 : vector<2x16x16xf32>
    %625 = math.exp %624 : vector<2x16x16xf32>
    %cst_280 = arith.constant dense<0.000000e+00> : vector<2x16xf32>
    %626 = vector.multi_reduction <add>, %625, %cst_280 [2] : vector<2x16x16xf32> to vector<2x16xf32>
    %627 = vector.shape_cast %626 : vector<2x16xf32> to vector<2x16x1xf32>
    %628 = tpu.reciprocal %627 : vector<2x16x1xf32> -> vector<2x16x1xf32>
    %629 = vector.broadcast %628 : vector<2x16x1xf32> to vector<2x16x16xf32>
    %630 = arith.mulf %625, %629 : vector<2x16x16xf32>
    %631 = arith.truncf %630 : vector<2x16x16xf32> to vector<2x16x16xbf16>
    %632 = vector.extract_strided_slice %597 {offsets = [0, 0, 32], sizes = [2, 16, 32], strides = [1, 1, 1]} : vector<2x16x128xbf16> to vector<2x16x32xbf16>
    "tpu.trace_start"() <{level = 10 : i32, message = "bqk,bkd->bqd"}> : () -> ()
    %cst_281 = arith.constant dense<0.000000e+00> : vector<2x16x32xf32>
    %633 = tpu.matmul %631, %632, %cst_281 {dimension_numbers = #tpu.dot_dimension_numbers<[2], [1], [1], [2], [0, 0, 0, 1, 1, 2], [0], [0]>} : vector<2x16x16xbf16>, vector<2x16x32xbf16>, vector<2x16x32xf32> -> vector<2x16x32xf32>
    "tpu.trace_stop"() : () -> ()
    %634 = vector.extract_strided_slice %595 {offsets = [0, 0, 64], sizes = [2, 16, 32], strides = [1, 1, 1]} : vector<2x16x128xbf16> to vector<2x16x32xbf16>
    %635 = vector.extract_strided_slice %596 {offsets = [0, 0, 64], sizes = [2, 16, 32], strides = [1, 1, 1]} : vector<2x16x128xbf16> to vector<2x16x32xbf16>
    "tpu.trace_start"() <{level = 10 : i32, message = "bqd,bkd->bqk"}> : () -> ()
    %cst_282 = arith.constant dense<0.000000e+00> : vector<2x16x16xf32>
    %636 = tpu.matmul %634, %635, %cst_282 {dimension_numbers = #tpu.dot_dimension_numbers<[2], [2], [1], [1], [0, 0, 0, 1, 1, 1], [0], [0]>} : vector<2x16x32xbf16>, vector<2x16x32xbf16>, vector<2x16x16xf32> -> vector<2x16x16xf32>
    "tpu.trace_stop"() : () -> ()
    %cst_283 = arith.constant dense<0xFF800000> : vector<2x16xf32>
    %637 = vector.multi_reduction <maximumf>, %636, %cst_283 [2] : vector<2x16x16xf32> to vector<2x16xf32>
    %638 = vector.shape_cast %637 : vector<2x16xf32> to vector<2x16x1xf32>
    %639 = vector.broadcast %638 : vector<2x16x1xf32> to vector<2x16x16xf32>
    %640 = arith.subf %636, %639 : vector<2x16x16xf32>
    %641 = math.exp %640 : vector<2x16x16xf32>
    %cst_284 = arith.constant dense<0.000000e+00> : vector<2x16xf32>
    %642 = vector.multi_reduction <add>, %641, %cst_284 [2] : vector<2x16x16xf32> to vector<2x16xf32>
    %643 = vector.shape_cast %642 : vector<2x16xf32> to vector<2x16x1xf32>
    %644 = tpu.reciprocal %643 : vector<2x16x1xf32> -> vector<2x16x1xf32>
    %645 = vector.broadcast %644 : vector<2x16x1xf32> to vector<2x16x16xf32>
    %646 = arith.mulf %641, %645 : vector<2x16x16xf32>
    %647 = arith.truncf %646 : vector<2x16x16xf32> to vector<2x16x16xbf16>
    %648 = vector.extract_strided_slice %597 {offsets = [0, 0, 64], sizes = [2, 16, 32], strides = [1, 1, 1]} : vector<2x16x128xbf16> to vector<2x16x32xbf16>
    "tpu.trace_start"() <{level = 10 : i32, message = "bqk,bkd->bqd"}> : () -> ()
    %cst_285 = arith.constant dense<0.000000e+00> : vector<2x16x32xf32>
    %649 = tpu.matmul %647, %648, %cst_285 {dimension_numbers = #tpu.dot_dimension_numbers<[2], [1], [1], [2], [0, 0, 0, 1, 1, 2], [0], [0]>} : vector<2x16x16xbf16>, vector<2x16x32xbf16>, vector<2x16x32xf32> -> vector<2x16x32xf32>
    "tpu.trace_stop"() : () -> ()
    %650 = vector.extract_strided_slice %595 {offsets = [0, 0, 96], sizes = [2, 16, 32], strides = [1, 1, 1]} : vector<2x16x128xbf16> to vector<2x16x32xbf16>
    %651 = vector.extract_strided_slice %596 {offsets = [0, 0, 96], sizes = [2, 16, 32], strides = [1, 1, 1]} : vector<2x16x128xbf16> to vector<2x16x32xbf16>
    "tpu.trace_start"() <{level = 10 : i32, message = "bqd,bkd->bqk"}> : () -> ()
    %cst_286 = arith.constant dense<0.000000e+00> : vector<2x16x16xf32>
    %652 = tpu.matmul %650, %651, %cst_286 {dimension_numbers = #tpu.dot_dimension_numbers<[2], [2], [1], [1], [0, 0, 0, 1, 1, 1], [0], [0]>} : vector<2x16x32xbf16>, vector<2x16x32xbf16>, vector<2x16x16xf32> -> vector<2x16x16xf32>
    "tpu.trace_stop"() : () -> ()
    %cst_287 = arith.constant dense<0xFF800000> : vector<2x16xf32>
    %653 = vector.multi_reduction <maximumf>, %652, %cst_287 [2] : vector<2x16x16xf32> to vector<2x16xf32>
    %654 = vector.shape_cast %653 : vector<2x16xf32> to vector<2x16x1xf32>
    %655 = vector.broadcast %654 : vector<2x16x1xf32> to vector<2x16x16xf32>
    %656 = arith.subf %652, %655 : vector<2x16x16xf32>
    %657 = math.exp %656 : vector<2x16x16xf32>
    %cst_288 = arith.constant dense<0.000000e+00> : vector<2x16xf32>
    %658 = vector.multi_reduction <add>, %657, %cst_288 [2] : vector<2x16x16xf32> to vector<2x16xf32>
    %659 = vector.shape_cast %658 : vector<2x16xf32> to vector<2x16x1xf32>
    %660 = tpu.reciprocal %659 : vector<2x16x1xf32> -> vector<2x16x1xf32>
    %661 = vector.broadcast %660 : vector<2x16x1xf32> to vector<2x16x16xf32>
    %662 = arith.mulf %657, %661 : vector<2x16x16xf32>
    %663 = arith.truncf %662 : vector<2x16x16xf32> to vector<2x16x16xbf16>
    %664 = vector.extract_strided_slice %597 {offsets = [0, 0, 96], sizes = [2, 16, 32], strides = [1, 1, 1]} : vector<2x16x128xbf16> to vector<2x16x32xbf16>
    "tpu.trace_start"() <{level = 10 : i32, message = "bqk,bkd->bqd"}> : () -> ()
    %cst_289 = arith.constant dense<0.000000e+00> : vector<2x16x32xf32>
    %665 = tpu.matmul %663, %664, %cst_289 {dimension_numbers = #tpu.dot_dimension_numbers<[2], [1], [1], [2], [0, 0, 0, 1, 1, 2], [0], [0]>} : vector<2x16x16xbf16>, vector<2x16x32xbf16>, vector<2x16x32xf32> -> vector<2x16x32xf32>
    "tpu.trace_stop"() : () -> ()
    %666 = tpu.concatenate %617, %633, %649, %665 in 2 : vector<2x16x32xf32>, vector<2x16x32xf32>, vector<2x16x32xf32>, vector<2x16x32xf32> -> vector<2x16x128xf32>
    %667 = arith.truncf %666 : vector<2x16x128xf32> to vector<2x16x128xbf16>
    %668 = vector.shape_cast %667 : vector<2x16x128xbf16> to vector<32x128xbf16>
    %cst_290 = arith.constant dense<0.000000e+00> : vector<32x128xf32>
    %669 = tpu.matmul %668, %599, %cst_290 {dimension_numbers = #tpu.dot_dimension_numbers<[1], [0], [0], [1], [0, 0, 1, 1], [], []>} : vector<32x128xbf16>, vector<128x128xbf16>, vector<32x128xf32> -> vector<32x128xf32>
    %670 = vector.broadcast %601 : vector<1x128xf32> to vector<32x128xf32>
    %671 = arith.addf %669, %670 : vector<32x128xf32>
    %672 = vector.shape_cast %671 : vector<32x128xf32> to vector<2x16x128xf32>
    %673 = vector.shape_cast %672 : vector<2x16x128xf32> to vector<32x128xf32>
    %c2_291 = arith.constant 2 : index
    %c0_292 = arith.constant 0 : index
    %c0_293 = arith.constant 0 : index
    %674 = vector.load %arg17[%c2_291, %c0_292, %c0_293] : memref<3x128x256xbf16, #tpu.memory_space<vmem>>, vector<1x128x256xbf16>
    %675 = vector.shape_cast %674 : vector<1x128x256xbf16> to vector<128x256xbf16>
    %c2_294 = arith.constant 2 : index
    %c0_295 = arith.constant 0 : index
    %c0_296 = arith.constant 0 : index
    %676 = vector.load %arg18[%c2_294, %c0_295, %c0_296] : memref<3x1x256xf32, #tpu.memory_space<vmem>>, vector<1x1x256xf32>
    %677 = vector.shape_cast %676 : vector<1x1x256xf32> to vector<1x256xf32>
    %678 = arith.truncf %673 : vector<32x128xf32> to vector<32x128xbf16>
    %cst_297 = arith.constant dense<0.000000e+00> : vector<32x256xf32>
    %679 = tpu.matmul %678, %675, %cst_297 {dimension_numbers = #tpu.dot_dimension_numbers<[1], [0], [0], [1], [0, 0, 1, 1], [], []>} : vector<32x128xbf16>, vector<128x256xbf16>, vector<32x256xf32> -> vector<32x256xf32>
    %680 = vector.broadcast %677 : vector<1x256xf32> to vector<32x256xf32>
    %681 = arith.addf %679, %680 : vector<32x256xf32>
    %682 = arith.truncf %681 : vector<32x256xf32> to vector<32x256xbf16>
    %683 = vector.shape_cast %682 : vector<32x256xbf16> to vector<2x16x256xbf16>
    %684 = vector.extract_strided_slice %683 {offsets = [0, 0, 0], sizes = [2, 16, 128], strides = [1, 1, 1]} : vector<2x16x256xbf16> to vector<2x16x128xbf16>
    %685 = vector.extract_strided_slice %683 {offsets = [0, 0, 128], sizes = [2, 16, 128], strides = [1, 1, 1]} : vector<2x16x256xbf16> to vector<2x16x128xbf16>
    %c2_298 = arith.constant 2 : index
    %c0_299 = arith.constant 0 : index
    %c0_300 = arith.constant 0 : index
    %686 = vector.load %arg15[%c2_298, %c0_299, %c0_300] : memref<3x128x128xbf16, #tpu.memory_space<vmem>>, vector<1x128x128xbf16>
    %687 = vector.shape_cast %686 : vector<1x128x128xbf16> to vector<128x128xbf16>
    %c2_301 = arith.constant 2 : index
    %c0_302 = arith.constant 0 : index
    %c0_303 = arith.constant 0 : index
    %688 = vector.load %arg16[%c2_301, %c0_302, %c0_303] : memref<3x1x128xf32, #tpu.memory_space<vmem>>, vector<1x1x128xf32>
    %689 = vector.shape_cast %688 : vector<1x1x128xf32> to vector<1x128xf32>
    %cst_304 = arith.constant dense<0.000000e+00> : vector<32x128xf32>
    %690 = tpu.matmul %585, %687, %cst_304 {dimension_numbers = #tpu.dot_dimension_numbers<[1], [0], [0], [1], [0, 0, 1, 1], [], []>} : vector<32x128xbf16>, vector<128x128xbf16>, vector<32x128xf32> -> vector<32x128xf32>
    %691 = vector.broadcast %689 : vector<1x128xf32> to vector<32x128xf32>
    %692 = arith.addf %690, %691 : vector<32x128xf32>
    %693 = arith.truncf %692 : vector<32x128xf32> to vector<32x128xbf16>
    %694 = vector.shape_cast %693 : vector<32x128xbf16> to vector<2x16x128xbf16>
    %c2_305 = arith.constant 2 : index
    %c0_306 = arith.constant 0 : index
    %c0_307 = arith.constant 0 : index
    %695 = vector.load %arg19[%c2_305, %c0_306, %c0_307] : memref<3x128x128xbf16, #tpu.memory_space<vmem>>, vector<1x128x128xbf16>
    %696 = vector.shape_cast %695 : vector<1x128x128xbf16> to vector<128x128xbf16>
    %c2_308 = arith.constant 2 : index
    %c0_309 = arith.constant 0 : index
    %c0_310 = arith.constant 0 : index
    %697 = vector.load %arg20[%c2_308, %c0_309, %c0_310] : memref<3x1x128xf32, #tpu.memory_space<vmem>>, vector<1x1x128xf32>
    %698 = vector.shape_cast %697 : vector<1x1x128xf32> to vector<1x128xf32>
    %699 = vector.extract_strided_slice %694 {offsets = [0, 0, 0], sizes = [2, 16, 32], strides = [1, 1, 1]} : vector<2x16x128xbf16> to vector<2x16x32xbf16>
    %700 = vector.extract_strided_slice %684 {offsets = [0, 0, 0], sizes = [2, 16, 32], strides = [1, 1, 1]} : vector<2x16x128xbf16> to vector<2x16x32xbf16>
    "tpu.trace_start"() <{level = 10 : i32, message = "bqd,bkd->bqk"}> : () -> ()
    %cst_311 = arith.constant dense<0.000000e+00> : vector<2x16x16xf32>
    %701 = tpu.matmul %699, %700, %cst_311 {dimension_numbers = #tpu.dot_dimension_numbers<[2], [2], [1], [1], [0, 0, 0, 1, 1, 1], [0], [0]>} : vector<2x16x32xbf16>, vector<2x16x32xbf16>, vector<2x16x16xf32> -> vector<2x16x16xf32>
    "tpu.trace_stop"() : () -> ()
    %cst_312 = arith.constant dense<0xFF800000> : vector<2x16xf32>
    %702 = vector.multi_reduction <maximumf>, %701, %cst_312 [2] : vector<2x16x16xf32> to vector<2x16xf32>
    %703 = vector.shape_cast %702 : vector<2x16xf32> to vector<2x16x1xf32>
    %704 = vector.broadcast %703 : vector<2x16x1xf32> to vector<2x16x16xf32>
    %705 = arith.subf %701, %704 : vector<2x16x16xf32>
    %706 = math.exp %705 : vector<2x16x16xf32>
    %cst_313 = arith.constant dense<0.000000e+00> : vector<2x16xf32>
    %707 = vector.multi_reduction <add>, %706, %cst_313 [2] : vector<2x16x16xf32> to vector<2x16xf32>
    %708 = vector.shape_cast %707 : vector<2x16xf32> to vector<2x16x1xf32>
    %709 = tpu.reciprocal %708 : vector<2x16x1xf32> -> vector<2x16x1xf32>
    %710 = vector.broadcast %709 : vector<2x16x1xf32> to vector<2x16x16xf32>
    %711 = arith.mulf %706, %710 : vector<2x16x16xf32>
    %712 = arith.truncf %711 : vector<2x16x16xf32> to vector<2x16x16xbf16>
    %713 = vector.extract_strided_slice %685 {offsets = [0, 0, 0], sizes = [2, 16, 32], strides = [1, 1, 1]} : vector<2x16x128xbf16> to vector<2x16x32xbf16>
    "tpu.trace_start"() <{level = 10 : i32, message = "bqk,bkd->bqd"}> : () -> ()
    %cst_314 = arith.constant dense<0.000000e+00> : vector<2x16x32xf32>
    %714 = tpu.matmul %712, %713, %cst_314 {dimension_numbers = #tpu.dot_dimension_numbers<[2], [1], [1], [2], [0, 0, 0, 1, 1, 2], [0], [0]>} : vector<2x16x16xbf16>, vector<2x16x32xbf16>, vector<2x16x32xf32> -> vector<2x16x32xf32>
    "tpu.trace_stop"() : () -> ()
    %715 = vector.extract_strided_slice %694 {offsets = [0, 0, 32], sizes = [2, 16, 32], strides = [1, 1, 1]} : vector<2x16x128xbf16> to vector<2x16x32xbf16>
    %716 = vector.extract_strided_slice %684 {offsets = [0, 0, 32], sizes = [2, 16, 32], strides = [1, 1, 1]} : vector<2x16x128xbf16> to vector<2x16x32xbf16>
    "tpu.trace_start"() <{level = 10 : i32, message = "bqd,bkd->bqk"}> : () -> ()
    %cst_315 = arith.constant dense<0.000000e+00> : vector<2x16x16xf32>
    %717 = tpu.matmul %715, %716, %cst_315 {dimension_numbers = #tpu.dot_dimension_numbers<[2], [2], [1], [1], [0, 0, 0, 1, 1, 1], [0], [0]>} : vector<2x16x32xbf16>, vector<2x16x32xbf16>, vector<2x16x16xf32> -> vector<2x16x16xf32>
    "tpu.trace_stop"() : () -> ()
    %cst_316 = arith.constant dense<0xFF800000> : vector<2x16xf32>
    %718 = vector.multi_reduction <maximumf>, %717, %cst_316 [2] : vector<2x16x16xf32> to vector<2x16xf32>
    %719 = vector.shape_cast %718 : vector<2x16xf32> to vector<2x16x1xf32>
    %720 = vector.broadcast %719 : vector<2x16x1xf32> to vector<2x16x16xf32>
    %721 = arith.subf %717, %720 : vector<2x16x16xf32>
    %722 = math.exp %721 : vector<2x16x16xf32>
    %cst_317 = arith.constant dense<0.000000e+00> : vector<2x16xf32>
    %723 = vector.multi_reduction <add>, %722, %cst_317 [2] : vector<2x16x16xf32> to vector<2x16xf32>
    %724 = vector.shape_cast %723 : vector<2x16xf32> to vector<2x16x1xf32>
    %725 = tpu.reciprocal %724 : vector<2x16x1xf32> -> vector<2x16x1xf32>
    %726 = vector.broadcast %725 : vector<2x16x1xf32> to vector<2x16x16xf32>
    %727 = arith.mulf %722, %726 : vector<2x16x16xf32>
    %728 = arith.truncf %727 : vector<2x16x16xf32> to vector<2x16x16xbf16>
    %729 = vector.extract_strided_slice %685 {offsets = [0, 0, 32], sizes = [2, 16, 32], strides = [1, 1, 1]} : vector<2x16x128xbf16> to vector<2x16x32xbf16>
    "tpu.trace_start"() <{level = 10 : i32, message = "bqk,bkd->bqd"}> : () -> ()
    %cst_318 = arith.constant dense<0.000000e+00> : vector<2x16x32xf32>
    %730 = tpu.matmul %728, %729, %cst_318 {dimension_numbers = #tpu.dot_dimension_numbers<[2], [1], [1], [2], [0, 0, 0, 1, 1, 2], [0], [0]>} : vector<2x16x16xbf16>, vector<2x16x32xbf16>, vector<2x16x32xf32> -> vector<2x16x32xf32>
    "tpu.trace_stop"() : () -> ()
    %731 = vector.extract_strided_slice %694 {offsets = [0, 0, 64], sizes = [2, 16, 32], strides = [1, 1, 1]} : vector<2x16x128xbf16> to vector<2x16x32xbf16>
    %732 = vector.extract_strided_slice %684 {offsets = [0, 0, 64], sizes = [2, 16, 32], strides = [1, 1, 1]} : vector<2x16x128xbf16> to vector<2x16x32xbf16>
    "tpu.trace_start"() <{level = 10 : i32, message = "bqd,bkd->bqk"}> : () -> ()
    %cst_319 = arith.constant dense<0.000000e+00> : vector<2x16x16xf32>
    %733 = tpu.matmul %731, %732, %cst_319 {dimension_numbers = #tpu.dot_dimension_numbers<[2], [2], [1], [1], [0, 0, 0, 1, 1, 1], [0], [0]>} : vector<2x16x32xbf16>, vector<2x16x32xbf16>, vector<2x16x16xf32> -> vector<2x16x16xf32>
    "tpu.trace_stop"() : () -> ()
    %cst_320 = arith.constant dense<0xFF800000> : vector<2x16xf32>
    %734 = vector.multi_reduction <maximumf>, %733, %cst_320 [2] : vector<2x16x16xf32> to vector<2x16xf32>
    %735 = vector.shape_cast %734 : vector<2x16xf32> to vector<2x16x1xf32>
    %736 = vector.broadcast %735 : vector<2x16x1xf32> to vector<2x16x16xf32>
    %737 = arith.subf %733, %736 : vector<2x16x16xf32>
    %738 = math.exp %737 : vector<2x16x16xf32>
    %cst_321 = arith.constant dense<0.000000e+00> : vector<2x16xf32>
    %739 = vector.multi_reduction <add>, %738, %cst_321 [2] : vector<2x16x16xf32> to vector<2x16xf32>
    %740 = vector.shape_cast %739 : vector<2x16xf32> to vector<2x16x1xf32>
    %741 = tpu.reciprocal %740 : vector<2x16x1xf32> -> vector<2x16x1xf32>
    %742 = vector.broadcast %741 : vector<2x16x1xf32> to vector<2x16x16xf32>
    %743 = arith.mulf %738, %742 : vector<2x16x16xf32>
    %744 = arith.truncf %743 : vector<2x16x16xf32> to vector<2x16x16xbf16>
    %745 = vector.extract_strided_slice %685 {offsets = [0, 0, 64], sizes = [2, 16, 32], strides = [1, 1, 1]} : vector<2x16x128xbf16> to vector<2x16x32xbf16>
    "tpu.trace_start"() <{level = 10 : i32, message = "bqk,bkd->bqd"}> : () -> ()
    %cst_322 = arith.constant dense<0.000000e+00> : vector<2x16x32xf32>
    %746 = tpu.matmul %744, %745, %cst_322 {dimension_numbers = #tpu.dot_dimension_numbers<[2], [1], [1], [2], [0, 0, 0, 1, 1, 2], [0], [0]>} : vector<2x16x16xbf16>, vector<2x16x32xbf16>, vector<2x16x32xf32> -> vector<2x16x32xf32>
    "tpu.trace_stop"() : () -> ()
    %747 = vector.extract_strided_slice %694 {offsets = [0, 0, 96], sizes = [2, 16, 32], strides = [1, 1, 1]} : vector<2x16x128xbf16> to vector<2x16x32xbf16>
    %748 = vector.extract_strided_slice %684 {offsets = [0, 0, 96], sizes = [2, 16, 32], strides = [1, 1, 1]} : vector<2x16x128xbf16> to vector<2x16x32xbf16>
    "tpu.trace_start"() <{level = 10 : i32, message = "bqd,bkd->bqk"}> : () -> ()
    %cst_323 = arith.constant dense<0.000000e+00> : vector<2x16x16xf32>
    %749 = tpu.matmul %747, %748, %cst_323 {dimension_numbers = #tpu.dot_dimension_numbers<[2], [2], [1], [1], [0, 0, 0, 1, 1, 1], [0], [0]>} : vector<2x16x32xbf16>, vector<2x16x32xbf16>, vector<2x16x16xf32> -> vector<2x16x16xf32>
    "tpu.trace_stop"() : () -> ()
    %cst_324 = arith.constant dense<0xFF800000> : vector<2x16xf32>
    %750 = vector.multi_reduction <maximumf>, %749, %cst_324 [2] : vector<2x16x16xf32> to vector<2x16xf32>
    %751 = vector.shape_cast %750 : vector<2x16xf32> to vector<2x16x1xf32>
    %752 = vector.broadcast %751 : vector<2x16x1xf32> to vector<2x16x16xf32>
    %753 = arith.subf %749, %752 : vector<2x16x16xf32>
    %754 = math.exp %753 : vector<2x16x16xf32>
    %cst_325 = arith.constant dense<0.000000e+00> : vector<2x16xf32>
    %755 = vector.multi_reduction <add>, %754, %cst_325 [2] : vector<2x16x16xf32> to vector<2x16xf32>
    %756 = vector.shape_cast %755 : vector<2x16xf32> to vector<2x16x1xf32>
    %757 = tpu.reciprocal %756 : vector<2x16x1xf32> -> vector<2x16x1xf32>
    %758 = vector.broadcast %757 : vector<2x16x1xf32> to vector<2x16x16xf32>
    %759 = arith.mulf %754, %758 : vector<2x16x16xf32>
    %760 = arith.truncf %759 : vector<2x16x16xf32> to vector<2x16x16xbf16>
    %761 = vector.extract_strided_slice %685 {offsets = [0, 0, 96], sizes = [2, 16, 32], strides = [1, 1, 1]} : vector<2x16x128xbf16> to vector<2x16x32xbf16>
    "tpu.trace_start"() <{level = 10 : i32, message = "bqk,bkd->bqd"}> : () -> ()
    %cst_326 = arith.constant dense<0.000000e+00> : vector<2x16x32xf32>
    %762 = tpu.matmul %760, %761, %cst_326 {dimension_numbers = #tpu.dot_dimension_numbers<[2], [1], [1], [2], [0, 0, 0, 1, 1, 2], [0], [0]>} : vector<2x16x16xbf16>, vector<2x16x32xbf16>, vector<2x16x32xf32> -> vector<2x16x32xf32>
    "tpu.trace_stop"() : () -> ()
    %763 = tpu.concatenate %714, %730, %746, %762 in 2 : vector<2x16x32xf32>, vector<2x16x32xf32>, vector<2x16x32xf32>, vector<2x16x32xf32> -> vector<2x16x128xf32>
    %764 = arith.truncf %763 : vector<2x16x128xf32> to vector<2x16x128xbf16>
    %765 = vector.shape_cast %764 : vector<2x16x128xbf16> to vector<32x128xbf16>
    %cst_327 = arith.constant dense<0.000000e+00> : vector<32x128xf32>
    %766 = tpu.matmul %765, %696, %cst_327 {dimension_numbers = #tpu.dot_dimension_numbers<[1], [0], [0], [1], [0, 0, 1, 1], [], []>} : vector<32x128xbf16>, vector<128x128xbf16>, vector<32x128xf32> -> vector<32x128xf32>
    %767 = vector.broadcast %698 : vector<1x128xf32> to vector<32x128xf32>
    %768 = arith.addf %766, %767 : vector<32x128xf32>
    %769 = vector.shape_cast %768 : vector<32x128xf32> to vector<2x16x128xf32>
    %770 = vector.extract_strided_slice %769 {offsets = [0, 0, 0], sizes = [2, 8, 128], strides = [1, 1, 1]} : vector<2x16x128xf32> to vector<2x8x128xf32>
    %cst_328 = arith.constant dense<0.000000e+00> : vector<2x128xf32>
    %771 = vector.multi_reduction <add>, %770, %cst_328 [1] : vector<2x8x128xf32> to vector<2x128xf32>
    %cst_329 = arith.constant 8.000000e+00 : f32
    %772 = vector.broadcast %cst_329 : f32 to vector<2x128xf32>
    %773 = arith.divf %771, %772 : vector<2x128xf32>
    %774 = vector.extract_strided_slice %769 {offsets = [0, 8, 0], sizes = [2, 8, 128], strides = [1, 1, 1]} : vector<2x16x128xf32> to vector<2x8x128xf32>
    %cst_330 = arith.constant dense<0.000000e+00> : vector<2x128xf32>
    %775 = vector.multi_reduction <add>, %774, %cst_330 [1] : vector<2x8x128xf32> to vector<2x128xf32>
    %cst_331 = arith.constant 8.000000e+00 : f32
    %776 = vector.broadcast %cst_331 : f32 to vector<2x128xf32>
    %777 = arith.divf %775, %776 : vector<2x128xf32>
    %c2_332 = arith.constant 2 : index
    %c0_333 = arith.constant 0 : index
    %c0_334 = arith.constant 0 : index
    %778 = vector.load %arg21[%c2_332, %c0_333, %c0_334] : memref<3x128x128xbf16, #tpu.memory_space<vmem>>, vector<1x128x128xbf16>
    %779 = vector.shape_cast %778 : vector<1x128x128xbf16> to vector<128x128xbf16>
    %c2_335 = arith.constant 2 : index
    %c0_336 = arith.constant 0 : index
    %c0_337 = arith.constant 0 : index
    %780 = vector.load %arg22[%c2_335, %c0_336, %c0_337] : memref<3x1x128xf32, #tpu.memory_space<vmem>>, vector<1x1x128xf32>
    %781 = vector.shape_cast %780 : vector<1x1x128xf32> to vector<1x128xf32>
    %782 = arith.truncf %773 : vector<2x128xf32> to vector<2x128xbf16>
    %cst_338 = arith.constant dense<0.000000e+00> : vector<2x128xf32>
    %783 = tpu.matmul %782, %779, %cst_338 {dimension_numbers = #tpu.dot_dimension_numbers<[1], [0], [0], [1], [0, 0, 1, 1], [], []>} : vector<2x128xbf16>, vector<128x128xbf16>, vector<2x128xf32> -> vector<2x128xf32>
    %784 = vector.broadcast %781 : vector<1x128xf32> to vector<2x128xf32>
    %785 = arith.addf %783, %784 : vector<2x128xf32>
    %cst_339 = arith.constant 0.000000e+00 : f32
    %786 = vector.broadcast %cst_339 : f32 to vector<2x128xf32>
    %787 = arith.maximumf %785, %786 : vector<2x128xf32>
    %c2_340 = arith.constant 2 : index
    %c0_341 = arith.constant 0 : index
    %c0_342 = arith.constant 0 : index
    %c0_343 = arith.constant 0 : index
    %788 = vector.load %arg25[%c2_340, %c0_341, %c0_342, %c0_343] : memref<3x2x1x128xf32, #tpu.memory_space<vmem>>, vector<1x1x1x128xf32>
    %789 = vector.shape_cast %788 : vector<1x1x1x128xf32> to vector<1x128xf32>
    %c2_344 = arith.constant 2 : index
    %c1_345 = arith.constant 1 : index
    %c0_346 = arith.constant 0 : index
    %c0_347 = arith.constant 0 : index
    %790 = vector.load %arg25[%c2_344, %c1_345, %c0_346, %c0_347] : memref<3x2x1x128xf32, #tpu.memory_space<vmem>>, vector<1x1x1x128xf32>
    %791 = vector.shape_cast %790 : vector<1x1x1x128xf32> to vector<1x128xf32>
    %cst_348 = arith.constant dense<0.000000e+00> : vector<2xf32>
    %792 = vector.multi_reduction <add>, %787, %cst_348 [1] : vector<2x128xf32> to vector<2xf32>
    %793 = vector.shape_cast %792 : vector<2xf32> to vector<2x1xf32>
    %cst_349 = arith.constant 1.280000e+02 : f32
    %794 = vector.broadcast %cst_349 : f32 to vector<2x1xf32>
    %795 = arith.divf %793, %794 : vector<2x1xf32>
    %796 = vector.broadcast %795 : vector<2x1xf32> to vector<2x128xf32>
    %797 = arith.subf %787, %796 : vector<2x128xf32>
    %798 = arith.mulf %797, %797 : vector<2x128xf32>
    %cst_350 = arith.constant dense<0.000000e+00> : vector<2xf32>
    %799 = vector.multi_reduction <add>, %798, %cst_350 [1] : vector<2x128xf32> to vector<2xf32>
    %800 = vector.shape_cast %799 : vector<2xf32> to vector<2x1xf32>
    %cst_351 = arith.constant 1.280000e+02 : f32
    %801 = vector.broadcast %cst_351 : f32 to vector<2x1xf32>
    %802 = arith.divf %800, %801 : vector<2x1xf32>
    %803 = vector.broadcast %795 : vector<2x1xf32> to vector<2x128xf32>
    %804 = arith.subf %787, %803 : vector<2x128xf32>
    %cst_352 = arith.constant 9.99999974E-6 : f32
    %805 = vector.broadcast %cst_352 : f32 to vector<2x1xf32>
    %806 = arith.addf %802, %805 : vector<2x1xf32>
    %807 = math.rsqrt %806 : vector<2x1xf32>
    %808 = vector.broadcast %807 : vector<2x1xf32> to vector<2x128xf32>
    %809 = arith.mulf %804, %808 : vector<2x128xf32>
    %810 = vector.broadcast %789 : vector<1x128xf32> to vector<2x128xf32>
    %811 = arith.mulf %809, %810 : vector<2x128xf32>
    %812 = vector.broadcast %791 : vector<1x128xf32> to vector<2x128xf32>
    %813 = arith.addf %811, %812 : vector<2x128xf32>
    %c2_353 = arith.constant 2 : index
    %c0_354 = arith.constant 0 : index
    %c0_355 = arith.constant 0 : index
    %814 = vector.load %arg23[%c2_353, %c0_354, %c0_355] : memref<3x128x128xbf16, #tpu.memory_space<vmem>>, vector<1x128x128xbf16>
    %815 = vector.shape_cast %814 : vector<1x128x128xbf16> to vector<128x128xbf16>
    %c2_356 = arith.constant 2 : index
    %c0_357 = arith.constant 0 : index
    %c0_358 = arith.constant 0 : index
    %816 = vector.load %arg24[%c2_356, %c0_357, %c0_358] : memref<3x1x128xf32, #tpu.memory_space<vmem>>, vector<1x1x128xf32>
    %817 = vector.shape_cast %816 : vector<1x1x128xf32> to vector<1x128xf32>
    %818 = arith.truncf %777 : vector<2x128xf32> to vector<2x128xbf16>
    %cst_359 = arith.constant dense<0.000000e+00> : vector<2x128xf32>
    %819 = tpu.matmul %818, %815, %cst_359 {dimension_numbers = #tpu.dot_dimension_numbers<[1], [0], [0], [1], [0, 0, 1, 1], [], []>} : vector<2x128xbf16>, vector<128x128xbf16>, vector<2x128xf32> -> vector<2x128xf32>
    %820 = vector.broadcast %817 : vector<1x128xf32> to vector<2x128xf32>
    %821 = arith.addf %819, %820 : vector<2x128xf32>
    %cst_360 = arith.constant 0.000000e+00 : f32
    %822 = vector.broadcast %cst_360 : f32 to vector<2x128xf32>
    %823 = arith.maximumf %821, %822 : vector<2x128xf32>
    %c2_361 = arith.constant 2 : index
    %c0_362 = arith.constant 0 : index
    %c0_363 = arith.constant 0 : index
    %c0_364 = arith.constant 0 : index
    %824 = vector.load %arg26[%c2_361, %c0_362, %c0_363, %c0_364] : memref<3x2x1x128xf32, #tpu.memory_space<vmem>>, vector<1x1x1x128xf32>
    %825 = vector.shape_cast %824 : vector<1x1x1x128xf32> to vector<1x128xf32>
    %c2_365 = arith.constant 2 : index
    %c1_366 = arith.constant 1 : index
    %c0_367 = arith.constant 0 : index
    %c0_368 = arith.constant 0 : index
    %826 = vector.load %arg26[%c2_365, %c1_366, %c0_367, %c0_368] : memref<3x2x1x128xf32, #tpu.memory_space<vmem>>, vector<1x1x1x128xf32>
    %827 = vector.shape_cast %826 : vector<1x1x1x128xf32> to vector<1x128xf32>
    %cst_369 = arith.constant dense<0.000000e+00> : vector<2xf32>
    %828 = vector.multi_reduction <add>, %823, %cst_369 [1] : vector<2x128xf32> to vector<2xf32>
    %829 = vector.shape_cast %828 : vector<2xf32> to vector<2x1xf32>
    %cst_370 = arith.constant 1.280000e+02 : f32
    %830 = vector.broadcast %cst_370 : f32 to vector<2x1xf32>
    %831 = arith.divf %829, %830 : vector<2x1xf32>
    %832 = vector.broadcast %831 : vector<2x1xf32> to vector<2x128xf32>
    %833 = arith.subf %823, %832 : vector<2x128xf32>
    %834 = arith.mulf %833, %833 : vector<2x128xf32>
    %cst_371 = arith.constant dense<0.000000e+00> : vector<2xf32>
    %835 = vector.multi_reduction <add>, %834, %cst_371 [1] : vector<2x128xf32> to vector<2xf32>
    %836 = vector.shape_cast %835 : vector<2xf32> to vector<2x1xf32>
    %cst_372 = arith.constant 1.280000e+02 : f32
    %837 = vector.broadcast %cst_372 : f32 to vector<2x1xf32>
    %838 = arith.divf %836, %837 : vector<2x1xf32>
    %839 = vector.broadcast %831 : vector<2x1xf32> to vector<2x128xf32>
    %840 = arith.subf %823, %839 : vector<2x128xf32>
    %cst_373 = arith.constant 9.99999974E-6 : f32
    %841 = vector.broadcast %cst_373 : f32 to vector<2x1xf32>
    %842 = arith.addf %838, %841 : vector<2x1xf32>
    %843 = math.rsqrt %842 : vector<2x1xf32>
    %844 = vector.broadcast %843 : vector<2x1xf32> to vector<2x128xf32>
    %845 = arith.mulf %840, %844 : vector<2x128xf32>
    %846 = vector.broadcast %825 : vector<1x128xf32> to vector<2x128xf32>
    %847 = arith.mulf %845, %846 : vector<2x128xf32>
    %848 = vector.broadcast %827 : vector<1x128xf32> to vector<2x128xf32>
    %849 = arith.addf %847, %848 : vector<2x128xf32>
    %850 = tpu.concatenate %253, %533, %813 in 1 : vector<2x128xf32>, vector<2x128xf32>, vector<2x128xf32> -> vector<2x384xf32>
    %c0_374 = arith.constant 0 : index
    %c0_375 = arith.constant 0 : index
    %851 = vector.load %arg27[%c0_374, %c0_375] : memref<384x128xbf16, #tpu.memory_space<vmem>>, vector<384x128xbf16>
    %c0_376 = arith.constant 0 : index
    %c0_377 = arith.constant 0 : index
    %852 = vector.load %arg28[%c0_376, %c0_377] : memref<1x128xf32, #tpu.memory_space<vmem>>, vector<1x128xf32>
    %853 = arith.truncf %850 : vector<2x384xf32> to vector<2x384xbf16>
    %cst_378 = arith.constant dense<0.000000e+00> : vector<2x128xf32>
    %854 = tpu.matmul %853, %851, %cst_378 {dimension_numbers = #tpu.dot_dimension_numbers<[1], [0], [0], [1], [0, 0, 1, 1], [], []>} : vector<2x384xbf16>, vector<384x128xbf16>, vector<2x128xf32> -> vector<2x128xf32>
    %855 = vector.broadcast %852 : vector<1x128xf32> to vector<2x128xf32>
    %856 = arith.addf %854, %855 : vector<2x128xf32>
    %c0_379 = arith.constant 0 : index
    %c0_380 = arith.constant 0 : index
    %857 = vector.load %arg29[%c0_379, %c0_380] : memref<128x128xbf16, #tpu.memory_space<vmem>>, vector<128x128xbf16>
    %c0_381 = arith.constant 0 : index
    %c0_382 = arith.constant 0 : index
    %858 = vector.load %arg30[%c0_381, %c0_382] : memref<1x128xf32, #tpu.memory_space<vmem>>, vector<1x128xf32>
    %859 = arith.truncf %856 : vector<2x128xf32> to vector<2x128xbf16>
    %cst_383 = arith.constant dense<0.000000e+00> : vector<2x128xf32>
    %860 = tpu.matmul %859, %857, %cst_383 {dimension_numbers = #tpu.dot_dimension_numbers<[1], [0], [0], [1], [0, 0, 1, 1], [], []>} : vector<2x128xbf16>, vector<128x128xbf16>, vector<2x128xf32> -> vector<2x128xf32>
    %861 = vector.broadcast %858 : vector<1x128xf32> to vector<2x128xf32>
    %862 = arith.addf %860, %861 : vector<2x128xf32>
    %cst_384 = arith.constant 0.000000e+00 : f32
    %863 = vector.broadcast %cst_384 : f32 to vector<2x128xf32>
    %864 = arith.maximumf %862, %863 : vector<2x128xf32>
    %c0_385 = arith.constant 0 : index
    %c0_386 = arith.constant 0 : index
    %865 = vector.load %arg31[%c0_385, %c0_386] : memref<128x128xbf16, #tpu.memory_space<vmem>>, vector<128x128xbf16>
    %c0_387 = arith.constant 0 : index
    %c0_388 = arith.constant 0 : index
    %866 = vector.load %arg32[%c0_387, %c0_388] : memref<1x128xf32, #tpu.memory_space<vmem>>, vector<1x128xf32>
    %867 = arith.truncf %864 : vector<2x128xf32> to vector<2x128xbf16>
    %cst_389 = arith.constant dense<0.000000e+00> : vector<2x128xf32>
    %868 = tpu.matmul %867, %865, %cst_389 {dimension_numbers = #tpu.dot_dimension_numbers<[1], [0], [0], [1], [0, 0, 1, 1], [], []>} : vector<2x128xbf16>, vector<128x128xbf16>, vector<2x128xf32> -> vector<2x128xf32>
    %869 = vector.broadcast %866 : vector<1x128xf32> to vector<2x128xf32>
    %870 = arith.addf %868, %869 : vector<2x128xf32>
    %871 = arith.addf %253, %533 : vector<2x128xf32>
    %872 = arith.addf %871, %813 : vector<2x128xf32>
    %cst_390 = arith.constant 0.333333343 : f32
    %873 = vector.broadcast %cst_390 : f32 to vector<2x128xf32>
    %874 = arith.mulf %872, %873 : vector<2x128xf32>
    %875 = arith.addf %289, %569 : vector<2x128xf32>
    %876 = arith.addf %875, %849 : vector<2x128xf32>
    %877 = arith.addf %876, %874 : vector<2x128xf32>
    %c0_391 = arith.constant 0 : index
    %c0_392 = arith.constant 0 : index
    %878 = vector.load %arg33[%c0_391, %c0_392] : memref<128x128xbf16, #tpu.memory_space<vmem>>, vector<128x128xbf16>
    %c0_393 = arith.constant 0 : index
    %c0_394 = arith.constant 0 : index
    %879 = vector.load %arg34[%c0_393, %c0_394] : memref<1x128xf32, #tpu.memory_space<vmem>>, vector<1x128xf32>
    %880 = arith.truncf %877 : vector<2x128xf32> to vector<2x128xbf16>
    %cst_395 = arith.constant dense<0.000000e+00> : vector<2x128xf32>
    %881 = tpu.matmul %880, %878, %cst_395 {dimension_numbers = #tpu.dot_dimension_numbers<[1], [0], [0], [1], [0, 0, 1, 1], [], []>} : vector<2x128xbf16>, vector<128x128xbf16>, vector<2x128xf32> -> vector<2x128xf32>
    %882 = vector.broadcast %879 : vector<1x128xf32> to vector<2x128xf32>
    %883 = arith.addf %881, %882 : vector<2x128xf32>
    %cst_396 = arith.constant 0.000000e+00 : f32
    %884 = vector.broadcast %cst_396 : f32 to vector<2x128xf32>
    %885 = arith.maximumf %883, %884 : vector<2x128xf32>
    %c0_397 = arith.constant 0 : index
    %c0_398 = arith.constant 0 : index
    %886 = vector.load %arg35[%c0_397, %c0_398] : memref<128x128xbf16, #tpu.memory_space<vmem>>, vector<128x128xbf16>
    %c0_399 = arith.constant 0 : index
    %c0_400 = arith.constant 0 : index
    %887 = vector.load %arg36[%c0_399, %c0_400] : memref<1x128xf32, #tpu.memory_space<vmem>>, vector<1x128xf32>
    %888 = arith.truncf %885 : vector<2x128xf32> to vector<2x128xbf16>
    %cst_401 = arith.constant dense<0.000000e+00> : vector<2x128xf32>
    %889 = tpu.matmul %888, %886, %cst_401 {dimension_numbers = #tpu.dot_dimension_numbers<[1], [0], [0], [1], [0, 0, 1, 1], [], []>} : vector<2x128xbf16>, vector<128x128xbf16>, vector<2x128xf32> -> vector<2x128xf32>
    %890 = vector.broadcast %887 : vector<1x128xf32> to vector<2x128xf32>
    %891 = arith.addf %889, %890 : vector<2x128xf32>
    %c0_402 = arith.constant 0 : index
    %c0_403 = arith.constant 0 : index
    %c0_404 = arith.constant 0 : index
    %892 = vector.load %arg37[%c0_402, %c0_403, %c0_404] : memref<2x2x128xf32, #tpu.memory_space<vmem>>, vector<1x2x128xf32>
    %893 = vector.shape_cast %892 : vector<1x2x128xf32> to vector<2x128xf32>
    %894 = vector.shape_cast %891 : vector<2x128xf32> to vector<1x2x128xf32>
    tpu.vector_store %arg37[%c0_402, %c0_403, %c0_404], %894 {strides = array<i32>} : memref<2x2x128xf32, #tpu.memory_space<vmem>>, vector<1x2x128xf32>,
    %c1_405 = arith.constant 1 : index
    %c0_406 = arith.constant 0 : index
    %c0_407 = arith.constant 0 : index
    %895 = vector.load %arg37[%c1_405, %c0_406, %c0_407] : memref<2x2x128xf32, #tpu.memory_space<vmem>>, vector<1x2x128xf32>
    %896 = vector.shape_cast %895 : vector<1x2x128xf32> to vector<2x128xf32>
    %897 = vector.shape_cast %870 : vector<2x128xf32> to vector<1x2x128xf32>
    tpu.vector_store %arg37[%c1_405, %c0_406, %c0_407], %897 {strides = array<i32>} : memref<2x2x128xf32, #tpu.memory_space<vmem>>, vector<1x2x128xf32>,
    return
  }
  func.func @transform_0(%arg0: i32) -> (i32, i32, i32) {
    %c0_i32 = arith.constant 0 : i32
    %c0_i32_0 = arith.constant 0 : i32
    %c0_i32_1 = arith.constant 0 : i32
    %c0_i32_2 = arith.constant 0 : i32
    return %c0_i32, %c0_i32_0, %c0_i32_1 : i32, i32, i32
  }
  func.func @transform_1(%arg0: i32) -> (i32, i32, i32) {
    %c0_i32 = arith.constant 0 : i32
    %c0_i32_0 = arith.constant 0 : i32
    %c0_i32_1 = arith.constant 0 : i32
    %c0_i32_2 = arith.constant 0 : i32
    return %c0_i32, %c0_i32_0, %c0_i32_1 : i32, i32, i32
  }
  func.func @transform_2(%arg0: i32) -> (i32, i32, i32) {
    %c0_i32 = arith.constant 0 : i32
    %c0_i32_0 = arith.constant 0 : i32
    %c0_i32_1 = arith.constant 0 : i32
    %c0_i32_2 = arith.constant 0 : i32
    return %c0_i32, %c0_i32_0, %c0_i32_1 : i32, i32, i32
  }
  func.func @transform_3(%arg0: i32) -> (i32, i32, i32) {
    %c0_i32 = arith.constant 0 : i32
    %c0_i32_0 = arith.constant 0 : i32
    %c0_i32_1 = arith.constant 0 : i32
    %c0_i32_2 = arith.constant 0 : i32
    return %c0_i32, %c0_i32_0, %c0_i32_1 : i32, i32, i32
  }
  func.func @transform_4(%arg0: i32) -> (i32, i32) {
    %c0_i32 = arith.constant 0 : i32
    %c0_i32_0 = arith.constant 0 : i32
    %c0_i32_1 = arith.constant 0 : i32
    return %c0_i32, %c0_i32_0 : i32, i32
  }
  func.func @transform_5(%arg0: i32) -> (i32, i32) {
    %c0_i32 = arith.constant 0 : i32
    %c0_i32_0 = arith.constant 0 : i32
    %c0_i32_1 = arith.constant 0 : i32
    return %c0_i32, %c0_i32_0 : i32, i32
  }
  func.func @transform_6(%arg0: i32) -> (i32, i32) {
    %c0_i32 = arith.constant 0 : i32
    %c0_i32_0 = arith.constant 0 : i32
    %c0_i32_1 = arith.constant 0 : i32
    return %c0_i32, %c0_i32_0 : i32, i32
  }
  func.func @transform_7(%arg0: i32) -> (i32, i32) {
    %c0_i32 = arith.constant 0 : i32
    %c0_i32_0 = arith.constant 0 : i32
    %c0_i32_1 = arith.constant 0 : i32
    return %c0_i32, %c0_i32_0 : i32, i32
  }
  func.func @transform_8(%arg0: i32) -> (i32, i32) {
    %c0_i32 = arith.constant 0 : i32
    %c0_i32_0 = arith.constant 0 : i32
    %c0_i32_1 = arith.constant 0 : i32
    return %c0_i32, %c0_i32_0 : i32, i32
  }
  func.func @transform_9(%arg0: i32) -> (i32, i32, i32) {
    %c0_i32 = arith.constant 0 : i32
    %c0_i32_0 = arith.constant 0 : i32
    %c0_i32_1 = arith.constant 0 : i32
    %c0_i32_2 = arith.constant 0 : i32
    return %c0_i32, %c0_i32_0, %c0_i32_1 : i32, i32, i32
  }
  func.func @transform_10(%arg0: i32) -> (i32, i32, i32) {
    %c0_i32 = arith.constant 0 : i32
    %c0_i32_0 = arith.constant 0 : i32
    %c0_i32_1 = arith.constant 0 : i32
    %c0_i32_2 = arith.constant 0 : i32
    return %c0_i32, %c0_i32_0, %c0_i32_1 : i32, i32, i32
  }
  func.func @transform_11(%arg0: i32) -> (i32, i32, i32) {
    %c0_i32 = arith.constant 0 : i32
    %c0_i32_0 = arith.constant 0 : i32
    %c0_i32_1 = arith.constant 0 : i32
    %c0_i32_2 = arith.constant 0 : i32
    return %c0_i32, %c0_i32_0, %c0_i32_1 : i32, i32, i32
  }
  func.func @transform_12(%arg0: i32) -> (i32, i32, i32) {
    %c0_i32 = arith.constant 0 : i32
    %c0_i32_0 = arith.constant 0 : i32
    %c0_i32_1 = arith.constant 0 : i32
    %c0_i32_2 = arith.constant 0 : i32
    return %c0_i32, %c0_i32_0, %c0_i32_1 : i32, i32, i32
  }
  func.func @transform_13(%arg0: i32) -> (i32, i32, i32) {
    %c0_i32 = arith.constant 0 : i32
    %c0_i32_0 = arith.constant 0 : i32
    %c0_i32_1 = arith.constant 0 : i32
    %c0_i32_2 = arith.constant 0 : i32
    return %c0_i32, %c0_i32_0, %c0_i32_1 : i32, i32, i32
  }
  func.func @transform_14(%arg0: i32) -> (i32, i32, i32) {
    %c0_i32 = arith.constant 0 : i32
    %c0_i32_0 = arith.constant 0 : i32
    %c0_i32_1 = arith.constant 0 : i32
    %c0_i32_2 = arith.constant 0 : i32
    return %c0_i32, %c0_i32_0, %c0_i32_1 : i32, i32, i32
  }
  func.func @transform_15(%arg0: i32) -> (i32, i32, i32) {
    %c0_i32 = arith.constant 0 : i32
    %c0_i32_0 = arith.constant 0 : i32
    %c0_i32_1 = arith.constant 0 : i32
    %c0_i32_2 = arith.constant 0 : i32
    return %c0_i32, %c0_i32_0, %c0_i32_1 : i32, i32, i32
  }
  func.func @transform_16(%arg0: i32) -> (i32, i32, i32) {
    %c0_i32 = arith.constant 0 : i32
    %c0_i32_0 = arith.constant 0 : i32
    %c0_i32_1 = arith.constant 0 : i32
    %c0_i32_2 = arith.constant 0 : i32
    return %c0_i32, %c0_i32_0, %c0_i32_1 : i32, i32, i32
  }
  func.func @transform_17(%arg0: i32) -> (i32, i32, i32) {
    %c0_i32 = arith.constant 0 : i32
    %c0_i32_0 = arith.constant 0 : i32
    %c0_i32_1 = arith.constant 0 : i32
    %c0_i32_2 = arith.constant 0 : i32
    return %c0_i32, %c0_i32_0, %c0_i32_1 : i32, i32, i32
  }
  func.func @transform_18(%arg0: i32) -> (i32, i32, i32) {
    %c0_i32 = arith.constant 0 : i32
    %c0_i32_0 = arith.constant 0 : i32
    %c0_i32_1 = arith.constant 0 : i32
    %c0_i32_2 = arith.constant 0 : i32
    return %c0_i32, %c0_i32_0, %c0_i32_1 : i32, i32, i32
  }
  func.func @transform_19(%arg0: i32) -> (i32, i32, i32) {
    %c0_i32 = arith.constant 0 : i32
    %c0_i32_0 = arith.constant 0 : i32
    %c0_i32_1 = arith.constant 0 : i32
    %c0_i32_2 = arith.constant 0 : i32
    return %c0_i32, %c0_i32_0, %c0_i32_1 : i32, i32, i32
  }
  func.func @transform_20(%arg0: i32) -> (i32, i32, i32) {
    %c0_i32 = arith.constant 0 : i32
    %c0_i32_0 = arith.constant 0 : i32
    %c0_i32_1 = arith.constant 0 : i32
    %c0_i32_2 = arith.constant 0 : i32
    return %c0_i32, %c0_i32_0, %c0_i32_1 : i32, i32, i32
  }
  func.func @transform_21(%arg0: i32) -> (i32, i32, i32) {
    %c0_i32 = arith.constant 0 : i32
    %c0_i32_0 = arith.constant 0 : i32
    %c0_i32_1 = arith.constant 0 : i32
    %c0_i32_2 = arith.constant 0 : i32
    return %c0_i32, %c0_i32_0, %c0_i32_1 : i32, i32, i32
  }
  func.func @transform_22(%arg0: i32) -> (i32, i32, i32) {
    %c0_i32 = arith.constant 0 : i32
    %c0_i32_0 = arith.constant 0 : i32
    %c0_i32_1 = arith.constant 0 : i32
    %c0_i32_2 = arith.constant 0 : i32
    return %c0_i32, %c0_i32_0, %c0_i32_1 : i32, i32, i32
  }
  func.func @transform_23(%arg0: i32) -> (i32, i32, i32) {
    %c0_i32 = arith.constant 0 : i32
    %c0_i32_0 = arith.constant 0 : i32
    %c0_i32_1 = arith.constant 0 : i32
    %c0_i32_2 = arith.constant 0 : i32
    return %c0_i32, %c0_i32_0, %c0_i32_1 : i32, i32, i32
  }
  func.func @transform_24(%arg0: i32) -> (i32, i32, i32, i32) {
    %c0_i32 = arith.constant 0 : i32
    %c0_i32_0 = arith.constant 0 : i32
    %c0_i32_1 = arith.constant 0 : i32
    %c0_i32_2 = arith.constant 0 : i32
    %c0_i32_3 = arith.constant 0 : i32
    return %c0_i32, %c0_i32_0, %c0_i32_1, %c0_i32_2 : i32, i32, i32, i32
  }
  func.func @transform_25(%arg0: i32) -> (i32, i32, i32, i32) {
    %c0_i32 = arith.constant 0 : i32
    %c0_i32_0 = arith.constant 0 : i32
    %c0_i32_1 = arith.constant 0 : i32
    %c0_i32_2 = arith.constant 0 : i32
    %c0_i32_3 = arith.constant 0 : i32
    return %c0_i32, %c0_i32_0, %c0_i32_1, %c0_i32_2 : i32, i32, i32, i32
  }
  func.func @transform_26(%arg0: i32) -> (i32, i32) {
    %c0_i32 = arith.constant 0 : i32
    %c0_i32_0 = arith.constant 0 : i32
    %c0_i32_1 = arith.constant 0 : i32
    return %c0_i32, %c0_i32_0 : i32, i32
  }
  func.func @transform_27(%arg0: i32) -> (i32, i32) {
    %c0_i32 = arith.constant 0 : i32
    %c0_i32_0 = arith.constant 0 : i32
    %c0_i32_1 = arith.constant 0 : i32
    return %c0_i32, %c0_i32_0 : i32, i32
  }
  func.func @transform_28(%arg0: i32) -> (i32, i32) {
    %c0_i32 = arith.constant 0 : i32
    %c0_i32_0 = arith.constant 0 : i32
    %c0_i32_1 = arith.constant 0 : i32
    return %c0_i32, %c0_i32_0 : i32, i32
  }
  func.func @transform_29(%arg0: i32) -> (i32, i32) {
    %c0_i32 = arith.constant 0 : i32
    %c0_i32_0 = arith.constant 0 : i32
    %c0_i32_1 = arith.constant 0 : i32
    return %c0_i32, %c0_i32_0 : i32, i32
  }
  func.func @transform_30(%arg0: i32) -> (i32, i32) {
    %c0_i32 = arith.constant 0 : i32
    %c0_i32_0 = arith.constant 0 : i32
    %c0_i32_1 = arith.constant 0 : i32
    return %c0_i32, %c0_i32_0 : i32, i32
  }
  func.func @transform_31(%arg0: i32) -> (i32, i32) {
    %c0_i32 = arith.constant 0 : i32
    %c0_i32_0 = arith.constant 0 : i32
    %c0_i32_1 = arith.constant 0 : i32
    return %c0_i32, %c0_i32_0 : i32, i32
  }
  func.func @transform_32(%arg0: i32) -> (i32, i32) {
    %c0_i32 = arith.constant 0 : i32
    %c0_i32_0 = arith.constant 0 : i32
    %c0_i32_1 = arith.constant 0 : i32
    return %c0_i32, %c0_i32_0 : i32, i32
  }
  func.func @transform_33(%arg0: i32) -> (i32, i32) {
    %c0_i32 = arith.constant 0 : i32
    %c0_i32_0 = arith.constant 0 : i32
    %c0_i32_1 = arith.constant 0 : i32
    return %c0_i32, %c0_i32_0 : i32, i32
  }
  func.func @transform_34(%arg0: i32) -> (i32, i32) {
    %c0_i32 = arith.constant 0 : i32
    %c0_i32_0 = arith.constant 0 : i32
    %c0_i32_1 = arith.constant 0 : i32
    return %c0_i32, %c0_i32_0 : i32, i32
  }
  func.func @transform_35(%arg0: i32) -> (i32, i32) {
    %c0_i32 = arith.constant 0 : i32
    %c0_i32_0 = arith.constant 0 : i32
    %c0_i32_1 = arith.constant 0 : i32
    return %c0_i32, %c0_i32_0 : i32, i32
  }
  func.func @transform_36(%arg0: i32) -> (i32, i32, i32) {
    %c0_i32 = arith.constant 0 : i32
    %c0_i32_0 = arith.constant 0 : i32
    %c0_i32_1 = arith.constant 0 : i32
    %c0_i32_2 = arith.constant 0 : i32
    return %c0_i32, %c0_i32_0, %c0_i32_1 : i32, i32, i32
  }
}

</mosaic_0001>

<bundles_post_ra>
// kernel: eam_model_forward.1
= control target key start
LH: loop header
LB: loop body
LE: loop exit
PB: predicated region body
PF: predicated region fallthrough
CT: control target
= control target key end

     0   :  { %s17136_s6 = smov 1   ;;  %s17137_s10 = smov 2   ;;  %s19127_s0 = inlined_call_operand.smem [shape: u32[37], index: -1, kind: input, shape index: {}] }
   0x1   :  { %s17217_s5 = sld [smem:[%s19127_s0]]   ;;  %s17138_s14 = smov 3  }
   0x2   :  { %s17222_s9 = sld [smem:[%s19127_s0 + %s17136_s6]]   ;;  %s17139_s18 = smov 4  }
   0x3   :  { %s17227_s13 = sld [smem:[%s19127_s0 + %s17137_s10]]   ;;  %s17140_s22 = smov 5  }
   0x4   :  { %s17232_s17 = sld [smem:[%s19127_s0 + %s17138_s14]]   ;;  %s17141_s26 = smov 6  }
   0x5   :  { %s17237_s21 = sld [smem:[%s19127_s0 + %s17139_s18]]   ;;  %s17142_s30 = smov 7  }
   0x6   :  { %s17242_s25 = sld [smem:[%s19127_s0 + %s17140_s22]]   ;;  %s17143_s4 = smov 8  }
   0x7   :  { %19138 = sst [smem:[#allocation48_spill]] %s17217_s5  ;;  %s17144_s10 = smov 9  }
   0x8   :  { %19139 = sst [smem:[#allocation49_spill]] %s17222_s9  ;;  %s17145_s15 = smov 10  }
   0x9   :  { %19140 = sst [smem:[#allocation50_spill]] %s17227_s13  ;;  %s17146_s20 = smov 11  }
   0xa   :  { %19141 = sst [smem:[#allocation51_spill]] %s17232_s17  ;;  %s17148_s1 = smov 13  }
   0xb   :  { %s17247_s29 = sld [smem:[%s19127_s0 + %s17141_s26]]   ;;  %s17147_s26 = smov 12  }
   0xc   :  { %19142 = sst [smem:[#allocation52_spill]] %s17242_s25  ;;  %s17149_s7 = smov 14  }
   0xd   :  { %s17252_s3 = sld [smem:[%s19127_s0 + %s17142_s30]]   ;;  %s17151_s22 = smov 16  }
   0xe   :  { %s17257_s8 = sld [smem:[%s19127_s0 + %s17143_s4]]   ;;  %s17152_s28 = smov 17  }
   0xf   :  { %s17262_s14 = sld [smem:[%s19127_s0 + %s17144_s10]]  }
  0x10   :  { %s17267_s19 = sld [smem:[%s19127_s0 + %s17145_s15]]   ;;  %s17150_s15 = smov 15  }
  0x11   :  { %s17272_s24 = sld [smem:[%s19127_s0 + %s17146_s20]]  }
  0x12   :  { %s17277_s30 = sld [smem:[%s19127_s0 + %s17147_s26]]  }
  0x13   :  { %s17282_s6 = sld [smem:[%s19127_s0 + %s17148_s1]]  }
  0x14   :  { %19143 = sst [smem:[#allocation53_spill]] %s17257_s8 }
  0x15   :  { %19144 = sst [smem:[#allocation54_spill]] %s17262_s14 }
  0x16   :  { %s17287_s12 = sld [smem:[%s19127_s0 + %s17149_s7]]   ;;  %s17153_s7 = smov 18  }
  0x17   :  { %s17292_s20 = sld [smem:[%s19127_s0 + %s17150_s15]]   ;;  %s17154_s15 = smov 19  }
  0x18   :  { %s17297_s27 = sld [smem:[%s19127_s0 + %s17151_s22]]   ;;  %s17155_s22 = smov 20  }
  0x19   :  { %s17302_s4 = sld [smem:[%s19127_s0 + %s17152_s28]]   ;;  %s17156_s28 = smov 21  }
  0x1a   :  { %s17307_s17 = sld [smem:[%s19127_s0 + %s17153_s7]]   ;;  %s17157_s7 = smov 22  }
  0x1b   :  { %s17312_s8 = sld [smem:[%s19127_s0 + %s17154_s15]]   ;;  %s17158_s15 = smov 23  }
  0x1c   :  { %s17317_s13 = sld [smem:[%s19127_s0 + %s17155_s22]]   ;;  %s17159_s22 = smov 24  }
  0x1d   :  { %19145 = sst [smem:[#allocation55_spill]] %s17292_s20 }
  0x1e   :  { %s17327_s14 = sld [smem:[%s19127_s0 + %s17157_s7]]   ;;  %s17161_s7 = smov 26  }
  0x1f   :  { %19146 = sst [smem:[#allocation56_spill]] %s17302_s4 }
  0x20   :  { %19147 = sst [smem:[#allocation57_spill]] %s17307_s17 }
  0x21   :  { %s17322_s4 = sld [smem:[%s19127_s0 + %s17156_s28]]   ;;  %s17160_s28 = smov 25  }
  0x22   :  { %19148 = sst [smem:[#allocation58_spill]] %s17317_s13 }
  0x23   :  { %s17332_s25 = sld [smem:[%s19127_s0 + %s17158_s15]]   ;;  %s17162_s15 = smov 27  }
  0x24   :  { %s17337_s9 = sld [smem:[%s19127_s0 + %s17159_s22]]   ;;  %s17163_s22 = smov 28  }
  0x25   :  { %s17347_s5 = sld [smem:[%s19127_s0 + %s17161_s7]]   ;;  %s17165_s7 = smov 30  }
  0x26   :  { %s17367_s13 = sld [smem:[%s19127_s0 + %s17165_s7]]   ;;  %s17169_s7 = smov 34  }
  0x27   :  { %19149 = sst [smem:[#allocation59_spill]] %s17322_s4 }
  0x28   :  { %s17342_s4 = sld [smem:[%s19127_s0 + %s17160_s28]]   ;;  %s17164_s28 = smov 29  }
  0x29   :  { %19150 = sst [smem:[#allocation60_spill]] %s17332_s25 }
  0x2a   :  { %19151 = sst [smem:[#allocation61_spill]] %s17337_s9 }
  0x2b   :  { %s17352_s25 = sld [smem:[%s19127_s0 + %s17162_s15]]   ;;  %s17166_s15 = smov 31  }
  0x2c   :  { %s17357_s9 = sld [smem:[%s19127_s0 + %s17163_s22]]   ;;  %s17167_s22 = smov 32  }
  0x2d   :  { %19155 = sst [smem:[#allocation65_spill]] %s17367_s13 }
  0x2e   :  { %19152 = sst [smem:[#allocation62_spill]] %s17342_s4 }
  0x2f   :  { %s17362_s4 = sld [smem:[%s19127_s0 + %s17164_s28]]   ;;  %s17168_s28 = smov 33  }
  0x30   :  { %s17382_s17 = sld [smem:[%s19127_s0 + %s17168_s28]]  }
  0x31   :  { %19153 = sst [smem:[#allocation63_spill]] %s17352_s25 }
  0x32   :  { %19154 = sst [smem:[#allocation64_spill]] %s17357_s9 }
  0x33   :  { %s17372_s25 = sld [smem:[%s19127_s0 + %s17166_s15]]   ;;  %s17170_s15 = smov 35  }
  0x34   :  { %s17377_s9 = sld [smem:[%s19127_s0 + %s17167_s22]]   ;;  %s17171_s22 = smov 36  }
  0x35   :  { %s17387_s13 = sld [smem:[%s19127_s0 + %s17169_s7]]  }
  0x36   :  { %s17392_s20 = sld [smem:[%s19127_s0 + %s17170_s15]]  }
  0x3a   :  { %19156 = sst [smem:[#allocation66_spill]] %s17377_s9 }
  0x3b   :  { %s17397_s9 = sld [smem:[%s19127_s0 + %s17171_s22]]  }
  0x3c   :  { %78 = vsyncpa [#allocation3], 0 }
  0x3d   :  { %79 = vsyncpa [#allocation5], 0 }
  0x3e   :  { %80 = vsyncpa [#allocation8], 0 }
  0x3f   :  { %81 = vsyncpa [#allocation11], 0 }
  0x40   :  { %82 = vsyncpa [#allocation14], 0 }
  0x41   :  { %83 = vsyncpa [#allocation17], 0 }
  0x42   :  { %84 = vsyncpa [#allocation20], 0 }
  0x43   :  { %85 = vsyncpa [#allocation23], 0 }
  0x44   :  { %86 = vsyncpa [#allocation26], 0 }
  0x45   :  { %87 = vsyncpa [#allocation29], 0 }
  0x46   :  { %88 = vsyncpa [#allocation32], 0 }
  0x47   :  { %89 = vsyncpa [#allocation35], 0  ;;  %s17172_s28 = smov [#allocation4]  }
  0x48   :  { %s117_s1 = sshll.u32 %s17172_s28, 4  ;;  %s118_s1 = int_to_ptr.vmem [resolvable:$true] %s117_s1 }
  0x49   :  { %s16680_s2 = scalar_lea.vmem %s118_s1, 4096  ;;  %p16685_p1 = scmp.lt.s32.totalorder %s118_s1, %s118_s1 }
  0x4a   :  { %p16681_p0 = scmp.ne.s32.totalorder %s118_s1, %s16680_s2  ;;  %p16686_p2 = scmp.lt.s32.totalorder %s16680_s2, %s16680_s2 }
  0x4c   :  { %p16687_p3 = por %p16686_p2, %p16685_p1 }
  0x4e   :  { %p16688_p4 = pnand %p16687_p3, %p16681_p0 }
  0x50   :  { %16691 = shalt.err (!%p16688_p4)
}
  0x51   :  { %s17173_s0 = smov 64   ;;  %s17174_s7 = smov 4  }
  0x52   :  { %123 = dma.hbm_to_vmem [thread:$0]  %s17247_s29, 4096, %s118_s1, [#allocation5], %s17173_s0, %s17173_s0, %s17174_s7  }
  0x53   :  { %s17175_s10 = smov [#allocation7]   ;;  %s17176_s15 = smov [#allocation10]  }
  0x54   :  { %s145_s11 = sshll.u32 %s17175_s10, 4  ;;  %s169_s16 = sshll.u32 %s17176_s15, 4  ;;  %s146_s11 = int_to_ptr.vmem [resolvable:$true] %s145_s11  ;;  %s170_s16 = int_to_ptr.vmem [resolvable:$true] %s169_s16 }
  0x55   :  { %s16700_s18 = scalar_lea.vmem %s146_s11, 9216  ;;  %p16705_p6 = scmp.lt.s32.totalorder %s146_s11, %s146_s11 }
  0x56   :  { %p16701_p5 = scmp.ne.s32.totalorder %s146_s11, %s16700_s18  ;;  %p16706_p7 = scmp.lt.s32.totalorder %s16700_s18, %s16700_s18 }
  0x58   :  { %p16707_p8 = por %p16706_p7, %p16705_p6 }
  0x5a   :  { %p16708_p9 = pnand %p16707_p8, %p16701_p5 }
  0x5c   :  { %16711 = shalt.err (!%p16708_p9)
}
  0x5d   :  { %s17177_s22 = smov 192   ;;  %s17178_s23 = smov 12  }
  0x5e   :  { %151 = dma.hbm_to_vmem [thread:$0]  %s17267_s19, 9216, %s146_s11, [#allocation8], %s17177_s22, %s17177_s22, %s17178_s23  }
  0x5f   :  { %s16720_s29 = scalar_lea.vmem %s170_s16, 3072  ;;  %p16725_p11 = scmp.lt.s32.totalorder %s170_s16, %s170_s16 }
  0x60   :  { %p16721_p10 = scmp.ne.s32.totalorder %s170_s16, %s16720_s29  ;;  %p16726_p12 = scmp.lt.s32.totalorder %s16720_s29, %s16720_s29 }
  0x62   :  { %p16727_p13 = por %p16726_p12, %p16725_p11 }
  0x64   :  { %p16728_p0 = pnand %p16727_p13, %p16721_p10 }
  0x66   :  { %16731 = shalt.err (!%p16728_p0)
}
  0x67   :  { %175 = dma.hbm_to_vmem [thread:$0]  %s17277_s30, 3072, %s170_s16, [#allocation11], %s17173_s0, %s17173_s0, %s17174_s7  }
  0x68   :  { %s17179_s26 = smov [#allocation13]   ;;  %s17180_s1 = smov [#allocation16]  }
  0x69   :  { %s193_s28 = sshll.u32 %s17179_s26, 4  ;;  %s217_s2 = sshll.u32 %s17180_s1, 4  ;;  %s194_s28 = int_to_ptr.vmem [resolvable:$true] %s193_s28  ;;  %s218_s2 = int_to_ptr.vmem [resolvable:$true] %s217_s2 }
  0x6a   :  { %s16740_s10 = scalar_lea.vmem %s194_s28, 3072  ;;  %p16745_p2 = scmp.lt.s32.totalorder %s194_s28, %s194_s28 }
  0x6b   :  { %p16741_p1 = scmp.ne.s32.totalorder %s194_s28, %s16740_s10  ;;  %p16746_p3 = scmp.lt.s32.totalorder %s16740_s10, %s16740_s10 }
  0x6d   :  { %p16747_p4 = por %p16746_p3, %p16745_p2 }
  0x6f   :  { %p16748_p5 = pnand %p16747_p4, %p16741_p1 }
  0x71   :  { %16751 = shalt.err (!%p16748_p5)
}
  0x72   :  { %199 = dma.hbm_to_vmem [thread:$0]  %s17287_s12, 3072, %s194_s28, [#allocation14], %s17173_s0, %s17173_s0, %s17174_s7  }
  0x73   :  { %s16760_s19 = scalar_lea.vmem %s218_s2, 6144  ;;  %p16765_p7 = scmp.lt.s32.totalorder %s218_s2, %s218_s2 }
  0x74   :  { %p16761_p6 = scmp.ne.s32.totalorder %s218_s2, %s16760_s19  ;;  %p16766_p8 = scmp.lt.s32.totalorder %s16760_s19, %s16760_s19 }
  0x76   :  { %p16767_p9 = por %p16766_p8, %p16765_p7 }
  0x78   :  { %p16768_p10 = pnand %p16767_p9, %p16761_p6 }
  0x7a   :  { %16771 = shalt.err (!%p16768_p10)
}
  0x7b   :  { %s17181_s30 = smov 128   ;;  %s17182_s11 = smov 8  }
  0x7c   :  { %223 = dma.hbm_to_vmem [thread:$0]  %s17297_s27, 6144, %s218_s2, [#allocation17], %s17181_s30, %s17181_s30, %s17182_s11  }
  0x7d   :  { %s17183_s15 = smov [#allocation19]   ;;  %s17184_s18 = smov [#allocation22]  }
  0x7e   :  { %s243_s16 = sshll.u32 %s17183_s15, 4  ;;  %s269_s29 = sshll.u32 %s17184_s18, 4  ;;  %s244_s16 = int_to_ptr.vmem [resolvable:$true] %s243_s16  ;;  %s270_s29 = int_to_ptr.vmem [resolvable:$true] %s269_s29 }
  0x7f   :  { %s16780_s26 = scalar_lea.vmem %s244_s16, 48  ;;  %s16784_s12 = scalar_lea.vmem %s244_s16, 64 }
  0x80   :  { %p16781_p11 = scmp.ne.s32.totalorder %s244_s16, %s16780_s26  ;;  %p16785_p12 = scmp.lt.s32.totalorder %s244_s16, %s244_s16 }
  0x81   :  { %p16786_p13 = scmp.lt.s32.totalorder %s16784_s12, %s16780_s26 }
  0x83   :  { %p16787_p0 = por %p16786_p13, %p16785_p12 }
  0x85   :  { %p16788_p1 = pnand %p16787_p0, %p16781_p11 }
  0x87   :  { %16791 = shalt.err (!%p16788_p1)
}
  0x88   :  { %s17185_s28 = smov 16   ;;  %s17186_s1 = smov 1  }
  0x89   :  { %249 = dma.hbm_to_vmem [thread:$0]  %s17312_s8, 48, %s244_s16, [#allocation20], %s17185_s28, %s17185_s28, %s17186_s1  }
  0x8a   :  { %s16800_s27 = scalar_lea.vmem %s270_s29, 3072  ;;  %p16805_p3 = scmp.lt.s32.totalorder %s270_s29, %s270_s29 }
  0x8b   :  { %p16801_p2 = scmp.ne.s32.totalorder %s270_s29, %s16800_s27  ;;  %p16806_p4 = scmp.lt.s32.totalorder %s16800_s27, %s16800_s27 }
  0x8d   :  { %p16807_p5 = por %p16806_p4, %p16805_p3 }
  0x8f   :  { %p16808_p6 = pnand %p16807_p5, %p16801_p2 }
  0x91   :  { %16811 = shalt.err (!%p16808_p6)
}
  0x92   :  { %275 = dma.hbm_to_vmem [thread:$0]  %s17327_s14, 3072, %s270_s29, [#allocation23], %s17173_s0, %s17173_s0, %s17174_s7  }
  0x93   :  { %s17187_s2 = smov [#allocation25]   ;;  %s17188_s19 = smov [#allocation28]  }
  0x94   :  { %s297_s10 = sshll.u32 %s17187_s2, 4  ;;  %s324_s30 = sshll.u32 %s17188_s19, 4  ;;  %s298_s10 = int_to_ptr.vmem [resolvable:$true] %s297_s10  ;;  %s325_s30 = int_to_ptr.vmem [resolvable:$true] %s324_s30 }
  0x95   :  { %s16820_s11 = scalar_lea.vmem %s298_s10, 3072  ;;  %p16825_p8 = scmp.lt.s32.totalorder %s298_s10, %s298_s10 }
  0x96   :  { %p16821_p7 = scmp.ne.s32.totalorder %s298_s10, %s16820_s11  ;;  %p16826_p9 = scmp.lt.s32.totalorder %s16820_s11, %s16820_s11 }
  0x98   :  { %p16827_p10 = por %p16826_p9, %p16825_p8 }
  0x9a   :  { %p16828_p11 = pnand %p16827_p10, %p16821_p7 }
  0x9c   :  { %16831 = shalt.err (!%p16828_p11)
}
  0x9d   :  { %303 = dma.hbm_to_vmem [thread:$0]  %s17347_s5, 3072, %s298_s10, [#allocation26], %s17173_s0, %s17173_s0, %s17174_s7  }
  0x9e   :  { %s16840_s8 = scalar_lea.vmem %s325_s30, 16  ;;  %s16844_s14 = scalar_lea.vmem %s325_s30, 32 }
  0x9f   :  { %p16841_p12 = scmp.ne.s32.totalorder %s325_s30, %s16840_s8  ;;  %p16845_p13 = scmp.lt.s32.totalorder %s325_s30, %s325_s30 }
  0xa0   :  { %p16846_p0 = scmp.lt.s32.totalorder %s16844_s14, %s16840_s8 }
  0xa2   :  { %p16847_p1 = por %p16846_p0, %p16845_p13 }
  0xa4   :  { %p16848_p2 = pnand %p16847_p1, %p16841_p12 }
  0xa6   :  { %16851 = shalt.err (!%p16848_p2)
}
  0xa7   :  { %327 = dma.hbm_to_vmem [thread:$0]  %s17362_s4, 16, %s325_s30, [#allocation29]  }
  0xa8   :  { %s17189_s15 = smov [#allocation31]   ;;  %s17190_s18 = smov [#allocation2]  }
  0xa9   :  { %s346_s16 = sshll.u32 %s17189_s15, 4  ;;  %s103_s29 = sshll.u32 %s17190_s18, 4  ;;  %s347_s16 = int_to_ptr.vmem [resolvable:$true] %s346_s16  ;;  %s104_s29 = int_to_ptr.vmem [resolvable:$true] %s103_s29 }
  0xaa   :  { %s16860_s26 = scalar_lea.vmem %s347_s16, 16  ;;  %s16864_s12 = scalar_lea.vmem %s347_s16, 32 }
  0xab   :  { %p16861_p3 = scmp.ne.s32.totalorder %s347_s16, %s16860_s26  ;;  %p16865_p4 = scmp.lt.s32.totalorder %s347_s16, %s347_s16 }
  0xac   :  { %p16866_p5 = scmp.lt.s32.totalorder %s16864_s12, %s16860_s26 }
  0xae   :  { %p16867_p6 = por %p16866_p5, %p16865_p4 }
  0xb0   :  { %p16868_p7 = pnand %p16867_p6, %p16861_p3 }
  0xb2   :  { %16871 = shalt.err (!%p16868_p7)
}
  0xb3   :  { %349 = dma.hbm_to_vmem [thread:$0]  %s17372_s25, 16, %s347_s16, [#allocation32]  }
  0xb4   :  { %s16880_s5 = scalar_lea.vmem %s104_s29, 12288  ;;  %p16885_p9 = scmp.lt.s32.totalorder %s104_s29, %s104_s29 }
  0xb5   :  { %p16881_p8 = scmp.ne.s32.totalorder %s104_s29, %s16880_s5  ;;  %p16886_p10 = scmp.lt.s32.totalorder %s16880_s5, %s16880_s5 }
  0xb7   :  { %p16887_p11 = por %p16886_p10, %p16885_p9 }
  0xb9   :  { %p16888_p12 = pnand %p16887_p11, %p16881_p8 }
  0xbb   :  { %16891 = shalt.err (!%p16888_p12)
}
  0xbc   :  { %109 = dma.hbm_to_vmem [thread:$0]  %s17237_s21, 12288, %s104_s29, [#allocation3], %s17177_s22, %s17177_s22, %s17178_s23  }
  0xbd   :  { %s17191_s4 = smov [#allocation6]   ;;  %s17192_s2 = smov [#allocation9]  }
  0xbe   :  { %s129_s27 = sshll.u32 %s17191_s4, 4  ;;  %s157_s10 = sshll.u32 %s17192_s2, 4  ;;  %s130_s27 = int_to_ptr.vmem [resolvable:$true] %s129_s27  ;;  %s158_s10 = int_to_ptr.vmem [resolvable:$true] %s157_s10 }
  0xbf   :  { %s16900_s19 = scalar_lea.vmem %s130_s27, 4096  ;;  %p16905_p0 = scmp.lt.s32.totalorder %s130_s27, %s130_s27 }
  0xc0   :  { %p16901_p13 = scmp.ne.s32.totalorder %s130_s27, %s16900_s19  ;;  %p16906_p1 = scmp.lt.s32.totalorder %s16900_s19, %s16900_s19 }
  0xc2   :  { %p16907_p2 = por %p16906_p1, %p16905_p0 }
  0xc4   :  { %p16908_p3 = pnand %p16907_p2, %p16901_p13 }
  0xc6   :  { %16911 = shalt.err (!%p16908_p3)
}
  0xc7   :  { %135 = dma.hbm_to_vmem [thread:$0]  %s17252_s3, 4096, %s130_s27, [#allocation5], %s17173_s0, %s17173_s0, %s17174_s7  }
  0xc8   :  { %s16920_s25 = scalar_lea.vmem %s158_s10, 144  ;;  %s16924_s21 = scalar_lea.vmem %s158_s10, 160 }
  0xc9   :  { %p16921_p4 = scmp.ne.s32.totalorder %s158_s10, %s16920_s25  ;;  %p16925_p5 = scmp.lt.s32.totalorder %s158_s10, %s158_s10 }
  0xca   :  { %p16926_p6 = scmp.lt.s32.totalorder %s16924_s21, %s16920_s25 }
  0xcc   :  { %p16927_p7 = por %p16926_p6, %p16925_p5 }
  0xce   :  { %p16928_p8 = pnand %p16927_p7, %p16921_p4 }
  0xd0   :  { %16931 = shalt.err (!%p16928_p8)
}
  0xd1   :  { %s17193_s22 = smov 48   ;;  %s17194_s23 = smov 3  }
  0xd2   :  { %163 = dma.hbm_to_vmem [thread:$0]  %s17272_s24, 144, %s158_s10, [#allocation8], %s17193_s22, %s17193_s22, %s17194_s23  }
  0xd3   :  { %s17195_s30 = smov [#allocation12]   ;;  %s17196_s8 = smov [#allocation15]  }
  0xd4   :  { %s181_s11 = sshll.u32 %s17195_s30, 4  ;;  %s205_s14 = sshll.u32 %s17196_s8, 4  ;;  %s182_s11 = int_to_ptr.vmem [resolvable:$true] %s181_s11  ;;  %s206_s14 = int_to_ptr.vmem [resolvable:$true] %s205_s14 }
  0xd5   :  { %s16940_s15 = scalar_lea.vmem %s182_s11, 48  ;;  %s16944_s3 = scalar_lea.vmem %s182_s11, 64 }
  0xd6   :  { %p16941_p9 = scmp.ne.s32.totalorder %s182_s11, %s16940_s15  ;;  %p16945_p10 = scmp.lt.s32.totalorder %s182_s11, %s182_s11 }
  0xd7   :  { %p16946_p11 = scmp.lt.s32.totalorder %s16944_s3, %s16940_s15 }
  0xd9   :  { %p16947_p12 = por %p16946_p11, %p16945_p10 }
  0xdb   :  { %p16948_p13 = pnand %p16947_p12, %p16941_p9 }
  0xdd   :  { %16951 = shalt.err (!%p16948_p13)
}
  0xde   :  { %187 = dma.hbm_to_vmem [thread:$0]  %s17282_s6, 48, %s182_s11, [#allocation11], %s17185_s28, %s17185_s28, %s17186_s1  }
  0xdf   :  { %s16960_s24 = scalar_lea.vmem %s206_s14, 48  ;;  %s16964_s16 = scalar_lea.vmem %s206_s14, 64 }
  0xe0   :  { %p16961_p0 = scmp.ne.s32.totalorder %s206_s14, %s16960_s24  ;;  %p16965_p1 = scmp.lt.s32.totalorder %s206_s14, %s206_s14 }
  0xe1   :  { %p16966_p2 = scmp.lt.s32.totalorder %s16964_s16, %s16960_s24 }
  0xe3   :  { %p16967_p3 = por %p16966_p2, %p16965_p1 }
  0xe5   :  { %p16968_p4 = pnand %p16967_p3, %p16961_p0 }
  0xe7   :  { %16971 = shalt.err (!%p16968_p4)
}
  0xe8   :  { %s19157_s18 = sld [smem:[#allocation55_spill]]  ;;  %s17197_s29 = smov [#allocation18]  }
  0xe9   :  { %s231_s26 = sshll.u32 %s17197_s29, 4  ;;  %s17198_s12 = smov [#allocation21]   ;;  %s232_s26 = int_to_ptr.vmem [resolvable:$true] %s231_s26 }
  0xea   :  { %s255_s5 = sshll.u32 %s17198_s12, 4  ;;  %s16980_s6 = scalar_lea.vmem %s232_s26, 3072  ;;  %s256_s5 = int_to_ptr.vmem [resolvable:$true] %s255_s5 }
  0xeb   :  { %p16981_p5 = scmp.ne.s32.totalorder %s232_s26, %s16980_s6  ;;  %p16985_p6 = scmp.lt.s32.totalorder %s232_s26, %s232_s26 }
  0xec   :  { %p16986_p7 = scmp.lt.s32.totalorder %s16980_s6, %s16980_s6 }
  0xee   :  { %211 = dma.hbm_to_vmem [thread:$0]  %s19157_s18, 48, %s206_s14, [#allocation14], %s17185_s28, %s17185_s28, %s17186_s1  }
  0xef   :  { %p16987_p8 = por %p16986_p7, %p16985_p6 }
  0xf1   :  { %p16988_p9 = pnand %p16987_p8, %p16981_p5 }
  0xf3   :  { %16991 = shalt.err (!%p16988_p9)
}
  0xf4   :  { %s19158_s4 = sld [smem:[#allocation57_spill]]  ;;  %s17000_s27 = scalar_lea.vmem %s256_s5, 3072 }
  0xf5   :  { %p17001_p10 = scmp.ne.s32.totalorder %s256_s5, %s17000_s27  ;;  %p17005_p11 = scmp.lt.s32.totalorder %s256_s5, %s256_s5 }
  0xf6   :  { %p17006_p12 = scmp.lt.s32.totalorder %s17000_s27, %s17000_s27 }
  0xf8   :  { %p17007_p13 = por %p17006_p12, %p17005_p11 }
  0xfa   :  { %237 = dma.hbm_to_vmem [thread:$0]  %s19158_s4, 3072, %s232_s26, [#allocation17], %s17173_s0, %s17173_s0, %s17174_s7  }
  0xfb   :  { %p17008_p0 = pnand %p17007_p13, %p17001_p10 }
  0xfd   :  { %17011 = shalt.err (!%p17008_p0)
}
  0xfe   :  { %s19159_s2 = sld [smem:[#allocation58_spill]]  ;;  %s17199_s10 = smov [#allocation24]  }
  0xff   :  { %s285_s19 = sshll.u32 %s17199_s10, 4  ;;  %s17200_s25 = smov [#allocation27]   ;;  %s286_s19 = int_to_ptr.vmem [resolvable:$true] %s285_s19 }
 0x100   :  { %s311_s21 = sshll.u32 %s17200_s25, 4  ;;  %s17020_s22 = scalar_lea.vmem %s286_s19, 96  ;;  %s312_s21 = int_to_ptr.vmem [resolvable:$true] %s311_s21 }
 0x101   :  { %p17021_p1 = scmp.ne.s32.totalorder %s286_s19, %s17020_s22  ;;  %p17025_p2 = scmp.lt.s32.totalorder %s286_s19, %s286_s19 }
 0x102   :  { %p17026_p3 = scmp.lt.s32.totalorder %s17020_s22, %s17020_s22 }
 0x104   :  { %261 = dma.hbm_to_vmem [thread:$0]  %s19159_s2, 3072, %s256_s5, [#allocation20], %s17173_s0, %s17173_s0, %s17174_s7  }
 0x105   :  { %p17027_p4 = por %p17026_p3, %p17025_p2 }
 0x107   :  { %p17028_p5 = pnand %p17027_p4, %p17021_p1 }
 0x109   :  { %17031 = shalt.err (!%p17028_p5)
}
 0x10a   :  { %s19160_s23 = sld [smem:[#allocation62_spill]]  ;;  %s17040_s30 = scalar_lea.vmem %s312_s21, 1024 }
 0x10b   :  { %p17041_p6 = scmp.ne.s32.totalorder %s312_s21, %s17040_s30  ;;  %p17045_p7 = scmp.lt.s32.totalorder %s312_s21, %s312_s21 }
 0x10c   :  { %p17046_p8 = scmp.lt.s32.totalorder %s17040_s30, %s17040_s30 }
 0x10e   :  { %p17047_p9 = por %p17046_p8, %p17045_p7 }
 0x110   :  { %291 = dma.hbm_to_vmem [thread:$0]  %s19160_s23, 96, %s286_s19, [#allocation23], %s17185_s28, %s17185_s28, %s17186_s1  }
 0x111   :  { %p17048_p10 = pnand %p17047_p9, %p17041_p6 }
 0x113   :  { %17051 = shalt.err (!%p17048_p10)
}
 0x114   :  { %s19161_s11 = sld [smem:[#allocation64_spill]]  ;;  %s17201_s8 = smov [#allocation30]  }
 0x115   :  { %s333_s14 = sshll.u32 %s17201_s8, 4  ;;  %s17202_s15 = smov [#allocation33]   ;;  %s334_s14 = int_to_ptr.vmem [resolvable:$true] %s333_s14 }
 0x116   :  { %s355_s3 = sshll.u32 %s17202_s15, 4  ;;  %s17060_s24 = scalar_lea.vmem %s334_s14, 1024  ;;  %s356_s3 = int_to_ptr.vmem [resolvable:$true] %s355_s3 }
 0x117   :  { %p17061_p11 = scmp.ne.s32.totalorder %s334_s14, %s17060_s24  ;;  %p17065_p12 = scmp.lt.s32.totalorder %s334_s14, %s334_s14 }
 0x118   :  { %p17066_p13 = scmp.lt.s32.totalorder %s17060_s24, %s17060_s24 }
 0x11a   :  { %317 = dma.hbm_to_vmem [thread:$0]  %s19161_s11, 1024, %s312_s21, [#allocation26], %s17173_s0, %s17173_s0, %s17174_s7  }
 0x11b   :  { %p17067_p0 = por %p17066_p13, %p17065_p12 }
 0x11d   :  { %p17068_p1 = pnand %p17067_p0, %p17061_p11 }
 0x11f   :  { %17071 = shalt.err (!%p17068_p1)
}
 0x120   :  { %s19162_s28 = sld [smem:[#allocation65_spill]]  ;;  %s17080_s1 = scalar_lea.vmem %s356_s3, 1024 }
 0x121   :  { %p17081_p2 = scmp.ne.s32.totalorder %s356_s3, %s17080_s1  ;;  %p17085_p3 = scmp.lt.s32.totalorder %s356_s3, %s356_s3 }
 0x122   :  { %p17086_p4 = scmp.lt.s32.totalorder %s17080_s1, %s17080_s1 }
 0x124   :  { %p17087_p5 = por %p17086_p4, %p17085_p3 }
 0x126   :  { %339 = dma.hbm_to_vmem [thread:$0]  %s19162_s28, 1024, %s334_s14, [#allocation29], %s17173_s0, %s17173_s0, %s17174_s7  }
 0x127   :  { %p17088_p6 = pnand %p17087_p5, %p17081_p2 }
 0x129   :  { %17091 = shalt.err (!%p17088_p6)
}
 0x12a   :  { %s19163_s16 = sld [smem:[#allocation66_spill]]  ;;  %s17203_s18 = smov [#allocation34]  }
 0x12b   :  { %s369_s29 = sshll.u32 %s17203_s18, 4  ;;  %s370_s29 = int_to_ptr.vmem [resolvable:$true] %s369_s29 }
 0x12c   :  { %s17100_s26 = scalar_lea.vmem %s370_s29, 1024  ;;  %p17105_p8 = scmp.lt.s32.totalorder %s370_s29, %s370_s29 }
 0x12d   :  { %p17101_p7 = scmp.ne.s32.totalorder %s370_s29, %s17100_s26  ;;  %p17106_p9 = scmp.lt.s32.totalorder %s17100_s26, %s17100_s26 }
 0x12f   :  { %p17107_p10 = por %p17106_p9, %p17105_p8 }
 0x130   :  { %361 = dma.hbm_to_vmem [thread:$0]  %s19163_s16, 1024, %s356_s3, [#allocation32], %s17173_s0, %s17173_s0, %s17174_s7  }
 0x131   :  { %p17108_p11 = pnand %p17107_p10, %p17101_p7 }
 0x133   :  { %17111 = shalt.err (!%p17108_p11)
}
 0x134   :  { %375 = dma.hbm_to_vmem [thread:$0]  %s17387_s13, 1024, %s370_s29, [#allocation35], %s17173_s0, %s17173_s0, %s17174_s7  }
 0x135   :  { %17112 = dma.done.wait [#allocation3], 12288  }
 0x136   :  { %17113 = vsyncadd [#allocation3], 4294955008 }
 0x137   :  { %17114 = dma.done.wait [#allocation5], 8192  }
 0x138   :  { %17115 = vsyncadd [#allocation5], 4294959104 }
 0x139   :  { %17116 = dma.done.wait [#allocation8], 9360  }
 0x13a   :  { %17117 = vsyncadd [#allocation8], 4294957936 }
 0x13b   :  { %17118 = dma.done.wait [#allocation11], 3120  }
 0x13c   :  { %17119 = vsyncadd [#allocation11], 4294964176 }
 0x13d   :  { %17120 = dma.done.wait [#allocation14], 3120  }
 0x13e   :  { %17121 = vsyncadd [#allocation14], 4294964176 }
 0x13f   :  { %17122 = dma.done.wait [#allocation17], 9216  }
 0x140   :  { %17123 = vsyncadd [#allocation17], 4294958080 }
 0x141   :  { %17124 = dma.done.wait [#allocation20], 3120  }
 0x142   :  { %17125 = vsyncadd [#allocation20], 4294964176 }
 0x143   :  { %17126 = dma.done.wait [#allocation23], 3168  }
 0x144   :  { %17127 = vsyncadd [#allocation23], 4294964128 }
 0x145   :  { %17128 = dma.done.wait [#allocation26], 4096  }
 0x146   :  { %17129 = vsyncadd [#allocation26], 4294963200 }
 0x147   :  { %17130 = dma.done.wait [#allocation29], 1040  }
 0x148   :  { %17131 = vsyncadd [#allocation29], 4294966256 }
 0x149   :  { %17132 = dma.done.wait [#allocation32], 1040  }
 0x14a   :  { %17133 = vsyncadd [#allocation32], 4294966256 }
 0x14b   :  { %17134 = dma.done.wait [#allocation35], 1024  }
 0x14c   :  { %17135 = vsyncadd [#allocation35], 4294966272  ;;  %v15665_v0 = vld [vmem:[#allocation2 + $0xac] ss:$12 sps:$4 sm:$0xff]   ;;  %v15669_v2 = vld [vmem:[#allocation2 + $0xa8] ss:$12 sps:$4 sm:$0xff]  }
 0x14d   :  { %v15667_v1 = vld [vmem:[#allocation2 + $0x22c] ss:$12 sps:$4 sm:$0xff]   ;;  %1126 = vmatprep.subr.bf16.mxu0 %v15665_v0  ;;  %v15670_v3 = vld [vmem:[#allocation2 + $0x228] ss:$12 sps:$4 sm:$0xff]   ;;  %v15675_v6 = vld [vmem:[#allocation2 + $0x90] ss:$12 sps:$4 sm:$0xff]  }
 0x14e   :  { %1169 = vmatprep.subr.bf16.mxu1 %v15667_v1  ;;  %v15671_v4 = vld [vmem:[#allocation2 + $0x94] ss:$12 sps:$4 sm:$0xff]   ;;  %1127 = vmatpush1.bf16.msra.mxu0 %v15669_v2  ;;  %v15676_v7 = vld [vmem:[#allocation2 + $0x210] ss:$12 sps:$4 sm:$0xff]   ;;  %v15681_v10 = vld [vmem:[#allocation2 + $0x78] ss:$12 sps:$4 sm:$0xff]  }
 0x14f   :  { %1170 = vmatpush1.bf16.msra.mxu1 %v15670_v3  ;;  %v15673_v5 = vld [vmem:[#allocation2 + $0x214] ss:$12 sps:$4 sm:$0xff]   ;;  %1128 = vmatprep.subr.bf16.mxu0 %v15671_v4  ;;  %v15677_v8 = vld [vmem:[#allocation2 + $0x7c] ss:$12 sps:$4 sm:$0xff]   ;;  %v15682_v11 = vld [vmem:[#allocation2 + $0x1f8] ss:$12 sps:$4 sm:$0xff]  }
 0x150   :  { %1171 = vmatprep.subr.bf16.mxu1 %v15673_v5  ;;  %v15679_v9 = vld [vmem:[#allocation2 + $0x1fc] ss:$12 sps:$4 sm:$0xff]   ;;  %v15683_v12 = vld [vmem:[#allocation2 + $0x64] ss:$12 sps:$4 sm:$0xff]   ;;  %v15687_v14 = vld [vmem:[#allocation2 + $0x60] ss:$12 sps:$4 sm:$0xff]  }
 0x151   :  { %v15685_v13 = vld [vmem:[#allocation2 + $0x1e4] ss:$12 sps:$4 sm:$0xff]   ;;  %v15688_v15 = vld [vmem:[#allocation2 + $0x1e0] ss:$12 sps:$4 sm:$0xff]   ;;  %v15693_v18 = vld [vmem:[#allocation2 + $0x48] ss:$12 sps:$4 sm:$0xff]  }
 0x152   :  { %1129 = vmatpush1.bf16.msra.mxu0 %v15675_v6  ;;  %v15689_v16 = vld [vmem:[#allocation2 + $0x4c] ss:$12 sps:$4 sm:$0xff]   ;;  %v15694_v19 = vld [vmem:[#allocation2 + $0x1c8] ss:$12 sps:$4 sm:$0xff]   ;;  %v15699_v22 = vld [vmem:[#allocation2 + $0x30] ss:$12 sps:$4 sm:$0xff]  }
 0x153   :  { %1172 = vmatpush1.bf16.msra.mxu1 %v15676_v7  ;;  %1130 = vmatprep.subr.bf16.mxu0 %v15677_v8  ;;  %v15691_v17 = vld [vmem:[#allocation2 + $0x1cc] ss:$12 sps:$4 sm:$0xff]   ;;  %v15695_v20 = vld [vmem:[#allocation2 + $0x34] ss:$12 sps:$4 sm:$0xff]   ;;  %v15700_v23 = vld [vmem:[#allocation2 + $0x1b0] ss:$12 sps:$4 sm:$0xff]  }
 0x154   :  { %1173 = vmatprep.subr.bf16.mxu1 %v15679_v9  ;;  %v15697_v21 = vld [vmem:[#allocation2 + $0x1b4] ss:$12 sps:$4 sm:$0xff]   ;;  %v15701_v24 = vld [vmem:[#allocation2 + $0x1c] ss:$12 sps:$4 sm:$0xff]   ;;  %v15705_v26 = vld [vmem:[#allocation2 + $0x18] ss:$12 sps:$4 sm:$0xff]  }
 0x155   :  { %v15703_v25 = vld [vmem:[#allocation2 + $0x19c] ss:$12 sps:$4 sm:$0xff]   ;;  %v15706_v27 = vld [vmem:[#allocation2 + $0x198] ss:$12 sps:$4 sm:$0xff]   ;;  %v15711_v30 = vld [vmem:[#allocation2] ss:$12 sps:$4 sm:$0xff]  }
 0x156   :  { %1131 = vmatpush1.bf16.msra.mxu0 %v15681_v10  ;;  %v15707_v28 = vld [vmem:[#allocation2 + $0x4] ss:$12 sps:$4 sm:$0xff]   ;;  %v15712_v31 = vld [vmem:[#allocation2 + $0x180] ss:$12 sps:$4 sm:$0xff]   ;;  %v15717_v34 = vld [vmem:[#allocation2 + $0x168] ss:$12 sps:$4 sm:$0xff]  }
 0x157   :  { %1174 = vmatpush1.bf16.msra.mxu1 %v15682_v11  ;;  %1132 = vmatprep.subr.bf16.mxu0 %v15683_v12  ;;  %v15709_v29 = vld [vmem:[#allocation2 + $0x184] ss:$12 sps:$4 sm:$0xff]   ;;  %v15713_v32 = vld [vmem:[#allocation2 + $0x16c] ss:$12 sps:$4 sm:$0xff]   ;;  %v15718_v35 = vld [vmem:[#allocation2 + $0x2e8] ss:$12 sps:$4 sm:$0xff]  }
 0x158   :  { %1175 = vmatprep.subr.bf16.mxu1 %v15685_v13  ;;  %v15715_v33 = vld [vmem:[#allocation2 + $0x2ec] ss:$12 sps:$4 sm:$0xff]   ;;  %v15719_v36 = vld [vmem:[#allocation2 + $0x154] ss:$12 sps:$4 sm:$0xff]   ;;  %v15723_v38 = vld [vmem:[#allocation2 + $0x150] ss:$12 sps:$4 sm:$0xff]  }
 0x159   :  { %v15721_v37 = vld [vmem:[#allocation2 + $0x2d4] ss:$12 sps:$4 sm:$0xff]   ;;  %v15724_v39 = vld [vmem:[#allocation2 + $0x2d0] ss:$12 sps:$4 sm:$0xff]   ;;  %s19164_s13 = sld [smem:[#allocation48_spill]]  ;;  %vm1685_vm0 = vcmask 1043456  }
 0x15a   :  { %1133 = vmatpush1.bf16.msra.mxu0 %v15687_v14  ;;  %v15725_v40 = vld [vmem:[#allocation2 + $0x13c] ss:$12 sps:$4 sm:$0xff]   ;;  %v15729_v42 = vld [vmem:[#allocation2 + $0x138] ss:$12 sps:$4 sm:$0xff]   ;;  %v15735_v46 = vld [vmem:[#allocation2 + $0x120] ss:$12 sps:$4 sm:$0xff]  }
 0x15b   :  { %1176 = vmatpush1.bf16.msra.mxu1 %v15688_v15  ;;  %1134 = vmatprep.subr.bf16.mxu0 %v15689_v16  ;;  %v15727_v41 = vld [vmem:[#allocation2 + $0x2bc] ss:$12 sps:$4 sm:$0xff]   ;;  %v15730_v43 = vld [vmem:[#allocation2 + $0x2b8] ss:$12 sps:$4 sm:$0xff]   ;;  %v15736_v47 = vld [vmem:[#allocation2 + $0x2a0] ss:$12 sps:$4 sm:$0xff]  }
 0x15c   :  { %1177 = vmatprep.subr.bf16.mxu1 %v15691_v17  ;;  %v15731_v44 = vld [vmem:[#allocation2 + $0x124] ss:$12 sps:$4 sm:$0xff]   ;;  %v15737_v48 = vld [vmem:[#allocation2 + $0x10c] ss:$12 sps:$4 sm:$0xff]   ;;  %v15741_v52 = vld [vmem:[#allocation2 + $0x108] ss:$12 sps:$4 sm:$0xff]  }
 0x15d   :  { %v15733_v45 = vld [vmem:[#allocation2 + $0x2a4] ss:$12 sps:$4 sm:$0xff]   ;;  %v15739_v50 = vld [vmem:[#allocation2 + $0x28c] ss:$12 sps:$4 sm:$0xff]   ;;  %v15742_v53 = vld [vmem:[#allocation2 + $0x288] ss:$12 sps:$4 sm:$0xff]  }
 0x15e   :  { %1135 = vmatpush1.bf16.msra.mxu0 %v15693_v18  ;;  %v15743_v54 = vld [vmem:[#allocation2 + $0xf4] ss:$12 sps:$4 sm:$0xff]   ;;  %v15747_v56 = vld [vmem:[#allocation2 + $0xf0] ss:$12 sps:$4 sm:$0xff]   ;;  %v15753_v60 = vld [vmem:[#allocation2 + $0xd8] ss:$12 sps:$4 sm:$0xff]  }
 0x15f   :  { %1178 = vmatpush1.bf16.msra.mxu1 %v15694_v19  ;;  %1136 = vmatprep.subr.bf16.mxu0 %v15695_v20  ;;  %v15763_v49 = vld [vmem:[%s19164_s13 + $0x4] ss:$16 sps:$4 sm:$0xff]   ;;  %v15766_v51 = vld [vmem:[%s19164_s13 + $0xc] ss:$16 sps:$4 sm:$0xff]   ;;  %v17478_v3 = vld [vmem:[%s19164_s13] ss:$16 sps:$4 sm:$0xff]  }
 0x160   :  { %1179 = vmatprep.subr.bf16.mxu1 %v15697_v21  ;;  %1158 = vmatprep.mubr.bf16.mxu0 %v15763_v49  ;;  %v15745_v55 = vld [vmem:[#allocation2 + $0x274] ss:$12 sps:$4 sm:$0xff]   ;;  %v15748_v57 = vld [vmem:[#allocation2 + $0x270] ss:$12 sps:$4 sm:$0xff]   ;;  %v15754_v61 = vld [vmem:[#allocation2 + $0x258] ss:$12 sps:$4 sm:$0xff]  }
 0x161   :  { %1201 = vmatprep.mubr.bf16.mxu1 %v15766_v51  ;;  %v15749_v58 = vld [vmem:[#allocation2 + $0xdc] ss:$12 sps:$4 sm:$0xff]   ;;  %v15755_v62 = vld [vmem:[#allocation2 + $0xc4] ss:$12 sps:$4 sm:$0xff]   ;;  %v15759_v0 = vld [vmem:[#allocation2 + $0xc0] ss:$12 sps:$4 sm:$0xff]  }
 0x162   :  { %1137 = vmatpush1.bf16.msra.mxu0 %v15699_v22  ;;  %v15751_v59 = vld [vmem:[#allocation2 + $0x25c] ss:$12 sps:$4 sm:$0xff]   ;;  %v15757_v63 = vld [vmem:[#allocation2 + $0x244] ss:$12 sps:$4 sm:$0xff]   ;;  %v15760_v1 = vld [vmem:[#allocation2 + $0x240] ss:$12 sps:$4 sm:$0xff]  }
 0x163   :  { %1180 = vmatpush1.bf16.msra.mxu1 %v15700_v23  ;;  %1138 = vmatprep.subr.bf16.mxu0 %v15701_v24  ;;  %v15767_v2 = vld [vmem:[#allocation2 + $0x170] ss:$12 sps:$4 sm:$0xff]   ;;  %v17481_v4 = vld [vmem:[%s19164_s13 + $0x8] ss:$16 sps:$4 sm:$0xff]   ;;  %v15775_v12 = vld [vmem:[#allocation2 + $0x140] ss:$12 sps:$4 sm:$0xff]  }
 0x164   :  { %1181 = vmatprep.subr.bf16.mxu1 %v15703_v25  ;;  %v15768_v5 = vld [vmem:[#allocation2 + $0x2f0] ss:$12 sps:$4 sm:$0xff]   ;;  %v15771_v8 = vld [vmem:[#allocation2 + $0x158] ss:$12 sps:$4 sm:$0xff]   ;;  %v15776_v13 = vld [vmem:[#allocation2 + $0x2c0] ss:$12 sps:$4 sm:$0xff]  }
 0x165   :  { %v15769_v6 = vld [vmem:[#allocation2 + $0xb0] ss:$12 sps:$4 sm:$0xff]   ;;  %v15772_v9 = vld [vmem:[#allocation2 + $0x2d8] ss:$12 sps:$4 sm:$0xff]   ;;  %v15777_v14 = vld [vmem:[#allocation2 + $0x80] ss:$12 sps:$4 sm:$0xff]  }
 0x166   :  { %1139 = vmatpush1.bf16.msra.mxu0 %v15705_v26  ;;  %v15770_v7 = vld [vmem:[#allocation2 + $0x230] ss:$12 sps:$4 sm:$0xff]   ;;  %v15773_v10 = vld [vmem:[#allocation2 + $0x98] ss:$12 sps:$4 sm:$0xff]   ;;  %v15778_v15 = vld [vmem:[#allocation2 + $0x200] ss:$12 sps:$4 sm:$0xff]  }
 0x167   :  { %1182 = vmatpush1.bf16.msra.mxu1 %v15706_v27  ;;  %1140 = vmatprep.subr.bf16.mxu0 %v15707_v28  ;;  %v15774_v11 = vld [vmem:[#allocation2 + $0x218] ss:$12 sps:$4 sm:$0xff]   ;;  %v15779_v16 = vld [vmem:[#allocation2 + $0x128] ss:$12 sps:$4 sm:$0xff]   ;;  %v15783_v20 = vld [vmem:[#allocation2 + $0x110] ss:$12 sps:$4 sm:$0xff]  }
 0x168   :  { %1183 = vmatprep.subr.bf16.mxu1 %v15709_v29  ;;  %v15780_v17 = vld [vmem:[#allocation2 + $0x2a8] ss:$12 sps:$4 sm:$0xff]   ;;  %v15784_v21 = vld [vmem:[#allocation2 + $0x290] ss:$12 sps:$4 sm:$0xff]   ;;  %v15787_v24 = vld [vmem:[#allocation2 + $0xf8] ss:$12 sps:$4 sm:$0xff]  }
 0x169   :  { %v15781_v18 = vld [vmem:[#allocation2 + $0x68] ss:$12 sps:$4 sm:$0xff]   ;;  %v15785_v22 = vld [vmem:[#allocation2 + $0x50] ss:$12 sps:$4 sm:$0xff]   ;;  %v15788_v25 = vld [vmem:[#allocation2 + $0x278] ss:$12 sps:$4 sm:$0xff]  }
 0x16a   :  { %1141 = vmatpush1.bf16.msra.mxu0 %v15711_v30  ;;  %v15782_v19 = vld [vmem:[#allocation2 + $0x1e8] ss:$12 sps:$4 sm:$0xff]   ;;  %v15786_v23 = vld [vmem:[#allocation2 + $0x1d0] ss:$12 sps:$4 sm:$0xff]   ;;  %v15789_v26 = vld [vmem:[#allocation2 + $0x38] ss:$12 sps:$4 sm:$0xff]  }
 0x16b   :  { %1184 = vmatpush1.bf16.msra.mxu1 %v15712_v31  ;;  %1142 = vmatprep.subr.bf16.mxu0 %v15713_v32  ;;  %v15790_v27 = vld [vmem:[#allocation2 + $0x1b8] ss:$12 sps:$4 sm:$0xff]   ;;  %v15791_v28 = vld [vmem:[#allocation2 + $0xe0] ss:$12 sps:$4 sm:$0xff]   ;;  %v15795_v32 = vld [vmem:[#allocation2 + $0xc8] ss:$12 sps:$4 sm:$0xff]  }
 0x16c   :  { %1185 = vmatprep.subr.bf16.mxu1 %v15715_v33  ;;  %v15792_v29 = vld [vmem:[#allocation2 + $0x260] ss:$12 sps:$4 sm:$0xff]   ;;  %v15796_v33 = vld [vmem:[#allocation2 + $0x248] ss:$12 sps:$4 sm:$0xff]   ;;  %s19165_s7 = sld [smem:[#allocation49_spill]]  ;;  %vm17206_vm1 = vmmov 0  }
 0x16d   :  { %v15793_v30 = vld [vmem:[#allocation2 + $0x20] ss:$12 sps:$4 sm:$0xff]   ;;  %s19166_s12 = sld [smem:[#allocation52_spill]]  ;;  %vm1996_vm2 = vcmask 261120   ;;  %vm2091_vm3 = vcmask 130048   ;;  %s17207_s6 = smov 96  }
 0x16e   :  { %1143 = vmatpush2.bf16.msra.mxu0 %v15717_v34  ;;  %v15794_v31 = vld [vmem:[#allocation2 + $0x1a0] ss:$12 sps:$4 sm:$0xff]   ;;  %v15797_v34 = vld [vmem:[#allocation2 + $0x8] ss:$12 sps:$4 sm:$0xff]   ;;  %s19167_s5 = sld [smem:[#allocation54_spill]]  ;;  %s17208_s4 = smov 32  }
 0x16f   :  { %1186 = vmatpush2.bf16.msra.mxu1 %v15718_v35  ;;  %1144 = vmatprep.subr.bf16.mxu0 %v15719_v36  ;;  %v15798_v35 = vld [vmem:[#allocation2 + $0x188] ss:$12 sps:$4 sm:$0xff]   ;;  %v15799_v36 = vld [vmem:[#allocation4 + $0x78] sm:$0xff]   ;;  %vm3010_vm4 = vcmask 523264   ;;  %vm3015_vm5 = vcmask 785408   ;;  %s19168_s27 = sld [smem:[#allocation56_spill]] }
 0x170   :  { %1187 = vmatprep.subr.bf16.mxu1 %v15721_v37  ;;  %v15800_v37 = vld [vmem:[#allocation4 + $0xf8] sm:$0xff]   ;;  %s19169_s2 = sld [smem:[#allocation50_spill]]  ;;  %vm4614_vm6 = vcmask 1041409   ;;  %vm4710_vm7 = vcmask 1041408  }
 0x171   :  { %s19170_s10 = sld [smem:[#allocation53_spill]] }
 0x172   :  { %1145 = vmatpush2.bf16.msra.mxu0 %v15723_v38  ;;  %v15801_v38 = vld [vmem:[#allocation4 + $0x38] sm:$0xff]   ;;  %s19171_s19 = sld [smem:[#allocation51_spill]] }
 0x173   :  { %1188 = vmatpush2.bf16.msra.mxu1 %v15724_v39  ;;  %1146 = vmatprep.subr.bf16.mxu0 %v15725_v40  ;;  %v15802_v39 = vld [vmem:[#allocation4 + $0xb8] sm:$0xff]   ;;  %v15803_v40 = vld [vmem:[#allocation4 + $0x70] sm:$0xff]   ;;  %s19173_s25 = sld [smem:[#allocation60_spill]] }
 0x174   :  { %1189 = vmatprep.subr.bf16.mxu1 %v15727_v41  ;;  %v15804_v41 = vld [vmem:[#allocation4 + $0xf0] sm:$0xff]   ;;  %s19174_s21 = sld [smem:[#allocation61_spill]] }
 0x175   :  { %s19175_s22 = sld [smem:[#allocation63_spill]] }
 0x176   :  { %1147 = vmatpush2.bf16.msra.mxu0 %v15729_v42  ;;  %v15805_v42 = vld [vmem:[#allocation4 + $0x30] sm:$0xff]  }
 0x177   :  { %1190 = vmatpush2.bf16.msra.mxu1 %v15730_v43  ;;  %1148 = vmatprep.subr.bf16.mxu0 %v15731_v44  ;;  %v15806_v43 = vld [vmem:[#allocation4 + $0xb0] sm:$0xff]   ;;  %v15807_v44 = vld [vmem:[#allocation4 + $0x68] sm:$0xff]  }
 0x178   :  { %1191 = vmatprep.subr.bf16.mxu1 %v15733_v45  ;;  %v15808_v45 = vld [vmem:[#allocation4 + $0xe8] sm:$0xff]  }
 0x17a   :  { %1149 = vmatpush2.bf16.msra.mxu0 %v15735_v46  ;;  %v15809_v46 = vld [vmem:[#allocation4 + $0x28] sm:$0xff]  }
 0x17b   :  { %1192 = vmatpush2.bf16.msra.mxu1 %v15736_v47  ;;  %1150 = vmatprep.subr.bf16.mxu0 %v15737_v48  ;;  %v15810_v47 = vld [vmem:[#allocation4 + $0xa8] sm:$0xff]   ;;  %v15811_v48 = vld [vmem:[#allocation4 + $0x60] sm:$0xff]  }
 0x17c   :  { %1193 = vmatprep.subr.bf16.mxu1 %v15739_v50  ;;  %v15813_v50 = vld [vmem:[#allocation4 + $0x20] sm:$0xff]  }
 0x17e   :  { %1151 = vmatpush2.bf16.msra.mxu0 %v15741_v52  ;;  %v15815_v52 = vld [vmem:[#allocation4 + $0x58] sm:$0xff]  }
 0x17f   :  { %1194 = vmatpush2.bf16.msra.mxu1 %v15742_v53  ;;  %1152 = vmatprep.subr.bf16.mxu0 %v15743_v54  ;;  %v15816_v53 = vld [vmem:[#allocation4 + $0xd8] sm:$0xff]  }
 0x180   :  { %1195 = vmatprep.subr.bf16.mxu1 %v15745_v55  ;;  %v15817_v54 = vld [vmem:[#allocation4 + $0x18] sm:$0xff]  }
 0x181   :  { %v15818_v55 = vld [vmem:[#allocation4 + $0x98] sm:$0xff]  }
 0x182   :  { %1153 = vmatpush2.bf16.msra.mxu0 %v15747_v56  ;;  %v15833_v56 = vld [vmem:[%s19165_s7 + $0x4] ss:$16 sps:$4 sm:$0xff]  }
 0x183   :  { %1196 = vmatpush2.bf16.msra.mxu1 %v15748_v57  ;;  %1154 = vmatprep.subr.bf16.mxu0 %v15749_v58  ;;  %v15819_v57 = vld [vmem:[#allocation4 + $0x50] sm:$0xff]   ;;  %v15836_v58 = vld [vmem:[%s19165_s7 + $0xc] ss:$16 sps:$4 sm:$0xff]  }
 0x184   :  { %1197 = vmatprep.subr.bf16.mxu1 %v15751_v59  ;;  %v15820_v59 = vld [vmem:[#allocation4 + $0xd0] sm:$0xff]  }
 0x186   :  { %1155 = vmatpush2.bf16.msra.mxu0 %v15753_v60  ;;  %v15821_v60 = vld [vmem:[#allocation4 + $0x10] sm:$0xff]  }
 0x187   :  { %1198 = vmatpush2.bf16.msra.mxu1 %v15754_v61  ;;  %1156 = vmatprep.subr.bf16.mxu0 %v15755_v62  ;;  %v15822_v61 = vld [vmem:[#allocation4 + $0x90] sm:$0xff]   ;;  %v15823_v62 = vld [vmem:[#allocation4 + $0x48] sm:$0xff]  }
 0x188   :  { %1199 = vmatprep.subr.bf16.mxu1 %v15757_v63  ;;  %v15824_v63 = vld [vmem:[#allocation4 + $0xc8] sm:$0xff]  }
 0x18a   :  { %1157 = vmatpush2.bf16.msra.mxu0 %v15759_v0  ;;  %v15825_v0 = vld [vmem:[#allocation4 + $0x8] sm:$0xff]  }
 0x18b   :  { %1200 = vmatpush2.bf16.msra.mxu1 %v15760_v1  ;;  %13745 = vmatprep.subr.bf16.mxu0 %v15767_v2  ;;  %v15826_v1 = vld [vmem:[#allocation4 + $0x88] sm:$0xff]   ;;  %v15827_v2 = vld [vmem:[#allocation4 + $0x40] sm:$0xff]  }
 0x18c   :  { %13767 = vmatprep.subr.bf16.mxu1 %v15768_v5  ;;  %v15830_v5 = vld [vmem:[#allocation4 + $0x80] sm:$0xff]  }
 0x18d   :  { %1159 = vmatmul.mubr.bf16.vlgmr.msra.gmra.mxu0 %v17478_v3 }
 0x18e   :  { %1202 = vmatmul.mubr.bf16.vlgmr.msra.gmra.mxu1 %v17481_v4  ;;  %13746 = vmatpush3.bf16.msra.mxu0 %v15769_v6  ;;  %v15831_v6 = vld [vmem:[%s19165_s7] ss:$16 sps:$4 sm:$0xff]  }
 0x18f   :  { %13768 = vmatpush3.bf16.msra.mxu1 %v15770_v7  ;;  %13747 = vmatprep.subr.bf16.mxu0 %v15771_v8  ;;  %v15834_v7 = vld [vmem:[%s19165_s7 + $0x8] ss:$16 sps:$4 sm:$0xff]  }
 0x190   :  { %13769 = vmatprep.subr.bf16.mxu1 %v15772_v9  ;;  %1244 = vmatprep.mubr.bf16.mxu0 %v15763_v49  ;;  %v15812_v49 = vld [vmem:[#allocation4 + $0xe0] sm:$0xff]   ;;  %v15839_v8 = vld [vmem:[#allocation7 + $0xac] ss:$12 sps:$4 sm:$0xff]   ;;  %v15837_v9 = vld [vmem:[#allocation7 + $0xa8] ss:$12 sps:$4 sm:$0xff]  }
 0x191   :  { %1285 = vmatprep.mubr.bf16.mxu1 %v15766_v51  ;;  %v15814_v51 = vld [vmem:[#allocation4 + $0xa0] sm:$0xff]  }
 0x192   :  { %13748 = vmatpush3.bf16.msra.mxu0 %v15773_v10  ;;  %v15840_v10 = vld [vmem:[#allocation7 + $0x90] ss:$12 sps:$4 sm:$0xff]  }
 0x193   :  { %13770 = vmatpush3.bf16.msra.mxu1 %v15774_v11  ;;  %13749 = vmatprep.subr.bf16.mxu0 %v15775_v12  ;;  %v15842_v11 = vld [vmem:[#allocation7 + $0x94] ss:$12 sps:$4 sm:$0xff]   ;;  %v15843_v12 = vld [vmem:[#allocation7 + $0xb0] ss:$12 sps:$4 sm:$0xff]  }
 0x194   :  { %13771 = vmatprep.subr.bf16.mxu1 %v15776_v13  ;;  %v15846_v13 = vld [vmem:[#allocation7 + $0x7c] ss:$12 sps:$4 sm:$0xff]  }
 0x196   :  { %13750 = vmatpush3.bf16.msra.mxu0 %v15777_v14  ;;  %v15847_v14 = vld [vmem:[#allocation7 + $0x98] ss:$12 sps:$4 sm:$0xff]  }
 0x197   :  { %13772 = vmatpush3.bf16.msra.mxu1 %v15778_v15  ;;  %13751 = vmatprep.subr.bf16.mxu0 %v15779_v16  ;;  %v15844_v15 = vld [vmem:[#allocation7 + $0x78] ss:$12 sps:$4 sm:$0xff]  }
 0x198   :  { %13773 = vmatprep.subr.bf16.mxu1 %v15780_v17  ;;  %v15850_v16 = vld [vmem:[#allocation7 + $0x64] ss:$12 sps:$4 sm:$0xff]   ;;  %v15851_v17 = vld [vmem:[#allocation7 + $0x80] ss:$12 sps:$4 sm:$0xff]  }
 0x19a   :  { %13752 = vmatpush3.bf16.msra.mxu0 %v15781_v18  ;;  %v15848_v18 = vld [vmem:[#allocation7 + $0x60] ss:$12 sps:$4 sm:$0xff]  }
 0x19b   :  { %13774 = vmatpush3.bf16.msra.mxu1 %v15782_v19  ;;  %13753 = vmatprep.subr.bf16.mxu0 %v15783_v20  ;;  %v15855_v19 = vld [vmem:[#allocation7 + $0x68] ss:$12 sps:$4 sm:$0xff]   ;;  %v15854_v20 = vld [vmem:[#allocation7 + $0x4c] ss:$12 sps:$4 sm:$0xff]  }
 0x19c   :  { %13775 = vmatprep.subr.bf16.mxu1 %v15784_v21  ;;  %v15852_v21 = vld [vmem:[#allocation7 + $0x48] ss:$12 sps:$4 sm:$0xff]  }
 0x19e   :  { %13754 = vmatpush3.bf16.msra.mxu0 %v15785_v22  ;;  %v15858_v22 = vld [vmem:[#allocation7 + $0x34] ss:$12 sps:$4 sm:$0xff]  }
 0x19f   :  { %13776 = vmatpush3.bf16.msra.mxu1 %v15786_v23  ;;  %13755 = vmatprep.subr.bf16.mxu0 %v15787_v24  ;;  %v15859_v23 = vld [vmem:[#allocation7 + $0x50] ss:$12 sps:$4 sm:$0xff]  }
 0x1a0   :  { %13777 = vmatprep.subr.bf16.mxu1 %v15788_v25  ;;  %v15856_v24 = vld [vmem:[#allocation7 + $0x30] ss:$12 sps:$4 sm:$0xff]  }
 0x1a1   :  { %v15862_v25 = vld [vmem:[#allocation7 + $0x1c] ss:$12 sps:$4 sm:$0xff]  }
 0x1a2   :  { %13756 = vmatpush3.bf16.msra.mxu0 %v15789_v26  ;;  %v15863_v26 = vld [vmem:[#allocation7 + $0x38] ss:$12 sps:$4 sm:$0xff]  }
 0x1a3   :  { %13778 = vmatpush3.bf16.msra.mxu1 %v15790_v27  ;;  %13757 = vmatprep.subr.bf16.mxu0 %v15791_v28  ;;  %v15860_v27 = vld [vmem:[#allocation7 + $0x18] ss:$12 sps:$4 sm:$0xff]  }
 0x1a4   :  { %13779 = vmatprep.subr.bf16.mxu1 %v15792_v29  ;;  %v15866_v28 = vld [vmem:[#allocation7 + $0x4] ss:$12 sps:$4 sm:$0xff]   ;;  %v15867_v29 = vld [vmem:[#allocation7 + $0x20] ss:$12 sps:$4 sm:$0xff]  }
 0x1a6   :  { %13758 = vmatpush3.bf16.msra.mxu0 %v15793_v30  ;;  %v15864_v30 = vld [vmem:[#allocation7] ss:$12 sps:$4 sm:$0xff]  }
 0x1a7   :  { %13780 = vmatpush3.bf16.msra.mxu1 %v15794_v31  ;;  %13759 = vmatprep.subr.bf16.mxu0 %v15795_v32  ;;  %v15868_v31 = vld [vmem:[#allocation7 + $0x8] ss:$12 sps:$4 sm:$0xff]   ;;  %v17204_v32 = vmov 0  }
 0x1a8   :  { %13781 = vmatprep.subr.bf16.mxu1 %v15796_v33  ;;  %v579_v33 = vlaneseq }
 0x1aa   :  { %13760 = vmatpush3.bf16.msra.mxu0 %v15797_v34  ;;  %v580_v34 = vshrl.u32 %v579_v33, 7 }
 0x1ab   :  { %13782 = vmatpush3.bf16.msra.mxu1 %v15798_v35  ;;  %13789 = vmatprep.subr.bf16.mxu0 %v15799_v36  ;;  %v577_v36 = vld [vmem:[%s19166_s12] sm:$0x7] }
 0x1ac   :  { %13811 = vmatprep.subr.bf16.mxu1 %v15800_v37  ;;  %v17492_v35 = vsub.s32 1, %v580_v34 }
 0x1ad   :  { %1245 = vmatmul.mubr.bf16.vlgmr.msra.gmra.mxu0 %v17478_v3  ;;  %v15828_v3 = vld [vmem:[#allocation4 + $0xc0] sm:$0xff]  }
 0x1ae   :  { %1286 = vmatmul.mubr.bf16.vlgmr.msra.gmra.mxu1 %v17481_v4  ;;  %13790 = vmatpush3.bf16.msra.mxu0 %v15801_v38  ;;  %v15829_v4 = vld [vmem:[#allocation4] sm:$0xff]   ;;  %v17496_v37 = vrot.slane %v577_v36, %v17492_v35 }
 0x1af   :  { %13812 = vmatpush3.bf16.msra.mxu1 %v15802_v39  ;;  %13791 = vmatprep.subr.bf16.mxu0 %v15803_v40 }
 0x1b0   :  { %13813 = vmatprep.subr.bf16.mxu1 %v15804_v41  ;;  %1622 = vmatprep.mubr.bf16.mxu0 %v15833_v56 }
 0x1b1   :  { %1663 = vmatprep.mubr.bf16.mxu1 %v15836_v58 }
 0x1b2   :  { %13792 = vmatpush3.bf16.msra.mxu0 %v15805_v42 }
 0x1b3   :  { %13814 = vmatpush3.bf16.msra.mxu1 %v15806_v43  ;;  %13793 = vmatprep.subr.bf16.mxu0 %v15807_v44 }
 0x1b4   :  { %13815 = vmatprep.subr.bf16.mxu1 %v15808_v45 }
 0x1b6   :  { %13794 = vmatpush3.bf16.msra.mxu0 %v15809_v46  ;;  %v17501_v46 = vsub.s32 0, %v580_v34 }
 0x1b7   :  { %13816 = vmatpush3.bf16.msra.mxu1 %v15810_v47  ;;  %13795 = vmatprep.subr.bf16.mxu0 %v15811_v48  ;;  %v17503_v47 = vsub.s32 2, %v580_v34 }
 0x1b8   :  { %13817 = vmatprep.subr.bf16.mxu1 %v15812_v49 }
 0x1ba   :  { %13796 = vmatpush3.bf16.msra.mxu0 %v15813_v50 }
 0x1bb   :  { %13818 = vmatpush3.bf16.msra.mxu1 %v15814_v51  ;;  %13797 = vmatprep.subr.bf16.mxu0 %v15815_v52  ;;  %v582_v52 = vrot.slane %v577_v36, %v17501_v46 }
 0x1bc   :  { %13819 = vmatprep.subr.bf16.mxu1 %v15816_v53  ;;  %v590_v53 = vrot.slane %v577_v36, %v17503_v47 }
 0x1be   :  { %13798 = vmatpush3.bf16.msra.mxu0 %v15817_v54 }
 0x1bf   :  { %13820 = vmatpush3.bf16.msra.mxu1 %v15818_v55  ;;  %13799 = vmatprep.subr.bf16.mxu0 %v15819_v57 }
 0x1c0   :  { %13821 = vmatprep.subr.bf16.mxu1 %v15820_v59 }
 0x1c2   :  { %13800 = vmatpush3.bf16.msra.mxu0 %v15821_v60 }
 0x1c3   :  { %13822 = vmatpush3.bf16.msra.mxu1 %v15822_v61  ;;  %13801 = vmatprep.subr.bf16.mxu0 %v15823_v62 }
 0x1c4   :  { %13823 = vmatprep.subr.bf16.mxu1 %v15824_v63 }
 0x1c6   :  { %13802 = vmatpush3.bf16.msra.mxu0 %v15825_v0 }
 0x1c7   :  { %13824 = vmatpush3.bf16.msra.mxu1 %v15826_v1  ;;  %13803 = vmatprep.subr.bf16.mxu0 %v15827_v2 }
 0x1c8   :  { %13825 = vmatprep.subr.bf16.mxu1 %v15828_v3 }
 0x1ca   :  { %13804 = vmatpush3.bf16.msra.mxu0 %v15829_v4 }
 0x1cb   :  { %13826 = vmatpush3.bf16.msra.mxu1 %v15830_v5  ;;  %1871 = vmatprep.subr.bf16.mxu0 %v15839_v8 }
 0x1cc   :  { %14376 = vmatprep.subr.bf16.mxu1 %v15843_v12 }
 0x1cd   :  { %1623 = vmatmul.mubr.bf16.vlgmr.msra.gmra.mxu0 %v15831_v6 }
 0x1ce   :  { %1664 = vmatmul.mubr.bf16.vlgmr.msra.gmra.mxu1 %v15834_v7  ;;  %1872 = vmatpush1.bf16.msra.mxu0 %v15837_v9  ;;  %v13154_v9 = vld [vmem:[%s19167_s5] ss:$0 sm:$0xff] }
 0x1cf   :  { %1873 = vmatprep.subr.bf16.mxu0 %v15842_v11  ;;  %14377 = vmatpush3.bf16.msra.mxu1 %v15843_v12 }
 0x1d0   :  { %14378 = vmatprep.subr.bf16.mxu1 %v15847_v14  ;;  %1903 = vmatprep.mubr.bf16.mxu0 %v17204_v32 }
 0x1d2   :  { %1874 = vmatpush1.bf16.msra.mxu0 %v15840_v10 }
 0x1d3   :  { %1875 = vmatprep.subr.bf16.mxu0 %v15846_v13  ;;  %14379 = vmatpush3.bf16.msra.mxu1 %v15847_v14 }
 0x1d4   :  { %14380 = vmatprep.subr.bf16.mxu1 %v15851_v17 }
 0x1d6   :  { %1876 = vmatpush1.bf16.msra.mxu0 %v15844_v15 }
 0x1d7   :  { %1877 = vmatprep.subr.bf16.mxu0 %v15850_v16  ;;  %14381 = vmatpush3.bf16.msra.mxu1 %v15851_v17 }
 0x1d8   :  { %14382 = vmatprep.subr.bf16.mxu1 %v15855_v19 }
 0x1da   :  { %1878 = vmatpush1.bf16.msra.mxu0 %v15848_v18 }
 0x1db   :  { %1879 = vmatprep.subr.bf16.mxu0 %v15854_v20  ;;  %14383 = vmatpush3.bf16.msra.mxu1 %v15855_v19 }
 0x1dc   :  { %14384 = vmatprep.subr.bf16.mxu1 %v15859_v23 }
 0x1de   :  { %1880 = vmatpush1.bf16.msra.mxu0 %v15852_v21 }
 0x1df   :  { %1881 = vmatprep.subr.bf16.mxu0 %v15858_v22  ;;  %14385 = vmatpush3.bf16.msra.mxu1 %v15859_v23 }
 0x1e0   :  { %14386 = vmatprep.subr.bf16.mxu1 %v15863_v26 }
 0x1e2   :  { %1882 = vmatpush1.bf16.msra.mxu0 %v15856_v24 }
 0x1e3   :  { %1883 = vmatprep.subr.bf16.mxu0 %v15862_v25  ;;  %14387 = vmatpush3.bf16.msra.mxu1 %v15863_v26 }
 0x1e4   :  { %14388 = vmatprep.subr.bf16.mxu1 %v15867_v29 }
 0x1e6   :  { %1884 = vmatpush1.bf16.msra.mxu0 %v15860_v27 }
 0x1e7   :  { %1885 = vmatprep.subr.bf16.mxu0 %v15866_v28  ;;  %14389 = vmatpush3.bf16.msra.mxu1 %v15867_v29 }
 0x1e8   :  { %14390 = vmatprep.subr.bf16.mxu1 %v15868_v31 }
 0x1ea   :  { %1886 = vmatpush1.bf16.msra.mxu0 %v15864_v30 }
 0x1eb   :  { %14391 = vmatpush3.bf16.msra.mxu1 %v15868_v31 }
 0x24d   :  { %v1160_v38 = vpop.f32.mrf.mxu0 }
 0x24e   :  { %v1203_v39 = vpop.f32.mrf.mxu1  ;;  %v1161_v60 = vadd.f32 %v1160_v38, %v582_v52  ;;  %v17205_v38 = vmov 0.0  }
 0x24f   :  { %v1162_v40 = vpop.f32.mrf.mxu0  ;;  %14396 = vmatprep.subr.bf16.mxu1 %v17205_v38  ;;  %14426 = vmatprep.subr.bf16.mxu0 %v17205_v38 }
 0x250   :  { %v1163_v41 = vadd.f32 %v1162_v40, %v17496_v37  ;;  %v1205_v42 = vpop.f32.mrf.mxu1  ;;  %v1204_v2 = vadd.f32 %v1203_v39, %v1161_v60  ;;  %v1726_v39 = vld [vmem:[#allocation9] sm:$0x7] }
 0x251   :  { %v1164_v44 = vpop.f32.mrf.mxu0 }
 0x252   :  { %v17499_v43 = vadd.f32 %v1205_v42, %v1163_v41  ;;  %v1207_v45 = vpop.f32.mrf.mxu1  ;;  %v1294_v6 = vmax.f32 %v1204_v2, 0.0  ;;  %v1165_v10 = vadd.f32 %v1164_v44, %v582_v52  ;;  %v1739_v41 = vrot.slane %v1726_v39, %v17503_v47 }
 0x253   :  { %v17505_v48 = vpop.f32.mrf.mxu0  ;;  %v1735_v44 = vrot.slane %v1726_v39, %v17492_v35 }
 0x254   :  { %v17507_v49 = vpop.f32.mrf.mxu1  ;;  %v1208_v16 = vadd.f32 %v1207_v45, %v1165_v10  ;;  %v13733_v27 = vpack.c.bf16 %v1294_v6, %v1294_v6 }
 0x256   :  { %v1297_v23 = vmax.f32 %v1208_v16, 0.0 }
 0x258   :  { %v13734_v33 = vpack.c.bf16 %v1297_v23, %v1297_v23 }
 0x26d   :  { %v13761_v50 = vpop.f32.mrf.mxu0 }
 0x26e   :  { %v13783_v51 = vpop.f32.mrf.mxu1 }
 0x26f   :  { %v13762_v54 = vpop.f32.mrf.mxu0 }
 0x270   :  { %v13784_v55 = vpop.f32.mrf.mxu1  ;;  %v13763_v56 = vadd.f32 %v13762_v54, %v13761_v50 }
 0x271   :  { %v13785_v57 = vadd.f32 %v13784_v55, %v13783_v51  ;;  %v13764_v58 = vpop.f32.mrf.mxu0 }
 0x272   :  { %v13786_v59 = vpop.f32.mrf.mxu1  ;;  %v1247_v61 = vadd.f32 %v13763_v56, %v590_v53 }
 0x273   :  { %v13765_v62 = vpop.f32.mrf.mxu0 }
 0x274   :  { %v13787_v63 = vpop.f32.mrf.mxu1  ;;  %v17511_v0 = vadd.f32 %v13785_v57, %v1247_v61  ;;  %v13766_v1 = vadd.f32 %v13765_v62, %v13764_v58  ;;  %v1731_v61 = vrot.slane %v1726_v39, %v17501_v46 }
 0x275   :  { %v13788_v4 = vadd.f32 %v13787_v63, %v13786_v59 }
 0x276   :  { %v1250_v3 = vadd.f32 %v13766_v1, %v590_v53 }
 0x278   :  { %v17513_v5 = vadd.f32 %v13788_v4, %v1250_v3 }
 0x28d   :  { %v13805_v7 = vpop.f32.mrf.mxu0 }
 0x28e   :  { %v13827_v8 = vpop.f32.mrf.mxu1 }
 0x28f   :  { %v13806_v11 = vpop.f32.mrf.mxu0 }
 0x290   :  { %v13828_v12 = vpop.f32.mrf.mxu1  ;;  %v13807_v13 = vadd.f32 %v13806_v11, %v13805_v7 }
 0x291   :  { %v13808_v14 = vpop.f32.mrf.mxu0  ;;  %v13829_v18 = vadd.f32 %v13828_v12, %v13827_v8 }
 0x292   :  { %v13830_v15 = vpop.f32.mrf.mxu1  ;;  %v1625_v17 = vadd.f32 %v13807_v13, %v13154_v9 }
 0x293   :  { %v13809_v19 = vpop.f32.mrf.mxu0 }
 0x294   :  { %v13831_v20 = vpop.f32.mrf.mxu1  ;;  %v1666_v21 = vadd.f32 %v13829_v18, %v1625_v17  ;;  %v13810_v22 = vadd.f32 %v13809_v19, %v13808_v14 }
 0x295   :  { %v13832_v26 = vadd.f32 %v13831_v20, %v13830_v15 }
 0x296   :  { %v1672_v24 = vmax.f32 %v1666_v21, 0.0  ;;  %v1628_v25 = vadd.f32 %v13810_v22, %v13154_v9 }
 0x298   :  { %v13735_v28 = vpack.c.bf16 %v1672_v24, %v1672_v24  ;;  %v1669_v29 = vadd.f32 %v13832_v26, %v1628_v25 }
 0x29a   :  { %v1673_v30 = vmax.f32 %v1669_v29, 0.0  ;;  %v17517_v31 = vsel %vm1685_vm0, %v13733_v27, %v13735_v28 }
 0x29b   :  { %1904 = vmatmul.mubr.bf16.vlgmr.msra.gmra.mxu0 %v17517_v31  ;;  %14392 = vmatprep.mubr.bf16.mxu1 %v17517_v31 }
 0x29c   :  { %v13736_v34 = vpack.c.bf16 %v1673_v30, %v1673_v30  ;;  %1913 = vmatprep.mubr.bf16.mxu0 %v17204_v32 }
 0x29e   :  { %v17523_v36 = vsel %vm1685_vm0, %v13734_v33, %v13736_v34 }
 0x29f   :  { %14393 = vmatmul.mubr.bf16.vlgmr.msra.gmra.mxu1 %v17523_v36 }
 0x2a0   :  { %14398 = vmatprep.mubr.msk.bf16.mxu1 %vm17206_vm1, %v17205_v38 }
 0x2a3   :  { %1914 = vmatmul.mubr.bf16.gmra.mxu0 %v17523_v36 }
 0x2a4   :  { %14428 = vmatprep.mubr.msk.bf16.mxu0 %vm17206_vm1, %v17205_v38 }
 0x35b   :  { %v1905_v40 = vpop.f32.mrf.mxu0 }
 0x35c   :  { %v1906_v4 = vadd.f32 %v1905_v40, %v1731_v61 }
 0x35d   :  { %v1907_v42 = vpop.f32.mrf.mxu0 }
 0x35e   :  { %v1908_v54 = vadd.f32 %v1907_v42, %v1735_v44 }
 0x35f   :  { %v1909_v45 = vpop.f32.mrf.mxu0  ;;  %v14394_v50 = vpop.f32.mrf.mxu1 }
 0x360   :  { %v1967_v51 = vadd.f32 %v14394_v50, %v1739_v41  ;;  %v1910_v2 = vadd.f32 %v1909_v45, %v1731_v61 }
 0x361   :  { %v1911_v52 = vpop.f32.mrf.mxu0  ;;  %v1958_v53 = vpop.f32.mrf.mxu1 }
 0x362   :  { %v1912_v55 = vadd.f32 %v1911_v52, %v1735_v44  ;;  %v17543_v8 = vpack.c.bf16 %v1910_v2, %v1906_v4  ;;  %v1959_v15 = vadd.f32 %v1958_v53, %v1739_v41 }
 0x363   :  { %v1915_v56 = vpop.f32.mrf.mxu0  ;;  %v14395_v57 = vpop.f32.mrf.mxu1 }
 0x364   :  { %v17535_v58 = vpack.c.bf16 %v1912_v55, %v1908_v54  ;;  %v1970_v59 = vadd.f32 %v14395_v57, %v1739_v41  ;;  %v1916_v14 = vadd.f32 %v1915_v56, %v1731_v61 }
 0x365   :  { %v1917_v60 = vpop.f32.mrf.mxu0  ;;  %v1961_v10 = vpop.f32.mrf.mxu1 }
 0x366   :  { %v17538_v62 = vpack.c.bf16 %v1970_v59, %v1967_v51  ;;  %v2001_v63 = vsel %vm1996_vm2, %v17535_v58, 0  ;;  %v1918_v6 = vadd.f32 %v1917_v60, %v1735_v44  ;;  %v1962_v13 = vadd.f32 %v1961_v10, %v1739_v41 }
 0x367   :  { %v1919_v1 = vpop.f32.mrf.mxu0  ;;  %14397 = vmatpush3.bf16.xpose.msra.mxu1 %v2001_v63 }
 0x368   :  { %14402 = vmatprep.subr.bf16.mxu1 %v17205_v38  ;;  %v1920_v12 = vadd.f32 %v1919_v1, %v1731_v61  ;;  %v17556_v17 = vpack.c.bf16 %v1962_v13, %v1959_v15 }
 0x369   :  { %v1921_v3 = vpop.f32.mrf.mxu0 }
 0x36a   :  { %v1922_v7 = vadd.f32 %v1921_v3, %v1735_v44  ;;  %v17554_v16 = vpack.c.bf16 %v1920_v12, %v1916_v14 }
 0x36c   :  { %v17545_v9 = vpack.c.bf16 %v1922_v7, %v1918_v6 }
 0x36e   :  { %14399 = vmatmul.mubr.msk.bf16.vlgmr.msra.gmra.mxu1 %vm1996_vm2, %v17543_v8  ;;  %v2048_v11 = vsel %vm1996_vm2, %v17545_v9, 0 }
 0x36f   :  { %14403 = vmatpush3.bf16.xpose.msra.mxu1 %v2048_v11  ;;  %14404 = vmatprep.mubr.msk.bf16.mxu1 %vm17206_vm1, %v17205_v38 }
 0x370   :  { %14408 = vmatprep.subr.bf16.mxu1 %v17205_v38 }
 0x376   :  { %14405 = vmatmul.mubr.msk.bf16.vlgmr.msra.gmra.mxu1 %vm1996_vm2, %v17554_v16 }
 0x377   :  { %14409 = vmatpush3.bf16.msra.mxu1 %v17556_v17  ;;  %14410 = vmatprep.mubr.msk.bf16.mxu1 %vm17206_vm1, %v17205_v38 }
 0x378   :  { %14414 = vmatprep.subr.bf16.mxu1 %v17205_v38 }
 0x42e   :  { %v2037_v18 = vpop.f32.mrf.mxu1 }
 0x42f   :  { %v2092_v19 = vsel %vm2091_vm3, %v2037_v18, -inf }
 0x430   :  { %2093 = vmax.xlane.f32.xlu0 %v2092_v19  ;;  %v14400_v20 = vpop.f32.mrf.mxu1 }
 0x432   :  { %v2040_v21 = vpop.f32.mrf.mxu1 }
 0x433   :  { %v2095_v22 = vsel %vm2091_vm3, %v2040_v21, -inf }
 0x434   :  { %2096 = vmax.xlane.f32.xlu0 %v2095_v22  ;;  %v14401_v23 = vpop.f32.mrf.mxu1 }
 0x436   :  { %v2084_v24 = vpop.f32.mrf.mxu1 }
 0x437   :  { %v2098_v25 = vsel %vm2091_vm3, %v2084_v24, -inf }
 0x438   :  { %2099 = vmax.xlane.f32.xlu1 %v2098_v25  ;;  %v14406_v26 = vpop.f32.mrf.mxu1 }
 0x43a   :  { %v2087_v27 = vpop.f32.mrf.mxu1 }
 0x43b   :  { %v2101_v28 = vsel %vm2091_vm3, %v2087_v27, -inf }
 0x43c   :  { %2102 = vmax.xlane.f32.xlu1 %v2101_v28  ;;  %v14407_v29 = vpop.f32.mrf.mxu1 }
 0x4b9   :  { %v2094_v30 = vpop.xlane.xlu0 %2093 }
 0x4ba   :  { %v2104_v33 = vsub.f32 %v2037_v18, %v2094_v30 }
 0x4bc   :  { %v2108_v34 = vmul.f32 1.442695, %v2104_v33 }
 0x4bd   :  { %v2097_v39 = vpop.xlane.xlu0 %2096 }
 0x4be   :  { %16276 = vpow2.f32 %v2108_v34  ;;  %v2105_v40 = vsub.f32 %v2040_v21, %v2097_v39 }
 0x4c0   :  { %v2110_v41 = vmul.f32 1.442695, %v2105_v40 }
 0x4c1   :  { %v2100_v42 = vpop.xlane.xlu1 %2099 }
 0x4c2   :  { %16278 = vpow2.f32 %v2110_v41  ;;  %v2106_v44 = vsub.f32 %v2084_v24, %v2100_v42 }
 0x4c4   :  { %v2112_v45 = vmul.f32 1.442695, %v2106_v44 }
 0x4c5   :  { %v2103_v56 = vpop.xlane.xlu1 %2102 }
 0x4c6   :  { %16280 = vpow2.f32 %v2112_v45  ;;  %v2107_v57 = vsub.f32 %v2087_v27, %v2103_v56 }
 0x4c8   :  { %v2114_v59 = vmul.f32 1.442695, %v2107_v57 }
 0x4ca   :  { %16282 = vpow2.f32 %v2114_v59 }
 0x4cb   :  { %v16277_v50 = vpop.eup %16276 }
 0x4cc   :  { %v2116_v51 = vsel %vm2091_vm3, %v16277_v50, 0.0 }
 0x4cd   :  { %2117 = vadd.xlane.f32.xlu0 %v2116_v51 }
 0x4cf   :  { %v16279_v52 = vpop.eup %16278 }
 0x4d0   :  { %v2119_v53 = vsel %vm2091_vm3, %v16279_v52, 0.0 }
 0x4d1   :  { %2120 = vadd.xlane.f32.xlu1 %v2119_v53 }
 0x4d3   :  { %v16281_v54 = vpop.eup %16280 }
 0x4d4   :  { %v2122_v55 = vsel %vm2091_vm3, %v16281_v54, 0.0 }
 0x4d5   :  { %2123 = vadd.xlane.f32.xlu0 %v2122_v55 }
 0x4d7   :  { %v16283_v60 = vpop.eup %16282 }
 0x4d8   :  { %v2125_v61 = vsel %vm2091_vm3, %v16283_v60, 0.0 }
 0x4e2   :  { %2283 = vrot.lane.b32.xlu1 %v17545_v9, %s17207_s6 }
 0x4eb   :  { %2230 = vrot.lane.b32.xlu0 %v17535_v58, %s17207_s6 }
 0x506   :  { %2126 = vadd.xlane.f32.xlu1 %v2125_v61 }
 0x517   :  { %2227 = vrot.lane.b32.xlu1 %v17543_v8, %s17207_s6 }
 0x51b   :  { %2280 = vrot.lane.b32.xlu1 %v17554_v16, %s17207_s6 }
 0x556   :  { %v2118_v63 = vpop.xlane.xlu0 %2117 }
 0x557   :  { %16284 = vrcp.f32 %v2118_v63 }
 0x55a   :  { %v2121_v1 = vpop.xlane.xlu1 %2120 }
 0x55b   :  { %16286 = vrcp.f32 %v2121_v1 }
 0x55e   :  { %v2284_v2 = vpop.permute.xlu1 %2283  ;;  %v2124_v12 = vpop.xlane.xlu0 %2123 }
 0x55f   :  { %v2289_v3 = vsel %vm1996_vm2, %v2284_v2, 0  ;;  %16288 = vrcp.f32 %v2124_v12 }
 0x560   :  { %14427 = vmatpush3.bf16.xpose.msra.mxu0 %v2289_v3 }
 0x561   :  { %14438 = vmatprep.subr.bf16.mxu0 %v17205_v38 }
 0x562   :  { %v2231_v22 = vpop.permute.xlu0 %2230 }
 0x563   :  { %v2236_v24 = vsel %vm1996_vm2, %v2231_v22, 0 }
 0x564   :  { %v16285_v4 = vpop.eup %16284 }
 0x565   :  { %v2132_v7 = vmul.f32 %v16285_v4, %v16277_v50 }
 0x568   :  { %v16287_v6 = vpop.eup %16286 }
 0x569   :  { %v2133_v10 = vmul.f32 %v16287_v6, %v16279_v52 }
 0x56b   :  { %v2136_v11 = vpack.c.bf16 %v2133_v10, %v2132_v7 }
 0x56c   :  { %v16289_v18 = vpop.eup %16288 }
 0x56d   :  { %14411 = vmatmul.mubr.msk.bf16.vlgmr.msra.gmra.mxu1 %vm2091_vm3, %v2136_v11  ;;  %v2134_v20 = vmul.f32 %v16289_v18, %v16281_v54 }
 0x56e   :  { %14415 = vmatpush3.bf16.msra.mxu1 %v17538_v62  ;;  %14416 = vmatprep.mubr.msk.bf16.mxu1 %vm17206_vm1, %v17205_v38 }
 0x56f   :  { %14420 = vmatprep.subr.bf16.mxu1 %v17205_v38 }
 0x58f   :  { %v2127_v13 = vpop.xlane.xlu1 %2126 }
 0x590   :  { %16290 = vrcp.f32 %v2127_v13 }
 0x593   :  { %v2228_v14 = vpop.permute.xlu1 %2227 }
 0x597   :  { %v2281_v15 = vpop.permute.xlu1 %2280 }
 0x598   :  { %14429 = vmatmul.mubr.msk.bf16.vlgmr.msra.gmra.mxu0 %vm1996_vm2, %v2281_v15 }
 0x599   :  { %14440 = vmatprep.mubr.msk.bf16.mxu0 %vm17206_vm1, %v17205_v38 }
 0x59d   :  { %v16291_v19 = vpop.eup %16290 }
 0x59e   :  { %v2135_v21 = vmul.f32 %v16291_v19, %v16283_v60 }
 0x5a0   :  { %v2137_v23 = vpack.c.bf16 %v2135_v21, %v2134_v20 }
 0x5a2   :  { %14417 = vmatmul.mubr.msk.bf16.vlgmr.msra.gmra.mxu1 %vm2091_vm3, %v2137_v23 }
 0x5a3   :  { %14421 = vmatpush3.bf16.xpose.msra.mxu1 %v2236_v24  ;;  %14422 = vmatprep.mubr.msk.bf16.mxu1 %vm17206_vm1, %v17205_v38 }
 0x5a4   :  { %14432 = vmatprep.subr.bf16.mxu1 %v17205_v38 }
 0x5aa   :  { %14423 = vmatmul.mubr.msk.bf16.vlgmr.msra.gmra.mxu1 %vm1996_vm2, %v2228_v14 }
 0x5ab   :  { %14434 = vmatprep.mubr.msk.bf16.mxu1 %vm17206_vm1, %v17205_v38 }
 0x62d   :  { %v17598_v25 = vpop.f32.mrf.mxu1 }
 0x62f   :  { %v14412_v26 = vpop.f32.mrf.mxu1 }
 0x631   :  { %v17600_v27 = vpop.f32.mrf.mxu1 }
 0x633   :  { %v14413_v28 = vpop.f32.mrf.mxu1 }
 0x658   :  { %v2325_v29 = vpop.f32.mrf.mxu0 }
 0x659   :  { %v2338_v52 = vsel %vm2091_vm3, %v2325_v29, -inf }
 0x65a   :  { %v14430_v30 = vpop.f32.mrf.mxu0 }
 0x65c   :  { %v2328_v33 = vpop.f32.mrf.mxu0 }
 0x65d   :  { %v2341_v55 = vsel %vm2091_vm3, %v2328_v33, -inf }
 0x65e   :  { %v14431_v34 = vpop.f32.mrf.mxu0 }
 0x662   :  { %v17602_v39 = vpop.f32.mrf.mxu1 }
 0x664   :  { %v14418_v40 = vpop.f32.mrf.mxu1 }
 0x666   :  { %v17604_v41 = vpop.f32.mrf.mxu1 }
 0x668   :  { %v14419_v42 = vpop.f32.mrf.mxu1 }
 0x66a   :  { %v2272_v44 = vpop.f32.mrf.mxu1 }
 0x66b   :  { %v2332_v45 = vsel %vm2091_vm3, %v2272_v44, -inf }
 0x66c   :  { %2333 = vmax.xlane.f32.xlu0 %v2332_v45  ;;  %v14424_v50 = vpop.f32.mrf.mxu1 }
 0x66e   :  { %v2275_v51 = vpop.f32.mrf.mxu1 }
 0x66f   :  { %v2335_v53 = vsel %vm2091_vm3, %v2275_v51, -inf }
 0x670   :  { %2339 = vmax.xlane.f32.xlu0 %v2338_v52  ;;  %2336 = vmax.xlane.f32.xlu1 %v2335_v53  ;;  %v14425_v54 = vpop.f32.mrf.mxu1 }
 0x674   :  { %2342 = vmax.xlane.f32.xlu0 %v2341_v55 }
 0x6f5   :  { %v2334_v56 = vpop.xlane.xlu0 %2333 }
 0x6f6   :  { %v2344_v57 = vsub.f32 %v2272_v44, %v2334_v56 }
 0x6f8   :  { %v2348_v61 = vmul.f32 1.442695, %v2344_v57 }
 0x6f9   :  { %v2340_v59 = vpop.xlane.xlu0 %2339  ;;  %v2337_v13 = vpop.xlane.xlu1 %2336 }
 0x6fa   :  { %v2346_v60 = vsub.f32 %v2325_v29, %v2340_v59  ;;  %v2345_v14 = vsub.f32 %v2275_v51, %v2337_v13 }
 0x6fc   :  { %v2352_v63 = vmul.f32 1.442695, %v2346_v60  ;;  %v2350_v15 = vmul.f32 1.442695, %v2345_v14 }
 0x6fd   :  { %v2343_v1 = vpop.xlane.xlu0 %2342 }
 0x6fe   :  { %16292 = vpow2.f32 %v2352_v63  ;;  %v2347_v2 = vsub.f32 %v2328_v33, %v2343_v1 }
 0x6ff   :  { %16294 = vpow2.f32 %v2348_v61 }
 0x700   :  { %v2354_v3 = vmul.f32 1.442695, %v2347_v2 }
 0x702   :  { %16296 = vpow2.f32 %v2354_v3 }
 0x703   :  { %16298 = vpow2.f32 %v2350_v15 }
 0x70b   :  { %v16293_v4 = vpop.eup %16292 }
 0x70c   :  { %v2362_v6 = vsel %vm2091_vm3, %v16293_v4, 0.0  ;;  %v16295_v7 = vpop.eup %16294 }
 0x70d   :  { %2363 = vadd.xlane.f32.xlu0 %v2362_v6  ;;  %v2356_v11 = vsel %vm2091_vm3, %v16295_v7, 0.0 }
 0x70f   :  { %v16297_v10 = vpop.eup %16296 }
 0x710   :  { %v2365_v12 = vsel %vm2091_vm3, %v16297_v10, 0.0  ;;  %v16299_v18 = vpop.eup %16298 }
 0x711   :  { %2357 = vadd.xlane.f32.xlu0 %v2356_v11  ;;  %2366 = vadd.xlane.f32.xlu1 %v2365_v12  ;;  %v2359_v19 = vsel %vm2091_vm3, %v16299_v18, 0.0 }
 0x722   :  { %2427 = vrot.lane.b32.xlu1 %v17538_v62, %s17207_s6 }
 0x726   :  { %2476 = vrot.lane.b32.xlu1 %v17535_v58, %s17173_s0 }
 0x727   :  { %2379 = vrot.lane.b32.xlu0 %v17556_v17, %s17207_s6 }
 0x72b   :  { %2474 = vrot.lane.b32.xlu0 %v17543_v8, %s17173_s0 }
 0x74a   :  { %2360 = vadd.xlane.f32.xlu1 %v2359_v19 }
 0x75b   :  { %2527 = vrot.lane.b32.xlu1 %v17545_v9, %s17173_s0 }
 0x75f   :  { %2525 = vrot.lane.b32.xlu1 %v17554_v16, %s17173_s0 }
 0x796   :  { %v2364_v20 = vpop.xlane.xlu0 %2363 }
 0x797   :  { %16300 = vrcp.f32 %v2364_v20 }
 0x79a   :  { %v2358_v21 = vpop.xlane.xlu0 %2357  ;;  %v2367_v22 = vpop.xlane.xlu1 %2366 }
 0x79b   :  { %16302 = vrcp.f32 %v2367_v22 }
 0x79c   :  { %16304 = vrcp.f32 %v2358_v21 }
 0x79e   :  { %v2380_v23 = vpop.permute.xlu0 %2379  ;;  %v2428_v24 = vpop.permute.xlu1 %2427 }
 0x79f   :  { %14433 = vmatpush3.bf16.msra.mxu1 %v2380_v23  ;;  %14439 = vmatpush3.bf16.msra.mxu0 %v2428_v24 }
 0x7a0   :  { %14450 = vmatprep.subr.bf16.mxu0 %v17205_v38  ;;  %14444 = vmatprep.subr.bf16.mxu1 %v17205_v38 }
 0x7a2   :  { %v2477_v34 = vpop.permute.xlu1 %2476  ;;  %v2475_v56 = vpop.permute.xlu0 %2474 }
 0x7a3   :  { %v2482_v55 = vsel %vm1996_vm2, %v2477_v34, 0 }
 0x7a4   :  { %v16301_v26 = vpop.eup %16300 }
 0x7a5   :  { %v2374_v29 = vmul.f32 %v16301_v26, %v16293_v4 }
 0x7a8   :  { %v16303_v28 = vpop.eup %16302 }
 0x7a9   :  { %v2375_v30 = vmul.f32 %v16303_v28, %v16297_v10  ;;  %v16305_v45 = vpop.eup %16304 }
 0x7aa   :  { %v2372_v52 = vmul.f32 %v16305_v45, %v16295_v7 }
 0x7ab   :  { %v2377_v33 = vpack.c.bf16 %v2375_v30, %v2374_v29 }
 0x7ad   :  { %14441 = vmatmul.mubr.msk.bf16.vlgmr.msra.gmra.mxu0 %vm2091_vm3, %v2377_v33 }
 0x7ae   :  { %14452 = vmatprep.mubr.msk.bf16.mxu0 %vm17206_vm1, %v17205_v38 }
 0x7d3   :  { %v2361_v40 = vpop.xlane.xlu1 %2360 }
 0x7d4   :  { %16306 = vrcp.f32 %v2361_v40 }
 0x7d7   :  { %v2528_v42 = vpop.permute.xlu1 %2527 }
 0x7d8   :  { %v2533_v44 = vsel %vm1996_vm2, %v2528_v42, 0 }
 0x7d9   :  { %14451 = vmatpush3.bf16.xpose.msra.mxu0 %v2533_v44 }
 0x7da   :  { %14462 = vmatprep.subr.bf16.mxu0 %v17205_v38 }
 0x7db   :  { %v2526_v50 = vpop.permute.xlu1 %2525 }
 0x7e0   :  { %14453 = vmatmul.mubr.msk.bf16.vlgmr.msra.gmra.mxu0 %vm1996_vm2, %v2526_v50 }
 0x7e1   :  { %v16307_v51 = vpop.eup %16306  ;;  %14464 = vmatprep.mubr.msk.bf16.mxu0 %vm17206_vm1, %v17205_v38 }
 0x7e2   :  { %v2373_v53 = vmul.f32 %v16307_v51, %v16299_v18 }
 0x7e4   :  { %v2376_v54 = vpack.c.bf16 %v2373_v53, %v2372_v52 }
 0x7e6   :  { %14435 = vmatmul.mubr.msk.bf16.vlgmr.msra.gmra.mxu1 %vm2091_vm3, %v2376_v54 }
 0x7e7   :  { %14445 = vmatpush3.bf16.xpose.msra.mxu1 %v2482_v55  ;;  %14446 = vmatprep.mubr.msk.bf16.mxu1 %vm17206_vm1, %v17205_v38 }
 0x7e8   :  { %14456 = vmatprep.subr.bf16.mxu1 %v17205_v38 }
 0x7ee   :  { %14447 = vmatmul.mubr.msk.bf16.vlgmr.msra.gmra.mxu1 %vm1996_vm2, %v2475_v56 }
 0x7ef   :  { %14458 = vmatprep.mubr.msk.bf16.mxu1 %vm17206_vm1, %v17205_v38 }
 0x86d   :  { %v17644_v57 = vpop.f32.mrf.mxu0 }
 0x86f   :  { %v14442_v59 = vpop.f32.mrf.mxu0 }
 0x871   :  { %v17646_v60 = vpop.f32.mrf.mxu0 }
 0x872   :  { %v15490_v61 = vpack.i.bf16 %v17646_v60, %v17644_v57 }
 0x873   :  { %v14443_v63 = vpop.f32.mrf.mxu0 }
 0x8a0   :  { %v2569_v1 = vpop.f32.mrf.mxu0 }
 0x8a1   :  { %v2582_v19 = vsel %vm2091_vm3, %v2569_v1, -inf }
 0x8a2   :  { %v14454_v2 = vpop.f32.mrf.mxu0 }
 0x8a4   :  { %v2572_v3 = vpop.f32.mrf.mxu0 }
 0x8a5   :  { %v2585_v22 = vsel %vm2091_vm3, %v2572_v3, -inf }
 0x8a6   :  { %v17650_v4 = vpop.f32.mrf.mxu1  ;;  %v14455_v6 = vpop.f32.mrf.mxu0 }
 0x8a8   :  { %v14436_v7 = vpop.f32.mrf.mxu1 }
 0x8aa   :  { %v17652_v10 = vpop.f32.mrf.mxu1 }
 0x8ab   :  { %v15485_v11 = vpack.i.bf16 %v17652_v10, %v17650_v4 }
 0x8ac   :  { %v14437_v12 = vpop.f32.mrf.mxu1 }
 0x8ae   :  { %v2518_v13 = vpop.f32.mrf.mxu1 }
 0x8af   :  { %v2576_v14 = vsel %vm2091_vm3, %v2518_v13, -inf }
 0x8b0   :  { %2577 = vmax.xlane.f32.xlu0 %v2576_v14  ;;  %v14448_v15 = vpop.f32.mrf.mxu1 }
 0x8b2   :  { %v2521_v18 = vpop.f32.mrf.mxu1 }
 0x8b3   :  { %v2579_v20 = vsel %vm2091_vm3, %v2521_v18, -inf }
 0x8b4   :  { %2583 = vmax.xlane.f32.xlu0 %v2582_v19  ;;  %2580 = vmax.xlane.f32.xlu1 %v2579_v20  ;;  %v14449_v21 = vpop.f32.mrf.mxu1 }
 0x8b8   :  { %2586 = vmax.xlane.f32.xlu0 %v2585_v22 }
 0x939   :  { %v2578_v23 = vpop.xlane.xlu0 %2577 }
 0x93a   :  { %v2588_v24 = vsub.f32 %v2518_v13, %v2578_v23 }
 0x93c   :  { %v2592_v29 = vmul.f32 1.442695, %v2588_v24 }
 0x93d   :  { %v2584_v26 = vpop.xlane.xlu0 %2583  ;;  %v2581_v53 = vpop.xlane.xlu1 %2580 }
 0x93e   :  { %v2590_v28 = vsub.f32 %v2569_v1, %v2584_v26  ;;  %v2589_v54 = vsub.f32 %v2521_v18, %v2581_v53 }
 0x940   :  { %v2596_v30 = vmul.f32 1.442695, %v2590_v28  ;;  %v2594_v55 = vmul.f32 1.442695, %v2589_v54 }
 0x941   :  { %v2587_v33 = vpop.xlane.xlu0 %2586 }
 0x942   :  { %16308 = vpow2.f32 %v2596_v30  ;;  %v2591_v34 = vsub.f32 %v2572_v3, %v2587_v33 }
 0x943   :  { %16310 = vpow2.f32 %v2592_v29 }
 0x944   :  { %v2598_v40 = vmul.f32 1.442695, %v2591_v34 }
 0x946   :  { %16312 = vpow2.f32 %v2598_v40 }
 0x947   :  { %16314 = vpow2.f32 %v2594_v55 }
 0x94f   :  { %v16309_v42 = vpop.eup %16308 }
 0x950   :  { %v2606_v44 = vsel %vm2091_vm3, %v16309_v42, 0.0  ;;  %v16311_v45 = vpop.eup %16310 }
 0x951   :  { %2607 = vadd.xlane.f32.xlu0 %v2606_v44  ;;  %v2600_v51 = vsel %vm2091_vm3, %v16311_v45, 0.0 }
 0x953   :  { %v16313_v50 = vpop.eup %16312 }
 0x954   :  { %v2609_v52 = vsel %vm2091_vm3, %v16313_v50, 0.0  ;;  %v16315_v56 = vpop.eup %16314 }
 0x955   :  { %2601 = vadd.xlane.f32.xlu0 %v2600_v51  ;;  %2610 = vadd.xlane.f32.xlu1 %v2609_v52  ;;  %v2603_v59 = vsel %vm2091_vm3, %v16315_v56, 0.0 }
 0x966   :  { %2669 = vrot.lane.b32.xlu1 %v17538_v62, %s17173_s0 }
 0x96a   :  { %2718 = vrot.lane.b32.xlu1 %v17535_v58, %s17208_s4 }
 0x96b   :  { %2622 = vrot.lane.b32.xlu0 %v17556_v17, %s17173_s0 }
 0x96f   :  { %2716 = vrot.lane.b32.xlu0 %v17543_v8, %s17208_s4 }
 0x98e   :  { %2604 = vadd.xlane.f32.xlu1 %v2603_v59 }
 0x99f   :  { %2769 = vrot.lane.b32.xlu1 %v17545_v9, %s17208_s4 }
 0x9a3   :  { %2767 = vrot.lane.b32.xlu1 %v17554_v16, %s17208_s4 }
 0x9da   :  { %v2608_v58 = vpop.xlane.xlu0 %2607 }
 0x9db   :  { %16316 = vrcp.f32 %v2608_v58 }
 0x9de   :  { %v2602_v63 = vpop.xlane.xlu0 %2601  ;;  %v2611_v1 = vpop.xlane.xlu1 %2610 }
 0x9df   :  { %16318 = vrcp.f32 %v2611_v1 }
 0x9e0   :  { %16320 = vrcp.f32 %v2602_v63 }
 0x9e2   :  { %v2623_v8 = vpop.permute.xlu0 %2622  ;;  %v2670_v2 = vpop.permute.xlu1 %2669 }
 0x9e3   :  { %14457 = vmatpush3.bf16.msra.mxu1 %v2623_v8  ;;  %14463 = vmatpush3.bf16.msra.mxu0 %v2670_v2 }
 0x9e4   :  { %14474 = vmatprep.subr.bf16.mxu0 %v17205_v38  ;;  %14468 = vmatprep.subr.bf16.mxu1 %v17205_v38 }
 0x9e6   :  { %v2719_v16 = vpop.permute.xlu1 %2718  ;;  %v2717_v26 = vpop.permute.xlu0 %2716 }
 0x9e7   :  { %v2724_v24 = vsel %vm1996_vm2, %v2719_v16, 0 }
 0x9e8   :  { %v16317_v3 = vpop.eup %16316 }
 0x9e9   :  { %v2618_v7 = vmul.f32 %v16317_v3, %v16309_v42 }
 0x9ec   :  { %v16319_v6 = vpop.eup %16318 }
 0x9ed   :  { %v2619_v9 = vmul.f32 %v16319_v6, %v16313_v50  ;;  %v16321_v18 = vpop.eup %16320 }
 0x9ee   :  { %v2616_v21 = vmul.f32 %v16321_v18, %v16311_v45 }
 0x9ef   :  { %v2621_v12 = vpack.c.bf16 %v2619_v9, %v2618_v7 }
 0x9f1   :  { %14465 = vmatmul.mubr.msk.bf16.vlgmr.msra.gmra.mxu0 %vm2091_vm3, %v2621_v12 }
 0x9f2   :  { %14476 = vmatprep.mubr.msk.bf16.mxu0 %vm17206_vm1, %v17205_v38 }
 0xa17   :  { %v2605_v13 = vpop.xlane.xlu1 %2604 }
 0xa18   :  { %16322 = vrcp.f32 %v2605_v13 }
 0xa1b   :  { %v2770_v14 = vpop.permute.xlu1 %2769 }
 0xa1c   :  { %v2775_v15 = vsel %vm1996_vm2, %v2770_v14, 0 }
 0xa1d   :  { %14475 = vmatpush3.bf16.xpose.msra.mxu0 %v2775_v15 }
 0xa1e   :  { %14486 = vmatprep.subr.bf16.mxu0 %v17205_v38 }
 0xa1f   :  { %v2768_v19 = vpop.permute.xlu1 %2767 }
 0xa24   :  { %14477 = vmatmul.mubr.msk.bf16.vlgmr.msra.gmra.mxu0 %vm1996_vm2, %v2768_v19 }
 0xa25   :  { %v16323_v20 = vpop.eup %16322  ;;  %14488 = vmatprep.mubr.msk.bf16.mxu0 %vm17206_vm1, %v17205_v38 }
 0xa26   :  { %v2617_v22 = vmul.f32 %v16323_v20, %v16315_v56 }
 0xa28   :  { %v2620_v23 = vpack.c.bf16 %v2617_v22, %v2616_v21 }
 0xa2a   :  { %14459 = vmatmul.mubr.msk.bf16.vlgmr.msra.gmra.mxu1 %vm2091_vm3, %v2620_v23 }
 0xa2b   :  { %14469 = vmatpush3.bf16.xpose.msra.mxu1 %v2724_v24  ;;  %14470 = vmatprep.mubr.msk.bf16.mxu1 %vm17206_vm1, %v17205_v38 }
 0xa2c   :  { %14480 = vmatprep.subr.bf16.mxu1 %v17205_v38 }
 0xa32   :  { %14471 = vmatmul.mubr.msk.bf16.vlgmr.msra.gmra.mxu1 %vm1996_vm2, %v2717_v26 }
 0xa33   :  { %14482 = vmatprep.mubr.msk.bf16.mxu1 %vm17206_vm1, %v17205_v38 }
 0xab1   :  { %v2709_v28 = vpop.f32.mrf.mxu0 }
 0xab3   :  { %v14466_v29 = vpop.f32.mrf.mxu0 }
 0xab5   :  { %v2712_v30 = vpop.f32.mrf.mxu0 }
 0xab6   :  { %v15500_v33 = vpack.i.bf16 %v2712_v30, %v2709_v28 }
 0xab7   :  { %v14467_v34 = vpop.f32.mrf.mxu0 }
 0xae4   :  { %v2811_v40 = vpop.f32.mrf.mxu0 }
 0xae5   :  { %v2824_v63 = vsel %vm2091_vm3, %v2811_v40, -inf }
 0xae6   :  { %v14478_v42 = vpop.f32.mrf.mxu0 }
 0xae8   :  { %v2814_v44 = vpop.f32.mrf.mxu0 }
 0xae9   :  { %v2827_v2 = vsel %vm2091_vm3, %v2814_v44, -inf }
 0xaea   :  { %v2662_v45 = vpop.f32.mrf.mxu1  ;;  %v14479_v50 = vpop.f32.mrf.mxu0 }
 0xaec   :  { %v14460_v51 = vpop.f32.mrf.mxu1 }
 0xaee   :  { %v2665_v52 = vpop.f32.mrf.mxu1 }
 0xaef   :  { %v15495_v53 = vpack.i.bf16 %v2665_v52, %v2662_v45  ;;  %v15869_v52 = vld [vmem:[#allocation10 + $0x38] sm:$0xff]  }
 0xaf0   :  { %v14461_v54 = vpop.f32.mrf.mxu1 }
 0xaf1   :  { %v15871_v54 = vld [vmem:[#allocation10 + $0x28] sm:$0xff]  }
 0xaf2   :  { %v2760_v55 = vpop.f32.mrf.mxu1 }
 0xaf3   :  { %v2818_v56 = vsel %vm2091_vm3, %v2760_v55, -inf }
 0xaf4   :  { %2819 = vmax.xlane.f32.xlu0 %v2818_v56  ;;  %v14472_v59 = vpop.f32.mrf.mxu1  ;;  %v15873_v56 = vld [vmem:[#allocation10 + $0x18] sm:$0xff]  }
 0xaf5   :  { %v15874_v59 = vld [vmem:[#allocation10 + $0x10] sm:$0xff]  }
 0xaf6   :  { %v2763_v58 = vpop.f32.mrf.mxu1 }
 0xaf7   :  { %v2821_v1 = vsel %vm2091_vm3, %v2763_v58, -inf }
 0xaf8   :  { %2825 = vmax.xlane.f32.xlu0 %v2824_v63  ;;  %2822 = vmax.xlane.f32.xlu1 %v2821_v1  ;;  %v14473_v8 = vpop.f32.mrf.mxu1  ;;  %v15876_v63 = vld [vmem:[#allocation10] sm:$0xff]  }
 0xaf9   :  { %v17719_v8 = vld [vmem:[#allocation13 + $0x38] sm:$0xff]  }
 0xafc   :  { %2828 = vmax.xlane.f32.xlu0 %v2827_v2 }
 0xb7d   :  { %v2820_v3 = vpop.xlane.xlu0 %2819 }
 0xb7e   :  { %v2830_v6 = vsub.f32 %v2760_v55, %v2820_v3  ;;  %v15872_v55 = vld [vmem:[#allocation10 + $0x20] sm:$0xff]  }
 0xb80   :  { %v2834_v16 = vmul.f32 1.442695, %v2830_v6 }
 0xb81   :  { %v2826_v7 = vpop.xlane.xlu0 %2825  ;;  %v2823_v9 = vpop.xlane.xlu1 %2822 }
 0xb82   :  { %v2832_v12 = vsub.f32 %v2811_v40, %v2826_v7  ;;  %v2831_v14 = vsub.f32 %v2763_v58, %v2823_v9  ;;  %v15875_v58 = vld [vmem:[#allocation10 + $0x8] sm:$0xff]  }
 0xb84   :  { %v2838_v13 = vmul.f32 1.442695, %v2832_v12  ;;  %v2836_v19 = vmul.f32 1.442695, %v2831_v14 }
 0xb85   :  { %v2829_v15 = vpop.xlane.xlu0 %2828 }
 0xb86   :  { %16324 = vpow2.f32 %v2838_v13  ;;  %v2833_v18 = vsub.f32 %v2814_v44, %v2829_v15  ;;  %v15885_v15 = vld [vmem:[#allocation16 + $0x70] ss:$8 sps:$4 sm:$0xff]  }
 0xb87   :  { %16326 = vpow2.f32 %v2834_v16 }
 0xb88   :  { %v2840_v20 = vmul.f32 1.442695, %v2833_v18  ;;  %v15887_v18 = vld [vmem:[#allocation16 + $0x74] ss:$8 sps:$4 sm:$0xff]  }
 0xb8a   :  { %16328 = vpow2.f32 %v2840_v20  ;;  %v15888_v20 = vld [vmem:[#allocation16 + $0x60] ss:$8 sps:$4 sm:$0xff]  }
 0xb8b   :  { %16330 = vpow2.f32 %v2836_v19  ;;  %v15890_v19 = vld [vmem:[#allocation16 + $0x64] ss:$8 sps:$4 sm:$0xff]  }
 0xb93   :  { %v16325_v21 = vpop.eup %16324 }
 0xb94   :  { %v2848_v22 = vsel %vm2091_vm3, %v16325_v21, 0.0  ;;  %v16327_v23 = vpop.eup %16326 }
 0xb95   :  { %2849 = vadd.xlane.f32.xlu0 %v2848_v22  ;;  %v2842_v26 = vsel %vm2091_vm3, %v16327_v23, 0.0  ;;  %v15891_v22 = vld [vmem:[#allocation16 + $0x50] ss:$8 sps:$4 sm:$0xff]  }
 0xb97   :  { %v16329_v24 = vpop.eup %16328 }
 0xb98   :  { %v2851_v28 = vsel %vm2091_vm3, %v16329_v24, 0.0  ;;  %v16331_v29 = vpop.eup %16330 }
 0xb99   :  { %2843 = vadd.xlane.f32.xlu0 %v2842_v26  ;;  %2852 = vadd.xlane.f32.xlu1 %v2851_v28  ;;  %v2845_v30 = vsel %vm2091_vm3, %v16331_v29, 0.0  ;;  %v15899_v26 = vld [vmem:[#allocation16 + $0x34] ss:$8 sps:$4 sm:$0xff]   ;;  %v15897_v28 = vld [vmem:[#allocation16 + $0x30] ss:$8 sps:$4 sm:$0xff]  }
 0xb9d   :  { %2846 = vadd.xlane.f32.xlu1 %v2845_v30  ;;  %v15900_v30 = vld [vmem:[#allocation16 + $0x20] ss:$8 sps:$4 sm:$0xff]  }
 0xbae   :  { %2911 = vrot.lane.b32.xlu1 %v17538_v62, %s17208_s4 }
 0xbaf   :  { %2864 = vrot.lane.b32.xlu0 %v17556_v17, %s17208_s4 }
 0xbb2   :  { %15486 = vrot.lane.b32.xlu1 %v15485_v11, %s17208_s4 }
 0xbb3   :  { %15496 = vrot.lane.b32.xlu0 %v15495_v53, %s17173_s0  ;;  %v15870_v53 = vld [vmem:[#allocation10 + $0x30] sm:$0xff]  }
 0xbb6   :  { %15491 = vrot.lane.b32.xlu1 %v15490_v61, %s17208_s4 }
 0xbba   :  { %15501 = vrot.lane.b32.xlu1 %v15500_v33, %s17173_s0 }
 0xc1e   :  { %v2850_v34 = vpop.xlane.xlu0 %2849 }
 0xc1f   :  { %16332 = vrcp.f32 %v2850_v34 }
 0xc22   :  { %v2844_v62 = vpop.xlane.xlu0 %2843  ;;  %v2853_v40 = vpop.xlane.xlu1 %2852 }
 0xc23   :  { %16334 = vrcp.f32 %v2853_v40 }
 0xc24   :  { %16336 = vrcp.f32 %v2844_v62 }
 0xc26   :  { %v2865_v17 = vpop.permute.xlu0 %2864  ;;  %v2847_v42 = vpop.xlane.xlu1 %2846 }
 0xc27   :  { %16338 = vrcp.f32 %v2847_v42  ;;  %14481 = vmatpush3.bf16.msra.mxu1 %v2865_v17 }
 0xc28   :  { %14492 = vmatprep.subr.bf16.mxu1 %v15869_v52 }
 0xc2a   :  { %v2912_v4 = vpop.permute.xlu1 %2911 }
 0xc2b   :  { %14487 = vmatpush3.bf16.msra.mxu0 %v2912_v4  ;;  %v15497_v4 = vpop.permute.xlu0 %15496 }
 0xc2c   :  { %v16333_v10 = vpop.eup %16332  ;;  %3235 = vmatprep.subr.bf16.mxu0 %v15887_v18  ;;  %v15908_v18 = vld [vmem:[#allocation16 + $0x4] ss:$8 sps:$4 sm:$0xff]  }
 0xc2d   :  { %v2860_v45 = vmul.f32 %v16333_v10, %v16325_v21  ;;  %v15893_v21 = vld [vmem:[#allocation16 + $0x54] ss:$8 sps:$4 sm:$0xff]  }
 0xc2e   :  { %v15487_v34 = vpop.permute.xlu1 %15486 }
 0xc2f   :  { %v15489_v17 = vunpack.i.h.bf16 %v15487_v34  ;;  %v15488_v42 = vunpack.i.l.bf16 %v15487_v34 }
 0xc30   :  { %v16335_v11 = vpop.eup %16334 }
 0xc31   :  { %v16337_v44 = vpop.eup %16336  ;;  %v2861_v57 = vmul.f32 %v16335_v11, %v16329_v24  ;;  %v15894_v24 = vld [vmem:[#allocation16 + $0x40] ss:$8 sps:$4 sm:$0xff]  }
 0xc32   :  { %v2858_v33 = vmul.f32 %v16337_v44, %v16327_v23  ;;  %v15896_v23 = vld [vmem:[#allocation16 + $0x44] ss:$8 sps:$4 sm:$0xff]   ;;  %v15492_v62 = vpop.permute.xlu1 %15491 }
 0xc33   :  { %v2863_v61 = vpack.c.bf16 %v2861_v57, %v2860_v45  ;;  %v15494_v10 = vunpack.i.h.bf16 %v15492_v62  ;;  %v15493_v11 = vunpack.i.l.bf16 %v15492_v62 }
 0xc34   :  { %v16339_v60 = vpop.eup %16338 }
 0xc35   :  { %v2859_v50 = vmul.f32 %v16339_v60, %v16331_v29  ;;  %14489 = vmatmul.mubr.msk.bf16.vlgmr.msra.gmra.mxu0 %vm2091_vm3, %v2863_v61  ;;  %v15902_v29 = vld [vmem:[#allocation16 + $0x24] ss:$8 sps:$4 sm:$0xff]  }
 0xc36   :  { %3267 = vmatprep.mubr.bf16.mxu0 %v17204_v32  ;;  %3236 = vmatpush1.bf16.msra.mxu0 %v15885_v15  ;;  %v15502_v40 = vpop.permute.xlu1 %15501  ;;  %v15884_v15 = vld [vmem:[#allocation13] sm:$0xff]  }
 0xc37   :  { %v2862_v51 = vpack.c.bf16 %v2859_v50, %v2858_v33  ;;  %3237 = vmatprep.subr.bf16.mxu0 %v15890_v19  ;;  %v15504_v44 = vunpack.i.h.bf16 %v15502_v40  ;;  %v15503_v45 = vunpack.i.l.bf16 %v15502_v40  ;;  %v3007_v33 = vsel %vm1996_vm2, %v17600_v27, %v15489_v17  ;;  %v15906_v19 = vld [vmem:[#allocation16] ss:$8 sps:$4 sm:$0xff]   ;;  %v3141_v40 = vld [vmem:[%s19168_s27] sm:$0x3] }
 0xc38   :  { %v3006_v50 = vsel %vm1996_vm2, %v17598_v25, %v15488_v42 }
 0xc39   :  { %14483 = vmatmul.mubr.msk.bf16.vlgmr.msra.gmra.mxu1 %vm2091_vm3, %v2862_v51  ;;  %v15499_v51 = vunpack.i.h.bf16 %v15497_v4 }
 0xc3a   :  { %14493 = vmatpush3.bf16.msra.mxu1 %v15869_v52  ;;  %3238 = vmatpush1.bf16.msra.mxu0 %v15888_v20  ;;  %v15498_v52 = vunpack.i.l.bf16 %v15497_v4  ;;  %v3148_v4 = vrot.slane %v3141_v40, %v17501_v46 }
 0xc3b   :  { %14494 = vmatprep.subr.bf16.mxu1 %v15870_v53  ;;  %3239 = vmatprep.subr.bf16.mxu0 %v15893_v21 }
 0xc3e   :  { %14495 = vmatpush3.bf16.msra.mxu1 %v15870_v53  ;;  %3240 = vmatpush1.bf16.msra.mxu0 %v15891_v22  ;;  %v3009_v53 = vsel %vm1996_vm2, %v17604_v41, %v15494_v10 }
 0xc3f   :  { %14496 = vmatprep.subr.bf16.mxu1 %v15871_v54  ;;  %3241 = vmatprep.subr.bf16.mxu0 %v15896_v23  ;;  %v13235_v23 = vld [vmem:[#allocation12] ss:$0 sm:$0xff] }
 0xc42   :  { %14497 = vmatpush3.bf16.msra.mxu1 %v15871_v54  ;;  %3242 = vmatpush1.bf16.msra.mxu0 %v15894_v24  ;;  %v3008_v54 = vsel %vm1996_vm2, %v17602_v39, %v15493_v11 }
 0xc43   :  { %14498 = vmatprep.subr.bf16.mxu1 %v15872_v55  ;;  %3243 = vmatprep.subr.bf16.mxu0 %v15899_v26 }
 0xc46   :  { %14499 = vmatpush3.bf16.msra.mxu1 %v15872_v55  ;;  %3244 = vmatpush1.bf16.msra.mxu0 %v15897_v28 }
 0xc47   :  { %14500 = vmatprep.subr.bf16.mxu1 %v15873_v56  ;;  %3245 = vmatprep.subr.bf16.mxu0 %v15902_v29 }
 0xc4a   :  { %14501 = vmatpush3.bf16.msra.mxu1 %v15873_v56  ;;  %3246 = vmatpush1.bf16.msra.mxu0 %v15900_v30  ;;  %v3013_v56 = vsel %vm3010_vm4, %v3008_v54, %v15503_v45 }
 0xc4b   :  { %14502 = vmatprep.subr.bf16.mxu1 %v15874_v59 }
 0xc4e   :  { %14503 = vmatpush3.bf16.msra.mxu1 %v15874_v59  ;;  %v3014_v59 = vsel %vm3010_vm4, %v3009_v53, %v15504_v44 }
 0xc4f   :  { %14504 = vmatprep.subr.bf16.mxu1 %v15875_v58 }
 0xc52   :  { %14505 = vmatpush3.bf16.msra.mxu1 %v15875_v58 }
 0xc53   :  { %14506 = vmatprep.subr.bf16.mxu1 %v15876_v63 }
 0xc56   :  { %14507 = vmatpush3.bf16.msra.mxu1 %v15876_v63 }
 0xc57   :  { %14512 = vmatprep.subr.bf16.mxu1 %v17719_v8 }
 0xcf5   :  { %v2951_v1 = vpop.f32.mrf.mxu0 }
 0xcf7   :  { %v14490_v2 = vpop.f32.mrf.mxu0 }
 0xcf8   :  { %v3012_v2 = vsel %vm3010_vm4, %v3007_v33, %v15499_v51 }
 0xcf9   :  { %v2904_v3 = vpop.f32.mrf.mxu1  ;;  %v2954_v6 = vpop.f32.mrf.mxu0 }
 0xcfa   :  { %v15510_v7 = vpack.i.bf16 %v2954_v6, %v2951_v1  ;;  %v3011_v1 = vsel %vm3010_vm4, %v3006_v50, %v15498_v52  ;;  %v13260_v52 = vld [vmem:[#allocation15] ss:$0 sm:$0xff] }
 0xcfb   :  { %v14484_v9 = vpop.f32.mrf.mxu1  ;;  %v14491_v12 = vpop.f32.mrf.mxu0 }
 0xcfc   :  { %15511 = vrot.lane.b32.xlu1 %v15510_v7, %s17207_s6  ;;  %v15878_v7 = vld [vmem:[#allocation13 + $0x30] sm:$0xff]   ;;  %v15879_v9 = vld [vmem:[#allocation13 + $0x28] sm:$0xff]   ;;  %v15880_v12 = vld [vmem:[#allocation13 + $0x20] sm:$0xff]  }
 0xcfd   :  { %v2907_v16 = vpop.f32.mrf.mxu1 }
 0xcfe   :  { %v15505_v13 = vpack.i.bf16 %v2907_v16, %v2904_v3  ;;  %v15881_v16 = vld [vmem:[#allocation13 + $0x18] sm:$0xff]  }
 0xcff   :  { %v14485_v14 = vpop.f32.mrf.mxu1 }
 0xd00   :  { %15506 = vrot.lane.b32.xlu0 %v15505_v13, %s17207_s6  ;;  %v15882_v13 = vld [vmem:[#allocation13 + $0x10] sm:$0xff]   ;;  %v15883_v14 = vld [vmem:[#allocation13 + $0x8] sm:$0xff]  }
 0xd6e   :  { %v15512_v57 = vpop.permute.xlu1 %15511 }
 0xd6f   :  { %v15514_v60 = vunpack.i.h.bf16 %v15512_v57  ;;  %v15513_v61 = vunpack.i.l.bf16 %v15512_v57 }
 0xd71   :  { %v3018_v63 = vsel %vm3015_vm5, %v3013_v56, %v15513_v61  ;;  %v3019_v25 = vsel %vm3015_vm5, %v3014_v59, %v15514_v60  ;;  %v3152_v59 = vrot.slane %v3141_v40, %v17492_v35 }
 0xd72   :  { %v15507_v55 = vpop.permute.xlu0 %15506  ;;  %v3021_v6 = vpack.c.bf16 %v3019_v25, %v3018_v63 }
 0xd73   :  { %v15509_v58 = vunpack.i.h.bf16 %v15507_v55  ;;  %v15508_v27 = vunpack.i.l.bf16 %v15507_v55 }
 0xd75   :  { %v3016_v41 = vsel %vm3015_vm5, %v3011_v1, %v15508_v27  ;;  %v3017_v3 = vsel %vm3015_vm5, %v3012_v2, %v15509_v58 }
 0xd76   :  { %v3020_v39 = vpack.c.bf16 %v3017_v3, %v3016_v41 }
 0xd78   :  { %14508 = vmatprep.mubr.bf16.mxu1 %v3020_v39 }
 0xd79   :  { %14509 = vmatmul.mubr.bf16.vlgmr.msra.gmra.mxu1 %v3021_v6 }
 0xd7a   :  { %14513 = vmatpush3.bf16.msra.mxu1 %v17719_v8  ;;  %14528 = vmatprep.mubr.bf16.mxu1 %v17517_v31  ;;  %v15905_v31 = vld [vmem:[#allocation16 + $0x14] ss:$8 sps:$4 sm:$0xff]   ;;  %v15903_v8 = vld [vmem:[#allocation16 + $0x10] ss:$8 sps:$4 sm:$0xff]  }
 0xd7b   :  { %14514 = vmatprep.subr.bf16.mxu1 %v15878_v7  ;;  %3247 = vmatprep.subr.bf16.mxu0 %v15905_v31 }
 0xd7c   :  { %3248 = vmatpush1.bf16.msra.mxu0 %v15903_v8 }
 0xd7d   :  { %3249 = vmatprep.subr.bf16.mxu0 %v15908_v18 }
 0xd7e   :  { %14515 = vmatpush3.bf16.msra.mxu1 %v15878_v7 }
 0xd7f   :  { %14516 = vmatprep.subr.bf16.mxu1 %v15879_v9 }
 0xd80   :  { %3250 = vmatpush1.bf16.msra.mxu0 %v15906_v19 }
 0xd81   :  { %14532 = vmatprep.subr.bf16.mxu0 %v17205_v38 }
 0xd82   :  { %14517 = vmatpush3.bf16.msra.mxu1 %v15879_v9 }
 0xd83   :  { %14518 = vmatprep.subr.bf16.mxu1 %v15880_v12 }
 0xd86   :  { %14519 = vmatpush3.bf16.msra.mxu1 %v15880_v12 }
 0xd87   :  { %14520 = vmatprep.subr.bf16.mxu1 %v15881_v16 }
 0xd8a   :  { %14521 = vmatpush3.bf16.msra.mxu1 %v15881_v16 }
 0xd8b   :  { %14522 = vmatprep.subr.bf16.mxu1 %v15882_v13 }
 0xd8e   :  { %14523 = vmatpush3.bf16.msra.mxu1 %v15882_v13 }
 0xd8f   :  { %14524 = vmatprep.subr.bf16.mxu1 %v15883_v14 }
 0xd92   :  { %14525 = vmatpush3.bf16.msra.mxu1 %v15883_v14 }
 0xd93   :  { %14526 = vmatprep.subr.bf16.mxu1 %v15884_v15 }
 0xd96   :  { %14527 = vmatpush3.bf16.msra.mxu1 %v15884_v15 }
 0xd97   :  { %14550 = vmatprep.subr.bf16.mxu1 %v17205_v38 }
 0xd99   :  { %14529 = vmatmul.mubr.bf16.vlgmr.msra.gmra.mxu1 %v17523_v36 }
 0xd9a   :  { %14552 = vmatprep.mubr.msk.bf16.mxu1 %vm17206_vm1, %v17205_v38 }
 0xe39   :  { %v14510_v20 = vpop.f32.mrf.mxu1 }
 0xe3a   :  { %v3119_v30 = vadd.f32 %v14510_v20, %v13235_v23 }
 0xe3b   :  { %v3110_v21 = vpop.f32.mrf.mxu1 }
 0xe3c   :  { %v3111_v36 = vadd.f32 %v13235_v23, %v3110_v21 }
 0xe3d   :  { %v14511_v22 = vpop.f32.mrf.mxu1 }
 0xe3e   :  { %v3122_v29 = vadd.f32 %v14511_v22, %v13235_v23 }
 0xe3f   :  { %v3113_v24 = vpop.f32.mrf.mxu1 }
 0xe40   :  { %v3114_v26 = vadd.f32 %v13235_v23, %v3113_v24  ;;  %v3143_v34 = vpack.c.bf16 %v3122_v29, %v3119_v30 }
 0xe42   :  { %v3142_v28 = vpack.c.bf16 %v3114_v26, %v3111_v36 }
 0xe44   :  { %3268 = vmatmul.mubr.bf16.vlgmr.msra.gmra.mxu0 %v3142_v28 }
 0xe45   :  { %3277 = vmatprep.mubr.bf16.mxu0 %v17204_v32 }
 0xe4c   :  { %3278 = vmatmul.mubr.bf16.gmra.mxu0 %v3143_v34 }
 0xe4d   :  { %14534 = vmatprep.mubr.msk.bf16.mxu0 %vm17206_vm1, %v17205_v38 }
 0xe59   :  { %v14530_v62 = vpop.f32.mrf.mxu1 }
 0xe5a   :  { %v3406_v9 = vadd.f32 %v14530_v62, %v13260_v52 }
 0xe5b   :  { %v3397_v17 = vpop.f32.mrf.mxu1 }
 0xe5c   :  { %v3398_v56 = vadd.f32 %v13260_v52, %v3397_v17 }
 0xe5d   :  { %v14531_v11 = vpop.f32.mrf.mxu1 }
 0xe5e   :  { %v3409_v6 = vadd.f32 %v14531_v11, %v13260_v52 }
 0xe5f   :  { %v3400_v33 = vpop.f32.mrf.mxu1 }
 0xe60   :  { %v3401_v54 = vadd.f32 %v13260_v52, %v3400_v33  ;;  %v17773_v16 = vpack.c.bf16 %v3409_v6, %v3406_v9 }
 0xe62   :  { %v17758_v25 = vpack.c.bf16 %v3401_v54, %v3398_v56 }
 0xf04   :  { %v3269_v42 = vpop.f32.mrf.mxu0 }
 0xf05   :  { %v3270_v45 = vadd.f32 %v3269_v42, %v3148_v4 }
 0xf06   :  { %v3271_v10 = vpop.f32.mrf.mxu0 }
 0xf07   :  { %v3272_v12 = vadd.f32 %v3271_v10, %v3152_v59 }
 0xf08   :  { %v3273_v44 = vpop.f32.mrf.mxu0 }
 0xf09   :  { %v3274_v57 = vadd.f32 %v3273_v44, %v3148_v4 }
 0xf0a   :  { %v3275_v60 = vpop.f32.mrf.mxu0 }
 0xf0b   :  { %v17752_v61 = vpack.c.bf16 %v3274_v57, %v3270_v45  ;;  %v3276_v7 = vadd.f32 %v3275_v60, %v3152_v59 }
 0xf0c   :  { %v3279_v50 = vpop.f32.mrf.mxu0 }
 0xf0d   :  { %v3435_v51 = vsel %vm1996_vm2, %v17752_v61, 0  ;;  %v3280_v58 = vadd.f32 %v3279_v50, %v3148_v4  ;;  %v17775_v13 = vpack.c.bf16 %v3276_v7, %v3272_v12 }
 0xf0e   :  { %v3281_v53 = vpop.f32.mrf.mxu0  ;;  %14533 = vmatpush3.bf16.xpose.msra.mxu0 %v3435_v51 }
 0xf0f   :  { %14538 = vmatprep.subr.bf16.mxu0 %v17205_v38  ;;  %v3282_v1 = vadd.f32 %v3281_v53, %v3152_v59 }
 0xf10   :  { %v3283_v55 = vpop.f32.mrf.mxu0 }
 0xf11   :  { %v3284_v27 = vadd.f32 %v3283_v55, %v3148_v4 }
 0xf12   :  { %v3285_v63 = vpop.f32.mrf.mxu0 }
 0xf13   :  { %v17760_v2 = vpack.c.bf16 %v3284_v27, %v3280_v58  ;;  %v3286_v41 = vadd.f32 %v3285_v63, %v3152_v59 }
 0xf15   :  { %v17762_v3 = vpack.c.bf16 %v3286_v41, %v3282_v1  ;;  %14535 = vmatmul.mubr.msk.bf16.vlgmr.msra.gmra.mxu0 %vm1996_vm2, %v17758_v25  ;;  %v3482_v39 = vsel %vm1996_vm2, %v17760_v2, 0 }
 0xf16   :  { %14539 = vmatpush3.bf16.xpose.msra.mxu0 %v3482_v39  ;;  %14540 = vmatprep.mubr.msk.bf16.mxu0 %vm17206_vm1, %v17205_v38 }
 0xf17   :  { %14551 = vmatpush3.bf16.msra.mxu1 %v17762_v3  ;;  %14544 = vmatprep.subr.bf16.mxu0 %v17205_v38 }
 0xf18   :  { %14562 = vmatprep.subr.bf16.mxu1 %v17205_v38 }
 0xf1d   :  { %14541 = vmatmul.mubr.msk.bf16.vlgmr.msra.gmra.mxu0 %vm1996_vm2, %v17773_v16 }
 0xf1e   :  { %14545 = vmatpush3.bf16.msra.mxu0 %v17775_v13  ;;  %14546 = vmatprep.mubr.msk.bf16.mxu0 %vm17206_vm1, %v17205_v38 }
 0xf1f   :  { %14556 = vmatprep.subr.bf16.mxu0 %v17205_v38 }
 0xfd5   :  { %v3471_v14 = vpop.f32.mrf.mxu0 }
 0xfd6   :  { %v3525_v15 = vsel %vm2091_vm3, %v3471_v14, -inf }
 0xfd7   :  { %3526 = vmax.xlane.f32.xlu0 %v3525_v15  ;;  %v14536_v31 = vpop.f32.mrf.mxu0 }
 0xfd9   :  { %v3474_v8 = vpop.f32.mrf.mxu0 }
 0xfda   :  { %v3528_v18 = vsel %vm2091_vm3, %v3474_v8, -inf }
 0xfdb   :  { %3529 = vmax.xlane.f32.xlu1 %v3528_v18  ;;  %v14537_v19 = vpop.f32.mrf.mxu0 }
 0xfdd   :  { %v3518_v20 = vpop.f32.mrf.mxu0 }
 0xfde   :  { %v3531_v21 = vsel %vm2091_vm3, %v3518_v20, -inf }
 0xfdf   :  { %3532 = vmax.xlane.f32.xlu0 %v3531_v21  ;;  %v14542_v22 = vpop.f32.mrf.mxu0 }
 0xfe1   :  { %v3521_v23 = vpop.f32.mrf.mxu0 }
 0xfe2   :  { %v3534_v24 = vsel %vm2091_vm3, %v3521_v23, -inf }
 0xfe3   :  { %3535 = vmax.xlane.f32.xlu0 %v3534_v24  ;;  %v14543_v36 = vpop.f32.mrf.mxu0 }
0x1060   :  { %v3527_v26 = vpop.xlane.xlu0 %3526 }
0x1061   :  { %v3537_v28 = vsub.f32 %v3471_v14, %v3527_v26 }
0x1063   :  { %v3541_v29 = vmul.f32 1.442695, %v3537_v28 }
0x1064   :  { %v3530_v30 = vpop.xlane.xlu1 %3529 }
0x1065   :  { %16340 = vpow2.f32 %v3541_v29  ;;  %v3538_v34 = vsub.f32 %v3474_v8, %v3530_v30 }
0x1067   :  { %v3543_v62 = vmul.f32 1.442695, %v3538_v34 }
0x1068   :  { %v3533_v40 = vpop.xlane.xlu0 %3532 }
0x1069   :  { %16342 = vpow2.f32 %v3543_v62  ;;  %v3539_v17 = vsub.f32 %v3518_v20, %v3533_v40 }
0x106b   :  { %v3545_v42 = vmul.f32 1.442695, %v3539_v17 }
0x106c   :  { %v3536_v60 = vpop.xlane.xlu0 %3535 }
0x106d   :  { %16344 = vpow2.f32 %v3545_v42  ;;  %v3540_v33 = vsub.f32 %v3521_v23, %v3536_v60 }
0x106f   :  { %v3547_v50 = vmul.f32 1.442695, %v3540_v33 }
0x1071   :  { %16346 = vpow2.f32 %v3547_v50 }
0x1072   :  { %v16341_v4 = vpop.eup %16340 }
0x1073   :  { %v3549_v10 = vsel %vm2091_vm3, %v16341_v4, 0.0 }
0x1074   :  { %3550 = vadd.xlane.f32.xlu0 %v3549_v10 }
0x1076   :  { %v16343_v11 = vpop.eup %16342 }
0x1077   :  { %v3552_v44 = vsel %vm2091_vm3, %v16343_v11, 0.0 }
0x1078   :  { %3553 = vadd.xlane.f32.xlu1 %v3552_v44 }
0x107a   :  { %v16345_v45 = vpop.eup %16344 }
0x107b   :  { %v3555_v57 = vsel %vm2091_vm3, %v16345_v45, 0.0 }
0x107c   :  { %3556 = vadd.xlane.f32.xlu0 %v3555_v57 }
0x107e   :  { %v16347_v51 = vpop.eup %16346 }
0x107f   :  { %v3558_v52 = vsel %vm2091_vm3, %v16347_v51, 0.0 }
0x1089   :  { %3716 = vrot.lane.b32.xlu1 %v17760_v2, %s17207_s6 }
0x1092   :  { %3663 = vrot.lane.b32.xlu0 %v17752_v61, %s17207_s6 }
0x10ad   :  { %3559 = vadd.xlane.f32.xlu1 %v3558_v52 }
0x10be   :  { %3660 = vrot.lane.b32.xlu1 %v17758_v25, %s17207_s6 }
0x10c2   :  { %3713 = vrot.lane.b32.xlu1 %v17773_v16, %s17207_s6 }
0x10fd   :  { %v3551_v53 = vpop.xlane.xlu0 %3550 }
0x10fe   :  { %16348 = vrcp.f32 %v3551_v53 }
0x1101   :  { %v3554_v54 = vpop.xlane.xlu1 %3553 }
0x1102   :  { %16350 = vrcp.f32 %v3554_v54 }
0x1105   :  { %v3557_v55 = vpop.xlane.xlu0 %3556  ;;  %v3717_v39 = vpop.permute.xlu1 %3716 }
0x1106   :  { %16352 = vrcp.f32 %v3557_v55  ;;  %v3722_v8 = vsel %vm1996_vm2, %v3717_v39, 0 }
0x1109   :  { %v3664_v63 = vpop.permute.xlu0 %3663 }
0x110a   :  { %v3669_v41 = vsel %vm1996_vm2, %v3664_v63, 0 }
0x110b   :  { %v16349_v56 = vpop.eup %16348 }
0x110c   :  { %v3565_v58 = vmul.f32 %v16349_v56, %v16341_v4 }
0x110f   :  { %v16351_v59 = vpop.eup %16350 }
0x1110   :  { %v3566_v27 = vmul.f32 %v16351_v59, %v16343_v11 }
0x1112   :  { %v3569_v1 = vpack.c.bf16 %v3566_v27, %v3565_v58 }
0x1113   :  { %v16353_v9 = vpop.eup %16352 }
0x1114   :  { %14547 = vmatmul.mubr.msk.bf16.vlgmr.msra.gmra.mxu0 %vm2091_vm3, %v3569_v1  ;;  %v3567_v14 = vmul.f32 %v16353_v9, %v16345_v45 }
0x1115   :  { %14557 = vmatpush3.bf16.xpose.msra.mxu0 %v3669_v41  ;;  %14558 = vmatprep.mubr.msk.bf16.mxu0 %vm17206_vm1, %v17205_v38 }
0x1116   :  { %14568 = vmatprep.subr.bf16.mxu0 %v17205_v38 }
0x1136   :  { %v3560_v6 = vpop.xlane.xlu1 %3559 }
0x1137   :  { %16354 = vrcp.f32 %v3560_v6 }
0x113a   :  { %v3661_v7 = vpop.permute.xlu1 %3660 }
0x113b   :  { %14559 = vmatmul.mubr.msk.bf16.vlgmr.msra.gmra.mxu0 %vm1996_vm2, %v3661_v7 }
0x113c   :  { %14570 = vmatprep.mubr.msk.bf16.mxu0 %vm17206_vm1, %v17205_v38 }
0x113e   :  { %v3714_v18 = vpop.permute.xlu1 %3713 }
0x1144   :  { %v16355_v12 = vpop.eup %16354 }
0x1145   :  { %v3568_v15 = vmul.f32 %v16355_v12, %v16347_v51 }
0x1147   :  { %v3570_v31 = vpack.c.bf16 %v3568_v15, %v3567_v14 }
0x1149   :  { %14553 = vmatmul.mubr.msk.bf16.vlgmr.msra.gmra.mxu1 %vm2091_vm3, %v3570_v31 }
0x114a   :  { %14563 = vmatpush3.bf16.xpose.msra.mxu1 %v3722_v8  ;;  %14564 = vmatprep.mubr.msk.bf16.mxu1 %vm17206_vm1, %v17205_v38 }
0x114b   :  { %14574 = vmatprep.subr.bf16.mxu1 %v17205_v38 }
0x1151   :  { %14565 = vmatmul.mubr.msk.bf16.vlgmr.msra.gmra.mxu1 %vm1996_vm2, %v3714_v18 }
0x1152   :  { %14576 = vmatprep.mubr.msk.bf16.mxu1 %vm17206_vm1, %v17205_v38 }
0x11d4   :  { %v17815_v19 = vpop.f32.mrf.mxu0 }
0x11d6   :  { %v14548_v20 = vpop.f32.mrf.mxu0 }
0x11d8   :  { %v17817_v21 = vpop.f32.mrf.mxu0 }
0x11da   :  { %v14549_v22 = vpop.f32.mrf.mxu0 }
0x11fb   :  { %v3705_v23 = vpop.f32.mrf.mxu0 }
0x11fc   :  { %v3765_v24 = vsel %vm2091_vm3, %v3705_v23, -inf }
0x11fd   :  { %3766 = vmax.xlane.f32.xlu0 %v3765_v24  ;;  %v14560_v36 = vpop.f32.mrf.mxu0 }
0x11ff   :  { %v3708_v26 = vpop.f32.mrf.mxu0 }
0x1200   :  { %v3768_v28 = vsel %vm2091_vm3, %v3708_v26, -inf }
0x1201   :  { %3769 = vmax.xlane.f32.xlu1 %v3768_v28  ;;  %v14561_v29 = vpop.f32.mrf.mxu0 }
0x1209   :  { %v17821_v30 = vpop.f32.mrf.mxu1 }
0x120b   :  { %v14554_v34 = vpop.f32.mrf.mxu1 }
0x120d   :  { %v17823_v62 = vpop.f32.mrf.mxu1 }
0x120f   :  { %v14555_v40 = vpop.f32.mrf.mxu1 }
0x1211   :  { %v3758_v17 = vpop.f32.mrf.mxu1 }
0x1212   :  { %v3771_v42 = vsel %vm2091_vm3, %v3758_v17, -inf }
0x1213   :  { %v14566_v4 = vpop.f32.mrf.mxu1  ;;  %3772 = vmax.xlane.f32.xlu0 %v3771_v42 }
0x1215   :  { %v3761_v10 = vpop.f32.mrf.mxu1 }
0x1216   :  { %v3774_v11 = vsel %vm2091_vm3, %v3761_v10, -inf }
0x1217   :  { %v14567_v44 = vpop.f32.mrf.mxu1  ;;  %3775 = vmax.xlane.f32.xlu0 %v3774_v11 }
0x1286   :  { %v3767_v45 = vpop.xlane.xlu0 %3766 }
0x1287   :  { %v3777_v57 = vsub.f32 %v3705_v23, %v3767_v45 }
0x1289   :  { %v3781_v60 = vmul.f32 1.442695, %v3777_v57 }
0x128a   :  { %v3770_v33 = vpop.xlane.xlu1 %3769 }
0x128b   :  { %16356 = vpow2.f32 %v3781_v60  ;;  %v3778_v50 = vsub.f32 %v3708_v26, %v3770_v33 }
0x128d   :  { %v3783_v51 = vmul.f32 1.442695, %v3778_v50 }
0x128f   :  { %16358 = vpow2.f32 %v3783_v51 }
0x1298   :  { %v16357_v52 = vpop.eup %16356 }
0x1299   :  { %v3789_v53 = vsel %vm2091_vm3, %v16357_v52, 0.0 }
0x129a   :  { %3790 = vadd.xlane.f32.xlu0 %v3789_v53 }
0x129c   :  { %v16359_v54 = vpop.eup %16358  ;;  %v3773_v55 = vpop.xlane.xlu0 %3772 }
0x129d   :  { %v3779_v56 = vsub.f32 %v3758_v17, %v3773_v55  ;;  %v3792_v59 = vsel %vm2091_vm3, %v16359_v54, 0.0 }
0x129e   :  { %3793 = vadd.xlane.f32.xlu1 %v3792_v59 }
0x129f   :  { %v3785_v58 = vmul.f32 1.442695, %v3779_v56 }
0x12a0   :  { %v3776_v1 = vpop.xlane.xlu0 %3775 }
0x12a1   :  { %16360 = vpow2.f32 %v3785_v58  ;;  %v3780_v41 = vsub.f32 %v3761_v10, %v3776_v1 }
0x12a3   :  { %v3787_v39 = vmul.f32 1.442695, %v3780_v41 }
0x12a5   :  { %16362 = vpow2.f32 %v3787_v39 }
0x12ae   :  { %v16361_v27 = vpop.eup %16360 }
0x12af   :  { %3860 = vrot.lane.b32.xlu1 %v17762_v3, %s17207_s6  ;;  %v3795_v63 = vsel %vm2091_vm3, %v16361_v27, 0.0 }
0x12b0   :  { %3796 = vadd.xlane.f32.xlu0 %v3795_v63 }
0x12b2   :  { %v16363_v6 = vpop.eup %16362 }
0x12b3   :  { %3909 = vrot.lane.b32.xlu1 %v17752_v61, %s17173_s0  ;;  %v3798_v7 = vsel %vm2091_vm3, %v16363_v6, 0.0 }
0x12c6   :  { %3812 = vrot.lane.b32.xlu0 %v17775_v13, %s17207_s6 }
0x12ca   :  { %3907 = vrot.lane.b32.xlu0 %v17758_v25, %s17173_s0 }
0x12d7   :  { %3799 = vadd.xlane.f32.xlu1 %v3798_v7 }
0x12e8   :  { %3960 = vrot.lane.b32.xlu1 %v17760_v2, %s17173_s0 }
0x12ec   :  { %3958 = vrot.lane.b32.xlu1 %v17773_v16, %s17173_s0 }
0x1323   :  { %v3791_v12 = vpop.xlane.xlu0 %3790 }
0x1327   :  { %v3794_v9 = vpop.xlane.xlu1 %3793 }
0x1328   :  { %16364 = vrcp.f32 %v3794_v9 }
0x1329   :  { %16366 = vrcp.f32 %v3791_v12 }
0x132b   :  { %v3861_v14 = vpop.permute.xlu1 %3860 }
0x132c   :  { %14575 = vmatpush3.bf16.msra.mxu1 %v3861_v14 }
0x132d   :  { %14586 = vmatprep.subr.bf16.mxu1 %v17205_v38 }
0x132f   :  { %v3910_v23 = vpop.permute.xlu1 %3909 }
0x1330   :  { %v3915_v36 = vsel %vm1996_vm2, %v3910_v23, 0 }
0x1335   :  { %v16365_v15 = vpop.eup %16364 }
0x1336   :  { %v16367_v8 = vpop.eup %16366  ;;  %v3806_v18 = vmul.f32 %v16365_v15, %v16359_v54 }
0x1337   :  { %v3805_v22 = vmul.f32 %v16367_v8, %v16357_v52 }
0x1339   :  { %v3797_v31 = vpop.xlane.xlu0 %3796  ;;  %v3809_v24 = vpack.c.bf16 %v3806_v18, %v3805_v22 }
0x133a   :  { %16368 = vrcp.f32 %v3797_v31 }
0x133d   :  { %v3813_v20 = vpop.permute.xlu0 %3812 }
0x133e   :  { %14569 = vmatpush3.bf16.msra.mxu0 %v3813_v20 }
0x133f   :  { %14580 = vmatprep.subr.bf16.mxu0 %v17205_v38 }
0x1341   :  { %14571 = vmatmul.mubr.msk.bf16.vlgmr.msra.gmra.mxu0 %vm2091_vm3, %v3809_v24  ;;  %v3908_v26 = vpop.permute.xlu0 %3907 }
0x1342   :  { %14581 = vmatpush3.bf16.xpose.msra.mxu0 %v3915_v36  ;;  %14582 = vmatprep.mubr.msk.bf16.mxu0 %vm17206_vm1, %v17205_v38 }
0x1343   :  { %14592 = vmatprep.subr.bf16.mxu0 %v17205_v38 }
0x1347   :  { %v16369_v29 = vpop.eup %16368 }
0x1348   :  { %v3807_v40 = vmul.f32 %v16369_v29, %v16361_v27 }
0x1349   :  { %14583 = vmatmul.mubr.msk.bf16.vlgmr.msra.gmra.mxu0 %vm1996_vm2, %v3908_v26 }
0x134a   :  { %14594 = vmatprep.mubr.msk.bf16.mxu0 %vm17206_vm1, %v17205_v38 }
0x1360   :  { %v3800_v28 = vpop.xlane.xlu1 %3799 }
0x1361   :  { %16370 = vrcp.f32 %v3800_v28 }
0x1364   :  { %v3961_v42 = vpop.permute.xlu1 %3960 }
0x1365   :  { %v3966_v10 = vsel %vm1996_vm2, %v3961_v42, 0 }
0x1368   :  { %v3959_v11 = vpop.permute.xlu1 %3958 }
0x136e   :  { %v16371_v34 = vpop.eup %16370 }
0x136f   :  { %v3808_v17 = vmul.f32 %v16371_v34, %v16363_v6 }
0x1371   :  { %v3810_v4 = vpack.c.bf16 %v3808_v17, %v3807_v40 }
0x1373   :  { %14577 = vmatmul.mubr.msk.bf16.vlgmr.msra.gmra.mxu1 %vm2091_vm3, %v3810_v4 }
0x1374   :  { %14587 = vmatpush3.bf16.xpose.msra.mxu1 %v3966_v10  ;;  %14588 = vmatprep.mubr.msk.bf16.mxu1 %vm17206_vm1, %v17205_v38 }
0x1375   :  { %14598 = vmatprep.subr.bf16.mxu1 %v17205_v38 }
0x137b   :  { %14589 = vmatmul.mubr.msk.bf16.vlgmr.msra.gmra.mxu1 %vm1996_vm2, %v3959_v11 }
0x137c   :  { %14600 = vmatprep.mubr.msk.bf16.mxu1 %vm17206_vm1, %v17205_v38 }
0x1401   :  { %v17861_v44 = vpop.f32.mrf.mxu0 }
0x1403   :  { %v14572_v45 = vpop.f32.mrf.mxu0 }
0x1405   :  { %v17863_v57 = vpop.f32.mrf.mxu0 }
0x1406   :  { %v15515_v60 = vpack.i.bf16 %v17863_v57, %v17861_v44 }
0x1407   :  { %v14573_v33 = vpop.f32.mrf.mxu0 }
0x1409   :  { %v3951_v50 = vpop.f32.mrf.mxu0 }
0x140a   :  { %v4009_v51 = vsel %vm2091_vm3, %v3951_v50, -inf }
0x140b   :  { %4010 = vmax.xlane.f32.xlu0 %v4009_v51  ;;  %v14584_v52 = vpop.f32.mrf.mxu0 }
0x140d   :  { %v3954_v53 = vpop.f32.mrf.mxu0 }
0x140e   :  { %v4012_v54 = vsel %vm2091_vm3, %v3954_v53, -inf }
0x140f   :  { %4013 = vmax.xlane.f32.xlu1 %v4012_v54  ;;  %v14585_v55 = vpop.f32.mrf.mxu0 }
0x1433   :  { %v17869_v56 = vpop.f32.mrf.mxu1 }
0x1435   :  { %v14578_v59 = vpop.f32.mrf.mxu1 }
0x1437   :  { %v17871_v58 = vpop.f32.mrf.mxu1 }
0x1438   :  { %v15520_v27 = vpack.i.bf16 %v17871_v58, %v17869_v56 }
0x1439   :  { %v14579_v63 = vpop.f32.mrf.mxu1 }
0x143b   :  { %v4002_v1 = vpop.f32.mrf.mxu1 }
0x143c   :  { %v4015_v41 = vsel %vm2091_vm3, %v4002_v1, -inf }
0x143d   :  { %v14590_v39 = vpop.f32.mrf.mxu1  ;;  %4016 = vmax.xlane.f32.xlu0 %v4015_v41 }
0x143f   :  { %v4005_v6 = vpop.f32.mrf.mxu1 }
0x1440   :  { %v4018_v7 = vsel %vm2091_vm3, %v4005_v6, -inf }
0x1441   :  { %v14591_v9 = vpop.f32.mrf.mxu1  ;;  %4019 = vmax.xlane.f32.xlu0 %v4018_v7 }
0x1494   :  { %v4011_v12 = vpop.xlane.xlu0 %4010 }
0x1495   :  { %v4021_v14 = vsub.f32 %v3951_v50, %v4011_v12 }
0x1497   :  { %v4025_v15 = vmul.f32 1.442695, %v4021_v14 }
0x1498   :  { %v4014_v31 = vpop.xlane.xlu1 %4013 }
0x1499   :  { %16372 = vpow2.f32 %v4025_v15  ;;  %v4022_v8 = vsub.f32 %v3954_v53, %v4014_v31 }
0x149b   :  { %v4027_v18 = vmul.f32 1.442695, %v4022_v8 }
0x149d   :  { %16374 = vpow2.f32 %v4027_v18 }
0x14a6   :  { %v16373_v20 = vpop.eup %16372 }
0x14a7   :  { %v4033_v22 = vsel %vm2091_vm3, %v16373_v20, 0.0 }
0x14a8   :  { %4034 = vadd.xlane.f32.xlu0 %v4033_v22 }
0x14aa   :  { %v16375_v23 = vpop.eup %16374 }
0x14ab   :  { %v4036_v24 = vsel %vm2091_vm3, %v16375_v23, 0.0 }
0x14ac   :  { %4037 = vadd.xlane.f32.xlu1 %v4036_v24 }
0x14bd   :  { %4102 = vrot.lane.b32.xlu1 %v17762_v3, %s17173_s0 }
0x14c1   :  { %4151 = vrot.lane.b32.xlu1 %v17752_v61, %s17208_s4 }
0x14c6   :  { %v4017_v36 = vpop.xlane.xlu0 %4016 }
0x14c7   :  { %v4023_v26 = vsub.f32 %v4002_v1, %v4017_v36 }
0x14c9   :  { %v4029_v28 = vmul.f32 1.442695, %v4023_v26 }
0x14ca   :  { %v4020_v29 = vpop.xlane.xlu0 %4019 }
0x14cb   :  { %16376 = vpow2.f32 %v4029_v28  ;;  %v4024_v34 = vsub.f32 %v4005_v6, %v4020_v29 }
0x14cd   :  { %v4031_v40 = vmul.f32 1.442695, %v4024_v34 }
0x14cf   :  { %16378 = vpow2.f32 %v4031_v40 }
0x14d8   :  { %v16377_v17 = vpop.eup %16376 }
0x14d9   :  { %v4039_v42 = vsel %vm2091_vm3, %v16377_v17, 0.0 }
0x14da   :  { %4040 = vadd.xlane.f32.xlu0 %v4039_v42 }
0x14dc   :  { %v16379_v4 = vpop.eup %16378 }
0x14dd   :  { %v4042_v10 = vsel %vm2091_vm3, %v16379_v4, 0.0 }
0x14e5   :  { %4043 = vadd.xlane.f32.xlu1 %v4042_v10 }
0x14f0   :  { %4055 = vrot.lane.b32.xlu0 %v17775_v13, %s17173_s0 }
0x14f4   :  { %4149 = vrot.lane.b32.xlu0 %v17758_v25, %s17208_s4 }
0x14f6   :  { %4202 = vrot.lane.b32.xlu1 %v17760_v2, %s17208_s4 }
0x14fa   :  { %4200 = vrot.lane.b32.xlu1 %v17773_v16, %s17208_s4 }
0x1531   :  { %v4035_v45 = vpop.xlane.xlu0 %4034 }
0x1535   :  { %v4038_v61 = vpop.xlane.xlu1 %4037 }
0x1536   :  { %16380 = vrcp.f32 %v4038_v61 }
0x1537   :  { %16382 = vrcp.f32 %v4035_v45 }
0x1539   :  { %v4103_v11 = vpop.permute.xlu1 %4102 }
0x153a   :  { %14599 = vmatpush3.bf16.msra.mxu1 %v4103_v11 }
0x153b   :  { %14610 = vmatprep.subr.bf16.mxu1 %v17205_v38 }
0x153d   :  { %v4152_v54 = vpop.permute.xlu1 %4151 }
0x153e   :  { %v4157_v16 = vsel %vm1996_vm2, %v4152_v54, 0 }
0x1543   :  { %v16381_v33 = vpop.eup %16380 }
0x1544   :  { %v16383_v51 = vpop.eup %16382  ;;  %v4050_v52 = vmul.f32 %v16381_v33, %v16375_v23 }
0x1545   :  { %v4049_v25 = vmul.f32 %v16383_v51, %v16373_v20 }
0x1547   :  { %v4053_v2 = vpack.c.bf16 %v4050_v52, %v4049_v25 }
0x1563   :  { %v4041_v50 = vpop.xlane.xlu0 %4040 }
0x1564   :  { %16384 = vrcp.f32 %v4041_v50 }
0x1567   :  { %v4056_v53 = vpop.permute.xlu0 %4055 }
0x1568   :  { %14593 = vmatpush3.bf16.msra.mxu0 %v4056_v53 }
0x1569   :  { %14604 = vmatprep.subr.bf16.mxu0 %v17205_v38 }
0x156b   :  { %14595 = vmatmul.mubr.msk.bf16.vlgmr.msra.gmra.mxu0 %vm2091_vm3, %v4053_v2  ;;  %v4150_v59 = vpop.permute.xlu0 %4149 }
0x156c   :  { %14605 = vmatpush3.bf16.xpose.msra.mxu0 %v4157_v16  ;;  %14606 = vmatprep.mubr.msk.bf16.mxu0 %vm17206_vm1, %v17205_v38 }
0x156d   :  { %14616 = vmatprep.subr.bf16.mxu0 %v17205_v38 }
0x156e   :  { %v4044_v55 = vpop.xlane.xlu1 %4043 }
0x156f   :  { %16386 = vrcp.f32 %v4044_v55 }
0x1571   :  { %v16385_v63 = vpop.eup %16384 }
0x1572   :  { %v4051_v41 = vmul.f32 %v16385_v63, %v16377_v17  ;;  %v4203_v6 = vpop.permute.xlu1 %4202 }
0x1573   :  { %14607 = vmatmul.mubr.msk.bf16.vlgmr.msra.gmra.mxu0 %vm1996_vm2, %v4150_v59  ;;  %v4208_v9 = vsel %vm1996_vm2, %v4203_v6, 0 }
0x1574   :  { %14618 = vmatprep.mubr.msk.bf16.mxu0 %vm17206_vm1, %v17205_v38 }
0x1576   :  { %v4201_v12 = vpop.permute.xlu1 %4200 }
0x157c   :  { %v16387_v1 = vpop.eup %16386 }
0x157d   :  { %v4052_v39 = vmul.f32 %v16387_v1, %v16379_v4 }
0x157f   :  { %v4054_v7 = vpack.c.bf16 %v4052_v39, %v4051_v41 }
0x1581   :  { %14601 = vmatmul.mubr.msk.bf16.vlgmr.msra.gmra.mxu1 %vm2091_vm3, %v4054_v7 }
0x1582   :  { %14611 = vmatpush3.bf16.xpose.msra.mxu1 %v4208_v9  ;;  %14612 = vmatprep.mubr.msk.bf16.mxu1 %vm17206_vm1, %v17205_v38 }
0x1583   :  { %14622 = vmatprep.subr.bf16.mxu1 %v17205_v38 }
0x1589   :  { %14613 = vmatmul.mubr.msk.bf16.vlgmr.msra.gmra.mxu1 %vm1996_vm2, %v4201_v12 }
0x158a   :  { %14624 = vmatprep.mubr.msk.bf16.mxu1 %vm17206_vm1, %v17205_v38 }
0x162b   :  { %v4095_v14 = vpop.f32.mrf.mxu0 }
0x162d   :  { %v14596_v15 = vpop.f32.mrf.mxu0 }
0x162f   :  { %v4098_v31 = vpop.f32.mrf.mxu0 }
0x1630   :  { %v15525_v8 = vpack.i.bf16 %v4098_v31, %v4095_v14 }
0x1631   :  { %v14597_v18 = vpop.f32.mrf.mxu0 }
0x1633   :  { %v4193_v20 = vpop.f32.mrf.mxu0 }
0x1634   :  { %v4251_v22 = vsel %vm2091_vm3, %v4193_v20, -inf }
0x1635   :  { %4252 = vmax.xlane.f32.xlu0 %v4251_v22  ;;  %v14608_v23 = vpop.f32.mrf.mxu0 }
0x1637   :  { %v4196_v24 = vpop.f32.mrf.mxu0 }
0x1638   :  { %v4254_v36 = vsel %vm2091_vm3, %v4196_v24, -inf }
0x1639   :  { %4255 = vmax.xlane.f32.xlu1 %v4254_v36  ;;  %v14609_v26 = vpop.f32.mrf.mxu0  ;;  %v15909_v36 = vld [vmem:[#allocation18 + $0x38] sm:$0xff]  }
0x163a   :  { %v15910_v26 = vld [vmem:[#allocation18 + $0x30] sm:$0xff]  }
0x1641   :  { %v4142_v28 = vpop.f32.mrf.mxu1 }
0x1643   :  { %v14602_v29 = vpop.f32.mrf.mxu1 }
0x1644   :  { %v15912_v29 = vld [vmem:[#allocation18 + $0x20] sm:$0xff]  }
0x1645   :  { %v4145_v34 = vpop.f32.mrf.mxu1 }
0x1646   :  { %v15530_v40 = vpack.i.bf16 %v4145_v34, %v4142_v28  ;;  %v15911_v28 = vld [vmem:[#allocation18 + $0x28] sm:$0xff]   ;;  %v15913_v34 = vld [vmem:[#allocation18 + $0x18] sm:$0xff]  }
0x1647   :  { %v14603_v17 = vpop.f32.mrf.mxu1 }
0x1649   :  { %v4244_v42 = vpop.f32.mrf.mxu1 }
0x164a   :  { %v4257_v4 = vsel %vm2091_vm3, %v4244_v42, -inf }
0x164b   :  { %v14614_v10 = vpop.f32.mrf.mxu1  ;;  %4258 = vmax.xlane.f32.xlu0 %v4257_v4 }
0x164d   :  { %v4247_v61 = vpop.f32.mrf.mxu1 }
0x164e   :  { %v4260_v11 = vsel %vm2091_vm3, %v4247_v61, -inf }
0x164f   :  { %v14615_v45 = vpop.f32.mrf.mxu1  ;;  %4261 = vmax.xlane.f32.xlu0 %v4260_v11 }
0x1650   :  { %v15916_v45 = vld [vmem:[#allocation18] sm:$0xff]  }
0x16be   :  { %v4253_v33 = vpop.xlane.xlu0 %4252 }
0x16bf   :  { %v4263_v50 = vsub.f32 %v4193_v20, %v4253_v33  ;;  %v15917_v33 = vld [vmem:[#allocation21 + $0x38] sm:$0xff]  }
0x16c1   :  { %v4267_v51 = vmul.f32 1.442695, %v4263_v50 }
0x16c2   :  { %v4256_v52 = vpop.xlane.xlu1 %4255 }
0x16c3   :  { %16388 = vpow2.f32 %v4267_v51  ;;  %v4264_v53 = vsub.f32 %v4196_v24, %v4256_v52  ;;  %v15918_v51 = vld [vmem:[#allocation21 + $0x30] sm:$0xff]  }
0x16c5   :  { %v4269_v25 = vmul.f32 1.442695, %v4264_v53 }
0x16c7   :  { %16390 = vpow2.f32 %v4269_v25 }
0x16d0   :  { %v16389_v54 = vpop.eup %16388 }
0x16d1   :  { %v4275_v2 = vsel %vm2091_vm3, %v16389_v54, 0.0 }
0x16d2   :  { %4276 = vadd.xlane.f32.xlu0 %v4275_v2 }
0x16d4   :  { %v16391_v16 = vpop.eup %16390  ;;  %v4259_v55 = vpop.xlane.xlu0 %4258 }
0x16d5   :  { %v4265_v59 = vsub.f32 %v4244_v42, %v4259_v55  ;;  %v4278_v63 = vsel %vm2091_vm3, %v16391_v16, 0.0  ;;  %v15915_v42 = vld [vmem:[#allocation18 + $0x8] sm:$0xff]  }
0x16d6   :  { %4279 = vadd.xlane.f32.xlu1 %v4278_v63 }
0x16d7   :  { %v4271_v1 = vmul.f32 1.442695, %v4265_v59 }
0x16d8   :  { %v4262_v41 = vpop.xlane.xlu0 %4261 }
0x16d9   :  { %16392 = vpow2.f32 %v4271_v1  ;;  %v4266_v39 = vsub.f32 %v4247_v61, %v4262_v41 }
0x16db   :  { %v4273_v6 = vmul.f32 1.442695, %v4266_v39 }
0x16dd   :  { %16394 = vpow2.f32 %v4273_v6 }
0x16e6   :  { %v16393_v7 = vpop.eup %16392 }
0x16e7   :  { %v4281_v9 = vsel %vm2091_vm3, %v16393_v7, 0.0 }
0x16e8   :  { %4282 = vadd.xlane.f32.xlu0 %v4281_v9 }
0x16ea   :  { %v16395_v12 = vpop.eup %16394 }
0x16eb   :  { %v4284_v14 = vsel %vm2091_vm3, %v16395_v12, 0.0 }
0x16ec   :  { %4285 = vadd.xlane.f32.xlu1 %v4284_v14 }
0x16fd   :  { %4344 = vrot.lane.b32.xlu1 %v17762_v3, %s17208_s4 }
0x16fe   :  { %4297 = vrot.lane.b32.xlu0 %v17775_v13, %s17208_s4 }
0x1701   :  { %15516 = vrot.lane.b32.xlu1 %v15515_v60, %s17208_s4 }
0x1702   :  { %15526 = vrot.lane.b32.xlu0 %v15525_v8, %s17173_s0 }
0x1705   :  { %15521 = vrot.lane.b32.xlu1 %v15520_v27, %s17208_s4 }
0x1709   :  { %15531 = vrot.lane.b32.xlu1 %v15530_v40, %s17173_s0  ;;  %v15914_v40 = vld [vmem:[#allocation18 + $0x10] sm:$0xff]  }
0x175b   :  { %v4277_v31 = vpop.xlane.xlu0 %4276 }
0x175f   :  { %v4280_v15 = vpop.xlane.xlu1 %4279 }
0x1760   :  { %16396 = vrcp.f32 %v4280_v15 }
0x1761   :  { %16398 = vrcp.f32 %v4277_v31 }
0x176d   :  { %v16397_v3 = vpop.eup %16396 }
0x176e   :  { %v16399_v18 = vpop.eup %16398  ;;  %v4292_v20 = vmul.f32 %v16397_v3, %v16391_v16 }
0x176f   :  { %v4291_v60 = vmul.f32 %v16399_v18, %v16389_v54 }
0x1771   :  { %v4283_v13 = vpop.xlane.xlu0 %4282  ;;  %v4295_v8 = vpack.c.bf16 %v4292_v20, %v4291_v60 }
0x1772   :  { %16400 = vrcp.f32 %v4283_v13 }
0x1775   :  { %v4298_v44 = vpop.permute.xlu0 %4297  ;;  %v4286_v57 = vpop.xlane.xlu1 %4285 }
0x1776   :  { %16402 = vrcp.f32 %v4286_v57  ;;  %14617 = vmatpush3.bf16.msra.mxu0 %v4298_v44 }
0x1777   :  { %14628 = vmatprep.subr.bf16.mxu0 %v15909_v36 }
0x1779   :  { %14619 = vmatmul.mubr.msk.bf16.vlgmr.msra.gmra.mxu0 %vm2091_vm3, %v4295_v8  ;;  %v4345_v56 = vpop.permute.xlu1 %4344  ;;  %v15527_v59 = vpop.permute.xlu0 %15526 }
0x177a   :  { %14623 = vmatpush3.bf16.msra.mxu1 %v4345_v56  ;;  %14629 = vmatpush3.bf16.msra.mxu0 %v15909_v36  ;;  %v15529_v41 = vunpack.i.h.bf16 %v15527_v59  ;;  %v15528_v39 = vunpack.i.l.bf16 %v15527_v59  ;;  %v15919_v36 = vld [vmem:[#allocation22 + $0x38] sm:$0xff]  }
0x177b   :  { %14648 = vmatprep.subr.bf16.mxu1 %v17205_v38  ;;  %14630 = vmatprep.subr.bf16.mxu0 %v15910_v26 }
0x177d   :  { %v15517_v2 = vpop.permute.xlu1 %15516 }
0x177e   :  { %14631 = vmatpush3.bf16.msra.mxu0 %v15910_v26  ;;  %v15519_v16 = vunpack.i.h.bf16 %v15517_v2  ;;  %v15518_v55 = vunpack.i.l.bf16 %v15517_v2 }
0x177f   :  { %v16401_v58 = vpop.eup %16400  ;;  %14632 = vmatprep.subr.bf16.mxu0 %v15911_v28 }
0x1780   :  { %v4293_v22 = vmul.f32 %v16401_v58, %v16393_v7  ;;  %v4440_v63 = vsel %vm1996_vm2, %v17817_v21, %v15519_v16  ;;  %v4439_v1 = vsel %vm1996_vm2, %v17815_v19, %v15518_v55 }
0x1781   :  { %v4444_v14 = vsel %vm3010_vm4, %v4440_v63, %v15529_v41  ;;  %v15522_v3 = vpop.permute.xlu1 %15521 }
0x1782   :  { %14633 = vmatpush3.bf16.msra.mxu0 %v15911_v28  ;;  %v15524_v18 = vunpack.i.h.bf16 %v15522_v3  ;;  %v15523_v20 = vunpack.i.l.bf16 %v15522_v3  ;;  %v15922_v28 = vld [vmem:[#allocation21 + $0x20] sm:$0xff]  }
0x1783   :  { %v16403_v27 = vpop.eup %16402  ;;  %14634 = vmatprep.subr.bf16.mxu0 %v15912_v29 }
0x1784   :  { %v4294_v23 = vmul.f32 %v16403_v27, %v16395_v12  ;;  %v4443_v12 = vsel %vm3010_vm4, %v4439_v1, %v15528_v39  ;;  %v4442_v60 = vsel %vm1996_vm2, %v17823_v62, %v15524_v18  ;;  %v4441_v8 = vsel %vm1996_vm2, %v17821_v30, %v15523_v20  ;;  %v15920_v30 = vld [vmem:[#allocation21 + $0x28] sm:$0xff]   ;;  %v15921_v62 = vld [vmem:[#allocation22 + $0x30] sm:$0xff]  }
0x1785   :  { %v15532_v21 = vpop.permute.xlu1 %15531 }
0x1786   :  { %v4296_v24 = vpack.c.bf16 %v4294_v23, %v4293_v22  ;;  %14635 = vmatpush3.bf16.msra.mxu0 %v15912_v29  ;;  %v15534_v19 = vunpack.i.h.bf16 %v15532_v21  ;;  %v15533_v44 = vunpack.i.l.bf16 %v15532_v21  ;;  %v15923_v29 = vld [vmem:[#allocation22 + $0x28] sm:$0xff]  }
0x1787   :  { %14636 = vmatprep.subr.bf16.mxu0 %v15913_v34 }
0x1788   :  { %14625 = vmatmul.mubr.msk.bf16.vlgmr.msra.gmra.mxu1 %vm2091_vm3, %v4296_v24  ;;  %v4445_v27 = vsel %vm3010_vm4, %v4441_v8, %v15533_v44  ;;  %v4446_v22 = vsel %vm3010_vm4, %v4442_v60, %v15534_v19 }
0x1789   :  { %14664 = vmatprep.mubr.msk.bf16.mxu1 %vm17206_vm1, %v17205_v38  ;;  %14649 = vmatpush3.bf16.msra.mxu1 %v15917_v33  ;;  %v15933_v33 = vld [vmem:[#allocation22] sm:$0xff]  }
0x178a   :  { %14637 = vmatpush3.bf16.msra.mxu0 %v15913_v34  ;;  %14650 = vmatprep.subr.bf16.mxu1 %v17205_v38  ;;  %v15924_v34 = vld [vmem:[#allocation21 + $0x18] sm:$0xff]  }
0x178b   :  { %14638 = vmatprep.subr.bf16.mxu0 %v15914_v40 }
0x178d   :  { %14651 = vmatpush3.bf16.msra.mxu1 %v15918_v51  ;;  %v13285_v51 = vld [vmem:[#allocation19] ss:$0 sm:$0xff] }
0x178e   :  { %14639 = vmatpush3.bf16.msra.mxu0 %v15914_v40  ;;  %14652 = vmatprep.subr.bf16.mxu1 %v17205_v38  ;;  %v15925_v40 = vld [vmem:[#allocation22 + $0x20] sm:$0xff]  }
0x178f   :  { %14640 = vmatprep.subr.bf16.mxu0 %v15915_v42 }
0x1791   :  { %14653 = vmatpush3.bf16.msra.mxu1 %v15920_v30 }
0x1792   :  { %14641 = vmatpush3.bf16.msra.mxu0 %v15915_v42  ;;  %14654 = vmatprep.subr.bf16.mxu1 %v17205_v38  ;;  %v15927_v42 = vld [vmem:[#allocation22 + $0x18] sm:$0xff]  }
0x1793   :  { %14642 = vmatprep.subr.bf16.mxu0 %v15916_v45 }
0x1795   :  { %14655 = vmatpush3.bf16.msra.mxu1 %v15922_v28 }
0x1796   :  { %14643 = vmatpush3.bf16.msra.mxu0 %v15916_v45  ;;  %14656 = vmatprep.subr.bf16.mxu1 %v17205_v38  ;;  %v15932_v45 = vld [vmem:[#allocation6 + $0x78] sm:$0xff]  }
0x1797   :  { %14668 = vmatprep.subr.bf16.mxu0 %v17205_v38 }
0x1799   :  { %14657 = vmatpush3.bf16.msra.mxu1 %v15924_v34 }
0x179a   :  { %14658 = vmatprep.subr.bf16.mxu1 %v17205_v38 }
0x1839   :  { %v4337_v17 = vpop.f32.mrf.mxu0 }
0x183b   :  { %v14620_v4 = vpop.f32.mrf.mxu0 }
0x183c   :  { %v15928_v4 = vld [vmem:[#allocation21 + $0x8] sm:$0xff]  }
0x183d   :  { %v4340_v10 = vpop.f32.mrf.mxu0 }
0x183e   :  { %v15535_v61 = vpack.i.bf16 %v4340_v10, %v4337_v17  ;;  %v15926_v17 = vld [vmem:[#allocation21 + $0x10] sm:$0xff]  }
0x183f   :  { %v14621_v11 = vpop.f32.mrf.mxu0  ;;  %14659 = vmatpush3.bf16.msra.mxu1 %v15926_v17  ;;  %v15929_v10 = vld [vmem:[#allocation22 + $0x10] sm:$0xff]   ;;  %v15934_v17 = vld [vmem:[#allocation6 + $0x38] sm:$0xff]  }
0x1840   :  { %15536 = vrot.lane.b32.xlu0 %v15535_v61, %s17207_s6  ;;  %14660 = vmatprep.subr.bf16.mxu1 %v17205_v38  ;;  %v15930_v61 = vld [vmem:[#allocation21] sm:$0xff]   ;;  %v15931_v11 = vld [vmem:[#allocation22 + $0x8] sm:$0xff]  }
0x1843   :  { %14661 = vmatpush3.bf16.msra.mxu1 %v15928_v4 }
0x1844   :  { %14662 = vmatprep.subr.bf16.mxu1 %v17205_v38 }
0x1847   :  { %14663 = vmatpush3.bf16.msra.mxu1 %v15930_v61 }
0x1848   :  { %v4384_v50 = vpop.f32.mrf.mxu1  ;;  %13955 = vmatprep.subr.bf16.mxu1 %v15932_v45 }
0x184a   :  { %v14626_v52 = vpop.f32.mrf.mxu1 }
0x184c   :  { %v4387_v53 = vpop.f32.mrf.mxu1 }
0x184d   :  { %v15540_v25 = vpack.i.bf16 %v4387_v53, %v4384_v50  ;;  %v15936_v50 = vld [vmem:[#allocation6 + $0xf8] sm:$0xff]  }
0x184e   :  { %v14627_v54 = vpop.f32.mrf.mxu1 }
0x184f   :  { %15541 = vrot.lane.b32.xlu1 %v15540_v25, %s17207_s6 }
0x18b2   :  { %v15537_v6 = vpop.permute.xlu0 %15536 }
0x18b3   :  { %v15539_v7 = vunpack.i.h.bf16 %v15537_v6  ;;  %v15538_v9 = vunpack.i.l.bf16 %v15537_v6 }
0x18b5   :  { %v4447_v15 = vsel %vm3015_vm5, %v4443_v12, %v15538_v9  ;;  %v4448_v31 = vsel %vm3015_vm5, %v4444_v14, %v15539_v7 }
0x18b6   :  { %v4451_v13 = vpack.c.bf16 %v4448_v31, %v4447_v15 }
0x18b8   :  { %14644 = vmatprep.mubr.bf16.mxu0 %v4451_v13 }
0x18c1   :  { %v15542_v57 = vpop.permute.xlu1 %15541 }
0x18c2   :  { %v15544_v56 = vunpack.i.h.bf16 %v15542_v57  ;;  %v15543_v58 = vunpack.i.l.bf16 %v15542_v57 }
0x18c4   :  { %v4449_v23 = vsel %vm3015_vm5, %v4445_v27, %v15543_v58  ;;  %v4450_v24 = vsel %vm3015_vm5, %v4446_v22, %v15544_v56 }
0x18c5   :  { %v4452_v26 = vpack.c.bf16 %v4450_v24, %v4449_v23 }
0x18c7   :  { %14645 = vmatmul.mubr.bf16.vlgmr.msra.gmra.mxu0 %v4452_v26 }
0x18c8   :  { %14669 = vmatpush3.bf16.msra.mxu0 %v15919_v36  ;;  %14684 = vmatprep.mubr.msk.bf16.mxu0 %vm17206_vm1, %v17205_v38 }
0x18c9   :  { %14670 = vmatprep.subr.bf16.mxu0 %v17205_v38 }
0x18cc   :  { %14671 = vmatpush3.bf16.msra.mxu0 %v15921_v62 }
0x18cd   :  { %14672 = vmatprep.subr.bf16.mxu0 %v17205_v38 }
0x18d0   :  { %14673 = vmatpush3.bf16.msra.mxu0 %v15923_v29 }
0x18d1   :  { %14674 = vmatprep.subr.bf16.mxu0 %v17205_v38 }
0x18d4   :  { %14675 = vmatpush3.bf16.msra.mxu0 %v15925_v40 }
0x18d5   :  { %14676 = vmatprep.subr.bf16.mxu0 %v17205_v38 }
0x18d8   :  { %14677 = vmatpush3.bf16.msra.mxu0 %v15927_v42  ;;  %v15965_v42 = vld [vmem:[%s19169_s2 + $0x4] ss:$16 sps:$4 sm:$0xff]  }
0x18d9   :  { %14678 = vmatprep.subr.bf16.mxu0 %v17205_v38 }
0x18dc   :  { %14679 = vmatpush3.bf16.msra.mxu0 %v15929_v10  ;;  %v15935_v10 = vld [vmem:[#allocation6 + $0x70] sm:$0xff]  }
0x18dd   :  { %14680 = vmatprep.subr.bf16.mxu0 %v17205_v38 }
0x18e0   :  { %14681 = vmatpush3.bf16.msra.mxu0 %v15931_v11 }
0x18e1   :  { %14682 = vmatprep.subr.bf16.mxu0 %v17205_v38 }
0x18e4   :  { %14683 = vmatpush3.bf16.msra.mxu0 %v15933_v33  ;;  %v15937_v33 = vld [vmem:[#allocation6 + $0x30] sm:$0xff]  }
0x18e5   :  { %13977 = vmatprep.subr.bf16.mxu0 %v15936_v50  ;;  %v15938_v50 = vld [vmem:[#allocation6 + $0xb8] sm:$0xff]  }
0x1987   :  { %v14646_v52 = vpop.f32.mrf.mxu0 }
0x1988   :  { %v4550_v53 = vadd.f32 %v14646_v52, %v13285_v51  ;;  %v15939_v52 = vld [vmem:[#allocation6 + $0x68] sm:$0xff]  }
0x1989   :  { %v4541_v25 = vpop.f32.mrf.mxu0 }
0x198a   :  { %v4562_v54 = vrot.slane %v4550_v53, 4  ;;  %v4542_v2 = vadd.f32 %v13285_v51, %v4541_v25  ;;  %v15970_v25 = vld [vmem:[%s19169_s2 + $0xc] ss:$16 sps:$4 sm:$0xff]  }
0x198b   :  { %v14647_v16 = vpop.f32.mrf.mxu0 }
0x198c   :  { %v4563_v55 = vadd.f32 %v4562_v54, %v4550_v53  ;;  %v4556_v59 = vrot.slane %v4542_v2, 4  ;;  %v4553_v63 = vadd.f32 %v14647_v16, %v13285_v51  ;;  %v15940_v53 = vld [vmem:[#allocation6 + $0xf0] sm:$0xff]   ;;  %v15941_v54 = vld [vmem:[#allocation6 + $0x28] sm:$0xff]   ;;  %v15943_v16 = vld [vmem:[#allocation6 + $0x60] sm:$0xff]  }
0x198d   :  { %v4544_v1 = vpop.f32.mrf.mxu0 }
0x198e   :  { %v4564_v41 = vrot.slane %v4563_v55, 2  ;;  %v4557_v39 = vadd.f32 %v4556_v59, %v4542_v2  ;;  %v4577_v6 = vrot.slane %v4553_v63, 4  ;;  %v4545_v7 = vadd.f32 %v13285_v51, %v4544_v1  ;;  %v15942_v2 = vld [vmem:[#allocation6 + $0xb0] sm:$0xff]   ;;  %v15945_v59 = vld [vmem:[#allocation6 + $0x20] sm:$0xff]   ;;  %v15947_v1 = vld [vmem:[#allocation6 + $0x58] sm:$0xff]  }
0x1990   :  { %v4565_v9 = vadd.f32 %v4564_v41, %v4563_v55  ;;  %v4558_v12 = vrot.slane %v4557_v39, 2  ;;  %v4578_v14 = vadd.f32 %v4577_v6, %v4553_v63  ;;  %v4571_v15 = vrot.slane %v4545_v7, 4  ;;  %v15944_v55 = vld [vmem:[#allocation6 + $0xe8] sm:$0xff]   ;;  %v15948_v41 = vld [vmem:[#allocation6 + $0xe0] sm:$0xff]  }
0x1991   :  { %v15946_v63 = vld [vmem:[#allocation6 + $0xa8] sm:$0xff]   ;;  %v15950_v6 = vld [vmem:[#allocation6 + $0xa0] sm:$0xff]  }
0x1992   :  { %v4566_v31 = vrot.slane %v4565_v9, 1  ;;  %v4559_v3 = vadd.f32 %v4558_v12, %v4557_v39  ;;  %v4579_v13 = vrot.slane %v4578_v14, 2  ;;  %v4572_v21 = vadd.f32 %v4571_v15, %v4545_v7  ;;  %v15949_v39 = vld [vmem:[#allocation6 + $0x18] sm:$0xff]   ;;  %v15951_v7 = vld [vmem:[#allocation6 + $0x50] sm:$0xff]   ;;  %v15955_v15 = vld [vmem:[#allocation6 + $0x48] sm:$0xff]  }
0x1993   :  { %v15953_v12 = vld [vmem:[#allocation6 + $0x10] sm:$0xff]  }
0x1994   :  { %v4567_v18 = vadd.f32 %v4566_v31, %v4565_v9  ;;  %v4560_v20 = vrot.slane %v4559_v3, 1  ;;  %v4580_v19 = vadd.f32 %v4579_v13, %v4578_v14  ;;  %v4573_v44 = vrot.slane %v4572_v21, 2  ;;  %v15952_v9 = vld [vmem:[#allocation6 + $0xd8] sm:$0xff]   ;;  %v15956_v31 = vld [vmem:[#allocation6 + $0xd0] sm:$0xff]  }
0x1995   :  { %v15954_v14 = vld [vmem:[#allocation6 + $0x98] sm:$0xff]   ;;  %v15958_v13 = vld [vmem:[#allocation6 + $0x90] sm:$0xff]  }
0x1996   :  { %v4570_v57 = vmul.f32 0.125, %v4567_v18  ;;  %v4561_v60 = vadd.f32 %v4560_v20, %v4559_v3  ;;  %v4581_v8 = vrot.slane %v4580_v19, 1  ;;  %v4574_v56 = vadd.f32 %v4573_v44, %v4572_v21  ;;  %v15957_v3 = vld [vmem:[#allocation6 + $0x8] sm:$0xff]   ;;  %v15959_v21 = vld [vmem:[#allocation6 + $0x40] sm:$0xff]  }
0x1997   :  { %v15960_v18 = vld [vmem:[#allocation6 + $0xc8] sm:$0xff]   ;;  %v15961_v20 = vld [vmem:[#allocation6] sm:$0xff]  }
0x1998   :  { %v4603_v58 = vpack.c.bf16 %v4570_v57, %v4570_v57  ;;  %v4569_v27 = vmul.f32 0.125, %v4561_v60  ;;  %v4582_v22 = vadd.f32 %v4581_v8, %v4580_v19  ;;  %v4575_v23 = vrot.slane %v4574_v56, 1  ;;  %v15962_v19 = vld [vmem:[#allocation6 + $0x88] sm:$0xff]   ;;  %v15966_v44 = vld [vmem:[#allocation6 + $0xc0] sm:$0xff]  }
0x1999   :  { %v15963_v57 = vld [vmem:[%s19169_s2] ss:$16 sps:$4 sm:$0xff]   ;;  %v15968_v8 = vld [vmem:[%s19169_s2 + $0x8] ss:$16 sps:$4 sm:$0xff]  }
0x199a   :  { %v4602_v24 = vpack.c.bf16 %v4569_v27, %v4569_v27  ;;  %v4584_v36 = vmul.f32 0.125, %v4582_v22  ;;  %v4576_v26 = vadd.f32 %v4575_v23, %v4574_v56  ;;  %v4613_v30 = vunpack.c.l.b16 %v4603_v58  ;;  %v15967_v60 = vld [vmem:[#allocation6 + $0x80] sm:$0xff]   ;;  %v15971_v56 = vld [vmem:[#allocation7 + $0x168] ss:$12 sps:$4 sm:$0xff]   ;;  %v15973_v58 = vld [vmem:[#allocation7 + $0x16c] ss:$12 sps:$4 sm:$0xff]  }
0x199b   :  { %v15976_v27 = vld [vmem:[#allocation7 + $0x154] ss:$12 sps:$4 sm:$0xff]   ;;  %v15977_v22 = vld [vmem:[#allocation7 + $0x170] ss:$12 sps:$4 sm:$0xff]   ;;  %v15981_v23 = vld [vmem:[#allocation7 + $0x158] ss:$12 sps:$4 sm:$0xff]  }
0x199c   :  { %v4612_v62 = vunpack.c.l.b16 %v4602_v24  ;;  %v4757_v28 = vpack.c.bf16 %v4584_v36, %v4584_v36  ;;  %v4583_v29 = vmul.f32 0.125, %v4576_v26  ;;  %v15974_v24 = vld [vmem:[#allocation7 + $0x150] ss:$12 sps:$4 sm:$0xff]   ;;  %v15985_v26 = vld [vmem:[#allocation7 + $0x140] ss:$12 sps:$4 sm:$0xff]  }
0x199d   :  { %v15980_v36 = vld [vmem:[#allocation7 + $0x13c] ss:$12 sps:$4 sm:$0xff]  }
0x199e   :  { %v4756_v34 = vpack.c.bf16 %v4583_v29, %v4583_v29  ;;  %v4615_v40 = vsel %vm4614_vm6, %v4613_v30, %v4612_v62  ;;  %v4767_v61 = vunpack.c.l.b16 %v4757_v28  ;;  %v15978_v30 = vld [vmem:[#allocation7 + $0x138] ss:$12 sps:$4 sm:$0xff]   ;;  %v15982_v28 = vld [vmem:[#allocation7 + $0x120] ss:$12 sps:$4 sm:$0xff]  }
0x199f   :  { %v4616_v4 = vpack.c.b16 %v4615_v40, %v4615_v40  ;;  %v15984_v62 = vld [vmem:[#allocation7 + $0x124] ss:$12 sps:$4 sm:$0xff]   ;;  %v15988_v29 = vld [vmem:[#allocation7 + $0x10c] ss:$12 sps:$4 sm:$0xff]   ;;  %v15986_v40 = vld [vmem:[#allocation7 + $0x108] ss:$12 sps:$4 sm:$0xff]  }
0x19a0   :  { %v4766_v11 = vunpack.c.l.b16 %v4756_v34  ;;  %v15989_v34 = vld [vmem:[#allocation7 + $0x128] ss:$12 sps:$4 sm:$0xff]  }
0x19a1   :  { %14665 = vmatmul.mubr.bf16.vlgmr.msra.gmra.mxu1 %v4616_v4  ;;  %v15990_v4 = vld [vmem:[#allocation7 + $0xf0] ss:$12 sps:$4 sm:$0xff]  }
0x19a2   :  { %13956 = vmatpush3.bf16.msra.mxu1 %v15934_v17  ;;  %v4768_v45 = vsel %vm4614_vm6, %v4767_v61, %v4766_v11  ;;  %5210 = vmatprep.mubr.bf16.mxu1 %v15965_v42  ;;  %v15992_v17 = vld [vmem:[#allocation7 + $0xf4] ss:$12 sps:$4 sm:$0xff]   ;;  %v15993_v42 = vld [vmem:[#allocation7 + $0x110] ss:$12 sps:$4 sm:$0xff]   ;;  %v15997_v61 = vld [vmem:[#allocation7 + $0xf8] ss:$12 sps:$4 sm:$0xff]  }
0x19a3   :  { %13957 = vmatprep.subr.bf16.mxu1 %v15935_v10  ;;  %v4769_v51 = vpack.c.b16 %v4768_v45, %v4768_v45  ;;  %v15996_v10 = vld [vmem:[#allocation7 + $0xdc] ss:$12 sps:$4 sm:$0xff]   ;;  %v15994_v11 = vld [vmem:[#allocation7 + $0xd8] ss:$12 sps:$4 sm:$0xff]  }
0x19a4   :  { %v16000_v45 = vld [vmem:[#allocation7 + $0xc4] ss:$12 sps:$4 sm:$0xff]  }
0x19a5   :  { %14685 = vmatmul.mubr.bf16.vlgmr.msra.gmra.mxu0 %v4769_v51  ;;  %v16002_v51 = vld [vmem:[#allocation7 + $0xc8] ss:$12 sps:$4 sm:$0xff]  }
0x19a6   :  { %13958 = vmatpush3.bf16.msra.mxu1 %v15937_v33  ;;  %13978 = vmatpush3.bf16.msra.mxu0 %v15938_v50  ;;  %v16001_v33 = vld [vmem:[#allocation7 + $0xe0] ss:$12 sps:$4 sm:$0xff]  }
0x19a7   :  { %13959 = vmatprep.subr.bf16.mxu1 %v15939_v52  ;;  %13979 = vmatprep.subr.bf16.mxu0 %v15940_v53  ;;  %v15998_v50 = vld [vmem:[#allocation7 + $0xc0] ss:$12 sps:$4 sm:$0xff]  }
0x19a8   :  { %5251 = vmatprep.mubr.bf16.mxu0 %v15970_v25 }
0x19aa   :  { %13960 = vmatpush3.bf16.msra.mxu1 %v15941_v54  ;;  %13980 = vmatpush3.bf16.msra.mxu0 %v15942_v2 }
0x19ab   :  { %13961 = vmatprep.subr.bf16.mxu1 %v15943_v16  ;;  %13981 = vmatprep.subr.bf16.mxu0 %v15944_v55 }
0x19ae   :  { %13962 = vmatpush3.bf16.msra.mxu1 %v15945_v59  ;;  %13982 = vmatpush3.bf16.msra.mxu0 %v15946_v63 }
0x19af   :  { %13963 = vmatprep.subr.bf16.mxu1 %v15947_v1  ;;  %13983 = vmatprep.subr.bf16.mxu0 %v15948_v41 }
0x19b2   :  { %13964 = vmatpush3.bf16.msra.mxu1 %v15949_v39  ;;  %13984 = vmatpush3.bf16.msra.mxu0 %v15950_v6  ;;  %v13318_v39 = vld [vmem:[%s19167_s5 + $0x1] ss:$0 sm:$0xff] }
0x19b3   :  { %13965 = vmatprep.subr.bf16.mxu1 %v15951_v7  ;;  %13985 = vmatprep.subr.bf16.mxu0 %v15952_v9  ;;  %v1167_v9 = vadd.f32 %v17505_v48, %v17496_v37 }
0x19b6   :  { %13966 = vmatpush3.bf16.msra.mxu1 %v15953_v12  ;;  %13986 = vmatpush3.bf16.msra.mxu0 %v15954_v14 }
0x19b7   :  { %13967 = vmatprep.subr.bf16.mxu1 %v15955_v15  ;;  %13987 = vmatprep.subr.bf16.mxu0 %v15956_v31 }
0x19ba   :  { %13968 = vmatpush3.bf16.msra.mxu1 %v15957_v3  ;;  %13988 = vmatpush3.bf16.msra.mxu0 %v15958_v13 }
0x19bb   :  { %13969 = vmatprep.subr.bf16.mxu1 %v15959_v21  ;;  %13989 = vmatprep.subr.bf16.mxu0 %v15960_v18  ;;  %v1295_v21 = vmax.f32 %v17499_v43, 0.0  ;;  %v1210_v18 = vadd.f32 %v17507_v49, %v1167_v9 }
0x19be   :  { %13970 = vmatpush3.bf16.msra.mxu1 %v15961_v20  ;;  %13990 = vmatpush3.bf16.msra.mxu0 %v15962_v19 }
0x19bf   :  { %13991 = vmatprep.subr.bf16.mxu0 %v15966_v44  ;;  %5460 = vmatprep.subr.bf16.mxu1 %v15973_v58 }
0x19c1   :  { %5211 = vmatmul.mubr.bf16.vlgmr.msra.gmra.mxu1 %v15963_v57 }
0x19c2   :  { %13992 = vmatpush3.bf16.msra.mxu0 %v15967_v60  ;;  %5492 = vmatprep.mubr.bf16.mxu1 %v17204_v32 }
0x19c3   :  { %5461 = vmatpush1.bf16.msra.mxu1 %v15971_v56  ;;  %14688 = vmatprep.subr.bf16.mxu0 %v15977_v22  ;;  %v1298_v56 = vmax.f32 %v1210_v18, 0.0 }
0x19c4   :  { %5462 = vmatprep.subr.bf16.mxu1 %v15976_v27 }
0x19c5   :  { %5252 = vmatmul.mubr.bf16.vlgmr.msra.gmra.mxu0 %v15968_v8  ;;  %v13737_v8 = vpack.c.bf16 %v1295_v21, %v1295_v21  ;;  %v13738_v43 = vpack.c.bf16 %v1298_v56, %v1298_v56 }
0x19c6   :  { %14689 = vmatpush3.bf16.msra.mxu0 %v15977_v22 }
0x19c7   :  { %14690 = vmatprep.subr.bf16.mxu0 %v15981_v23  ;;  %5463 = vmatpush1.bf16.msra.mxu1 %v15974_v24  ;;  %v5315_v24 = vld [vmem:[#allocation9 + $0x3] sm:$0x7] }
0x19c8   :  { %5464 = vmatprep.subr.bf16.mxu1 %v15980_v36 }
0x19ca   :  { %14691 = vmatpush3.bf16.msra.mxu0 %v15981_v23 }
0x19cb   :  { %14692 = vmatprep.subr.bf16.mxu0 %v15985_v26  ;;  %5465 = vmatpush1.bf16.msra.mxu1 %v15978_v30 }
0x19cc   :  { %5466 = vmatprep.subr.bf16.mxu1 %v15984_v62 }
0x19ce   :  { %14693 = vmatpush3.bf16.msra.mxu0 %v15985_v26  ;;  %v5324_v26 = vrot.slane %v5315_v24, %v17492_v35 }
0x19cf   :  { %5467 = vmatpush1.bf16.msra.mxu1 %v15982_v28  ;;  %14694 = vmatprep.subr.bf16.mxu0 %v15989_v34  ;;  %v5328_v28 = vrot.slane %v5315_v24, %v17503_v47 }
0x19d0   :  { %5468 = vmatprep.subr.bf16.mxu1 %v15988_v29 }
0x19d2   :  { %14695 = vmatpush3.bf16.msra.mxu0 %v15989_v34 }
0x19d3   :  { %5469 = vmatpush1.bf16.msra.mxu1 %v15986_v40  ;;  %14696 = vmatprep.subr.bf16.mxu0 %v15993_v42 }
0x19d4   :  { %5470 = vmatprep.subr.bf16.mxu1 %v15992_v17 }
0x19d6   :  { %14697 = vmatpush3.bf16.msra.mxu0 %v15993_v42 }
0x19d7   :  { %5471 = vmatpush1.bf16.msra.mxu1 %v15990_v4  ;;  %14698 = vmatprep.subr.bf16.mxu0 %v15997_v61 }
0x19d8   :  { %5472 = vmatprep.subr.bf16.mxu1 %v15996_v10 }
0x19da   :  { %14699 = vmatpush3.bf16.msra.mxu0 %v15997_v61 }
0x19db   :  { %5473 = vmatpush1.bf16.msra.mxu1 %v15994_v11  ;;  %14700 = vmatprep.subr.bf16.mxu0 %v16001_v33 }
0x19dc   :  { %5474 = vmatprep.subr.bf16.mxu1 %v16000_v45 }
0x19de   :  { %14701 = vmatpush3.bf16.msra.mxu0 %v16001_v33  ;;  %v5320_v33 = vrot.slane %v5315_v24, %v17501_v46 }
0x19df   :  { %5475 = vmatpush1.bf16.msra.mxu1 %v15998_v50  ;;  %14702 = vmatprep.subr.bf16.mxu0 %v16002_v51 }
0x19e0   :  { %14708 = vmatprep.subr.bf16.mxu1 %v17205_v38 }
0x19e2   :  { %14703 = vmatpush3.bf16.msra.mxu0 %v16002_v51 }
0x19e3   :  { %14726 = vmatprep.subr.bf16.mxu0 %v17205_v38 }
0x1a61   :  { %v17982_v52 = vpop.f32.mrf.mxu1 }
0x1a63   :  { %v14666_v53 = vpop.f32.mrf.mxu1 }
0x1a65   :  { %v4703_v25 = vpop.f32.mrf.mxu1  ;;  %v17984_v54 = vpop.f32.mrf.mxu0 }
0x1a67   :  { %v14667_v2 = vpop.f32.mrf.mxu1  ;;  %v14686_v16 = vpop.f32.mrf.mxu0 }
0x1a69   :  { %v4856_v55 = vpop.f32.mrf.mxu0 }
0x1a6b   :  { %v14687_v59 = vpop.f32.mrf.mxu0 }
0x1a81   :  { %v13971_v63 = vpop.f32.mrf.mxu1 }
0x1a83   :  { %v13972_v1 = vpop.f32.mrf.mxu1 }
0x1a84   :  { %v13973_v41 = vadd.f32 %v13972_v1, %v13971_v63 }
0x1a85   :  { %v13974_v6 = vpop.f32.mrf.mxu1  ;;  %v13993_v7 = vpop.f32.mrf.mxu0 }
0x1a86   :  { %v5213_v15 = vadd.f32 %v13973_v41, %v13318_v39 }
0x1a87   :  { %v13975_v12 = vpop.f32.mrf.mxu1  ;;  %v13994_v14 = vpop.f32.mrf.mxu0 }
0x1a88   :  { %v13976_v31 = vadd.f32 %v13975_v12, %v13974_v6  ;;  %v13995_v3 = vadd.f32 %v13994_v14, %v13993_v7 }
0x1a89   :  { %v13996_v13 = vpop.f32.mrf.mxu0 }
0x1a8a   :  { %v5254_v20 = vadd.f32 %v13995_v3, %v5213_v15  ;;  %v5216_v44 = vadd.f32 %v13976_v31, %v13318_v39 }
0x1a8b   :  { %v13997_v19 = vpop.f32.mrf.mxu0 }
0x1a8c   :  { %v5260_v57 = vmax.f32 %v5254_v20, 0.0  ;;  %v13998_v60 = vadd.f32 %v13997_v19, %v13996_v13 }
0x1a8e   :  { %v13739_v58 = vpack.c.bf16 %v5260_v57, %v5260_v57  ;;  %v5257_v27 = vadd.f32 %v13998_v60, %v5216_v44 }
0x1a90   :  { %v5261_v37 = vmax.f32 %v5257_v27, 0.0  ;;  %v17992_v48 = vsel %vm1685_vm0, %v13737_v8, %v13739_v58 }
0x1a91   :  { %5493 = vmatmul.mubr.bf16.vlgmr.msra.gmra.mxu1 %v17992_v48  ;;  %14704 = vmatprep.mubr.bf16.mxu0 %v17992_v48 }
0x1a92   :  { %v13740_v22 = vpack.c.bf16 %v5261_v37, %v5261_v37  ;;  %5502 = vmatprep.mubr.bf16.mxu1 %v17204_v32 }
0x1a94   :  { %v17998_v49 = vsel %vm1685_vm0, %v13738_v43, %v13740_v22 }
0x1a95   :  { %14705 = vmatmul.mubr.bf16.vlgmr.msra.gmra.mxu0 %v17998_v49 }
0x1a96   :  { %14728 = vmatprep.mubr.msk.bf16.mxu0 %vm17206_vm1, %v17205_v38 }
0x1a99   :  { %5503 = vmatmul.mubr.bf16.gmra.mxu1 %v17998_v49 }
0x1a9a   :  { %14710 = vmatprep.mubr.msk.bf16.mxu1 %vm17206_vm1, %v17205_v38 }
0x1b51   :  { %v5494_v23 = vpop.f32.mrf.mxu1 }
0x1b52   :  { %v5495_v16 = vadd.f32 %v5494_v23, %v5320_v33 }
0x1b53   :  { %v5496_v36 = vpop.f32.mrf.mxu1 }
0x1b54   :  { %v5497_v40 = vadd.f32 %v5496_v36, %v5324_v26 }
0x1b55   :  { %v5498_v30 = vpop.f32.mrf.mxu1  ;;  %v14706_v62 = vpop.f32.mrf.mxu0 }
0x1b56   :  { %v5556_v10 = vadd.f32 %v14706_v62, %v5328_v28  ;;  %v5499_v25 = vadd.f32 %v5498_v30, %v5320_v33 }
0x1b57   :  { %v5500_v29 = vpop.f32.mrf.mxu1  ;;  %v5547_v34 = vpop.f32.mrf.mxu0 }
0x1b58   :  { %v5501_v17 = vadd.f32 %v5500_v29, %v5324_v26  ;;  %v18018_v63 = vpack.c.bf16 %v5499_v25, %v5495_v16  ;;  %v5548_v12 = vadd.f32 %v5547_v34, %v5328_v28 }
0x1b59   :  { %v5504_v42 = vpop.f32.mrf.mxu1  ;;  %v14707_v4 = vpop.f32.mrf.mxu0 }
0x1b5a   :  { %v18008_v61 = vpack.c.bf16 %v5501_v17, %v5497_v40  ;;  %v5559_v11 = vadd.f32 %v14707_v4, %v5328_v28  ;;  %v5505_v9 = vadd.f32 %v5504_v42, %v5320_v33 }
0x1b5b   :  { %v5506_v45 = vpop.f32.mrf.mxu1  ;;  %v5550_v41 = vpop.f32.mrf.mxu0 }
0x1b5c   :  { %v18011_v50 = vpack.c.bf16 %v5559_v11, %v5556_v10  ;;  %v5591_v51 = vsel %vm1996_vm2, %v18008_v61, 0  ;;  %v5507_v55 = vadd.f32 %v5506_v45, %v5324_v26  ;;  %v5551_v7 = vadd.f32 %v5550_v41, %v5328_v28 }
0x1b5d   :  { %v5508_v53 = vpop.f32.mrf.mxu1  ;;  %14709 = vmatpush3.bf16.xpose.msra.mxu1 %v5591_v51 }
0x1b5e   :  { %14727 = vmatpush3.bf16.msra.mxu0 %v18011_v50  ;;  %14714 = vmatprep.subr.bf16.mxu1 %v17205_v38  ;;  %v5509_v6 = vadd.f32 %v5508_v53, %v5320_v33  ;;  %v18031_v15 = vpack.c.bf16 %v5551_v7, %v5548_v12 }
0x1b5f   :  { %v5510_v2 = vpop.f32.mrf.mxu1  ;;  %14738 = vmatprep.subr.bf16.mxu0 %v17205_v38 }
0x1b60   :  { %v5511_v59 = vadd.f32 %v5510_v2, %v5324_v26  ;;  %v18029_v14 = vpack.c.bf16 %v5509_v6, %v5505_v9 }
0x1b62   :  { %v18020_v1 = vpack.c.bf16 %v5511_v59, %v5507_v55 }
0x1b64   :  { %14711 = vmatmul.mubr.msk.bf16.vlgmr.msra.gmra.mxu1 %vm1996_vm2, %v18018_v63  ;;  %v5638_v39 = vsel %vm1996_vm2, %v18020_v1, 0 }
0x1b65   :  { %14715 = vmatpush3.bf16.xpose.msra.mxu1 %v5638_v39  ;;  %14716 = vmatprep.mubr.msk.bf16.mxu1 %vm17206_vm1, %v17205_v38 }
0x1b66   :  { %14720 = vmatprep.subr.bf16.mxu1 %v17205_v38 }
0x1b6c   :  { %14717 = vmatmul.mubr.msk.bf16.vlgmr.msra.gmra.mxu1 %vm1996_vm2, %v18029_v14 }
0x1b6d   :  { %14721 = vmatpush3.bf16.msra.mxu1 %v18031_v15  ;;  %14722 = vmatprep.mubr.msk.bf16.mxu1 %vm17206_vm1, %v17205_v38 }
0x1b6e   :  { %14732 = vmatprep.subr.bf16.mxu1 %v17205_v38 }
0x1c24   :  { %v5627_v31 = vpop.f32.mrf.mxu1 }
0x1c25   :  { %v5681_v3 = vsel %vm2091_vm3, %v5627_v31, -inf }
0x1c26   :  { %5682 = vmax.xlane.f32.xlu0 %v5681_v3  ;;  %v14712_v13 = vpop.f32.mrf.mxu1 }
0x1c28   :  { %v5630_v21 = vpop.f32.mrf.mxu1 }
0x1c29   :  { %v5684_v18 = vsel %vm2091_vm3, %v5630_v21, -inf }
0x1c2a   :  { %5685 = vmax.xlane.f32.xlu1 %v5684_v18  ;;  %v14713_v20 = vpop.f32.mrf.mxu1 }
0x1c2c   :  { %v5674_v19 = vpop.f32.mrf.mxu1 }
0x1c2d   :  { %v5687_v44 = vsel %vm2091_vm3, %v5674_v19, -inf }
0x1c2e   :  { %5688 = vmax.xlane.f32.xlu0 %v5687_v44  ;;  %v14718_v57 = vpop.f32.mrf.mxu1 }
0x1c30   :  { %v5677_v60 = vpop.f32.mrf.mxu1 }
0x1c31   :  { %v5690_v8 = vsel %vm2091_vm3, %v5677_v60, -inf }
0x1c32   :  { %5691 = vmax.xlane.f32.xlu0 %v5690_v8  ;;  %v14719_v56 = vpop.f32.mrf.mxu1 }
0x1caf   :  { %v5683_v58 = vpop.xlane.xlu0 %5682 }
0x1cb0   :  { %v5693_v27 = vsub.f32 %v5627_v31, %v5683_v58 }
0x1cb2   :  { %v5697_v37 = vmul.f32 1.442695, %v5693_v27 }
0x1cb3   :  { %v5686_v43 = vpop.xlane.xlu1 %5685 }
0x1cb4   :  { %16404 = vpow2.f32 %v5697_v37  ;;  %v5694_v22 = vsub.f32 %v5630_v21, %v5686_v43 }
0x1cb6   :  { %v5699_v23 = vmul.f32 1.442695, %v5694_v22 }
0x1cb7   :  { %v5689_v24 = vpop.xlane.xlu0 %5688 }
0x1cb8   :  { %16406 = vpow2.f32 %v5699_v23  ;;  %v5695_v36 = vsub.f32 %v5674_v19, %v5689_v24 }
0x1cba   :  { %v5701_v26 = vmul.f32 1.442695, %v5695_v36 }
0x1cbb   :  { %v5692_v17 = vpop.xlane.xlu0 %5691 }
0x1cbc   :  { %16408 = vpow2.f32 %v5701_v26  ;;  %v5696_v42 = vsub.f32 %v5677_v60, %v5692_v17 }
0x1cbe   :  { %v5703_v4 = vmul.f32 1.442695, %v5696_v42 }
0x1cc0   :  { %16410 = vpow2.f32 %v5703_v4 }
0x1cc1   :  { %v16405_v30 = vpop.eup %16404 }
0x1cc2   :  { %v5705_v62 = vsel %vm2091_vm3, %v16405_v30, 0.0 }
0x1cc3   :  { %5706 = vadd.xlane.f32.xlu0 %v5705_v62 }
0x1cc5   :  { %v16407_v28 = vpop.eup %16406 }
0x1cc6   :  { %v5708_v29 = vsel %vm2091_vm3, %v16407_v28, 0.0 }
0x1cc7   :  { %5709 = vadd.xlane.f32.xlu1 %v5708_v29 }
0x1cc9   :  { %v16409_v34 = vpop.eup %16408 }
0x1cca   :  { %v5711_v40 = vsel %vm2091_vm3, %v16409_v34, 0.0 }
0x1ccb   :  { %5712 = vadd.xlane.f32.xlu0 %v5711_v40 }
0x1ccd   :  { %v16411_v10 = vpop.eup %16410 }
0x1cce   :  { %v5714_v11 = vsel %vm2091_vm3, %v16411_v10, 0.0 }
0x1cd8   :  { %5872 = vrot.lane.b32.xlu1 %v18020_v1, %s17207_s6 }
0x1ce1   :  { %5819 = vrot.lane.b32.xlu0 %v18008_v61, %s17207_s6 }
0x1cfc   :  { %5715 = vadd.xlane.f32.xlu1 %v5714_v11 }
0x1d0d   :  { %5816 = vrot.lane.b32.xlu1 %v18018_v63, %s17207_s6 }
0x1d11   :  { %5869 = vrot.lane.b32.xlu1 %v18029_v14, %s17207_s6 }
0x1d4c   :  { %v5707_v45 = vpop.xlane.xlu0 %5706 }
0x1d4d   :  { %16412 = vrcp.f32 %v5707_v45 }
0x1d50   :  { %v5710_v33 = vpop.xlane.xlu1 %5709 }
0x1d51   :  { %16414 = vrcp.f32 %v5710_v33 }
0x1d54   :  { %v5713_v51 = vpop.xlane.xlu0 %5712  ;;  %v5873_v39 = vpop.permute.xlu1 %5872 }
0x1d55   :  { %16416 = vrcp.f32 %v5713_v51  ;;  %v5878_v21 = vsel %vm1996_vm2, %v5873_v39, 0 }
0x1d58   :  { %v5820_v55 = vpop.permute.xlu0 %5819 }
0x1d59   :  { %v5825_v41 = vsel %vm1996_vm2, %v5820_v55, 0 }
0x1d5a   :  { %v16413_v53 = vpop.eup %16412 }
0x1d5b   :  { %v5721_v2 = vmul.f32 %v16413_v53, %v16405_v30 }
0x1d5e   :  { %v16415_v25 = vpop.eup %16414 }
0x1d5f   :  { %v5722_v16 = vmul.f32 %v16415_v25, %v16407_v28 }
0x1d61   :  { %v5725_v59 = vpack.c.bf16 %v5722_v16, %v5721_v2 }
0x1d62   :  { %v16417_v9 = vpop.eup %16416 }
0x1d63   :  { %14723 = vmatmul.mubr.msk.bf16.vlgmr.msra.gmra.mxu1 %vm2091_vm3, %v5725_v59  ;;  %v5723_v31 = vmul.f32 %v16417_v9, %v16409_v34 }
0x1d64   :  { %14733 = vmatpush3.bf16.xpose.msra.mxu1 %v5825_v41  ;;  %14734 = vmatprep.mubr.msk.bf16.mxu1 %vm17206_vm1, %v17205_v38 }
0x1d65   :  { %14744 = vmatprep.subr.bf16.mxu1 %v17205_v38 }
0x1d85   :  { %v5716_v6 = vpop.xlane.xlu1 %5715 }
0x1d86   :  { %16418 = vrcp.f32 %v5716_v6 }
0x1d89   :  { %v5817_v7 = vpop.permute.xlu1 %5816 }
0x1d8a   :  { %14735 = vmatmul.mubr.msk.bf16.vlgmr.msra.gmra.mxu1 %vm1996_vm2, %v5817_v7 }
0x1d8b   :  { %14746 = vmatprep.mubr.msk.bf16.mxu1 %vm17206_vm1, %v17205_v38 }
0x1d8d   :  { %v5870_v18 = vpop.permute.xlu1 %5869 }
0x1d93   :  { %v16419_v12 = vpop.eup %16418 }
0x1d94   :  { %v5724_v3 = vmul.f32 %v16419_v12, %v16411_v10 }
0x1d96   :  { %v5726_v13 = vpack.c.bf16 %v5724_v3, %v5723_v31 }
0x1d98   :  { %14729 = vmatmul.mubr.msk.bf16.vlgmr.msra.gmra.mxu0 %vm2091_vm3, %v5726_v13 }
0x1d99   :  { %14739 = vmatpush3.bf16.xpose.msra.mxu0 %v5878_v21  ;;  %14740 = vmatprep.mubr.msk.bf16.mxu0 %vm17206_vm1, %v17205_v38 }
0x1d9a   :  { %14750 = vmatprep.subr.bf16.mxu0 %v17205_v38 }
0x1da0   :  { %14741 = vmatmul.mubr.msk.bf16.vlgmr.msra.gmra.mxu0 %vm1996_vm2, %v5870_v18 }
0x1da1   :  { %14752 = vmatprep.mubr.msk.bf16.mxu0 %vm17206_vm1, %v17205_v38 }
0x1e23   :  { %v18071_v20 = vpop.f32.mrf.mxu1 }
0x1e25   :  { %v14724_v19 = vpop.f32.mrf.mxu1 }
0x1e27   :  { %v18073_v44 = vpop.f32.mrf.mxu1 }
0x1e29   :  { %v14725_v57 = vpop.f32.mrf.mxu1 }
0x1e4a   :  { %v5861_v60 = vpop.f32.mrf.mxu1 }
0x1e4b   :  { %v5921_v8 = vsel %vm2091_vm3, %v5861_v60, -inf }
0x1e4c   :  { %5922 = vmax.xlane.f32.xlu0 %v5921_v8  ;;  %v14736_v56 = vpop.f32.mrf.mxu1 }
0x1e4e   :  { %v5864_v58 = vpop.f32.mrf.mxu1 }
0x1e4f   :  { %v5924_v27 = vsel %vm2091_vm3, %v5864_v58, -inf }
0x1e50   :  { %5925 = vmax.xlane.f32.xlu1 %v5924_v27  ;;  %v14737_v37 = vpop.f32.mrf.mxu1 }
0x1e58   :  { %v18077_v43 = vpop.f32.mrf.mxu0 }
0x1e5a   :  { %v14730_v22 = vpop.f32.mrf.mxu0 }
0x1e5c   :  { %v18079_v23 = vpop.f32.mrf.mxu0 }
0x1e5e   :  { %v14731_v24 = vpop.f32.mrf.mxu0 }
0x1e60   :  { %v5914_v36 = vpop.f32.mrf.mxu0 }
0x1e61   :  { %v5927_v26 = vsel %vm2091_vm3, %v5914_v36, -inf }
0x1e62   :  { %v14742_v30 = vpop.f32.mrf.mxu0  ;;  %5928 = vmax.xlane.f32.xlu0 %v5927_v26 }
0x1e64   :  { %v5917_v62 = vpop.f32.mrf.mxu0 }
0x1e65   :  { %v5930_v28 = vsel %vm2091_vm3, %v5917_v62, -inf }
0x1e66   :  { %v14743_v29 = vpop.f32.mrf.mxu0  ;;  %5931 = vmax.xlane.f32.xlu0 %v5930_v28 }
0x1ed5   :  { %v5923_v34 = vpop.xlane.xlu0 %5922 }
0x1ed6   :  { %v5933_v40 = vsub.f32 %v5861_v60, %v5923_v34 }
0x1ed8   :  { %v5937_v17 = vmul.f32 1.442695, %v5933_v40 }
0x1ed9   :  { %v5926_v42 = vpop.xlane.xlu1 %5925 }
0x1eda   :  { %16420 = vpow2.f32 %v5937_v17  ;;  %v5934_v4 = vsub.f32 %v5864_v58, %v5926_v42 }
0x1edc   :  { %v5939_v10 = vmul.f32 1.442695, %v5934_v4 }
0x1ede   :  { %16422 = vpow2.f32 %v5939_v10 }
0x1ee7   :  { %v16421_v11 = vpop.eup %16420 }
0x1ee8   :  { %v5945_v45 = vsel %vm2091_vm3, %v16421_v11, 0.0 }
0x1ee9   :  { %5946 = vadd.xlane.f32.xlu0 %v5945_v45 }
0x1eeb   :  { %v16423_v33 = vpop.eup %16422  ;;  %v5929_v51 = vpop.xlane.xlu0 %5928 }
0x1eec   :  { %v5935_v53 = vsub.f32 %v5914_v36, %v5929_v51  ;;  %v5948_v25 = vsel %vm2091_vm3, %v16423_v33, 0.0 }
0x1eed   :  { %5949 = vadd.xlane.f32.xlu1 %v5948_v25 }
0x1eee   :  { %v5941_v2 = vmul.f32 1.442695, %v5935_v53 }
0x1eef   :  { %v5932_v59 = vpop.xlane.xlu0 %5931 }
0x1ef0   :  { %16424 = vpow2.f32 %v5941_v2  ;;  %v5936_v41 = vsub.f32 %v5917_v62, %v5932_v59 }
0x1ef2   :  { %v5943_v39 = vmul.f32 1.442695, %v5936_v41 }
0x1ef4   :  { %16426 = vpow2.f32 %v5943_v39 }
0x1efd   :  { %v16425_v16 = vpop.eup %16424 }
0x1efe   :  { %6016 = vrot.lane.b32.xlu1 %v18011_v50, %s17207_s6  ;;  %v5951_v55 = vsel %vm2091_vm3, %v16425_v16, 0.0 }
0x1eff   :  { %5952 = vadd.xlane.f32.xlu0 %v5951_v55 }
0x1f01   :  { %v16427_v6 = vpop.eup %16426 }
0x1f02   :  { %6065 = vrot.lane.b32.xlu1 %v18008_v61, %s17173_s0  ;;  %v5954_v7 = vsel %vm2091_vm3, %v16427_v6, 0.0 }
0x1f15   :  { %5968 = vrot.lane.b32.xlu0 %v18031_v15, %s17207_s6 }
0x1f19   :  { %6063 = vrot.lane.b32.xlu0 %v18018_v63, %s17173_s0 }
0x1f26   :  { %5955 = vadd.xlane.f32.xlu1 %v5954_v7 }
0x1f37   :  { %6116 = vrot.lane.b32.xlu1 %v18020_v1, %s17173_s0 }
0x1f3b   :  { %6114 = vrot.lane.b32.xlu1 %v18029_v14, %s17173_s0 }
0x1f72   :  { %v5947_v12 = vpop.xlane.xlu0 %5946 }
0x1f76   :  { %v5950_v9 = vpop.xlane.xlu1 %5949 }
0x1f77   :  { %16428 = vrcp.f32 %v5950_v9 }
0x1f78   :  { %16430 = vrcp.f32 %v5947_v12 }
0x1f7a   :  { %v6017_v31 = vpop.permute.xlu1 %6016 }
0x1f7b   :  { %14751 = vmatpush3.bf16.msra.mxu0 %v6017_v31 }
0x1f7c   :  { %14762 = vmatprep.subr.bf16.mxu0 %v17205_v38 }
0x1f7e   :  { %v6066_v60 = vpop.permute.xlu1 %6065 }
0x1f7f   :  { %v6071_v56 = vsel %vm1996_vm2, %v6066_v60, 0 }
0x1f84   :  { %v16429_v3 = vpop.eup %16428 }
0x1f85   :  { %v16431_v21 = vpop.eup %16430  ;;  %v5962_v18 = vmul.f32 %v16429_v3, %v16423_v33 }
0x1f86   :  { %v5961_v19 = vmul.f32 %v16431_v21, %v16421_v11 }
0x1f88   :  { %v5953_v13 = vpop.xlane.xlu0 %5952  ;;  %v5965_v8 = vpack.c.bf16 %v5962_v18, %v5961_v19 }
0x1f89   :  { %16432 = vrcp.f32 %v5953_v13 }
0x1f8c   :  { %v5969_v57 = vpop.permute.xlu0 %5968 }
0x1f8d   :  { %14745 = vmatpush3.bf16.msra.mxu1 %v5969_v57 }
0x1f8e   :  { %14756 = vmatprep.subr.bf16.mxu1 %v17205_v38 }
0x1f90   :  { %14747 = vmatmul.mubr.msk.bf16.vlgmr.msra.gmra.mxu1 %vm2091_vm3, %v5965_v8  ;;  %v6064_v58 = vpop.permute.xlu0 %6063 }
0x1f91   :  { %14757 = vmatpush3.bf16.xpose.msra.mxu1 %v6071_v56  ;;  %14758 = vmatprep.mubr.msk.bf16.mxu1 %vm17206_vm1, %v17205_v38 }
0x1f92   :  { %14768 = vmatprep.subr.bf16.mxu1 %v17205_v38 }
0x1f96   :  { %v16433_v37 = vpop.eup %16432 }
0x1f97   :  { %v5963_v24 = vmul.f32 %v16433_v37, %v16425_v16 }
0x1f98   :  { %14759 = vmatmul.mubr.msk.bf16.vlgmr.msra.gmra.mxu1 %vm1996_vm2, %v6064_v58 }
0x1f99   :  { %14770 = vmatprep.mubr.msk.bf16.mxu1 %vm17206_vm1, %v17205_v38 }
0x1faf   :  { %v5956_v27 = vpop.xlane.xlu1 %5955 }
0x1fb0   :  { %16434 = vrcp.f32 %v5956_v27 }
0x1fb3   :  { %v6117_v26 = vpop.permute.xlu1 %6116 }
0x1fb4   :  { %v6122_v62 = vsel %vm1996_vm2, %v6117_v26, 0 }
0x1fb7   :  { %v6115_v28 = vpop.permute.xlu1 %6114 }
0x1fbd   :  { %v16435_v22 = vpop.eup %16434 }
0x1fbe   :  { %v5964_v36 = vmul.f32 %v16435_v22, %v16427_v6 }
0x1fc0   :  { %v5966_v30 = vpack.c.bf16 %v5964_v36, %v5963_v24 }
0x1fc2   :  { %14753 = vmatmul.mubr.msk.bf16.vlgmr.msra.gmra.mxu0 %vm2091_vm3, %v5966_v30 }
0x1fc3   :  { %14763 = vmatpush3.bf16.xpose.msra.mxu0 %v6122_v62  ;;  %14764 = vmatprep.mubr.msk.bf16.mxu0 %vm17206_vm1, %v17205_v38 }
0x1fc4   :  { %14774 = vmatprep.subr.bf16.mxu0 %v17205_v38 }
0x1fca   :  { %14765 = vmatmul.mubr.msk.bf16.vlgmr.msra.gmra.mxu0 %vm1996_vm2, %v6115_v28 }
0x1fcb   :  { %14776 = vmatprep.mubr.msk.bf16.mxu0 %vm17206_vm1, %v17205_v38 }
0x2050   :  { %v18117_v29 = vpop.f32.mrf.mxu1 }
0x2052   :  { %v14748_v34 = vpop.f32.mrf.mxu1 }
0x2054   :  { %v18119_v40 = vpop.f32.mrf.mxu1 }
0x2055   :  { %v15545_v17 = vpack.i.bf16 %v18119_v40, %v18117_v29 }
0x2056   :  { %v14749_v42 = vpop.f32.mrf.mxu1 }
0x2058   :  { %v6107_v4 = vpop.f32.mrf.mxu1 }
0x2059   :  { %v6165_v10 = vsel %vm2091_vm3, %v6107_v4, -inf }
0x205a   :  { %6166 = vmax.xlane.f32.xlu0 %v6165_v10  ;;  %v14760_v11 = vpop.f32.mrf.mxu1 }
0x205c   :  { %v6110_v45 = vpop.f32.mrf.mxu1 }
0x205d   :  { %v6168_v33 = vsel %vm2091_vm3, %v6110_v45, -inf }
0x205e   :  { %6169 = vmax.xlane.f32.xlu1 %v6168_v33  ;;  %v14761_v51 = vpop.f32.mrf.mxu1 }
0x2082   :  { %v18125_v53 = vpop.f32.mrf.mxu0 }
0x2084   :  { %v14754_v25 = vpop.f32.mrf.mxu0 }
0x2086   :  { %v18127_v2 = vpop.f32.mrf.mxu0 }
0x2087   :  { %v15550_v16 = vpack.i.bf16 %v18127_v2, %v18125_v53 }
0x2088   :  { %v14755_v55 = vpop.f32.mrf.mxu0 }
0x208a   :  { %v6158_v59 = vpop.f32.mrf.mxu0 }
0x208b   :  { %v6171_v41 = vsel %vm2091_vm3, %v6158_v59, -inf }
0x208c   :  { %v14766_v39 = vpop.f32.mrf.mxu0  ;;  %6172 = vmax.xlane.f32.xlu0 %v6171_v41 }
0x208e   :  { %v6161_v6 = vpop.f32.mrf.mxu0 }
0x208f   :  { %v6174_v7 = vsel %vm2091_vm3, %v6161_v6, -inf }
0x2090   :  { %v14767_v9 = vpop.f32.mrf.mxu0  ;;  %6175 = vmax.xlane.f32.xlu0 %v6174_v7 }
0x20e3   :  { %v6167_v12 = vpop.xlane.xlu0 %6166 }
0x20e4   :  { %v6177_v31 = vsub.f32 %v6107_v4, %v6167_v12 }
0x20e6   :  { %v6181_v3 = vmul.f32 1.442695, %v6177_v31 }
0x20e7   :  { %v6170_v13 = vpop.xlane.xlu1 %6169 }
0x20e8   :  { %16436 = vpow2.f32 %v6181_v3  ;;  %v6178_v21 = vsub.f32 %v6110_v45, %v6170_v13 }
0x20ea   :  { %v6183_v18 = vmul.f32 1.442695, %v6178_v21 }
0x20ec   :  { %16438 = vpow2.f32 %v6183_v18 }
0x20f5   :  { %v16437_v19 = vpop.eup %16436 }
0x20f6   :  { %v6189_v57 = vsel %vm2091_vm3, %v16437_v19, 0.0 }
0x20f7   :  { %6190 = vadd.xlane.f32.xlu0 %v6189_v57 }
0x20f9   :  { %v16439_v60 = vpop.eup %16438 }
0x20fa   :  { %v6192_v8 = vsel %vm2091_vm3, %v16439_v60, 0.0 }
0x20fb   :  { %6193 = vadd.xlane.f32.xlu1 %v6192_v8 }
0x210c   :  { %6258 = vrot.lane.b32.xlu1 %v18011_v50, %s17173_s0 }
0x2110   :  { %6307 = vrot.lane.b32.xlu1 %v18008_v61, %s17208_s4 }
0x2115   :  { %v6173_v56 = vpop.xlane.xlu0 %6172 }
0x2116   :  { %v6179_v58 = vsub.f32 %v6158_v59, %v6173_v56 }
0x2118   :  { %v6185_v27 = vmul.f32 1.442695, %v6179_v58 }
0x2119   :  { %v6176_v37 = vpop.xlane.xlu0 %6175 }
0x211a   :  { %16440 = vpow2.f32 %v6185_v27  ;;  %v6180_v22 = vsub.f32 %v6161_v6, %v6176_v37 }
0x211c   :  { %v6187_v24 = vmul.f32 1.442695, %v6180_v22 }
0x211e   :  { %16442 = vpow2.f32 %v6187_v24 }
0x2127   :  { %v16441_v36 = vpop.eup %16440 }
0x2128   :  { %v6195_v26 = vsel %vm2091_vm3, %v16441_v36, 0.0 }
0x2129   :  { %6196 = vadd.xlane.f32.xlu0 %v6195_v26 }
0x212b   :  { %v16443_v30 = vpop.eup %16442 }
0x212c   :  { %v6198_v62 = vsel %vm2091_vm3, %v16443_v30, 0.0 }
0x2134   :  { %6199 = vadd.xlane.f32.xlu1 %v6198_v62 }
0x213f   :  { %6211 = vrot.lane.b32.xlu0 %v18031_v15, %s17173_s0 }
0x2143   :  { %6305 = vrot.lane.b32.xlu0 %v18018_v63, %s17208_s4 }
0x2145   :  { %6358 = vrot.lane.b32.xlu1 %v18020_v1, %s17208_s4 }
0x2149   :  { %6356 = vrot.lane.b32.xlu1 %v18029_v14, %s17208_s4 }
0x2180   :  { %v6191_v34 = vpop.xlane.xlu0 %6190 }
0x2184   :  { %v6194_v61 = vpop.xlane.xlu1 %6193 }
0x2185   :  { %16444 = vrcp.f32 %v6194_v61 }
0x2186   :  { %16446 = vrcp.f32 %v6191_v34 }
0x2188   :  { %v6259_v28 = vpop.permute.xlu1 %6258 }
0x2189   :  { %14775 = vmatpush3.bf16.msra.mxu0 %v6259_v28 }
0x218a   :  { %14786 = vmatprep.subr.bf16.mxu0 %v17205_v38 }
0x218c   :  { %v6308_v33 = vpop.permute.xlu1 %6307 }
0x218d   :  { %v6313_v14 = vsel %vm1996_vm2, %v6308_v33, 0 }
0x2192   :  { %v16445_v42 = vpop.eup %16444 }
0x2193   :  { %v16447_v10 = vpop.eup %16446  ;;  %v6206_v11 = vmul.f32 %v16445_v42, %v16439_v60 }
0x2194   :  { %v6205_v45 = vmul.f32 %v16447_v10, %v16437_v19 }
0x2196   :  { %v6209_v1 = vpack.c.bf16 %v6206_v11, %v6205_v45 }
0x21b2   :  { %v6197_v4 = vpop.xlane.xlu0 %6196 }
0x21b3   :  { %16448 = vrcp.f32 %v6197_v4 }
0x21b6   :  { %v6212_v63 = vpop.permute.xlu0 %6211 }
0x21b7   :  { %14769 = vmatpush3.bf16.msra.mxu1 %v6212_v63 }
0x21b8   :  { %14780 = vmatprep.subr.bf16.mxu1 %v17205_v38 }
0x21ba   :  { %14771 = vmatmul.mubr.msk.bf16.vlgmr.msra.gmra.mxu1 %vm2091_vm3, %v6209_v1  ;;  %v6306_v25 = vpop.permute.xlu0 %6305 }
0x21bb   :  { %14781 = vmatpush3.bf16.xpose.msra.mxu1 %v6313_v14  ;;  %14782 = vmatprep.mubr.msk.bf16.mxu1 %vm17206_vm1, %v17205_v38 }
0x21bc   :  { %14792 = vmatprep.subr.bf16.mxu1 %v17205_v38 }
0x21bd   :  { %v6200_v51 = vpop.xlane.xlu1 %6199 }
0x21be   :  { %16450 = vrcp.f32 %v6200_v51 }
0x21c0   :  { %v16449_v55 = vpop.eup %16448 }
0x21c1   :  { %v6207_v41 = vmul.f32 %v16449_v55, %v16441_v36  ;;  %v6359_v6 = vpop.permute.xlu1 %6358 }
0x21c2   :  { %14783 = vmatmul.mubr.msk.bf16.vlgmr.msra.gmra.mxu1 %vm1996_vm2, %v6306_v25  ;;  %v6364_v9 = vsel %vm1996_vm2, %v6359_v6, 0 }
0x21c3   :  { %14794 = vmatprep.mubr.msk.bf16.mxu1 %vm17206_vm1, %v17205_v38 }
0x21c5   :  { %v6357_v12 = vpop.permute.xlu1 %6356 }
0x21cb   :  { %v16451_v59 = vpop.eup %16450 }
0x21cc   :  { %v6208_v39 = vmul.f32 %v16451_v59, %v16443_v30 }
0x21ce   :  { %v6210_v7 = vpack.c.bf16 %v6208_v39, %v6207_v41 }
0x21d0   :  { %14777 = vmatmul.mubr.msk.bf16.vlgmr.msra.gmra.mxu0 %vm2091_vm3, %v6210_v7 }
0x21d1   :  { %14787 = vmatpush3.bf16.xpose.msra.mxu0 %v6364_v9  ;;  %14788 = vmatprep.mubr.msk.bf16.mxu0 %vm17206_vm1, %v17205_v38 }
0x21d2   :  { %14798 = vmatprep.subr.bf16.mxu0 %v17205_v38 }
0x21d8   :  { %14789 = vmatmul.mubr.msk.bf16.vlgmr.msra.gmra.mxu0 %vm1996_vm2, %v6357_v12 }
0x21d9   :  { %14800 = vmatprep.mubr.msk.bf16.mxu0 %vm17206_vm1, %v17205_v38 }
0x227a   :  { %v6251_v31 = vpop.f32.mrf.mxu1 }
0x227c   :  { %v14772_v3 = vpop.f32.mrf.mxu1 }
0x227e   :  { %v6254_v13 = vpop.f32.mrf.mxu1 }
0x227f   :  { %v15555_v21 = vpack.i.bf16 %v6254_v13, %v6251_v31 }
0x2280   :  { %v14773_v18 = vpop.f32.mrf.mxu1 }
0x2282   :  { %v6349_v19 = vpop.f32.mrf.mxu1 }
0x2283   :  { %v6407_v57 = vsel %vm2091_vm3, %v6349_v19, -inf }
0x2284   :  { %6408 = vmax.xlane.f32.xlu0 %v6407_v57  ;;  %v14784_v60 = vpop.f32.mrf.mxu1 }
0x2286   :  { %v6352_v8 = vpop.f32.mrf.mxu1 }
0x2287   :  { %v6410_v56 = vsel %vm2091_vm3, %v6352_v8, -inf }
0x2288   :  { %6411 = vmax.xlane.f32.xlu1 %v6410_v56  ;;  %v14785_v58 = vpop.f32.mrf.mxu1  ;;  %v16003_v56 = vld [vmem:[#allocation10 + $0x78] sm:$0xff]  }
0x2289   :  { %v16004_v58 = vld [vmem:[#allocation10 + $0x70] sm:$0xff]  }
0x2290   :  { %v6298_v27 = vpop.f32.mrf.mxu0 }
0x2292   :  { %v14778_v37 = vpop.f32.mrf.mxu0 }
0x2293   :  { %v16006_v37 = vld [vmem:[#allocation10 + $0x60] sm:$0xff]  }
0x2294   :  { %v6301_v22 = vpop.f32.mrf.mxu0 }
0x2295   :  { %v15560_v24 = vpack.i.bf16 %v6301_v22, %v6298_v27  ;;  %v16005_v27 = vld [vmem:[#allocation10 + $0x68] sm:$0xff]   ;;  %v16007_v22 = vld [vmem:[#allocation10 + $0x58] sm:$0xff]  }
0x2296   :  { %v14779_v36 = vpop.f32.mrf.mxu0 }
0x2297   :  { %v16009_v36 = vld [vmem:[#allocation10 + $0x48] sm:$0xff]  }
0x2298   :  { %v6400_v26 = vpop.f32.mrf.mxu0 }
0x2299   :  { %v6413_v30 = vsel %vm2091_vm3, %v6400_v26, -inf }
0x229a   :  { %v14790_v62 = vpop.f32.mrf.mxu0  ;;  %6414 = vmax.xlane.f32.xlu0 %v6413_v30 }
0x229c   :  { %v6403_v61 = vpop.f32.mrf.mxu0 }
0x229d   :  { %v6416_v28 = vsel %vm2091_vm3, %v6403_v61, -inf }
0x229e   :  { %v14791_v34 = vpop.f32.mrf.mxu0  ;;  %6417 = vmax.xlane.f32.xlu0 %v6416_v28 }
0x229f   :  { %v16010_v34 = vld [vmem:[#allocation10 + $0x40] sm:$0xff]  }
0x230d   :  { %v6409_v42 = vpop.xlane.xlu0 %6408 }
0x230e   :  { %v6419_v4 = vsub.f32 %v6349_v19, %v6409_v42  ;;  %v18193_v42 = vld [vmem:[#allocation13 + $0x78] sm:$0xff]  }
0x2310   :  { %v6423_v10 = vmul.f32 1.442695, %v6419_v4 }
0x2311   :  { %v6412_v11 = vpop.xlane.xlu1 %6411 }
0x2312   :  { %16452 = vpow2.f32 %v6423_v10  ;;  %v6420_v45 = vsub.f32 %v6352_v8, %v6412_v11 }
0x2314   :  { %v6425_v63 = vmul.f32 1.442695, %v6420_v45 }
0x2316   :  { %16454 = vpow2.f32 %v6425_v63 }
0x231f   :  { %v16453_v33 = vpop.eup %16452 }
0x2320   :  { %v6431_v1 = vsel %vm2091_vm3, %v16453_v33, 0.0 }
0x2321   :  { %6432 = vadd.xlane.f32.xlu0 %v6431_v1  ;;  %v16021_v1 = vld [vmem:[#allocation16 + $0xf4] ss:$8 sps:$4 sm:$0xff]  }
0x2323   :  { %v16455_v14 = vpop.eup %16454  ;;  %v6415_v51 = vpop.xlane.xlu0 %6414 }
0x2324   :  { %v6421_v25 = vsub.f32 %v6400_v26, %v6415_v51  ;;  %v6434_v55 = vsel %vm2091_vm3, %v16455_v14, 0.0  ;;  %v16022_v51 = vld [vmem:[#allocation16 + $0xe0] ss:$8 sps:$4 sm:$0xff]  }
0x2325   :  { %6435 = vadd.xlane.f32.xlu1 %v6434_v55  ;;  %v16025_v55 = vld [vmem:[#allocation16 + $0xd0] ss:$8 sps:$4 sm:$0xff]  }
0x2326   :  { %v6427_v59 = vmul.f32 1.442695, %v6421_v25  ;;  %v16027_v25 = vld [vmem:[#allocation16 + $0xd4] ss:$8 sps:$4 sm:$0xff]  }
0x2327   :  { %v6418_v41 = vpop.xlane.xlu0 %6417 }
0x2328   :  { %16456 = vpow2.f32 %v6427_v59  ;;  %v6422_v39 = vsub.f32 %v6403_v61, %v6418_v41  ;;  %v16030_v59 = vld [vmem:[#allocation16 + $0xc4] ss:$8 sps:$4 sm:$0xff]   ;;  %v16028_v41 = vld [vmem:[#allocation16 + $0xc0] ss:$8 sps:$4 sm:$0xff]  }
0x232a   :  { %v6429_v6 = vmul.f32 1.442695, %v6422_v39  ;;  %v16033_v39 = vld [vmem:[#allocation16 + $0xb4] ss:$8 sps:$4 sm:$0xff]  }
0x232c   :  { %16458 = vpow2.f32 %v6429_v6  ;;  %v16031_v6 = vld [vmem:[#allocation16 + $0xb0] ss:$8 sps:$4 sm:$0xff]  }
0x2335   :  { %v16457_v7 = vpop.eup %16456 }
0x2336   :  { %v6437_v9 = vsel %vm2091_vm3, %v16457_v7, 0.0 }
0x2337   :  { %6438 = vadd.xlane.f32.xlu0 %v6437_v9  ;;  %v16034_v9 = vld [vmem:[#allocation16 + $0xa0] ss:$8 sps:$4 sm:$0xff]  }
0x2339   :  { %v16459_v12 = vpop.eup %16458 }
0x233a   :  { %v6440_v31 = vsel %vm2091_vm3, %v16459_v12, 0.0 }
0x233b   :  { %6441 = vadd.xlane.f32.xlu1 %v6440_v31 }
0x234c   :  { %6500 = vrot.lane.b32.xlu1 %v18011_v50, %s17208_s4 }
0x234d   :  { %6453 = vrot.lane.b32.xlu0 %v18031_v15, %s17208_s4 }
0x2350   :  { %15546 = vrot.lane.b32.xlu1 %v15545_v17, %s17208_s4 }
0x2351   :  { %15556 = vrot.lane.b32.xlu0 %v15555_v21, %s17173_s0 }
0x2354   :  { %15551 = vrot.lane.b32.xlu1 %v15550_v16, %s17208_s4 }
0x2358   :  { %15561 = vrot.lane.b32.xlu1 %v15560_v24, %s17173_s0  ;;  %v16008_v24 = vld [vmem:[#allocation10 + $0x50] sm:$0xff]  }
0x23aa   :  { %v6433_v13 = vpop.xlane.xlu0 %6432 }
0x23ae   :  { %v6436_v3 = vpop.xlane.xlu1 %6435 }
0x23af   :  { %16460 = vrcp.f32 %v6436_v3 }
0x23b0   :  { %16462 = vrcp.f32 %v6433_v13 }
0x23bc   :  { %v16461_v50 = vpop.eup %16460 }
0x23bd   :  { %v16463_v18 = vpop.eup %16462  ;;  %v6448_v19 = vmul.f32 %v16461_v50, %v16455_v14  ;;  %v16024_v14 = vld [vmem:[#allocation16 + $0xe4] ss:$8 sps:$4 sm:$0xff]  }
0x23be   :  { %v6447_v29 = vmul.f32 %v16463_v18, %v16453_v33  ;;  %v16019_v33 = vld [vmem:[#allocation16 + $0xf0] ss:$8 sps:$4 sm:$0xff]  }
0x23c0   :  { %v6439_v15 = vpop.xlane.xlu0 %6438  ;;  %v6451_v21 = vpack.c.bf16 %v6448_v19, %v6447_v29 }
0x23c1   :  { %16464 = vrcp.f32 %v6439_v15 }
0x23c4   :  { %v6454_v40 = vpop.permute.xlu0 %6453  ;;  %v6442_v17 = vpop.xlane.xlu1 %6441 }
0x23c5   :  { %16466 = vrcp.f32 %v6442_v17  ;;  %14793 = vmatpush3.bf16.msra.mxu1 %v6454_v40 }
0x23c6   :  { %14804 = vmatprep.subr.bf16.mxu1 %v16003_v56 }
0x23c8   :  { %14795 = vmatmul.mubr.msk.bf16.vlgmr.msra.gmra.mxu1 %vm2091_vm3, %v6451_v21  ;;  %v6501_v53 = vpop.permute.xlu1 %6500  ;;  %v15557_v13 = vpop.permute.xlu0 %15556 }
0x23c9   :  { %14799 = vmatpush3.bf16.msra.mxu0 %v6501_v53  ;;  %14805 = vmatpush3.bf16.msra.mxu1 %v16003_v56  ;;  %v15559_v18 = vunpack.i.h.bf16 %v15557_v13  ;;  %v15558_v19 = vunpack.i.l.bf16 %v15557_v13 }
0x23ca   :  { %14806 = vmatprep.subr.bf16.mxu1 %v16004_v58  ;;  %6824 = vmatprep.subr.bf16.mxu0 %v16021_v1 }
0x23cd   :  { %14807 = vmatpush3.bf16.msra.mxu1 %v16004_v58 }
0x23ce   :  { %v16465_v2 = vpop.eup %16464  ;;  %14808 = vmatprep.subr.bf16.mxu1 %v16005_v27 }
0x23cf   :  { %v6449_v57 = vmul.f32 %v16465_v2, %v16457_v7  ;;  %v16036_v7 = vld [vmem:[#allocation16 + $0xa4] ss:$8 sps:$4 sm:$0xff]  }
0x23d1   :  { %14809 = vmatpush3.bf16.msra.mxu1 %v16005_v27 }
0x23d2   :  { %v16467_v16 = vpop.eup %16466  ;;  %14810 = vmatprep.subr.bf16.mxu1 %v16006_v37 }
0x23d3   :  { %v6450_v60 = vmul.f32 %v16467_v16, %v16459_v12  ;;  %v15547_v12 = vpop.permute.xlu1 %15546 }
0x23d4   :  { %v15549_v31 = vunpack.i.h.bf16 %v15547_v12  ;;  %v15548_v3 = vunpack.i.l.bf16 %v15547_v12  ;;  %v13408_v12 = vld [vmem:[%s19168_s27 + $0x2] sm:$0x3] }
0x23d5   :  { %v6452_v8 = vpack.c.bf16 %v6450_v60, %v6449_v57  ;;  %14811 = vmatpush3.bf16.msra.mxu1 %v16006_v37  ;;  %v6737_v13 = vrot.slane %v13408_v12, %v17501_v46 }
0x23d6   :  { %14812 = vmatprep.subr.bf16.mxu1 %v16007_v22  ;;  %v6596_v50 = vsel %vm1996_vm2, %v18073_v44, %v15549_v31  ;;  %v6595_v15 = vsel %vm1996_vm2, %v18071_v20, %v15548_v3 }
0x23d7   :  { %14801 = vmatmul.mubr.msk.bf16.vlgmr.msra.gmra.mxu0 %vm2091_vm3, %v6452_v8  ;;  %v6599_v21 = vsel %vm3010_vm4, %v6595_v15, %v15558_v19  ;;  %v6600_v53 = vsel %vm3010_vm4, %v6596_v50, %v15559_v18  ;;  %v15552_v57 = vpop.permute.xlu1 %15551 }
0x23d8   :  { %6856 = vmatprep.mubr.bf16.mxu0 %v17204_v32  ;;  %6825 = vmatpush1.bf16.msra.mxu0 %v16019_v33  ;;  %v15554_v8 = vunpack.i.h.bf16 %v15552_v57  ;;  %v15553_v56 = vunpack.i.l.bf16 %v15552_v57  ;;  %v16040_v33 = vld [vmem:[#allocation16 + $0x80] ss:$8 sps:$4 sm:$0xff]  }
0x23d9   :  { %14813 = vmatpush3.bf16.msra.mxu1 %v16007_v22  ;;  %6826 = vmatprep.subr.bf16.mxu0 %v16024_v14 }
0x23da   :  { %14814 = vmatprep.subr.bf16.mxu1 %v16008_v24  ;;  %v6598_v37 = vsel %vm1996_vm2, %v18079_v23, %v15554_v8  ;;  %v6597_v22 = vsel %vm1996_vm2, %v18077_v43, %v15553_v56  ;;  %v16013_v23 = vld [vmem:[#allocation13 + $0x68] sm:$0xff]   ;;  %v16014_v43 = vld [vmem:[#allocation13 + $0x60] sm:$0xff]   ;;  %v6741_v56 = vrot.slane %v13408_v12, %v17492_v35 }
0x23db   :  { %v15562_v44 = vpop.permute.xlu1 %15561 }
0x23dc   :  { %6827 = vmatpush1.bf16.msra.mxu0 %v16022_v51  ;;  %v15564_v20 = vunpack.i.h.bf16 %v15562_v44  ;;  %v15563_v58 = vunpack.i.l.bf16 %v15562_v44 }
0x23dd   :  { %14815 = vmatpush3.bf16.msra.mxu1 %v16008_v24  ;;  %6828 = vmatprep.subr.bf16.mxu0 %v16027_v25  ;;  %v13399_v25 = vld [vmem:[#allocation12 + $0x1] ss:$0 sm:$0xff] }
0x23de   :  { %14816 = vmatprep.subr.bf16.mxu1 %v16009_v36 }
0x23e0   :  { %6829 = vmatpush1.bf16.msra.mxu0 %v16025_v55 }
0x23e1   :  { %14817 = vmatpush3.bf16.msra.mxu1 %v16009_v36  ;;  %6830 = vmatprep.subr.bf16.mxu0 %v16030_v59 }
0x23e2   :  { %14818 = vmatprep.subr.bf16.mxu1 %v16010_v34 }
0x23e4   :  { %6831 = vmatpush1.bf16.msra.mxu0 %v16028_v41 }
0x23e5   :  { %14819 = vmatpush3.bf16.msra.mxu1 %v16010_v34  ;;  %6832 = vmatprep.subr.bf16.mxu0 %v16033_v39  ;;  %v16012_v34 = vld [vmem:[#allocation13 + $0x70] sm:$0xff]  }
0x23e6   :  { %14824 = vmatprep.subr.bf16.mxu1 %v18193_v42 }
0x23e8   :  { %6833 = vmatpush1.bf16.msra.mxu0 %v16031_v6 }
0x23e9   :  { %6834 = vmatprep.subr.bf16.mxu0 %v16036_v7 }
0x23ec   :  { %6835 = vmatpush1.bf16.msra.mxu0 %v16034_v9 }
0x2488   :  { %v6493_v26 = vpop.f32.mrf.mxu1 }
0x248a   :  { %v14796_v30 = vpop.f32.mrf.mxu1 }
0x248b   :  { %v6602_v30 = vsel %vm3010_vm4, %v6598_v37, %v15564_v20 }
0x248c   :  { %v6496_v62 = vpop.f32.mrf.mxu1 }
0x248d   :  { %v15565_v61 = vpack.i.bf16 %v6496_v62, %v6493_v26  ;;  %v6601_v26 = vsel %vm3010_vm4, %v6597_v22, %v15563_v58 }
0x248e   :  { %v14797_v28 = vpop.f32.mrf.mxu1 }
0x248f   :  { %15566 = vrot.lane.b32.xlu0 %v15565_v61, %s17207_s6 }
0x2497   :  { %v6540_v4 = vpop.f32.mrf.mxu0 }
0x2499   :  { %v14802_v10 = vpop.f32.mrf.mxu0 }
0x249a   :  { %v16016_v10 = vld [vmem:[#allocation13 + $0x50] sm:$0xff]  }
0x249b   :  { %v6543_v11 = vpop.f32.mrf.mxu0 }
0x249c   :  { %v15570_v45 = vpack.i.bf16 %v6543_v11, %v6540_v4  ;;  %v16015_v4 = vld [vmem:[#allocation13 + $0x58] sm:$0xff]   ;;  %v16017_v11 = vld [vmem:[#allocation13 + $0x48] sm:$0xff]  }
0x249d   :  { %v14803_v63 = vpop.f32.mrf.mxu0 }
0x249e   :  { %15571 = vrot.lane.b32.xlu1 %v15570_v45, %s17207_s6  ;;  %v16018_v45 = vld [vmem:[#allocation13 + $0x40] sm:$0xff]   ;;  %v16042_v63 = vld [vmem:[#allocation16 + $0x84] ss:$8 sps:$4 sm:$0xff]  }
0x2501   :  { %v15567_v29 = vpop.permute.xlu0 %15566 }
0x2502   :  { %v15569_v40 = vunpack.i.h.bf16 %v15567_v29  ;;  %v15568_v17 = vunpack.i.l.bf16 %v15567_v29 }
0x2504   :  { %v6603_v2 = vsel %vm3015_vm5, %v6599_v21, %v15568_v17  ;;  %v6604_v16 = vsel %vm3015_vm5, %v6600_v53, %v15569_v40 }
0x2505   :  { %v6607_v60 = vpack.c.bf16 %v6604_v16, %v6603_v2  ;;  %v13425_v16 = vld [vmem:[#allocation15 + $0x1] ss:$0 sm:$0xff] }
0x2507   :  { %14820 = vmatprep.mubr.bf16.mxu1 %v6607_v60 }
0x2510   :  { %v15572_v27 = vpop.permute.xlu1 %15571 }
0x2511   :  { %v15574_v24 = vunpack.i.h.bf16 %v15572_v27  ;;  %v15573_v36 = vunpack.i.l.bf16 %v15572_v27 }
0x2513   :  { %v6605_v62 = vsel %vm3015_vm5, %v6601_v26, %v15573_v36  ;;  %v6606_v61 = vsel %vm3015_vm5, %v6602_v30, %v15574_v24 }
0x2514   :  { %v6608_v28 = vpack.c.bf16 %v6606_v61, %v6605_v62 }
0x2516   :  { %14821 = vmatmul.mubr.bf16.vlgmr.msra.gmra.mxu1 %v6608_v28 }
0x2517   :  { %14825 = vmatpush3.bf16.msra.mxu1 %v18193_v42  ;;  %14840 = vmatprep.mubr.bf16.mxu1 %v17992_v48  ;;  %v16039_v48 = vld [vmem:[#allocation16 + $0x94] ss:$8 sps:$4 sm:$0xff]   ;;  %v16037_v42 = vld [vmem:[#allocation16 + $0x90] ss:$8 sps:$4 sm:$0xff]  }
0x2518   :  { %14826 = vmatprep.subr.bf16.mxu1 %v16012_v34  ;;  %6836 = vmatprep.subr.bf16.mxu0 %v16039_v48 }
0x2519   :  { %6837 = vmatpush1.bf16.msra.mxu0 %v16037_v42 }
0x251a   :  { %6838 = vmatprep.subr.bf16.mxu0 %v16042_v63 }
0x251b   :  { %14827 = vmatpush3.bf16.msra.mxu1 %v16012_v34 }
0x251c   :  { %14828 = vmatprep.subr.bf16.mxu1 %v16013_v23 }
0x251d   :  { %6839 = vmatpush1.bf16.msra.mxu0 %v16040_v33 }
0x251e   :  { %14844 = vmatprep.subr.bf16.mxu0 %v17205_v38 }
0x251f   :  { %14829 = vmatpush3.bf16.msra.mxu1 %v16013_v23 }
0x2520   :  { %14830 = vmatprep.subr.bf16.mxu1 %v16014_v43 }
0x2523   :  { %14831 = vmatpush3.bf16.msra.mxu1 %v16014_v43 }
0x2524   :  { %14832 = vmatprep.subr.bf16.mxu1 %v16015_v4 }
0x2527   :  { %14833 = vmatpush3.bf16.msra.mxu1 %v16015_v4 }
0x2528   :  { %14834 = vmatprep.subr.bf16.mxu1 %v16016_v10 }
0x252b   :  { %14835 = vmatpush3.bf16.msra.mxu1 %v16016_v10 }
0x252c   :  { %14836 = vmatprep.subr.bf16.mxu1 %v16017_v11 }
0x252f   :  { %14837 = vmatpush3.bf16.msra.mxu1 %v16017_v11 }
0x2530   :  { %14838 = vmatprep.subr.bf16.mxu1 %v16018_v45 }
0x2533   :  { %14839 = vmatpush3.bf16.msra.mxu1 %v16018_v45 }
0x2534   :  { %14862 = vmatprep.subr.bf16.mxu1 %v17205_v38 }
0x2536   :  { %14841 = vmatmul.mubr.bf16.vlgmr.msra.gmra.mxu1 %v17998_v49 }
0x2537   :  { %14864 = vmatprep.mubr.msk.bf16.mxu1 %vm17206_vm1, %v17205_v38 }
0x25d6   :  { %v14822_v1 = vpop.f32.mrf.mxu1 }
0x25d7   :  { %v6706_v6 = vadd.f32 %v14822_v1, %v13399_v25 }
0x25d8   :  { %v6697_v14 = vpop.f32.mrf.mxu1 }
0x25d9   :  { %v6698_v49 = vadd.f32 %v13399_v25, %v6697_v14 }
0x25da   :  { %v14823_v51 = vpop.f32.mrf.mxu1 }
0x25db   :  { %v6709_v39 = vadd.f32 %v14823_v51, %v13399_v25 }
0x25dc   :  { %v6700_v55 = vpop.f32.mrf.mxu1 }
0x25dd   :  { %v6701_v59 = vadd.f32 %v13399_v25, %v6700_v55  ;;  %v6732_v7 = vpack.c.bf16 %v6709_v39, %v6706_v6 }
0x25df   :  { %v6731_v41 = vpack.c.bf16 %v6701_v59, %v6698_v49 }
0x25e1   :  { %6857 = vmatmul.mubr.bf16.vlgmr.msra.gmra.mxu0 %v6731_v41 }
0x25e2   :  { %6866 = vmatprep.mubr.bf16.mxu0 %v17204_v32 }
0x25e9   :  { %6867 = vmatmul.mubr.bf16.gmra.mxu0 %v6732_v7 }
0x25ea   :  { %14846 = vmatprep.mubr.msk.bf16.mxu0 %vm17206_vm1, %v17205_v38 }
0x25f6   :  { %v14842_v9 = vpop.f32.mrf.mxu1 }
0x25f7   :  { %v6997_v28 = vadd.f32 %v14842_v9, %v13425_v16 }
0x25f8   :  { %v6988_v31 = vpop.f32.mrf.mxu1 }
0x25f9   :  { %v6989_v8 = vadd.f32 %v13425_v16, %v6988_v31 }
0x25fa   :  { %v14843_v15 = vpop.f32.mrf.mxu1 }
0x25fb   :  { %v7000_v62 = vadd.f32 %v14843_v15, %v13425_v16 }
0x25fc   :  { %v6991_v21 = vpop.f32.mrf.mxu1 }
0x25fd   :  { %v6992_v60 = vadd.f32 %v13425_v16, %v6991_v21  ;;  %v18246_v23 = vpack.c.bf16 %v7000_v62, %v6997_v28 }
0x25ff   :  { %v18231_v37 = vpack.c.bf16 %v6992_v60, %v6989_v8 }
0x26a1   :  { %v6858_v3 = vpop.f32.mrf.mxu0 }
0x26a2   :  { %v6859_v19 = vadd.f32 %v6858_v3, %v6737_v13 }
0x26a3   :  { %v6860_v50 = vpop.f32.mrf.mxu0 }
0x26a4   :  { %v6861_v34 = vadd.f32 %v6860_v50, %v6741_v56 }
0x26a5   :  { %v6862_v18 = vpop.f32.mrf.mxu0 }
0x26a6   :  { %v6863_v29 = vadd.f32 %v6862_v18, %v6737_v13 }
0x26a7   :  { %v6864_v40 = vpop.f32.mrf.mxu0 }
0x26a8   :  { %v18225_v17 = vpack.c.bf16 %v6863_v29, %v6859_v19  ;;  %v6865_v61 = vadd.f32 %v6864_v40, %v6741_v56 }
0x26a9   :  { %v6868_v53 = vpop.f32.mrf.mxu0 }
0x26aa   :  { %v7028_v2 = vsel %vm1996_vm2, %v18225_v17, 0  ;;  %v6869_v20 = vadd.f32 %v6868_v53, %v6737_v13  ;;  %v18248_v43 = vpack.c.bf16 %v6865_v61, %v6861_v34 }
0x26ab   :  { %v6870_v57 = vpop.f32.mrf.mxu0  ;;  %14845 = vmatpush3.bf16.xpose.msra.mxu0 %v7028_v2 }
0x26ac   :  { %14850 = vmatprep.subr.bf16.mxu0 %v17205_v38  ;;  %v6871_v22 = vadd.f32 %v6870_v57, %v6741_v56 }
0x26ad   :  { %v6872_v44 = vpop.f32.mrf.mxu0 }
0x26ae   :  { %v6873_v58 = vadd.f32 %v6872_v44, %v6737_v13 }
0x26af   :  { %v6874_v27 = vpop.f32.mrf.mxu0 }
0x26b0   :  { %v18233_v24 = vpack.c.bf16 %v6873_v58, %v6869_v20  ;;  %v6875_v36 = vadd.f32 %v6874_v27, %v6741_v56 }
0x26b2   :  { %v18235_v26 = vpack.c.bf16 %v6875_v36, %v6871_v22  ;;  %14847 = vmatmul.mubr.msk.bf16.vlgmr.msra.gmra.mxu0 %vm1996_vm2, %v18231_v37  ;;  %v7075_v30 = vsel %vm1996_vm2, %v18233_v24, 0 }
0x26b3   :  { %14851 = vmatpush3.bf16.xpose.msra.mxu0 %v7075_v30  ;;  %14852 = vmatprep.mubr.msk.bf16.mxu0 %vm17206_vm1, %v17205_v38 }
0x26b4   :  { %14863 = vmatpush3.bf16.msra.mxu1 %v18235_v26  ;;  %14856 = vmatprep.subr.bf16.mxu0 %v17205_v38 }
0x26b5   :  { %14874 = vmatprep.subr.bf16.mxu1 %v17205_v38 }
0x26ba   :  { %14853 = vmatmul.mubr.msk.bf16.vlgmr.msra.gmra.mxu0 %vm1996_vm2, %v18246_v23 }
0x26bb   :  { %14857 = vmatpush3.bf16.msra.mxu0 %v18248_v43  ;;  %14858 = vmatprep.mubr.msk.bf16.mxu0 %vm17206_vm1, %v17205_v38 }
0x26bc   :  { %14868 = vmatprep.subr.bf16.mxu0 %v17205_v38 }
0x2772   :  { %v7064_v4 = vpop.f32.mrf.mxu0 }
0x2773   :  { %v7118_v10 = vsel %vm2091_vm3, %v7064_v4, -inf }
0x2774   :  { %7119 = vmax.xlane.f32.xlu0 %v7118_v10  ;;  %v14848_v11 = vpop.f32.mrf.mxu0 }
0x2776   :  { %v7067_v45 = vpop.f32.mrf.mxu0 }
0x2777   :  { %v7121_v48 = vsel %vm2091_vm3, %v7067_v45, -inf }
0x2778   :  { %7122 = vmax.xlane.f32.xlu1 %v7121_v48  ;;  %v14849_v42 = vpop.f32.mrf.mxu0 }
0x277a   :  { %v7111_v63 = vpop.f32.mrf.mxu0 }
0x277b   :  { %v7124_v33 = vsel %vm2091_vm3, %v7111_v63, -inf }
0x277c   :  { %7125 = vmax.xlane.f32.xlu0 %v7124_v33  ;;  %v14854_v1 = vpop.f32.mrf.mxu0 }
0x277e   :  { %v7114_v14 = vpop.f32.mrf.mxu0 }
0x277f   :  { %v7127_v51 = vsel %vm2091_vm3, %v7114_v14, -inf }
0x2780   :  { %7128 = vmax.xlane.f32.xlu0 %v7127_v51  ;;  %v14855_v25 = vpop.f32.mrf.mxu0 }
0x27fd   :  { %v7120_v55 = vpop.xlane.xlu0 %7119 }
0x27fe   :  { %v7130_v49 = vsub.f32 %v7064_v4, %v7120_v55 }
0x2800   :  { %v7134_v59 = vmul.f32 1.442695, %v7130_v49 }
0x2801   :  { %v7123_v41 = vpop.xlane.xlu1 %7122 }
0x2802   :  { %16468 = vpow2.f32 %v7134_v59  ;;  %v7131_v39 = vsub.f32 %v7067_v45, %v7123_v41 }
0x2804   :  { %v7136_v6 = vmul.f32 1.442695, %v7131_v39 }
0x2805   :  { %v7126_v7 = vpop.xlane.xlu0 %7125 }
0x2806   :  { %16470 = vpow2.f32 %v7136_v6  ;;  %v7132_v9 = vsub.f32 %v7111_v63, %v7126_v7 }
0x2808   :  { %v7138_v12 = vmul.f32 1.442695, %v7132_v9 }
0x2809   :  { %v7129_v19 = vpop.xlane.xlu0 %7128 }
0x280a   :  { %16472 = vpow2.f32 %v7138_v12  ;;  %v7133_v29 = vsub.f32 %v7114_v14, %v7129_v19 }
0x280c   :  { %v7140_v40 = vmul.f32 1.442695, %v7133_v29 }
0x280e   :  { %16474 = vpow2.f32 %v7140_v40 }
0x280f   :  { %v16469_v31 = vpop.eup %16468 }
0x2810   :  { %v7142_v3 = vsel %vm2091_vm3, %v16469_v31, 0.0 }
0x2811   :  { %7143 = vadd.xlane.f32.xlu0 %v7142_v3 }
0x2813   :  { %v16471_v13 = vpop.eup %16470 }
0x2814   :  { %v7145_v50 = vsel %vm2091_vm3, %v16471_v13, 0.0 }
0x2815   :  { %7146 = vadd.xlane.f32.xlu1 %v7145_v50 }
0x2817   :  { %v16473_v15 = vpop.eup %16472 }
0x2818   :  { %v7148_v18 = vsel %vm2091_vm3, %v16473_v15, 0.0 }
0x2819   :  { %7149 = vadd.xlane.f32.xlu0 %v7148_v18 }
0x281b   :  { %v16475_v21 = vpop.eup %16474 }
0x281c   :  { %v7151_v53 = vsel %vm2091_vm3, %v16475_v21, 0.0 }
0x2826   :  { %7309 = vrot.lane.b32.xlu1 %v18233_v24, %s17207_s6 }
0x282f   :  { %7256 = vrot.lane.b32.xlu0 %v18225_v17, %s17207_s6 }
0x284a   :  { %7152 = vadd.xlane.f32.xlu1 %v7151_v53 }
0x285b   :  { %7253 = vrot.lane.b32.xlu1 %v18231_v37, %s17207_s6 }
0x285f   :  { %7306 = vrot.lane.b32.xlu1 %v18246_v23, %s17207_s6 }
0x289a   :  { %v7144_v2 = vpop.xlane.xlu0 %7143 }
0x289b   :  { %16476 = vrcp.f32 %v7144_v2 }
0x289e   :  { %v7147_v16 = vpop.xlane.xlu1 %7146 }
0x289f   :  { %16478 = vrcp.f32 %v7147_v16 }
0x28a2   :  { %v7150_v57 = vpop.xlane.xlu0 %7149  ;;  %v7310_v22 = vpop.permute.xlu1 %7309 }
0x28a3   :  { %16480 = vrcp.f32 %v7150_v57  ;;  %v7315_v10 = vsel %vm1996_vm2, %v7310_v22, 0 }
0x28a6   :  { %v7257_v20 = vpop.permute.xlu0 %7256 }
0x28a7   :  { %v7262_v27 = vsel %vm1996_vm2, %v7257_v20, 0 }
0x28a8   :  { %v16477_v60 = vpop.eup %16476 }
0x28a9   :  { %v7158_v8 = vmul.f32 %v16477_v60, %v16469_v31 }
0x28ac   :  { %v16479_v44 = vpop.eup %16478 }
0x28ad   :  { %v7159_v56 = vmul.f32 %v16479_v44, %v16471_v13 }
0x28af   :  { %v7162_v58 = vpack.c.bf16 %v7159_v56, %v7158_v8 }
0x28b0   :  { %v16481_v62 = vpop.eup %16480 }
0x28b1   :  { %14859 = vmatmul.mubr.msk.bf16.vlgmr.msra.gmra.mxu0 %vm2091_vm3, %v7162_v58  ;;  %v7160_v28 = vmul.f32 %v16481_v62, %v16473_v15 }
0x28b2   :  { %14869 = vmatpush3.bf16.xpose.msra.mxu0 %v7262_v27  ;;  %14870 = vmatprep.mubr.msk.bf16.mxu0 %vm17206_vm1, %v17205_v38 }
0x28b3   :  { %14880 = vmatprep.subr.bf16.mxu0 %v17205_v38 }
0x28d3   :  { %v7153_v36 = vpop.xlane.xlu1 %7152 }
0x28d4   :  { %16482 = vrcp.f32 %v7153_v36 }
0x28d7   :  { %v7254_v30 = vpop.permute.xlu1 %7253 }
0x28d8   :  { %14871 = vmatmul.mubr.msk.bf16.vlgmr.msra.gmra.mxu0 %vm1996_vm2, %v7254_v30 }
0x28d9   :  { %14882 = vmatprep.mubr.msk.bf16.mxu0 %vm17206_vm1, %v17205_v38 }
0x28db   :  { %v7307_v11 = vpop.permute.xlu1 %7306 }
0x28e1   :  { %v16483_v61 = vpop.eup %16482 }
0x28e2   :  { %v7161_v34 = vmul.f32 %v16483_v61, %v16475_v21 }
0x28e4   :  { %v7163_v4 = vpack.c.bf16 %v7161_v34, %v7160_v28 }
0x28e6   :  { %14865 = vmatmul.mubr.msk.bf16.vlgmr.msra.gmra.mxu1 %vm2091_vm3, %v7163_v4 }
0x28e7   :  { %14875 = vmatpush3.bf16.xpose.msra.mxu1 %v7315_v10  ;;  %14876 = vmatprep.mubr.msk.bf16.mxu1 %vm17206_vm1, %v17205_v38 }
0x28e8   :  { %14886 = vmatprep.subr.bf16.mxu1 %v17205_v38 }
0x28ee   :  { %14877 = vmatmul.mubr.msk.bf16.vlgmr.msra.gmra.mxu1 %vm1996_vm2, %v7307_v11 }
0x28ef   :  { %14888 = vmatprep.mubr.msk.bf16.mxu1 %vm17206_vm1, %v17205_v38 }
0x2971   :  { %v18288_v45 = vpop.f32.mrf.mxu0 }
0x2973   :  { %v14860_v48 = vpop.f32.mrf.mxu0 }
0x2975   :  { %v18290_v42 = vpop.f32.mrf.mxu0 }
0x2977   :  { %v14861_v63 = vpop.f32.mrf.mxu0 }
0x2998   :  { %v7298_v33 = vpop.f32.mrf.mxu0 }
0x2999   :  { %v7358_v1 = vsel %vm2091_vm3, %v7298_v33, -inf }
0x299a   :  { %7359 = vmax.xlane.f32.xlu0 %v7358_v1  ;;  %v14872_v14 = vpop.f32.mrf.mxu0 }
0x299c   :  { %v7301_v51 = vpop.f32.mrf.mxu0 }
0x299d   :  { %v7361_v25 = vsel %vm2091_vm3, %v7301_v51, -inf }
0x299e   :  { %7362 = vmax.xlane.f32.xlu1 %v7361_v25  ;;  %v14873_v55 = vpop.f32.mrf.mxu0 }
0x29a6   :  { %v18294_v49 = vpop.f32.mrf.mxu1 }
0x29a8   :  { %v14866_v59 = vpop.f32.mrf.mxu1 }
0x29aa   :  { %v18296_v41 = vpop.f32.mrf.mxu1 }
0x29ac   :  { %v14867_v39 = vpop.f32.mrf.mxu1 }
0x29ae   :  { %v7351_v6 = vpop.f32.mrf.mxu1 }
0x29af   :  { %v7364_v7 = vsel %vm2091_vm3, %v7351_v6, -inf }
0x29b0   :  { %v14878_v9 = vpop.f32.mrf.mxu1  ;;  %7365 = vmax.xlane.f32.xlu0 %v7364_v7 }
0x29b2   :  { %v7354_v12 = vpop.f32.mrf.mxu1 }
0x29b3   :  { %v7367_v31 = vsel %vm2091_vm3, %v7354_v12, -inf }
0x29b4   :  { %v14879_v3 = vpop.f32.mrf.mxu1  ;;  %7368 = vmax.xlane.f32.xlu0 %v7367_v31 }
0x2a23   :  { %v7360_v13 = vpop.xlane.xlu0 %7359 }
0x2a24   :  { %v7370_v50 = vsub.f32 %v7298_v33, %v7360_v13 }
0x2a26   :  { %v7374_v15 = vmul.f32 1.442695, %v7370_v50 }
0x2a27   :  { %v7363_v18 = vpop.xlane.xlu1 %7362 }
0x2a28   :  { %16484 = vpow2.f32 %v7374_v15  ;;  %v7371_v19 = vsub.f32 %v7301_v51, %v7363_v18 }
0x2a2a   :  { %v7376_v29 = vmul.f32 1.442695, %v7371_v19 }
0x2a2c   :  { %16486 = vpow2.f32 %v7376_v29 }
0x2a35   :  { %v16485_v40 = vpop.eup %16484 }
0x2a36   :  { %v7382_v21 = vsel %vm2091_vm3, %v16485_v40, 0.0 }
0x2a37   :  { %7383 = vadd.xlane.f32.xlu0 %v7382_v21 }
0x2a39   :  { %v16487_v53 = vpop.eup %16486  ;;  %v7366_v2 = vpop.xlane.xlu0 %7365 }
0x2a3a   :  { %v7372_v16 = vsub.f32 %v7351_v6, %v7366_v2  ;;  %v7385_v57 = vsel %vm2091_vm3, %v16487_v53, 0.0 }
0x2a3b   :  { %7386 = vadd.xlane.f32.xlu1 %v7385_v57 }
0x2a3c   :  { %v7378_v60 = vmul.f32 1.442695, %v7372_v16 }
0x2a3d   :  { %v7369_v56 = vpop.xlane.xlu0 %7368 }
0x2a3e   :  { %16488 = vpow2.f32 %v7378_v60  ;;  %v7373_v20 = vsub.f32 %v7354_v12, %v7369_v56 }
0x2a40   :  { %v7380_v58 = vmul.f32 1.442695, %v7373_v20 }
0x2a42   :  { %16490 = vpow2.f32 %v7380_v58 }
0x2a4b   :  { %v16489_v44 = vpop.eup %16488 }
0x2a4c   :  { %7453 = vrot.lane.b32.xlu1 %v18235_v26, %s17207_s6  ;;  %v7388_v8 = vsel %vm2091_vm3, %v16489_v44, 0.0 }
0x2a4d   :  { %7389 = vadd.xlane.f32.xlu0 %v7388_v8 }
0x2a4f   :  { %v16491_v27 = vpop.eup %16490 }
0x2a50   :  { %7502 = vrot.lane.b32.xlu1 %v18225_v17, %s17173_s0  ;;  %v7391_v22 = vsel %vm2091_vm3, %v16491_v27, 0.0 }
0x2a63   :  { %7405 = vrot.lane.b32.xlu0 %v18248_v43, %s17207_s6 }
0x2a67   :  { %7500 = vrot.lane.b32.xlu0 %v18231_v37, %s17173_s0 }
0x2a74   :  { %7392 = vadd.xlane.f32.xlu1 %v7391_v22 }
0x2a85   :  { %7553 = vrot.lane.b32.xlu1 %v18233_v24, %s17173_s0 }
0x2a89   :  { %7551 = vrot.lane.b32.xlu1 %v18246_v23, %s17173_s0 }
0x2ac0   :  { %v7384_v30 = vpop.xlane.xlu0 %7383 }
0x2ac4   :  { %v7387_v36 = vpop.xlane.xlu1 %7386 }
0x2ac5   :  { %16492 = vrcp.f32 %v7387_v36 }
0x2ac6   :  { %16494 = vrcp.f32 %v7384_v30 }
0x2ac8   :  { %v7454_v62 = vpop.permute.xlu1 %7453 }
0x2ac9   :  { %14887 = vmatpush3.bf16.msra.mxu1 %v7454_v62 }
0x2aca   :  { %14898 = vmatprep.subr.bf16.mxu1 %v17205_v38 }
0x2acc   :  { %v7503_v48 = vpop.permute.xlu1 %7502 }
0x2acd   :  { %v7508_v33 = vsel %vm1996_vm2, %v7503_v48, 0 }
0x2ad2   :  { %v16493_v61 = vpop.eup %16492 }
0x2ad3   :  { %v16495_v34 = vpop.eup %16494  ;;  %v7399_v4 = vmul.f32 %v16493_v61, %v16487_v53 }
0x2ad4   :  { %v7398_v10 = vmul.f32 %v16495_v34, %v16485_v40 }
0x2ad6   :  { %v7390_v28 = vpop.xlane.xlu0 %7389  ;;  %v7402_v63 = vpack.c.bf16 %v7399_v4, %v7398_v10 }
0x2ad7   :  { %16496 = vrcp.f32 %v7390_v28 }
0x2ada   :  { %v7406_v11 = vpop.permute.xlu0 %7405 }
0x2adb   :  { %14881 = vmatpush3.bf16.msra.mxu0 %v7406_v11 }
0x2adc   :  { %14892 = vmatprep.subr.bf16.mxu0 %v17205_v38 }
0x2ade   :  { %14883 = vmatmul.mubr.msk.bf16.vlgmr.msra.gmra.mxu0 %vm2091_vm3, %v7402_v63  ;;  %v7501_v1 = vpop.permute.xlu0 %7500 }
0x2adf   :  { %14893 = vmatpush3.bf16.xpose.msra.mxu0 %v7508_v33  ;;  %14894 = vmatprep.mubr.msk.bf16.mxu0 %vm17206_vm1, %v17205_v38 }
0x2ae0   :  { %14904 = vmatprep.subr.bf16.mxu0 %v17205_v38 }
0x2ae4   :  { %v16497_v51 = vpop.eup %16496 }
0x2ae5   :  { %v7400_v55 = vmul.f32 %v16497_v51, %v16489_v44 }
0x2ae6   :  { %14895 = vmatmul.mubr.msk.bf16.vlgmr.msra.gmra.mxu0 %vm1996_vm2, %v7501_v1 }
0x2ae7   :  { %14906 = vmatprep.mubr.msk.bf16.mxu0 %vm17206_vm1, %v17205_v38 }
0x2afd   :  { %v7393_v14 = vpop.xlane.xlu1 %7392 }
0x2afe   :  { %16498 = vrcp.f32 %v7393_v14 }
0x2b01   :  { %v7554_v39 = vpop.permute.xlu1 %7553 }
0x2b02   :  { %v7559_v7 = vsel %vm1996_vm2, %v7554_v39, 0 }
0x2b05   :  { %v7552_v9 = vpop.permute.xlu1 %7551 }
0x2b0b   :  { %v16499_v25 = vpop.eup %16498 }
0x2b0c   :  { %v7401_v59 = vmul.f32 %v16499_v25, %v16491_v27 }
0x2b0e   :  { %v7403_v6 = vpack.c.bf16 %v7401_v59, %v7400_v55 }
0x2b10   :  { %14889 = vmatmul.mubr.msk.bf16.vlgmr.msra.gmra.mxu1 %vm2091_vm3, %v7403_v6 }
0x2b11   :  { %14899 = vmatpush3.bf16.xpose.msra.mxu1 %v7559_v7  ;;  %14900 = vmatprep.mubr.msk.bf16.mxu1 %vm17206_vm1, %v17205_v38 }
0x2b12   :  { %14910 = vmatprep.subr.bf16.mxu1 %v17205_v38 }
0x2b18   :  { %14901 = vmatmul.mubr.msk.bf16.vlgmr.msra.gmra.mxu1 %vm1996_vm2, %v7552_v9 }
0x2b19   :  { %14912 = vmatprep.mubr.msk.bf16.mxu1 %vm17206_vm1, %v17205_v38 }
0x2b9e   :  { %v18334_v12 = vpop.f32.mrf.mxu0 }
0x2ba0   :  { %v14884_v31 = vpop.f32.mrf.mxu0 }
0x2ba2   :  { %v18336_v3 = vpop.f32.mrf.mxu0 }
0x2ba3   :  { %v15575_v13 = vpack.i.bf16 %v18336_v3, %v18334_v12 }
0x2ba4   :  { %v14885_v50 = vpop.f32.mrf.mxu0 }
0x2ba6   :  { %v7544_v15 = vpop.f32.mrf.mxu0 }
0x2ba7   :  { %v7602_v18 = vsel %vm2091_vm3, %v7544_v15, -inf }
0x2ba8   :  { %7603 = vmax.xlane.f32.xlu0 %v7602_v18  ;;  %v14896_v19 = vpop.f32.mrf.mxu0 }
0x2baa   :  { %v7547_v29 = vpop.f32.mrf.mxu0 }
0x2bab   :  { %v7605_v40 = vsel %vm2091_vm3, %v7547_v29, -inf }
0x2bac   :  { %7606 = vmax.xlane.f32.xlu1 %v7605_v40  ;;  %v14897_v21 = vpop.f32.mrf.mxu0 }
0x2bd0   :  { %v18342_v53 = vpop.f32.mrf.mxu1 }
0x2bd2   :  { %v14890_v2 = vpop.f32.mrf.mxu1 }
0x2bd4   :  { %v18344_v16 = vpop.f32.mrf.mxu1 }
0x2bd5   :  { %v15580_v57 = vpack.i.bf16 %v18344_v16, %v18342_v53 }
0x2bd6   :  { %v14891_v60 = vpop.f32.mrf.mxu1 }
0x2bd8   :  { %v7595_v44 = vpop.f32.mrf.mxu1 }
0x2bd9   :  { %v7608_v8 = vsel %vm2091_vm3, %v7595_v44, -inf }
0x2bda   :  { %v14902_v56 = vpop.f32.mrf.mxu1  ;;  %7609 = vmax.xlane.f32.xlu0 %v7608_v8 }
0x2bdc   :  { %v7598_v20 = vpop.f32.mrf.mxu1 }
0x2bdd   :  { %v7611_v58 = vsel %vm2091_vm3, %v7598_v20, -inf }
0x2bde   :  { %v14903_v27 = vpop.f32.mrf.mxu1  ;;  %7612 = vmax.xlane.f32.xlu0 %v7611_v58 }
0x2c31   :  { %v7604_v22 = vpop.xlane.xlu0 %7603 }
0x2c32   :  { %v7614_v36 = vsub.f32 %v7544_v15, %v7604_v22 }
0x2c34   :  { %v7618_v30 = vmul.f32 1.442695, %v7614_v36 }
0x2c35   :  { %v7607_v62 = vpop.xlane.xlu1 %7606 }
0x2c36   :  { %16500 = vpow2.f32 %v7618_v30  ;;  %v7615_v61 = vsub.f32 %v7547_v29, %v7607_v62 }
0x2c38   :  { %v7620_v28 = vmul.f32 1.442695, %v7615_v61 }
0x2c3a   :  { %16502 = vpow2.f32 %v7620_v28 }
0x2c43   :  { %v16501_v34 = vpop.eup %16500 }
0x2c44   :  { %v7626_v4 = vsel %vm2091_vm3, %v16501_v34, 0.0 }
0x2c45   :  { %7627 = vadd.xlane.f32.xlu0 %v7626_v4 }
0x2c47   :  { %v16503_v10 = vpop.eup %16502 }
0x2c48   :  { %v7629_v11 = vsel %vm2091_vm3, %v16503_v10, 0.0 }
0x2c49   :  { %7630 = vadd.xlane.f32.xlu1 %v7629_v11 }
0x2c5a   :  { %7695 = vrot.lane.b32.xlu1 %v18235_v26, %s17173_s0 }
0x2c5e   :  { %7744 = vrot.lane.b32.xlu1 %v18225_v17, %s17208_s4 }
0x2c63   :  { %v7610_v48 = vpop.xlane.xlu0 %7609 }
0x2c64   :  { %v7616_v63 = vsub.f32 %v7595_v44, %v7610_v48 }
0x2c66   :  { %v7622_v33 = vmul.f32 1.442695, %v7616_v63 }
0x2c67   :  { %v7613_v1 = vpop.xlane.xlu0 %7612 }
0x2c68   :  { %16504 = vpow2.f32 %v7622_v33  ;;  %v7617_v14 = vsub.f32 %v7598_v20, %v7613_v1 }
0x2c6a   :  { %v7624_v51 = vmul.f32 1.442695, %v7617_v14 }
0x2c6c   :  { %16506 = vpow2.f32 %v7624_v51 }
0x2c75   :  { %v16505_v25 = vpop.eup %16504 }
0x2c76   :  { %v7632_v55 = vsel %vm2091_vm3, %v16505_v25, 0.0 }
0x2c77   :  { %7633 = vadd.xlane.f32.xlu0 %v7632_v55 }
0x2c79   :  { %v16507_v59 = vpop.eup %16506 }
0x2c7a   :  { %v7635_v39 = vsel %vm2091_vm3, %v16507_v59, 0.0 }
0x2c82   :  { %7636 = vadd.xlane.f32.xlu1 %v7635_v39 }
0x2c8d   :  { %7648 = vrot.lane.b32.xlu0 %v18248_v43, %s17173_s0 }
0x2c91   :  { %7742 = vrot.lane.b32.xlu0 %v18231_v37, %s17208_s4 }
0x2c93   :  { %7795 = vrot.lane.b32.xlu1 %v18233_v24, %s17208_s4 }
0x2c97   :  { %7793 = vrot.lane.b32.xlu1 %v18246_v23, %s17208_s4 }
0x2cce   :  { %v7628_v7 = vpop.xlane.xlu0 %7627 }
0x2cd2   :  { %v7631_v17 = vpop.xlane.xlu1 %7630 }
0x2cd3   :  { %16508 = vrcp.f32 %v7631_v17 }
0x2cd4   :  { %16510 = vrcp.f32 %v7628_v7 }
0x2cd6   :  { %v7696_v6 = vpop.permute.xlu1 %7695 }
0x2cd7   :  { %14911 = vmatpush3.bf16.msra.mxu1 %v7696_v6 }
0x2cd8   :  { %14922 = vmatprep.subr.bf16.mxu1 %v17205_v38 }
0x2cda   :  { %v7745_v19 = vpop.permute.xlu1 %7744 }
0x2cdb   :  { %v7750_v23 = vsel %vm1996_vm2, %v7745_v19, 0 }
0x2ce0   :  { %v16509_v9 = vpop.eup %16508 }
0x2ce1   :  { %v16511_v50 = vpop.eup %16510  ;;  %v7643_v15 = vmul.f32 %v16509_v9, %v16503_v10 }
0x2ce2   :  { %v7642_v18 = vmul.f32 %v16511_v50, %v16501_v34 }
0x2ce4   :  { %v7646_v24 = vpack.c.bf16 %v7643_v15, %v7642_v18 }
0x2d00   :  { %v7634_v31 = vpop.xlane.xlu0 %7633 }
0x2d01   :  { %16512 = vrcp.f32 %v7634_v31 }
0x2d04   :  { %v7649_v37 = vpop.permute.xlu0 %7648 }
0x2d05   :  { %14905 = vmatpush3.bf16.msra.mxu0 %v7649_v37 }
0x2d06   :  { %14916 = vmatprep.subr.bf16.mxu0 %v17205_v38 }
0x2d08   :  { %14907 = vmatmul.mubr.msk.bf16.vlgmr.msra.gmra.mxu0 %vm2091_vm3, %v7646_v24  ;;  %v7743_v40 = vpop.permute.xlu0 %7742 }
0x2d09   :  { %14917 = vmatpush3.bf16.xpose.msra.mxu0 %v7750_v23  ;;  %14918 = vmatprep.mubr.msk.bf16.mxu0 %vm17206_vm1, %v17205_v38 }
0x2d0a   :  { %14928 = vmatprep.subr.bf16.mxu0 %v17205_v38 }
0x2d0b   :  { %v7637_v29 = vpop.xlane.xlu1 %7636 }
0x2d0c   :  { %16514 = vrcp.f32 %v7637_v29 }
0x2d0e   :  { %v16513_v21 = vpop.eup %16512 }
0x2d0f   :  { %v7644_v60 = vmul.f32 %v16513_v21, %v16505_v25  ;;  %v7796_v8 = vpop.permute.xlu1 %7795 }
0x2d10   :  { %14919 = vmatmul.mubr.msk.bf16.vlgmr.msra.gmra.mxu0 %vm1996_vm2, %v7743_v40  ;;  %v7801_v20 = vsel %vm1996_vm2, %v7796_v8, 0 }
0x2d11   :  { %14930 = vmatprep.mubr.msk.bf16.mxu0 %vm17206_vm1, %v17205_v38 }
0x2d13   :  { %v7794_v58 = vpop.permute.xlu1 %7793 }
0x2d19   :  { %v16515_v2 = vpop.eup %16514 }
0x2d1a   :  { %v7645_v44 = vmul.f32 %v16515_v2, %v16507_v59 }
0x2d1c   :  { %v7647_v56 = vpack.c.bf16 %v7645_v44, %v7644_v60 }
0x2d1e   :  { %14913 = vmatmul.mubr.msk.bf16.vlgmr.msra.gmra.mxu1 %vm2091_vm3, %v7647_v56 }
0x2d1f   :  { %14923 = vmatpush3.bf16.xpose.msra.mxu1 %v7801_v20  ;;  %14924 = vmatprep.mubr.msk.bf16.mxu1 %vm17206_vm1, %v17205_v38 }
0x2d20   :  { %14934 = vmatprep.subr.bf16.mxu1 %v17205_v38 }
0x2d26   :  { %14925 = vmatmul.mubr.msk.bf16.vlgmr.msra.gmra.mxu1 %vm1996_vm2, %v7794_v58 }
0x2d27   :  { %14936 = vmatprep.mubr.msk.bf16.mxu1 %vm17206_vm1, %v17205_v38 }
0x2dc8   :  { %v7688_v27 = vpop.f32.mrf.mxu0 }
0x2dca   :  { %v14908_v22 = vpop.f32.mrf.mxu0 }
0x2dcc   :  { %v7691_v36 = vpop.f32.mrf.mxu0 }
0x2dcd   :  { %v15585_v30 = vpack.i.bf16 %v7691_v36, %v7688_v27 }
0x2dce   :  { %v14909_v62 = vpop.f32.mrf.mxu0 }
0x2dd0   :  { %v7786_v61 = vpop.f32.mrf.mxu0 }
0x2dd1   :  { %v7844_v28 = vsel %vm2091_vm3, %v7786_v61, -inf }
0x2dd2   :  { %7845 = vmax.xlane.f32.xlu0 %v7844_v28  ;;  %v14920_v34 = vpop.f32.mrf.mxu0 }
0x2dd3   :  { %v16043_v34 = vld [vmem:[#allocation18 + $0x78] sm:$0xff]  }
0x2dd4   :  { %v7789_v4 = vpop.f32.mrf.mxu0 }
0x2dd5   :  { %v7847_v10 = vsel %vm2091_vm3, %v7789_v4, -inf }
0x2dd6   :  { %7848 = vmax.xlane.f32.xlu1 %v7847_v10  ;;  %v14921_v11 = vpop.f32.mrf.mxu0  ;;  %v16045_v10 = vld [vmem:[#allocation18 + $0x68] sm:$0xff]  }
0x2dd7   :  { %v16046_v11 = vld [vmem:[#allocation18 + $0x60] sm:$0xff]  }
0x2dde   :  { %v7735_v48 = vpop.f32.mrf.mxu1 }
0x2de0   :  { %v14914_v63 = vpop.f32.mrf.mxu1 }
0x2de1   :  { %v16048_v63 = vld [vmem:[#allocation18 + $0x50] sm:$0xff]  }
0x2de2   :  { %v7738_v33 = vpop.f32.mrf.mxu1 }
0x2de3   :  { %v15590_v1 = vpack.i.bf16 %v7738_v33, %v7735_v48  ;;  %v16047_v48 = vld [vmem:[#allocation18 + $0x58] sm:$0xff]  }
0x2de4   :  { %v14915_v14 = vpop.f32.mrf.mxu1 }
0x2de6   :  { %v7837_v51 = vpop.f32.mrf.mxu1 }
0x2de7   :  { %v7850_v25 = vsel %vm2091_vm3, %v7837_v51, -inf }
0x2de8   :  { %v14926_v55 = vpop.f32.mrf.mxu1  ;;  %7851 = vmax.xlane.f32.xlu0 %v7850_v25 }
0x2dea   :  { %v7840_v59 = vpop.f32.mrf.mxu1 }
0x2deb   :  { %v7853_v39 = vsel %vm2091_vm3, %v7840_v59, -inf }
0x2dec   :  { %v14927_v17 = vpop.f32.mrf.mxu1  ;;  %7854 = vmax.xlane.f32.xlu0 %v7853_v39  ;;  %v16051_v39 = vld [vmem:[#allocation21 + $0x78] sm:$0xff]  }
0x2e5b   :  { %v7846_v6 = vpop.xlane.xlu0 %7845 }
0x2e5c   :  { %v7856_v7 = vsub.f32 %v7786_v61, %v7846_v6  ;;  %v16052_v6 = vld [vmem:[#allocation21 + $0x70] sm:$0xff]  }
0x2e5e   :  { %v7860_v9 = vmul.f32 1.442695, %v7856_v7 }
0x2e5f   :  { %v7849_v31 = vpop.xlane.xlu1 %7848 }
0x2e60   :  { %16516 = vpow2.f32 %v7860_v9  ;;  %v7857_v50 = vsub.f32 %v7789_v4, %v7849_v31  ;;  %v16044_v4 = vld [vmem:[#allocation18 + $0x70] sm:$0xff]  }
0x2e62   :  { %v7862_v15 = vmul.f32 1.442695, %v7857_v50 }
0x2e64   :  { %16518 = vpow2.f32 %v7862_v15 }
0x2e6d   :  { %v16517_v18 = vpop.eup %16516 }
0x2e6e   :  { %v7868_v37 = vsel %vm2091_vm3, %v16517_v18, 0.0 }
0x2e6f   :  { %7869 = vadd.xlane.f32.xlu0 %v7868_v37 }
0x2e71   :  { %v16519_v19 = vpop.eup %16518  ;;  %v7852_v24 = vpop.xlane.xlu0 %7851 }
0x2e72   :  { %v7858_v23 = vsub.f32 %v7837_v51, %v7852_v24  ;;  %v7871_v29 = vsel %vm2091_vm3, %v16519_v19, 0.0 }
0x2e73   :  { %7872 = vadd.xlane.f32.xlu1 %v7871_v29 }
0x2e74   :  { %v7864_v40 = vmul.f32 1.442695, %v7858_v23 }
0x2e75   :  { %v7855_v21 = vpop.xlane.xlu0 %7854 }
0x2e76   :  { %16520 = vpow2.f32 %v7864_v40  ;;  %v7859_v2 = vsub.f32 %v7840_v59, %v7855_v21  ;;  %v16050_v59 = vld [vmem:[#allocation18 + $0x40] sm:$0xff]  }
0x2e78   :  { %v7866_v60 = vmul.f32 1.442695, %v7859_v2 }
0x2e7a   :  { %16522 = vpow2.f32 %v7866_v60 }
0x2e83   :  { %v16521_v44 = vpop.eup %16520 }
0x2e84   :  { %v7874_v8 = vsel %vm2091_vm3, %v16521_v44, 0.0 }
0x2e85   :  { %7875 = vadd.xlane.f32.xlu0 %v7874_v8 }
0x2e87   :  { %v16523_v56 = vpop.eup %16522 }
0x2e88   :  { %v7877_v20 = vsel %vm2091_vm3, %v16523_v56, 0.0 }
0x2e89   :  { %7878 = vadd.xlane.f32.xlu1 %v7877_v20 }
0x2e9a   :  { %7937 = vrot.lane.b32.xlu1 %v18235_v26, %s17208_s4 }
0x2e9b   :  { %7890 = vrot.lane.b32.xlu0 %v18248_v43, %s17208_s4 }
0x2e9e   :  { %15576 = vrot.lane.b32.xlu1 %v15575_v13, %s17208_s4 }
0x2e9f   :  { %15586 = vrot.lane.b32.xlu0 %v15585_v30, %s17173_s0 }
0x2ea2   :  { %15581 = vrot.lane.b32.xlu1 %v15580_v57, %s17208_s4 }
0x2ea6   :  { %15591 = vrot.lane.b32.xlu1 %v15590_v1, %s17173_s0  ;;  %v16049_v1 = vld [vmem:[#allocation18 + $0x48] sm:$0xff]  }
0x2ef8   :  { %v7870_v27 = vpop.xlane.xlu0 %7869 }
0x2efc   :  { %v7873_v58 = vpop.xlane.xlu1 %7872 }
0x2efd   :  { %16524 = vrcp.f32 %v7873_v58 }
0x2efe   :  { %16526 = vrcp.f32 %v7870_v27 }
0x2f0a   :  { %v16525_v26 = vpop.eup %16524 }
0x2f0b   :  { %v16527_v22 = vpop.eup %16526  ;;  %v7885_v36 = vmul.f32 %v16525_v26, %v16519_v19 }
0x2f0c   :  { %v7884_v12 = vmul.f32 %v16527_v22, %v16517_v18 }
0x2f0e   :  { %v7876_v43 = vpop.xlane.xlu0 %7875  ;;  %v7888_v30 = vpack.c.bf16 %v7885_v36, %v7884_v12 }
0x2f0f   :  { %16528 = vrcp.f32 %v7876_v43 }
0x2f12   :  { %v7891_v3 = vpop.permute.xlu0 %7890  ;;  %v7879_v13 = vpop.xlane.xlu1 %7878 }
0x2f13   :  { %16530 = vrcp.f32 %v7879_v13  ;;  %14929 = vmatpush3.bf16.msra.mxu0 %v7891_v3 }
0x2f14   :  { %14940 = vmatprep.subr.bf16.mxu0 %v16043_v34 }
0x2f16   :  { %14931 = vmatmul.mubr.msk.bf16.vlgmr.msra.gmra.mxu0 %vm2091_vm3, %v7888_v30  ;;  %v7938_v53 = vpop.permute.xlu1 %7937  ;;  %v15587_v19 = vpop.permute.xlu0 %15586 }
0x2f17   :  { %14935 = vmatpush3.bf16.msra.mxu1 %v7938_v53  ;;  %14941 = vmatpush3.bf16.msra.mxu0 %v16043_v34  ;;  %v15589_v29 = vunpack.i.h.bf16 %v15587_v19  ;;  %v15588_v40 = vunpack.i.l.bf16 %v15587_v19  ;;  %v16056_v34 = vld [vmem:[#allocation21 + $0x60] sm:$0xff]  }
0x2f18   :  { %14960 = vmatprep.subr.bf16.mxu1 %v17205_v38  ;;  %14942 = vmatprep.subr.bf16.mxu0 %v16044_v4 }
0x2f1a   :  { %v15577_v15 = vpop.permute.xlu1 %15576 }
0x2f1b   :  { %14943 = vmatpush3.bf16.msra.mxu0 %v16044_v4  ;;  %v15579_v18 = vunpack.i.h.bf16 %v15577_v15  ;;  %v15578_v37 = vunpack.i.l.bf16 %v15577_v15  ;;  %v16057_v4 = vld [vmem:[#allocation22 + $0x68] sm:$0xff]  }
0x2f1c   :  { %v16529_v16 = vpop.eup %16528  ;;  %14944 = vmatprep.subr.bf16.mxu0 %v16045_v10 }
0x2f1d   :  { %v7886_v62 = vmul.f32 %v16529_v16, %v16521_v44  ;;  %v8033_v24 = vsel %vm1996_vm2, %v18290_v42, %v15579_v18  ;;  %v8032_v23 = vsel %vm1996_vm2, %v18288_v45, %v15578_v37 }
0x2f1e   :  { %v8036_v44 = vsel %vm3010_vm4, %v8032_v23, %v15588_v40  ;;  %v8037_v8 = vsel %vm3010_vm4, %v8033_v24, %v15589_v29  ;;  %v15582_v58 = vpop.permute.xlu1 %15581 }
0x2f1f   :  { %14945 = vmatpush3.bf16.msra.mxu0 %v16045_v10  ;;  %v15584_v26 = vunpack.i.h.bf16 %v15582_v58  ;;  %v15583_v43 = vunpack.i.l.bf16 %v15582_v58  ;;  %v16058_v10 = vld [vmem:[#allocation21 + $0x58] sm:$0xff]  }
0x2f20   :  { %v16531_v57 = vpop.eup %16530  ;;  %14946 = vmatprep.subr.bf16.mxu0 %v16046_v11 }
0x2f21   :  { %v7887_v61 = vmul.f32 %v16531_v57, %v16523_v56  ;;  %v8035_v12 = vsel %vm1996_vm2, %v18296_v41, %v15584_v26  ;;  %v8034_v3 = vsel %vm1996_vm2, %v18294_v49, %v15583_v43  ;;  %v16054_v49 = vld [vmem:[#allocation21 + $0x68] sm:$0xff]   ;;  %v16055_v41 = vld [vmem:[#allocation22 + $0x70] sm:$0xff]  }
0x2f22   :  { %v15592_v42 = vpop.permute.xlu1 %15591 }
0x2f23   :  { %v7889_v28 = vpack.c.bf16 %v7887_v61, %v7886_v62  ;;  %14947 = vmatpush3.bf16.msra.mxu0 %v16046_v11  ;;  %v15594_v45 = vunpack.i.h.bf16 %v15592_v42  ;;  %v15593_v22 = vunpack.i.l.bf16 %v15592_v42  ;;  %v16053_v61 = vld [vmem:[#allocation22 + $0x78] sm:$0xff]   ;;  %v16059_v11 = vld [vmem:[#allocation22 + $0x60] sm:$0xff]  }
0x2f24   :  { %14948 = vmatprep.subr.bf16.mxu0 %v16047_v48 }
0x2f25   :  { %14937 = vmatmul.mubr.msk.bf16.vlgmr.msra.gmra.mxu1 %vm2091_vm3, %v7889_v28  ;;  %v8038_v53 = vsel %vm3010_vm4, %v8034_v3, %v15593_v22  ;;  %v8039_v16 = vsel %vm3010_vm4, %v8035_v12, %v15594_v45 }
0x2f26   :  { %14976 = vmatprep.mubr.msk.bf16.mxu1 %vm17206_vm1, %v17205_v38  ;;  %14961 = vmatpush3.bf16.msra.mxu1 %v16051_v39  ;;  %v13450_v39 = vld [vmem:[#allocation19 + $0x1] ss:$0 sm:$0xff] }
0x2f27   :  { %14949 = vmatpush3.bf16.msra.mxu0 %v16047_v48  ;;  %14962 = vmatprep.subr.bf16.mxu1 %v17205_v38  ;;  %v16060_v48 = vld [vmem:[#allocation21 + $0x50] sm:$0xff]  }
0x2f28   :  { %14950 = vmatprep.subr.bf16.mxu0 %v16048_v63 }
0x2f2a   :  { %14963 = vmatpush3.bf16.msra.mxu1 %v16052_v6 }
0x2f2b   :  { %14951 = vmatpush3.bf16.msra.mxu0 %v16048_v63  ;;  %14964 = vmatprep.subr.bf16.mxu1 %v17205_v38  ;;  %v16061_v63 = vld [vmem:[#allocation22 + $0x58] sm:$0xff]  }
0x2f2c   :  { %14952 = vmatprep.subr.bf16.mxu0 %v16049_v1 }
0x2f2e   :  { %14965 = vmatpush3.bf16.msra.mxu1 %v16054_v49 }
0x2f2f   :  { %14953 = vmatpush3.bf16.msra.mxu0 %v16049_v1  ;;  %14966 = vmatprep.subr.bf16.mxu1 %v17205_v38  ;;  %v16063_v1 = vld [vmem:[#allocation22 + $0x50] sm:$0xff]  }
0x2f30   :  { %14954 = vmatprep.subr.bf16.mxu0 %v16050_v59 }
0x2f32   :  { %14967 = vmatpush3.bf16.msra.mxu1 %v16056_v34 }
0x2f33   :  { %14955 = vmatpush3.bf16.msra.mxu0 %v16050_v59  ;;  %14968 = vmatprep.subr.bf16.mxu1 %v17205_v38  ;;  %v16070_v59 = vld [vmem:[%s19170_s10 + $0xf8] sm:$0xff]  }
0x2f34   :  { %14980 = vmatprep.subr.bf16.mxu0 %v17205_v38 }
0x2f36   :  { %14969 = vmatpush3.bf16.msra.mxu1 %v16058_v10  ;;  %v16068_v10 = vld [vmem:[%s19170_s10 + $0x38] sm:$0xff]  }
0x2f37   :  { %14970 = vmatprep.subr.bf16.mxu1 %v17205_v38 }
0x2f3a   :  { %14971 = vmatpush3.bf16.msra.mxu1 %v16060_v48 }
0x2f3b   :  { %14972 = vmatprep.subr.bf16.mxu1 %v17205_v38 }
0x2fd6   :  { %v7930_v33 = vpop.f32.mrf.mxu0 }
0x2fd8   :  { %v14932_v14 = vpop.f32.mrf.mxu0 }
0x2fd9   :  { %v16064_v14 = vld [vmem:[#allocation21 + $0x40] sm:$0xff]  }
0x2fda   :  { %v7933_v51 = vpop.f32.mrf.mxu0 }
0x2fdb   :  { %v15595_v25 = vpack.i.bf16 %v7933_v51, %v7930_v33  ;;  %v16062_v33 = vld [vmem:[#allocation21 + $0x48] sm:$0xff]  }
0x2fdc   :  { %v14933_v55 = vpop.f32.mrf.mxu0  ;;  %14973 = vmatpush3.bf16.msra.mxu1 %v16062_v33  ;;  %v16065_v51 = vld [vmem:[#allocation22 + $0x48] sm:$0xff]  }
0x2fdd   :  { %15596 = vrot.lane.b32.xlu0 %v15595_v25, %s17207_s6  ;;  %14974 = vmatprep.subr.bf16.mxu1 %v17205_v38  ;;  %v16066_v25 = vld [vmem:[%s19170_s10 + $0x78] sm:$0xff]  }
0x2fde   :  { %v16067_v55 = vld [vmem:[#allocation22 + $0x40] sm:$0xff]  }
0x2fe0   :  { %14975 = vmatpush3.bf16.msra.mxu1 %v16064_v14 }
0x2fe1   :  { %14121 = vmatprep.subr.bf16.mxu1 %v16066_v25  ;;  %v16072_v25 = vld [vmem:[%s19170_s10 + $0xb8] sm:$0xff]  }
0x2fe5   :  { %v7977_v17 = vpop.f32.mrf.mxu1 }
0x2fe7   :  { %v14938_v7 = vpop.f32.mrf.mxu1 }
0x2fe9   :  { %v7980_v9 = vpop.f32.mrf.mxu1 }
0x2fea   :  { %v15600_v31 = vpack.i.bf16 %v7980_v9, %v7977_v17 }
0x2feb   :  { %v14939_v50 = vpop.f32.mrf.mxu1 }
0x2fec   :  { %15601 = vrot.lane.b32.xlu1 %v15600_v31, %s17207_s6 }
0x304f   :  { %v15597_v21 = vpop.permute.xlu0 %15596 }
0x3050   :  { %v15599_v2 = vunpack.i.h.bf16 %v15597_v21  ;;  %v15598_v60 = vunpack.i.l.bf16 %v15597_v21 }
0x3052   :  { %v8040_v56 = vsel %vm3015_vm5, %v8036_v44, %v15598_v60  ;;  %v8041_v20 = vsel %vm3015_vm5, %v8037_v8, %v15599_v2 }
0x3053   :  { %v8044_v27 = vpack.c.bf16 %v8041_v20, %v8040_v56 }
0x3055   :  { %14956 = vmatprep.mubr.bf16.mxu0 %v8044_v27 }
0x305e   :  { %v15602_v36 = vpop.permute.xlu1 %15601 }
0x305f   :  { %v15604_v13 = vunpack.i.h.bf16 %v15602_v36  ;;  %v15603_v30 = vunpack.i.l.bf16 %v15602_v36 }
0x3061   :  { %v8042_v57 = vsel %vm3015_vm5, %v8038_v53, %v15603_v30  ;;  %v8043_v62 = vsel %vm3015_vm5, %v8039_v16, %v15604_v13 }
0x3062   :  { %v8045_v28 = vpack.c.bf16 %v8043_v62, %v8042_v57 }
0x3064   :  { %14957 = vmatmul.mubr.bf16.vlgmr.msra.gmra.mxu0 %v8045_v28 }
0x3065   :  { %14981 = vmatpush3.bf16.msra.mxu0 %v16053_v61  ;;  %14996 = vmatprep.mubr.msk.bf16.mxu0 %vm17206_vm1, %v17205_v38 }
0x3066   :  { %14982 = vmatprep.subr.bf16.mxu0 %v17205_v38 }
0x3069   :  { %14983 = vmatpush3.bf16.msra.mxu0 %v16055_v41 }
0x306a   :  { %14984 = vmatprep.subr.bf16.mxu0 %v17205_v38 }
0x306d   :  { %14985 = vmatpush3.bf16.msra.mxu0 %v16057_v4 }
0x306e   :  { %14986 = vmatprep.subr.bf16.mxu0 %v17205_v38 }
0x3071   :  { %14987 = vmatpush3.bf16.msra.mxu0 %v16059_v11  ;;  %v16099_v11 = vld [vmem:[%s19171_s19 + $0x4] ss:$24 sps:$4 sm:$0xff]  }
0x3072   :  { %14988 = vmatprep.subr.bf16.mxu0 %v17205_v38 }
0x3075   :  { %14989 = vmatpush3.bf16.msra.mxu0 %v16061_v63  ;;  %v16069_v63 = vld [vmem:[%s19170_s10 + $0x70] sm:$0xff]  }
0x3076   :  { %14990 = vmatprep.subr.bf16.mxu0 %v17205_v38 }
0x3079   :  { %14991 = vmatpush3.bf16.msra.mxu0 %v16063_v1 }
0x307a   :  { %14992 = vmatprep.subr.bf16.mxu0 %v17205_v38 }
0x307d   :  { %14993 = vmatpush3.bf16.msra.mxu0 %v16065_v51  ;;  %v16071_v51 = vld [vmem:[%s19170_s10 + $0x30] sm:$0xff]  }
0x307e   :  { %14994 = vmatprep.subr.bf16.mxu0 %v17205_v38 }
0x3081   :  { %14995 = vmatpush3.bf16.msra.mxu0 %v16067_v55 }
0x3082   :  { %14143 = vmatprep.subr.bf16.mxu0 %v16070_v59  ;;  %v16073_v59 = vld [vmem:[%s19170_s10 + $0x68] sm:$0xff]  }
0x3124   :  { %v14958_v17 = vpop.f32.mrf.mxu0 }
0x3125   :  { %v8143_v6 = vadd.f32 %v14958_v17, %v13450_v39  ;;  %v16106_v17 = vld [vmem:[%s19171_s19 + $0xc] ss:$24 sps:$4 sm:$0xff]  }
0x3126   :  { %v8134_v7 = vpop.f32.mrf.mxu0 }
0x3127   :  { %v8155_v9 = vrot.slane %v8143_v6, 4  ;;  %v8135_v31 = vadd.f32 %v13450_v39, %v8134_v7  ;;  %v16076_v7 = vld [vmem:[%s19170_s10 + $0xb0] sm:$0xff]  }
0x3128   :  { %v14959_v50 = vpop.f32.mrf.mxu0 }
0x3129   :  { %v8156_v15 = vadd.f32 %v8155_v9, %v8143_v6  ;;  %v8149_v18 = vrot.slane %v8135_v31, 4  ;;  %v8146_v37 = vadd.f32 %v14959_v50, %v13450_v39  ;;  %v16075_v6 = vld [vmem:[%s19170_s10 + $0x28] sm:$0xff]   ;;  %v16077_v9 = vld [vmem:[%s19170_s10 + $0x60] sm:$0xff]  }
0x312a   :  { %v8137_v19 = vpop.f32.mrf.mxu0  ;;  %v16079_v50 = vld [vmem:[%s19170_s10 + $0x20] sm:$0xff]  }
0x312b   :  { %v8157_v24 = vrot.slane %v8156_v15, 2  ;;  %v8150_v23 = vadd.f32 %v8149_v18, %v8135_v31  ;;  %v8169_v29 = vrot.slane %v8146_v37, 4  ;;  %v8138_v40 = vadd.f32 %v13450_v39, %v8137_v19  ;;  %v16074_v39 = vld [vmem:[%s19170_s10 + $0xf0] sm:$0xff]   ;;  %v16078_v31 = vld [vmem:[%s19170_s10 + $0xe8] sm:$0xff]   ;;  %v16081_v18 = vld [vmem:[%s19170_s10 + $0x58] sm:$0xff]  }
0x312c   :  { %v16083_v19 = vld [vmem:[%s19170_s10 + $0x18] sm:$0xff]  }
0x312d   :  { %v8158_v21 = vadd.f32 %v8157_v24, %v8156_v15  ;;  %v8151_v2 = vrot.slane %v8150_v23, 2  ;;  %v8170_v60 = vadd.f32 %v8169_v29, %v8146_v37  ;;  %v8163_v44 = vrot.slane %v8138_v40, 4  ;;  %v16080_v15 = vld [vmem:[%s19170_s10 + $0xa8] sm:$0xff]   ;;  %v16082_v37 = vld [vmem:[%s19170_s10 + $0xe0] sm:$0xff]   ;;  %v16086_v29 = vld [vmem:[%s19170_s10 + $0xd8] sm:$0xff]  }
0x312e   :  { %v16084_v24 = vld [vmem:[%s19170_s10 + $0xa0] sm:$0xff]  }
0x312f   :  { %v8159_v8 = vrot.slane %v8158_v21, 1  ;;  %v8152_v56 = vadd.f32 %v8151_v2, %v8150_v23  ;;  %v8171_v20 = vrot.slane %v8170_v60, 2  ;;  %v8164_v58 = vadd.f32 %v8163_v44, %v8138_v40  ;;  %v16085_v23 = vld [vmem:[%s19170_s10 + $0x50] sm:$0xff]   ;;  %v16089_v2 = vld [vmem:[%s19170_s10 + $0x48] sm:$0xff]  }
0x3130   :  { %v16087_v40 = vld [vmem:[%s19170_s10 + $0x10] sm:$0xff]   ;;  %v16091_v44 = vld [vmem:[%s19170_s10 + $0x8] sm:$0xff]  }
0x3131   :  { %v8160_v27 = vadd.f32 %v8159_v8, %v8158_v21  ;;  %v8153_v42 = vrot.slane %v8152_v56, 1  ;;  %v8172_v26 = vadd.f32 %v8171_v20, %v8170_v60  ;;  %v8165_v43 = vrot.slane %v8164_v58, 2  ;;  %v16088_v21 = vld [vmem:[%s19170_s10 + $0x98] sm:$0xff]   ;;  %v16090_v60 = vld [vmem:[%s19170_s10 + $0xd0] sm:$0xff]   ;;  %v16094_v20 = vld [vmem:[%s19170_s10 + $0xc8] sm:$0xff]  }
0x3132   :  { %v16092_v8 = vld [vmem:[%s19170_s10 + $0x90] sm:$0xff]  }
0x3133   :  { %v8162_v45 = vmul.f32 0.125, %v8160_v27  ;;  %v8154_v22 = vadd.f32 %v8153_v42, %v8152_v56  ;;  %v8173_v36 = vrot.slane %v8172_v26, 1  ;;  %v8166_v12 = vadd.f32 %v8165_v43, %v8164_v58  ;;  %v16093_v56 = vld [vmem:[%s19170_s10 + $0x40] sm:$0xff]   ;;  %v16096_v27 = vld [vmem:[%s19170_s10 + $0x88] sm:$0xff]  }
0x3134   :  { %v16095_v58 = vld [vmem:[%s19170_s10] sm:$0xff]  }
0x3135   :  { %v8197_v3 = vpack.c.bf16 %v8162_v45, %v8162_v45  ;;  %v8161_v13 = vmul.f32 0.125, %v8154_v22  ;;  %v8174_v30 = vadd.f32 %v8173_v36, %v8172_v26  ;;  %v8167_v53 = vrot.slane %v8166_v12, 1  ;;  %v16100_v42 = vld [vmem:[%s19170_s10 + $0xc0] sm:$0xff]   ;;  %v16101_v26 = vld [vmem:[%s19170_s10 + $0x178] sm:$0xff]   ;;  %v16107_v36 = vld [vmem:[%s19170_s10 + $0x170] sm:$0xff]  }
0x3136   :  { %v16097_v43 = vld [vmem:[%s19171_s19] ss:$24 sps:$4 sm:$0xff]  }
0x3137   :  { %v8196_v16 = vpack.c.bf16 %v8161_v13, %v8161_v13  ;;  %v8176_v57 = vmul.f32 0.125, %v8174_v30  ;;  %v8168_v62 = vadd.f32 %v8167_v53, %v8166_v12  ;;  %v8207_v61 = vunpack.c.l.b16 %v8197_v3  ;;  %v16102_v45 = vld [vmem:[%s19170_s10 + $0x80] sm:$0xff]   ;;  %v16103_v22 = vld [vmem:[%s19170_s10 + $0x138] sm:$0xff]   ;;  %v16123_v12 = vld [vmem:[%s19171_s19 + $0x14] ss:$24 sps:$4 sm:$0xff]  }
0x3138   :  { %v16104_v3 = vld [vmem:[%s19171_s19 + $0x8] ss:$24 sps:$4 sm:$0xff]   ;;  %v16108_v13 = vld [vmem:[%s19170_s10 + $0x130] sm:$0xff]  }
0x3139   :  { %v8206_v28 = vunpack.c.l.b16 %v8196_v16  ;;  %v8351_v49 = vpack.c.bf16 %v8176_v57, %v8176_v57  ;;  %v8175_v41 = vmul.f32 0.125, %v8168_v62  ;;  %v16109_v30 = vld [vmem:[%s19170_s10 + $0x168] sm:$0xff]   ;;  %v16111_v16 = vld [vmem:[%s19170_s10 + $0x160] sm:$0xff]   ;;  %v16113_v62 = vld [vmem:[%s19170_s10 + $0x158] sm:$0xff]  }
0x313a   :  { %v16110_v53 = vld [vmem:[%s19170_s10 + $0x128] sm:$0xff]   ;;  %v16112_v57 = vld [vmem:[%s19170_s10 + $0x120] sm:$0xff]  }
0x313b   :  { %v8350_v34 = vpack.c.bf16 %v8175_v41, %v8175_v41  ;;  %v8208_v4 = vsel %vm4614_vm6, %v8207_v61, %v8206_v28  ;;  %v8361_v33 = vunpack.c.l.b16 %v8351_v49  ;;  %v16114_v61 = vld [vmem:[%s19170_s10 + $0x118] sm:$0xff]   ;;  %v16115_v28 = vld [vmem:[%s19170_s10 + $0x150] sm:$0xff]   ;;  %v16117_v41 = vld [vmem:[%s19170_s10 + $0x148] sm:$0xff]  }
0x313c   :  { %v8209_v48 = vpack.c.b16 %v8208_v4, %v8208_v4  ;;  %v16116_v49 = vld [vmem:[%s19170_s10 + $0x110] sm:$0xff]   ;;  %v16119_v4 = vld [vmem:[%s19170_s10 + $0x140] sm:$0xff]  }
0x313d   :  { %v8360_v1 = vunpack.c.l.b16 %v8350_v34  ;;  %v16118_v34 = vld [vmem:[%s19170_s10 + $0x108] sm:$0xff]  }
0x313e   :  { %14977 = vmatmul.mubr.bf16.vlgmr.msra.gmra.mxu1 %v8209_v48  ;;  %v16126_v48 = vld [vmem:[#allocation7 + $0x22c] ss:$12 sps:$4 sm:$0xff]  }
0x313f   :  { %14122 = vmatpush3.bf16.msra.mxu1 %v16068_v10  ;;  %v8362_v14 = vsel %vm4614_vm6, %v8361_v33, %v8360_v1  ;;  %8945 = vmatprep.mubr.bf16.mxu1 %v16099_v11  ;;  %v16120_v10 = vld [vmem:[%s19170_s10 + $0x100] sm:$0xff]   ;;  %v16121_v11 = vld [vmem:[%s19171_s19 + $0x10] ss:$24 sps:$4 sm:$0xff]  }
0x3140   :  { %14123 = vmatprep.subr.bf16.mxu1 %v16069_v63  ;;  %v8363_v55 = vpack.c.b16 %v8362_v14, %v8362_v14  ;;  %v16124_v63 = vld [vmem:[#allocation7 + $0x228] ss:$12 sps:$4 sm:$0xff]   ;;  %v16127_v33 = vld [vmem:[#allocation7 + $0x210] ss:$12 sps:$4 sm:$0xff]  }
0x3141   :  { %v16129_v1 = vld [vmem:[#allocation7 + $0x214] ss:$12 sps:$4 sm:$0xff]   ;;  %v16130_v14 = vld [vmem:[#allocation7 + $0x230] ss:$12 sps:$4 sm:$0xff]  }
0x3142   :  { %14997 = vmatmul.mubr.bf16.vlgmr.msra.gmra.mxu0 %v8363_v55  ;;  %v16131_v55 = vld [vmem:[#allocation7 + $0x1f8] ss:$12 sps:$4 sm:$0xff]  }
0x3143   :  { %14124 = vmatpush3.bf16.msra.mxu1 %v16071_v51  ;;  %14144 = vmatpush3.bf16.msra.mxu0 %v16072_v25  ;;  %v16133_v51 = vld [vmem:[#allocation7 + $0x1fc] ss:$12 sps:$4 sm:$0xff]   ;;  %v16134_v25 = vld [vmem:[#allocation7 + $0x218] ss:$12 sps:$4 sm:$0xff]  }
0x3144   :  { %14125 = vmatprep.subr.bf16.mxu1 %v16073_v59  ;;  %14145 = vmatprep.subr.bf16.mxu0 %v16074_v39  ;;  %v16138_v59 = vld [vmem:[#allocation7 + $0x200] ss:$12 sps:$4 sm:$0xff]   ;;  %v16137_v39 = vld [vmem:[#allocation7 + $0x1e4] ss:$12 sps:$4 sm:$0xff]  }
0x3145   :  { %8986 = vmatprep.mubr.bf16.mxu0 %v16106_v17  ;;  %v16135_v17 = vld [vmem:[#allocation7 + $0x1e0] ss:$12 sps:$4 sm:$0xff]  }
0x3147   :  { %14126 = vmatpush3.bf16.msra.mxu1 %v16075_v6  ;;  %14146 = vmatpush3.bf16.msra.mxu0 %v16076_v7  ;;  %v16142_v6 = vld [vmem:[#allocation7 + $0x1e8] ss:$12 sps:$4 sm:$0xff]   ;;  %v16141_v7 = vld [vmem:[#allocation7 + $0x1cc] ss:$12 sps:$4 sm:$0xff]  }
0x3148   :  { %14127 = vmatprep.subr.bf16.mxu1 %v16077_v9  ;;  %14147 = vmatprep.subr.bf16.mxu0 %v16078_v31  ;;  %v16139_v9 = vld [vmem:[#allocation7 + $0x1c8] ss:$12 sps:$4 sm:$0xff]  }
0x3149   :  { %v16145_v31 = vld [vmem:[#allocation7 + $0x1b4] ss:$12 sps:$4 sm:$0xff]  }
0x314b   :  { %14128 = vmatpush3.bf16.msra.mxu1 %v16079_v50  ;;  %14148 = vmatpush3.bf16.msra.mxu0 %v16080_v15  ;;  %v16146_v50 = vld [vmem:[#allocation7 + $0x1d0] ss:$12 sps:$4 sm:$0xff]  }
0x314c   :  { %14129 = vmatprep.subr.bf16.mxu1 %v16081_v18  ;;  %14149 = vmatprep.subr.bf16.mxu0 %v16082_v37  ;;  %v16143_v15 = vld [vmem:[#allocation7 + $0x1b0] ss:$12 sps:$4 sm:$0xff]   ;;  %v16150_v37 = vld [vmem:[#allocation7 + $0x1b8] ss:$12 sps:$4 sm:$0xff]  }
0x314d   :  { %v16149_v18 = vld [vmem:[#allocation7 + $0x19c] ss:$12 sps:$4 sm:$0xff]  }
0x314f   :  { %14130 = vmatpush3.bf16.msra.mxu1 %v16083_v19  ;;  %14150 = vmatpush3.bf16.msra.mxu0 %v16084_v24  ;;  %v16147_v19 = vld [vmem:[#allocation7 + $0x198] ss:$12 sps:$4 sm:$0xff]  }
0x3150   :  { %14131 = vmatprep.subr.bf16.mxu1 %v16085_v23  ;;  %14151 = vmatprep.subr.bf16.mxu0 %v16086_v29  ;;  %v16153_v24 = vld [vmem:[#allocation7 + $0x184] ss:$12 sps:$4 sm:$0xff]   ;;  %v16154_v23 = vld [vmem:[#allocation7 + $0x1a0] ss:$12 sps:$4 sm:$0xff]  }
0x3151   :  { %v16151_v29 = vld [vmem:[#allocation7 + $0x180] ss:$12 sps:$4 sm:$0xff]  }
0x3153   :  { %14132 = vmatpush3.bf16.msra.mxu1 %v16087_v40  ;;  %14152 = vmatpush3.bf16.msra.mxu0 %v16088_v21  ;;  %v16155_v40 = vld [vmem:[#allocation7 + $0x188] ss:$12 sps:$4 sm:$0xff]  }
0x3154   :  { %14133 = vmatprep.subr.bf16.mxu1 %v16089_v2  ;;  %14153 = vmatprep.subr.bf16.mxu0 %v16090_v60 }
0x3157   :  { %14134 = vmatpush3.bf16.msra.mxu1 %v16091_v44  ;;  %14154 = vmatpush3.bf16.msra.mxu0 %v16092_v8 }
0x3158   :  { %14135 = vmatprep.subr.bf16.mxu1 %v16093_v56  ;;  %14155 = vmatprep.subr.bf16.mxu0 %v16094_v20 }
0x315b   :  { %14136 = vmatpush3.bf16.msra.mxu1 %v16095_v58  ;;  %14156 = vmatpush3.bf16.msra.mxu0 %v16096_v27 }
0x315c   :  { %14157 = vmatprep.subr.bf16.mxu0 %v16100_v42  ;;  %14165 = vmatprep.subr.bf16.mxu1 %v16101_v26 }
0x315e   :  { %8946 = vmatmul.mubr.bf16.vlgmr.msra.gmra.mxu1 %v16097_v43 }
0x315f   :  { %14158 = vmatpush3.bf16.msra.mxu0 %v16102_v45  ;;  %14166 = vmatpush3.bf16.msra.mxu1 %v16103_v22 }
0x3160   :  { %14167 = vmatprep.subr.bf16.mxu1 %v16107_v36  ;;  %9027 = vmatprep.mubr.bf16.mxu1 %v16123_v12  ;;  %v13486_v12 = vld [vmem:[%s19167_s5 + $0x2] ss:$0 sm:$0xff] }
0x3161   :  { %9236 = vmatprep.subr.bf16.mxu0 %v16126_v48 }
0x3162   :  { %8987 = vmatmul.mubr.bf16.vlgmr.msra.gmra.mxu0 %v16104_v3 }
0x3163   :  { %14168 = vmatpush3.bf16.msra.mxu1 %v16108_v13  ;;  %9268 = vmatprep.mubr.bf16.mxu0 %v17204_v32 }
0x3164   :  { %14169 = vmatprep.subr.bf16.mxu1 %v16109_v30  ;;  %9237 = vmatpush1.bf16.msra.mxu0 %v16124_v63 }
0x3165   :  { %9238 = vmatprep.subr.bf16.mxu0 %v16129_v1 }
0x3167   :  { %14170 = vmatpush3.bf16.msra.mxu1 %v16110_v53 }
0x3168   :  { %14171 = vmatprep.subr.bf16.mxu1 %v16111_v16  ;;  %9239 = vmatpush1.bf16.msra.mxu0 %v16127_v33 }
0x3169   :  { %9240 = vmatprep.subr.bf16.mxu0 %v16133_v51 }
0x316b   :  { %14172 = vmatpush3.bf16.msra.mxu1 %v16112_v57 }
0x316c   :  { %14173 = vmatprep.subr.bf16.mxu1 %v16113_v62  ;;  %9241 = vmatpush1.bf16.msra.mxu0 %v16131_v55 }
0x316d   :  { %9242 = vmatprep.subr.bf16.mxu0 %v16137_v39 }
0x316f   :  { %14174 = vmatpush3.bf16.msra.mxu1 %v16114_v61 }
0x3170   :  { %14175 = vmatprep.subr.bf16.mxu1 %v16115_v28  ;;  %9243 = vmatpush1.bf16.msra.mxu0 %v16135_v17 }
0x3171   :  { %9244 = vmatprep.subr.bf16.mxu0 %v16141_v7 }
0x3173   :  { %14176 = vmatpush3.bf16.msra.mxu1 %v16116_v49 }
0x3174   :  { %14177 = vmatprep.subr.bf16.mxu1 %v16117_v41  ;;  %9245 = vmatpush1.bf16.msra.mxu0 %v16139_v9 }
0x3175   :  { %9246 = vmatprep.subr.bf16.mxu0 %v16145_v31 }
0x3177   :  { %14178 = vmatpush3.bf16.msra.mxu1 %v16118_v34  ;;  %v1296_v34 = vmax.f32 %v17511_v0, 0.0 }
0x3178   :  { %14179 = vmatprep.subr.bf16.mxu1 %v16119_v4  ;;  %9247 = vmatpush1.bf16.msra.mxu0 %v16143_v15 }
0x3179   :  { %9248 = vmatprep.subr.bf16.mxu0 %v16149_v18  ;;  %v13741_v1 = vpack.c.bf16 %v1296_v34, %v1296_v34 }
0x317b   :  { %14180 = vmatpush3.bf16.msra.mxu1 %v16120_v10 }
0x317c   :  { %15000 = vmatprep.subr.bf16.mxu1 %v16130_v14  ;;  %9249 = vmatpush1.bf16.msra.mxu0 %v16147_v19 }
0x317d   :  { %9250 = vmatprep.subr.bf16.mxu0 %v16153_v24 }
0x317e   :  { %9028 = vmatmul.mubr.bf16.vlgmr.msra.gmra.mxu1 %v16121_v11 }
0x317f   :  { %15001 = vmatpush3.bf16.msra.mxu1 %v16130_v14  ;;  %v1299_v14 = vmax.f32 %v17513_v5, 0.0 }
0x3180   :  { %15002 = vmatprep.subr.bf16.mxu1 %v16134_v25  ;;  %9251 = vmatpush1.bf16.msra.mxu0 %v16151_v29 }
0x3181   :  { %15026 = vmatprep.subr.bf16.mxu0 %v17205_v38  ;;  %v13742_v0 = vpack.c.bf16 %v1299_v14, %v1299_v14 }
0x3183   :  { %15003 = vmatpush3.bf16.msra.mxu1 %v16134_v25 }
0x3184   :  { %15004 = vmatprep.subr.bf16.mxu1 %v16138_v59 }
0x3187   :  { %15005 = vmatpush3.bf16.msra.mxu1 %v16138_v59 }
0x3188   :  { %15006 = vmatprep.subr.bf16.mxu1 %v16142_v6 }
0x318b   :  { %15007 = vmatpush3.bf16.msra.mxu1 %v16142_v6  ;;  %v9091_v6 = vld [vmem:[#allocation9 + $0x6] sm:$0x7] }
0x318c   :  { %15008 = vmatprep.subr.bf16.mxu1 %v16146_v50  ;;  %v9100_v9 = vrot.slane %v9091_v6, %v17492_v35 }
0x318f   :  { %15009 = vmatpush3.bf16.msra.mxu1 %v16146_v50 }
0x3190   :  { %15010 = vmatprep.subr.bf16.mxu1 %v16150_v37 }
0x3193   :  { %15011 = vmatpush3.bf16.msra.mxu1 %v16150_v37 }
0x3194   :  { %15012 = vmatprep.subr.bf16.mxu1 %v16154_v23 }
0x3197   :  { %15013 = vmatpush3.bf16.msra.mxu1 %v16154_v23 }
0x3198   :  { %15014 = vmatprep.subr.bf16.mxu1 %v16155_v40 }
0x319b   :  { %15015 = vmatpush3.bf16.msra.mxu1 %v16155_v40 }
0x319c   :  { %15020 = vmatprep.subr.bf16.mxu1 %v17205_v38 }
0x31fe   :  { %v18505_v21 = vpop.f32.mrf.mxu1 }
0x3200   :  { %v14978_v2 = vpop.f32.mrf.mxu1 }
0x3201   :  { %v9096_v2 = vrot.slane %v9091_v6, %v17501_v46 }
0x3202   :  { %v8296_v60 = vpop.f32.mrf.mxu1  ;;  %v18507_v44 = vpop.f32.mrf.mxu0 }
0x3204   :  { %v14979_v8 = vpop.f32.mrf.mxu1  ;;  %v14998_v56 = vpop.f32.mrf.mxu0 }
0x3205   :  { %v9104_v56 = vrot.slane %v9091_v6, %v17503_v47 }
0x3206   :  { %v8450_v20 = vpop.f32.mrf.mxu0 }
0x3208   :  { %v14999_v58 = vpop.f32.mrf.mxu0 }
0x321e   :  { %v14137_v27 = vpop.f32.mrf.mxu1 }
0x3220   :  { %v14138_v26 = vpop.f32.mrf.mxu1 }
0x3221   :  { %v14139_v36 = vadd.f32 %v14138_v26, %v14137_v27 }
0x3222   :  { %v14159_v42 = vpop.f32.mrf.mxu0  ;;  %v14140_v45 = vpop.f32.mrf.mxu1 }
0x3223   :  { %v8948_v16 = vadd.f32 %v14139_v36, %v13486_v12 }
0x3224   :  { %v14160_v43 = vpop.f32.mrf.mxu0  ;;  %v14141_v3 = vpop.f32.mrf.mxu1 }
0x3225   :  { %v14161_v13 = vadd.f32 %v14160_v43, %v14159_v42  ;;  %v14142_v57 = vadd.f32 %v14141_v3, %v14140_v45 }
0x3226   :  { %v14162_v22 = vpop.f32.mrf.mxu0 }
0x3227   :  { %v8989_v61 = vadd.f32 %v14161_v13, %v8948_v16  ;;  %v8951_v4 = vadd.f32 %v14142_v57, %v13486_v12 }
0x3228   :  { %v14163_v30 = vpop.f32.mrf.mxu0 }
0x3229   :  { %v14164_v28 = vadd.f32 %v14163_v30, %v14162_v22 }
0x322b   :  { %v8992_v48 = vadd.f32 %v14164_v28, %v8951_v4 }
0x323e   :  { %v14181_v53 = vpop.f32.mrf.mxu1 }
0x3240   :  { %v14182_v62 = vpop.f32.mrf.mxu1 }
0x3241   :  { %v14183_v49 = vadd.f32 %v14182_v62, %v14181_v53 }
0x3242   :  { %v14184_v41 = vpop.f32.mrf.mxu1 }
0x3243   :  { %v9030_v10 = vadd.f32 %v14183_v49, %v8989_v61 }
0x3244   :  { %v14185_v11 = vpop.f32.mrf.mxu1 }
0x3245   :  { %v9036_v63 = vmax.f32 %v9030_v10, 0.0  ;;  %v14186_v33 = vadd.f32 %v14185_v11, %v14184_v41 }
0x3247   :  { %v13743_v51 = vpack.c.bf16 %v9036_v63, %v9036_v63  ;;  %v9033_v25 = vadd.f32 %v14186_v33, %v8992_v48 }
0x3249   :  { %v9037_v55 = vmax.f32 %v9033_v25, 0.0  ;;  %v18513_v59 = vsel %vm1685_vm0, %v13741_v1, %v13743_v51 }
0x324a   :  { %9269 = vmatmul.mubr.bf16.vlgmr.msra.gmra.mxu0 %v18513_v59  ;;  %15016 = vmatprep.mubr.bf16.mxu1 %v18513_v59 }
0x324b   :  { %v13744_v39 = vpack.c.bf16 %v9037_v55, %v9037_v55  ;;  %9278 = vmatprep.mubr.bf16.mxu0 %v17204_v32 }
0x324d   :  { %v18519_v17 = vsel %vm1685_vm0, %v13742_v0, %v13744_v39 }
0x324e   :  { %15017 = vmatmul.mubr.bf16.vlgmr.msra.gmra.mxu1 %v18519_v17 }
0x324f   :  { %15022 = vmatprep.mubr.msk.bf16.mxu1 %vm17206_vm1, %v17205_v38 }
0x3252   :  { %9279 = vmatmul.mubr.bf16.gmra.mxu0 %v18519_v17 }
0x3253   :  { %15028 = vmatprep.mubr.msk.bf16.mxu0 %vm17206_vm1, %v17205_v38 }
0x330a   :  { %v9270_v5 = vpop.f32.mrf.mxu0 }
0x330b   :  { %v9271_v26 = vadd.f32 %v9270_v5, %v9096_v2 }
0x330c   :  { %v9272_v7 = vpop.f32.mrf.mxu0 }
0x330d   :  { %v9273_v37 = vadd.f32 %v9272_v7, %v9100_v9 }
0x330e   :  { %v9274_v31 = vpop.f32.mrf.mxu0  ;;  %v15018_v50 = vpop.f32.mrf.mxu1 }
0x330f   :  { %v9275_v58 = vadd.f32 %v9274_v31, %v9096_v2  ;;  %v9332_v16 = vadd.f32 %v15018_v50, %v9104_v56 }
0x3310   :  { %v9276_v15 = vpop.f32.mrf.mxu0  ;;  %v9323_v18 = vpop.f32.mrf.mxu1 }
0x3311   :  { %v9277_v19 = vadd.f32 %v9276_v15, %v9100_v9  ;;  %v9324_v22 = vadd.f32 %v9323_v18, %v9104_v56  ;;  %v18535_v36 = vpack.c.bf16 %v9275_v58, %v9271_v26 }
0x3312   :  { %v9280_v24 = vpop.f32.mrf.mxu0  ;;  %v15019_v23 = vpop.f32.mrf.mxu1 }
0x3313   :  { %v18528_v29 = vpack.c.bf16 %v9277_v19, %v9273_v37  ;;  %v9335_v30 = vadd.f32 %v15019_v23, %v9104_v56  ;;  %v9281_v53 = vadd.f32 %v9280_v24, %v9096_v2 }
0x3314   :  { %v9282_v40 = vpop.f32.mrf.mxu0  ;;  %v9326_v60 = vpop.f32.mrf.mxu1 }
0x3315   :  { %v9367_v8 = vsel %vm1996_vm2, %v18528_v29, 0  ;;  %v9327_v27 = vadd.f32 %v9326_v60, %v9104_v56  ;;  %v9283_v43 = vadd.f32 %v9282_v40, %v9100_v9  ;;  %v18552_v62 = vpack.c.bf16 %v9335_v30, %v9332_v16 }
0x3316   :  { %v9284_v20 = vpop.f32.mrf.mxu0  ;;  %15021 = vmatpush3.bf16.xpose.msra.mxu1 %v9367_v8 }
0x3317   :  { %15032 = vmatprep.subr.bf16.mxu1 %v17205_v38  ;;  %v18539_v3 = vpack.c.bf16 %v9327_v27, %v9324_v22  ;;  %v9285_v13 = vadd.f32 %v9284_v20, %v9096_v2 }
0x3318   :  { %v9286_v42 = vpop.f32.mrf.mxu0 }
0x3319   :  { %v9287_v45 = vadd.f32 %v9286_v42, %v9100_v9  ;;  %v18550_v57 = vpack.c.bf16 %v9285_v13, %v9281_v53 }
0x331b   :  { %v18537_v12 = vpack.c.bf16 %v9287_v45, %v9283_v43 }
0x331d   :  { %15023 = vmatmul.mubr.msk.bf16.vlgmr.msra.gmra.mxu1 %vm1996_vm2, %v18535_v36  ;;  %v9414_v47 = vsel %vm1996_vm2, %v18537_v12, 0 }
0x331e   :  { %15027 = vmatpush3.bf16.xpose.msra.mxu0 %v9414_v47  ;;  %15033 = vmatpush3.bf16.msra.mxu1 %v18539_v3 }
0x331f   :  { %15038 = vmatprep.subr.bf16.mxu0 %v17205_v38  ;;  %15034 = vmatprep.mubr.msk.bf16.mxu1 %vm17206_vm1, %v17205_v38 }
0x3320   :  { %15044 = vmatprep.subr.bf16.mxu1 %v17205_v38 }
0x3325   :  { %15029 = vmatmul.mubr.msk.bf16.vlgmr.msra.gmra.mxu0 %vm1996_vm2, %v18550_v57 }
0x3326   :  { %15039 = vmatpush3.bf16.msra.mxu0 %v18552_v62  ;;  %15040 = vmatprep.mubr.msk.bf16.mxu0 %vm17206_vm1, %v17205_v38 }
0x3327   :  { %15050 = vmatprep.subr.bf16.mxu0 %v17205_v38 }
0x33dd   :  { %v9403_v61 = vpop.f32.mrf.mxu1 }
0x33de   :  { %v9457_v28 = vsel %vm2091_vm3, %v9403_v61, -inf }
0x33df   :  { %9458 = vmax.xlane.f32.xlu0 %v9457_v28  ;;  %v15024_v49 = vpop.f32.mrf.mxu1 }
0x33e1   :  { %v9406_v41 = vpop.f32.mrf.mxu1 }
0x33e2   :  { %v9460_v34 = vsel %vm2091_vm3, %v9406_v41, -inf }
0x33e3   :  { %9461 = vmax.xlane.f32.xlu1 %v9460_v34  ;;  %v15025_v4 = vpop.f32.mrf.mxu1 }
0x33e5   :  { %v9450_v10 = vpop.f32.mrf.mxu0 }
0x33e6   :  { %v9463_v11 = vsel %vm2091_vm3, %v9450_v10, -inf }
0x33e7   :  { %v15030_v48 = vpop.f32.mrf.mxu0  ;;  %9464 = vmax.xlane.f32.xlu0 %v9463_v11 }
0x33e9   :  { %v9453_v63 = vpop.f32.mrf.mxu0 }
0x33ea   :  { %v9466_v33 = vsel %vm2091_vm3, %v9453_v63, -inf }
0x33eb   :  { %v15031_v1 = vpop.f32.mrf.mxu0  ;;  %9467 = vmax.xlane.f32.xlu0 %v9466_v33 }
0x3468   :  { %v9459_v14 = vpop.xlane.xlu0 %9458 }
0x3469   :  { %v9469_v51 = vsub.f32 %v9403_v61, %v9459_v14 }
0x346b   :  { %v9473_v25 = vmul.f32 1.442695, %v9469_v51 }
0x346c   :  { %v9462_v55 = vpop.xlane.xlu1 %9461 }
0x346d   :  { %16532 = vpow2.f32 %v9473_v25  ;;  %v9470_v0 = vsub.f32 %v9406_v41, %v9462_v55 }
0x346f   :  { %v9475_v39 = vmul.f32 1.442695, %v9470_v0 }
0x3470   :  { %v9465_v5 = vpop.xlane.xlu0 %9464 }
0x3471   :  { %16534 = vpow2.f32 %v9475_v39  ;;  %v9471_v6 = vsub.f32 %v9450_v10, %v9465_v5 }
0x3473   :  { %v9477_v7 = vmul.f32 1.442695, %v9471_v6 }
0x3474   :  { %v9468_v19 = vpop.xlane.xlu0 %9467 }
0x3475   :  { %16536 = vpow2.f32 %v9477_v7  ;;  %v9472_v24 = vsub.f32 %v9453_v63, %v9468_v19 }
0x3477   :  { %v9479_v23 = vmul.f32 1.442695, %v9472_v24 }
0x3479   :  { %16538 = vpow2.f32 %v9479_v23 }
0x347a   :  { %v16533_v9 = vpop.eup %16532 }
0x347b   :  { %v9481_v31 = vsel %vm2091_vm3, %v16533_v9, 0.0 }
0x347c   :  { %9482 = vadd.xlane.f32.xlu0 %v9481_v31 }
0x347e   :  { %v16535_v50 = vpop.eup %16534 }
0x347f   :  { %v9484_v15 = vsel %vm2091_vm3, %v16535_v50, 0.0 }
0x3480   :  { %9485 = vadd.xlane.f32.xlu1 %v9484_v15 }
0x3482   :  { %v16537_v18 = vpop.eup %16536 }
0x3483   :  { %v9487_v37 = vsel %vm2091_vm3, %v16537_v18, 0.0 }
0x3484   :  { %9488 = vadd.xlane.f32.xlu0 %v9487_v37 }
0x3486   :  { %v16539_v40 = vpop.eup %16538 }
0x3487   :  { %v9490_v2 = vsel %vm2091_vm3, %v16539_v40, 0.0 }
0x3491   :  { %9648 = vrot.lane.b32.xlu1 %v18537_v12, %s17207_s6 }
0x349a   :  { %9595 = vrot.lane.b32.xlu0 %v18528_v29, %s17207_s6 }
0x34b5   :  { %9491 = vadd.xlane.f32.xlu1 %v9490_v2 }
0x34c6   :  { %9592 = vrot.lane.b32.xlu1 %v18535_v36, %s17207_s6 }
0x34ca   :  { %9645 = vrot.lane.b32.xlu1 %v18550_v57, %s17207_s6 }
0x3505   :  { %v9483_v60 = vpop.xlane.xlu0 %9482 }
0x3506   :  { %16540 = vrcp.f32 %v9483_v60 }
0x3509   :  { %v9486_v8 = vpop.xlane.xlu1 %9485 }
0x350a   :  { %16542 = vrcp.f32 %v9486_v8 }
0x350d   :  { %v9489_v56 = vpop.xlane.xlu0 %9488  ;;  %v9649_v22 = vpop.permute.xlu1 %9648 }
0x350e   :  { %16544 = vrcp.f32 %v9489_v56  ;;  %v9654_v49 = vsel %vm1996_vm2, %v9649_v22, 0 }
0x3511   :  { %v9596_v26 = vpop.permute.xlu0 %9595 }
0x3512   :  { %v9601_v45 = vsel %vm1996_vm2, %v9596_v26, 0 }
0x3513   :  { %v16541_v20 = vpop.eup %16540 }
0x3514   :  { %v9497_v27 = vmul.f32 %v16541_v20, %v16533_v9 }
0x3517   :  { %v16543_v58 = vpop.eup %16542 }
0x3518   :  { %v9498_v42 = vmul.f32 %v16543_v58, %v16535_v50 }
0x351a   :  { %v9501_v43 = vpack.c.bf16 %v9498_v42, %v9497_v27 }
0x351b   :  { %v16545_v30 = vpop.eup %16544 }
0x351c   :  { %15035 = vmatmul.mubr.msk.bf16.vlgmr.msra.gmra.mxu1 %vm2091_vm3, %v9501_v43  ;;  %v9499_v16 = vmul.f32 %v16545_v30, %v16537_v18 }
0x351d   :  { %15045 = vmatpush3.bf16.xpose.msra.mxu1 %v9601_v45  ;;  %15046 = vmatprep.mubr.msk.bf16.mxu1 %vm17206_vm1, %v17205_v38 }
0x351e   :  { %15056 = vmatprep.subr.bf16.mxu1 %v17205_v38 }
0x353e   :  { %v9492_v47 = vpop.xlane.xlu1 %9491 }
0x353f   :  { %16546 = vrcp.f32 %v9492_v47 }
0x3542   :  { %v9593_v13 = vpop.permute.xlu1 %9592 }
0x3543   :  { %15047 = vmatmul.mubr.msk.bf16.vlgmr.msra.gmra.mxu1 %vm1996_vm2, %v9593_v13 }
0x3544   :  { %15058 = vmatprep.mubr.msk.bf16.mxu1 %vm17206_vm1, %v17205_v38 }
0x3546   :  { %v9646_v41 = vpop.permute.xlu1 %9645 }
0x354c   :  { %v16547_v53 = vpop.eup %16546 }
0x354d   :  { %v9500_v61 = vmul.f32 %v16547_v53, %v16539_v40 }
0x354f   :  { %v9502_v28 = vpack.c.bf16 %v9500_v61, %v9499_v16 }
0x3551   :  { %15041 = vmatmul.mubr.msk.bf16.vlgmr.msra.gmra.mxu0 %vm2091_vm3, %v9502_v28 }
0x3552   :  { %15051 = vmatpush3.bf16.xpose.msra.mxu0 %v9654_v49  ;;  %15052 = vmatprep.mubr.msk.bf16.mxu0 %vm17206_vm1, %v17205_v38 }
0x3553   :  { %15062 = vmatprep.subr.bf16.mxu0 %v17205_v38 }
0x3559   :  { %15053 = vmatmul.mubr.msk.bf16.vlgmr.msra.gmra.mxu0 %vm1996_vm2, %v9646_v41 }
0x355a   :  { %15064 = vmatprep.mubr.msk.bf16.mxu0 %vm17206_vm1, %v17205_v38 }
0x35dc   :  { %v18592_v34 = vpop.f32.mrf.mxu1 }
0x35de   :  { %v15036_v4 = vpop.f32.mrf.mxu1 }
0x35e0   :  { %v18594_v10 = vpop.f32.mrf.mxu1 }
0x35e2   :  { %v15037_v11 = vpop.f32.mrf.mxu1 }
0x3603   :  { %v9637_v48 = vpop.f32.mrf.mxu1 }
0x3604   :  { %v9697_v63 = vsel %vm2091_vm3, %v9637_v48, -inf }
0x3605   :  { %9698 = vmax.xlane.f32.xlu0 %v9697_v63  ;;  %v15048_v33 = vpop.f32.mrf.mxu1 }
0x3607   :  { %v9640_v1 = vpop.f32.mrf.mxu1 }
0x3608   :  { %v9700_v14 = vsel %vm2091_vm3, %v9640_v1, -inf }
0x3609   :  { %9701 = vmax.xlane.f32.xlu1 %v9700_v14  ;;  %v15049_v51 = vpop.f32.mrf.mxu1 }
0x3611   :  { %v18598_v25 = vpop.f32.mrf.mxu0 }
0x3613   :  { %v15042_v55 = vpop.f32.mrf.mxu0 }
0x3615   :  { %v18600_v0 = vpop.f32.mrf.mxu0 }
0x3617   :  { %v15043_v39 = vpop.f32.mrf.mxu0 }
0x3619   :  { %v9690_v5 = vpop.f32.mrf.mxu0 }
0x361a   :  { %v9703_v6 = vsel %vm2091_vm3, %v9690_v5, -inf }
0x361b   :  { %v15054_v7 = vpop.f32.mrf.mxu0  ;;  %9704 = vmax.xlane.f32.xlu0 %v9703_v6 }
0x361d   :  { %v9693_v9 = vpop.f32.mrf.mxu0 }
0x361e   :  { %v9706_v31 = vsel %vm2091_vm3, %v9693_v9, -inf }
0x361f   :  { %v15055_v50 = vpop.f32.mrf.mxu0  ;;  %9707 = vmax.xlane.f32.xlu0 %v9706_v31 }
0x368e   :  { %v9699_v15 = vpop.xlane.xlu0 %9698 }
0x368f   :  { %v9709_v18 = vsub.f32 %v9637_v48, %v9699_v15 }
0x3691   :  { %v9713_v37 = vmul.f32 1.442695, %v9709_v18 }
0x3692   :  { %v9702_v19 = vpop.xlane.xlu1 %9701 }
0x3693   :  { %16548 = vpow2.f32 %v9713_v37  ;;  %v9710_v24 = vsub.f32 %v9640_v1, %v9702_v19 }
0x3695   :  { %v9715_v23 = vmul.f32 1.442695, %v9710_v24 }
0x3697   :  { %16550 = vpow2.f32 %v9715_v23 }
0x36a0   :  { %v16549_v40 = vpop.eup %16548 }
0x36a1   :  { %v9721_v2 = vsel %vm2091_vm3, %v16549_v40, 0.0 }
0x36a2   :  { %9722 = vadd.xlane.f32.xlu0 %v9721_v2 }
0x36a4   :  { %v16551_v60 = vpop.eup %16550  ;;  %v9705_v8 = vpop.xlane.xlu0 %9704 }
0x36a5   :  { %v9711_v56 = vsub.f32 %v9690_v5, %v9705_v8  ;;  %v9724_v20 = vsel %vm2091_vm3, %v16551_v60, 0.0 }
0x36a6   :  { %9725 = vadd.xlane.f32.xlu1 %v9724_v20 }
0x36a7   :  { %v9717_v58 = vmul.f32 1.442695, %v9711_v56 }
0x36a8   :  { %v9708_v26 = vpop.xlane.xlu0 %9707 }
0x36a9   :  { %16552 = vpow2.f32 %v9717_v58  ;;  %v9712_v43 = vsub.f32 %v9693_v9, %v9708_v26 }
0x36ab   :  { %v9719_v45 = vmul.f32 1.442695, %v9712_v43 }
0x36ad   :  { %16554 = vpow2.f32 %v9719_v45 }
0x36b6   :  { %v16553_v27 = vpop.eup %16552 }
0x36b7   :  { %9792 = vrot.lane.b32.xlu1 %v18552_v62, %s17207_s6  ;;  %v9727_v42 = vsel %vm2091_vm3, %v16553_v27, 0.0 }
0x36b8   :  { %9728 = vadd.xlane.f32.xlu0 %v9727_v42 }
0x36ba   :  { %v16555_v22 = vpop.eup %16554 }
0x36bb   :  { %9841 = vrot.lane.b32.xlu1 %v18528_v29, %s17173_s0  ;;  %v9730_v47 = vsel %vm2091_vm3, %v16555_v22, 0.0 }
0x36ce   :  { %9744 = vrot.lane.b32.xlu0 %v18539_v3, %s17207_s6 }
0x36d2   :  { %9839 = vrot.lane.b32.xlu0 %v18535_v36, %s17173_s0 }
0x36df   :  { %9731 = vadd.xlane.f32.xlu1 %v9730_v47 }
0x36f0   :  { %9892 = vrot.lane.b32.xlu1 %v18537_v12, %s17173_s0 }
0x36f4   :  { %9890 = vrot.lane.b32.xlu1 %v18550_v57, %s17173_s0 }
0x372b   :  { %v9723_v30 = vpop.xlane.xlu0 %9722 }
0x372f   :  { %v9726_v13 = vpop.xlane.xlu1 %9725 }
0x3730   :  { %16556 = vrcp.f32 %v9726_v13 }
0x3731   :  { %16558 = vrcp.f32 %v9723_v30 }
0x3733   :  { %v9793_v53 = vpop.permute.xlu1 %9792 }
0x3734   :  { %15063 = vmatpush3.bf16.msra.mxu0 %v9793_v53 }
0x3735   :  { %15074 = vmatprep.subr.bf16.mxu0 %v17205_v38 }
0x3737   :  { %v9842_v11 = vpop.permute.xlu1 %9841 }
0x3738   :  { %v9847_v63 = vsel %vm1996_vm2, %v9842_v11, 0 }
0x373d   :  { %v16557_v16 = vpop.eup %16556 }
0x373e   :  { %v16559_v28 = vpop.eup %16558  ;;  %v9738_v49 = vmul.f32 %v16557_v16, %v16551_v60 }
0x373f   :  { %v9737_v41 = vmul.f32 %v16559_v28, %v16549_v40 }
0x3741   :  { %v9729_v61 = vpop.xlane.xlu0 %9728  ;;  %v9741_v48 = vpack.c.bf16 %v9738_v49, %v9737_v41 }
0x3742   :  { %16560 = vrcp.f32 %v9729_v61 }
0x3745   :  { %v9745_v4 = vpop.permute.xlu0 %9744 }
0x3746   :  { %15057 = vmatpush3.bf16.msra.mxu1 %v9745_v4 }
0x3747   :  { %15068 = vmatprep.subr.bf16.mxu1 %v17205_v38 }
0x3749   :  { %15059 = vmatmul.mubr.msk.bf16.vlgmr.msra.gmra.mxu1 %vm2091_vm3, %v9741_v48  ;;  %v9840_v33 = vpop.permute.xlu0 %9839 }
0x374a   :  { %15069 = vmatpush3.bf16.xpose.msra.mxu1 %v9847_v63  ;;  %15070 = vmatprep.mubr.msk.bf16.mxu1 %vm17206_vm1, %v17205_v38 }
0x374b   :  { %15080 = vmatprep.subr.bf16.mxu1 %v17205_v38 }
0x374f   :  { %v16561_v14 = vpop.eup %16560 }
0x3750   :  { %v9739_v55 = vmul.f32 %v16561_v14, %v16553_v27 }
0x3751   :  { %15071 = vmatmul.mubr.msk.bf16.vlgmr.msra.gmra.mxu1 %vm1996_vm2, %v9840_v33 }
0x3752   :  { %15082 = vmatprep.mubr.msk.bf16.mxu1 %vm17206_vm1, %v17205_v38 }
0x3768   :  { %v9732_v1 = vpop.xlane.xlu1 %9731 }
0x3769   :  { %16562 = vrcp.f32 %v9732_v1 }
0x376c   :  { %v9893_v5 = vpop.permute.xlu1 %9892 }
0x376d   :  { %v9898_v7 = vsel %vm1996_vm2, %v9893_v5, 0 }
0x3770   :  { %v9891_v9 = vpop.permute.xlu1 %9890 }
0x3776   :  { %v16563_v51 = vpop.eup %16562 }
0x3777   :  { %v9740_v39 = vmul.f32 %v16563_v51, %v16555_v22 }
0x3779   :  { %v9742_v6 = vpack.c.bf16 %v9740_v39, %v9739_v55 }
0x377b   :  { %15065 = vmatmul.mubr.msk.bf16.vlgmr.msra.gmra.mxu0 %vm2091_vm3, %v9742_v6 }
0x377c   :  { %15075 = vmatpush3.bf16.xpose.msra.mxu0 %v9898_v7  ;;  %15076 = vmatprep.mubr.msk.bf16.mxu0 %vm17206_vm1, %v17205_v38 }
0x377d   :  { %15086 = vmatprep.subr.bf16.mxu0 %v17205_v38 }
0x3783   :  { %15077 = vmatmul.mubr.msk.bf16.vlgmr.msra.gmra.mxu0 %vm1996_vm2, %v9891_v9 }
0x3784   :  { %15088 = vmatprep.mubr.msk.bf16.mxu0 %vm17206_vm1, %v17205_v38 }
0x3809   :  { %v18638_v31 = vpop.f32.mrf.mxu1 }
0x380b   :  { %v15060_v50 = vpop.f32.mrf.mxu1 }
0x380d   :  { %v18640_v15 = vpop.f32.mrf.mxu1 }
0x380e   :  { %v15605_v18 = vpack.i.bf16 %v18640_v15, %v18638_v31 }
0x380f   :  { %v15061_v37 = vpop.f32.mrf.mxu1 }
0x3811   :  { %v9883_v19 = vpop.f32.mrf.mxu1 }
0x3812   :  { %v9941_v24 = vsel %vm2091_vm3, %v9883_v19, -inf }
0x3813   :  { %9942 = vmax.xlane.f32.xlu0 %v9941_v24  ;;  %v15072_v23 = vpop.f32.mrf.mxu1 }
0x3815   :  { %v9886_v40 = vpop.f32.mrf.mxu1 }
0x3816   :  { %v9944_v2 = vsel %vm2091_vm3, %v9886_v40, -inf }
0x3817   :  { %9945 = vmax.xlane.f32.xlu1 %v9944_v2  ;;  %v15073_v60 = vpop.f32.mrf.mxu1 }
0x383b   :  { %v18646_v8 = vpop.f32.mrf.mxu0 }
0x383d   :  { %v15066_v56 = vpop.f32.mrf.mxu0 }
0x383f   :  { %v18648_v20 = vpop.f32.mrf.mxu0 }
0x3840   :  { %v15610_v58 = vpack.i.bf16 %v18648_v20, %v18646_v8 }
0x3841   :  { %v15067_v27 = vpop.f32.mrf.mxu0 }
0x3843   :  { %v9934_v42 = vpop.f32.mrf.mxu0 }
0x3844   :  { %v9947_v26 = vsel %vm2091_vm3, %v9934_v42, -inf }
0x3845   :  { %v15078_v43 = vpop.f32.mrf.mxu0  ;;  %9948 = vmax.xlane.f32.xlu0 %v9947_v26 }
0x3847   :  { %v9937_v45 = vpop.f32.mrf.mxu0 }
0x3848   :  { %v9950_v22 = vsel %vm2091_vm3, %v9937_v45, -inf }
0x3849   :  { %v15079_v47 = vpop.f32.mrf.mxu0  ;;  %9951 = vmax.xlane.f32.xlu0 %v9950_v22 }
0x389c   :  { %v9943_v13 = vpop.xlane.xlu0 %9942 }
0x389d   :  { %v9953_v30 = vsub.f32 %v9883_v19, %v9943_v13 }
0x389f   :  { %v9957_v53 = vmul.f32 1.442695, %v9953_v30 }
0x38a0   :  { %v9946_v16 = vpop.xlane.xlu1 %9945 }
0x38a1   :  { %16564 = vpow2.f32 %v9957_v53  ;;  %v9954_v61 = vsub.f32 %v9886_v40, %v9946_v16 }
0x38a3   :  { %v9959_v28 = vmul.f32 1.442695, %v9954_v61 }
0x38a5   :  { %16566 = vpow2.f32 %v9959_v28 }
0x38ae   :  { %v16565_v49 = vpop.eup %16564 }
0x38af   :  { %v9965_v41 = vsel %vm2091_vm3, %v16565_v49, 0.0 }
0x38b0   :  { %9966 = vadd.xlane.f32.xlu0 %v9965_v41 }
0x38b2   :  { %v16567_v4 = vpop.eup %16566 }
0x38b3   :  { %v9968_v11 = vsel %vm2091_vm3, %v16567_v4, 0.0 }
0x38b4   :  { %9969 = vadd.xlane.f32.xlu1 %v9968_v11 }
0x38c5   :  { %10034 = vrot.lane.b32.xlu1 %v18552_v62, %s17173_s0 }
0x38c9   :  { %10083 = vrot.lane.b32.xlu1 %v18528_v29, %s17208_s4 }
0x38ce   :  { %v9949_v48 = vpop.xlane.xlu0 %9948 }
0x38cf   :  { %v9955_v63 = vsub.f32 %v9934_v42, %v9949_v48 }
0x38d1   :  { %v9961_v33 = vmul.f32 1.442695, %v9955_v63 }
0x38d2   :  { %v9952_v1 = vpop.xlane.xlu0 %9951 }
0x38d3   :  { %16568 = vpow2.f32 %v9961_v33  ;;  %v9956_v14 = vsub.f32 %v9937_v45, %v9952_v1 }
0x38d5   :  { %v9963_v51 = vmul.f32 1.442695, %v9956_v14 }
0x38d7   :  { %16570 = vpow2.f32 %v9963_v51 }
0x38e0   :  { %v16569_v55 = vpop.eup %16568 }
0x38e1   :  { %v9971_v39 = vsel %vm2091_vm3, %v16569_v55, 0.0 }
0x38e2   :  { %9972 = vadd.xlane.f32.xlu0 %v9971_v39 }
0x38e4   :  { %v16571_v5 = vpop.eup %16570 }
0x38e5   :  { %v9974_v6 = vsel %vm2091_vm3, %v16571_v5, 0.0 }
0x38ed   :  { %9975 = vadd.xlane.f32.xlu1 %v9974_v6 }
0x38f8   :  { %9987 = vrot.lane.b32.xlu0 %v18539_v3, %s17173_s0 }
0x38fc   :  { %10081 = vrot.lane.b32.xlu0 %v18535_v36, %s17208_s4 }
0x38fe   :  { %10134 = vrot.lane.b32.xlu1 %v18537_v12, %s17208_s4 }
0x3902   :  { %10132 = vrot.lane.b32.xlu1 %v18550_v57, %s17208_s4 }
0x3939   :  { %v9967_v9 = vpop.xlane.xlu0 %9966 }
0x393d   :  { %v9970_v29 = vpop.xlane.xlu1 %9969 }
0x393e   :  { %16572 = vrcp.f32 %v9970_v29 }
0x393f   :  { %16574 = vrcp.f32 %v9967_v9 }
0x3941   :  { %v10035_v7 = vpop.permute.xlu1 %10034 }
0x3942   :  { %15087 = vmatpush3.bf16.msra.mxu0 %v10035_v7 }
0x3943   :  { %15098 = vmatprep.subr.bf16.mxu0 %v17205_v38 }
0x3945   :  { %v10084_v40 = vpop.permute.xlu1 %10083 }
0x3946   :  { %v10089_v57 = vsel %vm1996_vm2, %v10084_v40, 0 }
0x394b   :  { %v16573_v50 = vpop.eup %16572 }
0x394c   :  { %v16575_v19 = vpop.eup %16574  ;;  %v9982_v24 = vmul.f32 %v16573_v50, %v16567_v4 }
0x394d   :  { %v9981_v23 = vmul.f32 %v16575_v19, %v16565_v49 }
0x394f   :  { %v9985_v12 = vpack.c.bf16 %v9982_v24, %v9981_v23 }
0x396b   :  { %v9973_v37 = vpop.xlane.xlu0 %9972 }
0x396c   :  { %16576 = vrcp.f32 %v9973_v37 }
0x396f   :  { %v9988_v36 = vpop.permute.xlu0 %9987 }
0x3970   :  { %15081 = vmatpush3.bf16.msra.mxu1 %v9988_v36 }
0x3971   :  { %15092 = vmatprep.subr.bf16.mxu1 %v17205_v38 }
0x3973   :  { %15083 = vmatmul.mubr.msk.bf16.vlgmr.msra.gmra.mxu1 %vm2091_vm3, %v9985_v12  ;;  %v10082_v60 = vpop.permute.xlu0 %10081 }
0x3974   :  { %15093 = vmatpush3.bf16.xpose.msra.mxu1 %v10089_v57  ;;  %15094 = vmatprep.mubr.msk.bf16.mxu1 %vm17206_vm1, %v17205_v38 }
0x3975   :  { %15104 = vmatprep.subr.bf16.mxu1 %v17205_v38 }
0x3976   :  { %v9976_v2 = vpop.xlane.xlu1 %9975 }
0x3977   :  { %16578 = vrcp.f32 %v9976_v2 }
0x3979   :  { %v16577_v56 = vpop.eup %16576 }
0x397a   :  { %v9983_v42 = vmul.f32 %v16577_v56, %v16569_v55  ;;  %v10135_v43 = vpop.permute.xlu1 %10134 }
0x397b   :  { %15095 = vmatmul.mubr.msk.bf16.vlgmr.msra.gmra.mxu1 %vm1996_vm2, %v10082_v60  ;;  %v10140_v22 = vsel %vm1996_vm2, %v10135_v43, 0 }
0x397c   :  { %15106 = vmatprep.mubr.msk.bf16.mxu1 %vm17206_vm1, %v17205_v38 }
0x397e   :  { %v10133_v47 = vpop.permute.xlu1 %10132 }
0x3984   :  { %v16579_v27 = vpop.eup %16578 }
0x3985   :  { %v9984_v26 = vmul.f32 %v16579_v27, %v16571_v5 }
0x3987   :  { %v9986_v45 = vpack.c.bf16 %v9984_v26, %v9983_v42 }
0x3989   :  { %15089 = vmatmul.mubr.msk.bf16.vlgmr.msra.gmra.mxu0 %vm2091_vm3, %v9986_v45 }
0x398a   :  { %15099 = vmatpush3.bf16.xpose.msra.mxu0 %v10140_v22  ;;  %15100 = vmatprep.mubr.msk.bf16.mxu0 %vm17206_vm1, %v17205_v38 }
0x398b   :  { %15110 = vmatprep.subr.bf16.mxu0 %v17205_v38 }
0x3991   :  { %15101 = vmatmul.mubr.msk.bf16.vlgmr.msra.gmra.mxu0 %vm1996_vm2, %v10133_v47 }
0x3992   :  { %15112 = vmatprep.mubr.msk.bf16.mxu0 %vm17206_vm1, %v17205_v38 }
0x3a33   :  { %v10027_v13 = vpop.f32.mrf.mxu1 }
0x3a35   :  { %v15084_v30 = vpop.f32.mrf.mxu1 }
0x3a37   :  { %v10030_v53 = vpop.f32.mrf.mxu1 }
0x3a38   :  { %v15615_v16 = vpack.i.bf16 %v10030_v53, %v10027_v13 }
0x3a39   :  { %v15085_v61 = vpop.f32.mrf.mxu1 }
0x3a3b   :  { %v10125_v28 = vpop.f32.mrf.mxu1 }
0x3a3c   :  { %v10183_v49 = vsel %vm2091_vm3, %v10125_v28, -inf }
0x3a3d   :  { %10184 = vmax.xlane.f32.xlu0 %v10183_v49  ;;  %v15096_v41 = vpop.f32.mrf.mxu1 }
0x3a3f   :  { %v10128_v4 = vpop.f32.mrf.mxu1 }
0x3a40   :  { %v10186_v11 = vsel %vm2091_vm3, %v10128_v4, -inf }
0x3a41   :  { %10187 = vmax.xlane.f32.xlu1 %v10186_v11  ;;  %v15097_v48 = vpop.f32.mrf.mxu1  ;;  %v16157_v11 = vld [vmem:[#allocation10 + $0xb0] sm:$0xff]  }
0x3a42   :  { %v16158_v48 = vld [vmem:[#allocation10 + $0xa8] sm:$0xff]  }
0x3a49   :  { %v10074_v63 = vpop.f32.mrf.mxu0 }
0x3a4b   :  { %v15090_v33 = vpop.f32.mrf.mxu0 }
0x3a4c   :  { %v16160_v33 = vld [vmem:[#allocation10 + $0x98] sm:$0xff]  }
0x3a4d   :  { %v10077_v1 = vpop.f32.mrf.mxu0 }
0x3a4e   :  { %v15620_v14 = vpack.i.bf16 %v10077_v1, %v10074_v63  ;;  %v16159_v63 = vld [vmem:[#allocation10 + $0xa0] sm:$0xff]   ;;  %v16161_v1 = vld [vmem:[#allocation10 + $0x90] sm:$0xff]  }
0x3a4f   :  { %v15091_v51 = vpop.f32.mrf.mxu0 }
0x3a51   :  { %v10176_v55 = vpop.f32.mrf.mxu0 }
0x3a52   :  { %v10189_v39 = vsel %vm2091_vm3, %v10176_v55, -inf }
0x3a53   :  { %v15102_v5 = vpop.f32.mrf.mxu0  ;;  %10190 = vmax.xlane.f32.xlu0 %v10189_v39 }
0x3a55   :  { %v10179_v6 = vpop.f32.mrf.mxu0 }
0x3a56   :  { %v10192_v29 = vsel %vm2091_vm3, %v10179_v6, -inf }
0x3a57   :  { %v15103_v7 = vpop.f32.mrf.mxu0  ;;  %10193 = vmax.xlane.f32.xlu0 %v10192_v29  ;;  %v16163_v29 = vld [vmem:[#allocation10 + $0x80] sm:$0xff]  }
0x3a58   :  { %v18714_v7 = vld [vmem:[#allocation13 + $0xb8] sm:$0xff]  }
0x3ac6   :  { %v10185_v9 = vpop.xlane.xlu0 %10184 }
0x3ac7   :  { %v10195_v50 = vsub.f32 %v10125_v28, %v10185_v9 }
0x3ac9   :  { %v10199_v37 = vmul.f32 1.442695, %v10195_v50 }
0x3aca   :  { %v10188_v19 = vpop.xlane.xlu1 %10187 }
0x3acb   :  { %16580 = vpow2.f32 %v10199_v37  ;;  %v10196_v24 = vsub.f32 %v10128_v4, %v10188_v19  ;;  %v16156_v4 = vld [vmem:[#allocation10 + $0xb8] sm:$0xff]  }
0x3acd   :  { %v10201_v23 = vmul.f32 1.442695, %v10196_v24 }
0x3acf   :  { %16582 = vpow2.f32 %v10201_v23  ;;  %v16172_v23 = vld [vmem:[#allocation16 + $0x170] ss:$8 sps:$4 sm:$0xff]  }
0x3ad8   :  { %v16581_v36 = vpop.eup %16580 }
0x3ad9   :  { %v10207_v40 = vsel %vm2091_vm3, %v16581_v36, 0.0 }
0x3ada   :  { %10208 = vadd.xlane.f32.xlu0 %v10207_v40  ;;  %v16177_v40 = vld [vmem:[#allocation16 + $0x164] ss:$8 sps:$4 sm:$0xff]  }
0x3adc   :  { %v16583_v12 = vpop.eup %16582  ;;  %v10191_v57 = vpop.xlane.xlu0 %10190 }
0x3add   :  { %v10197_v2 = vsub.f32 %v10176_v55, %v10191_v57  ;;  %v10210_v60 = vsel %vm2091_vm3, %v16583_v12, 0.0  ;;  %v16180_v57 = vld [vmem:[#allocation16 + $0x154] ss:$8 sps:$4 sm:$0xff]  }
0x3ade   :  { %10211 = vadd.xlane.f32.xlu1 %v10210_v60  ;;  %v16183_v60 = vld [vmem:[#allocation16 + $0x144] ss:$8 sps:$4 sm:$0xff]  }
0x3adf   :  { %v10203_v56 = vmul.f32 1.442695, %v10197_v2  ;;  %v16178_v2 = vld [vmem:[#allocation16 + $0x150] ss:$8 sps:$4 sm:$0xff]  }
0x3ae0   :  { %v10194_v27 = vpop.xlane.xlu0 %10193 }
0x3ae1   :  { %16584 = vpow2.f32 %v10203_v56  ;;  %v10198_v42 = vsub.f32 %v10179_v6, %v10194_v27  ;;  %v16181_v56 = vld [vmem:[#allocation16 + $0x140] ss:$8 sps:$4 sm:$0xff]   ;;  %v16186_v27 = vld [vmem:[#allocation16 + $0x134] ss:$8 sps:$4 sm:$0xff]  }
0x3ae3   :  { %v10205_v26 = vmul.f32 1.442695, %v10198_v42  ;;  %v16184_v42 = vld [vmem:[#allocation16 + $0x130] ss:$8 sps:$4 sm:$0xff]  }
0x3ae5   :  { %16586 = vpow2.f32 %v10205_v26  ;;  %v16189_v26 = vld [vmem:[#allocation16 + $0x124] ss:$8 sps:$4 sm:$0xff]  }
0x3aee   :  { %v16585_v43 = vpop.eup %16584 }
0x3aef   :  { %v10213_v45 = vsel %vm2091_vm3, %v16585_v43, 0.0 }
0x3af0   :  { %10214 = vadd.xlane.f32.xlu0 %v10213_v45 }
0x3af2   :  { %v16587_v22 = vpop.eup %16586 }
0x3af3   :  { %v10216_v47 = vsel %vm2091_vm3, %v16587_v22, 0.0 }
0x3af4   :  { %10217 = vadd.xlane.f32.xlu1 %v10216_v47 }
0x3b05   :  { %10276 = vrot.lane.b32.xlu1 %v18552_v62, %s17208_s4 }
0x3b06   :  { %10229 = vrot.lane.b32.xlu0 %v18539_v3, %s17208_s4 }
0x3b09   :  { %15606 = vrot.lane.b32.xlu1 %v15605_v18, %s17208_s4 }
0x3b0a   :  { %15616 = vrot.lane.b32.xlu0 %v15615_v16, %s17173_s0 }
0x3b0d   :  { %15611 = vrot.lane.b32.xlu1 %v15610_v58, %s17208_s4 }
0x3b11   :  { %15621 = vrot.lane.b32.xlu1 %v15620_v14, %s17173_s0  ;;  %v16162_v14 = vld [vmem:[#allocation10 + $0x88] sm:$0xff]  }
0x3b63   :  { %v10209_v30 = vpop.xlane.xlu0 %10208 }
0x3b67   :  { %v10212_v13 = vpop.xlane.xlu1 %10211 }
0x3b68   :  { %16588 = vrcp.f32 %v10212_v13 }
0x3b69   :  { %16590 = vrcp.f32 %v10209_v30 }
0x3b75   :  { %v16589_v62 = vpop.eup %16588 }
0x3b76   :  { %v16591_v53 = vpop.eup %16590  ;;  %v10224_v61 = vmul.f32 %v16589_v62, %v16583_v12  ;;  %v16175_v12 = vld [vmem:[#allocation16 + $0x160] ss:$8 sps:$4 sm:$0xff]  }
0x3b77   :  { %v10223_v31 = vmul.f32 %v16591_v53, %v16581_v36  ;;  %v16174_v36 = vld [vmem:[#allocation16 + $0x174] ss:$8 sps:$4 sm:$0xff]  }
0x3b79   :  { %v10215_v3 = vpop.xlane.xlu0 %10214  ;;  %v10227_v16 = vpack.c.bf16 %v10224_v61, %v10223_v31 }
0x3b7a   :  { %16592 = vrcp.f32 %v10215_v3 }
0x3b7d   :  { %v10230_v15 = vpop.permute.xlu0 %10229  ;;  %v10218_v18 = vpop.xlane.xlu1 %10217 }
0x3b7e   :  { %16594 = vrcp.f32 %v10218_v18  ;;  %15105 = vmatpush3.bf16.msra.mxu1 %v10230_v15 }
0x3b7f   :  { %15116 = vmatprep.subr.bf16.mxu1 %v16156_v4 }
0x3b81   :  { %15107 = vmatmul.mubr.msk.bf16.vlgmr.msra.gmra.mxu1 %vm2091_vm3, %v10227_v16  ;;  %v10277_v8 = vpop.permute.xlu1 %10276  ;;  %v15617_v13 = vpop.permute.xlu0 %15616 }
0x3b82   :  { %15111 = vmatpush3.bf16.msra.mxu0 %v10277_v8  ;;  %15117 = vmatpush3.bf16.msra.mxu1 %v16156_v4  ;;  %v15619_v3 = vunpack.i.h.bf16 %v15617_v13  ;;  %v15618_v53 = vunpack.i.l.bf16 %v15617_v13 }
0x3b83   :  { %15118 = vmatprep.subr.bf16.mxu1 %v16157_v11  ;;  %10600 = vmatprep.subr.bf16.mxu0 %v16174_v36 }
0x3b85   :  { %v15607_v45 = vpop.permute.xlu1 %15606 }
0x3b86   :  { %15119 = vmatpush3.bf16.msra.mxu1 %v16157_v11  ;;  %v15608_v47 = vunpack.i.l.bf16 %v15607_v45 }
0x3b87   :  { %v16593_v20 = vpop.eup %16592  ;;  %15120 = vmatprep.subr.bf16.mxu1 %v16158_v48 }
0x3b88   :  { %v10225_v28 = vmul.f32 %v16593_v20, %v16585_v43  ;;  %v16187_v43 = vld [vmem:[#allocation16 + $0x120] ss:$8 sps:$4 sm:$0xff]   ;;  %v10371_v62 = vsel %vm1996_vm2, %v18592_v34, %v15608_v47 }
0x3b89   :  { %v10375_v18 = vsel %vm3010_vm4, %v10371_v62, %v15618_v53 }
0x3b8a   :  { %15121 = vmatpush3.bf16.msra.mxu1 %v16158_v48 }
0x3b8b   :  { %v16595_v58 = vpop.eup %16594  ;;  %15122 = vmatprep.subr.bf16.mxu1 %v16159_v63 }
0x3b8c   :  { %v10226_v49 = vmul.f32 %v16595_v58, %v16587_v22  ;;  %v15609_v22 = vunpack.i.h.bf16 %v15607_v45  ;;  %v15612_v58 = vpop.permute.xlu1 %15611 }
0x3b8e   :  { %v10228_v41 = vpack.c.bf16 %v10226_v49, %v10225_v28  ;;  %15123 = vmatpush3.bf16.msra.mxu1 %v16159_v63  ;;  %v10372_v30 = vsel %vm1996_vm2, %v18594_v10, %v15609_v22  ;;  %v15614_v49 = vunpack.i.h.bf16 %v15612_v58 }
0x3b8f   :  { %15124 = vmatprep.subr.bf16.mxu1 %v16160_v33  ;;  %v10376_v16 = vsel %vm3010_vm4, %v10372_v30, %v15619_v3 }
0x3b90   :  { %15113 = vmatmul.mubr.msk.bf16.vlgmr.msra.gmra.mxu0 %vm2091_vm3, %v10228_v41  ;;  %v15622_v10 = vpop.permute.xlu1 %15621  ;;  %v15613_v41 = vunpack.i.l.bf16 %v15612_v58  ;;  %v10374_v48 = vsel %vm1996_vm2, %v18600_v0, %v15614_v49  ;;  %v16166_v0 = vld [vmem:[#allocation13 + $0xa8] sm:$0xff]  }
0x3b91   :  { %10632 = vmatprep.mubr.bf16.mxu0 %v17204_v32  ;;  %10601 = vmatpush1.bf16.msra.mxu0 %v16172_v23  ;;  %v15624_v34 = vunpack.i.h.bf16 %v15622_v10  ;;  %v15623_v4 = vunpack.i.l.bf16 %v15622_v10 }
0x3b92   :  { %15125 = vmatpush3.bf16.msra.mxu1 %v16160_v33  ;;  %10602 = vmatprep.subr.bf16.mxu0 %v16177_v40  ;;  %v10373_v63 = vsel %vm1996_vm2, %v18598_v25, %v15613_v41  ;;  %v16167_v25 = vld [vmem:[#allocation13 + $0xa0] sm:$0xff]  }
0x3b93   :  { %15126 = vmatprep.subr.bf16.mxu1 %v16161_v1 }
0x3b95   :  { %10603 = vmatpush1.bf16.msra.mxu0 %v16175_v12  ;;  %v13585_v12 = vld [vmem:[#allocation12 + $0x2] ss:$0 sm:$0xff] }
0x3b96   :  { %15127 = vmatpush3.bf16.msra.mxu1 %v16161_v1  ;;  %10604 = vmatprep.subr.bf16.mxu0 %v16180_v57 }
0x3b97   :  { %15128 = vmatprep.subr.bf16.mxu1 %v16162_v14 }
0x3b99   :  { %10605 = vmatpush1.bf16.msra.mxu0 %v16178_v2 }
0x3b9a   :  { %15129 = vmatpush3.bf16.msra.mxu1 %v16162_v14  ;;  %10606 = vmatprep.subr.bf16.mxu0 %v16183_v60  ;;  %v10377_v14 = vsel %vm3010_vm4, %v10373_v63, %v15623_v4 }
0x3b9b   :  { %15130 = vmatprep.subr.bf16.mxu1 %v16163_v29 }
0x3b9d   :  { %10607 = vmatpush1.bf16.msra.mxu0 %v16181_v56 }
0x3b9e   :  { %15131 = vmatpush3.bf16.msra.mxu1 %v16163_v29  ;;  %10608 = vmatprep.subr.bf16.mxu0 %v16186_v27  ;;  %v16168_v29 = vld [vmem:[#allocation13 + $0x98] sm:$0xff]  }
0x3b9f   :  { %15136 = vmatprep.subr.bf16.mxu1 %v18714_v7 }
0x3ba1   :  { %10609 = vmatpush1.bf16.msra.mxu0 %v16184_v42 }
0x3ba2   :  { %10610 = vmatprep.subr.bf16.mxu0 %v16189_v26 }
0x3ba5   :  { %10611 = vmatpush1.bf16.msra.mxu0 %v16187_v43  ;;  %v13594_v43 = vld [vmem:[%s19168_s27 + $0x4] sm:$0x3] }
0x3ba6   :  { %v10513_v47 = vrot.slane %v13594_v43, %v17501_v46 }
0x3c41   :  { %v10269_v51 = vpop.f32.mrf.mxu1 }
0x3c43   :  { %v15108_v55 = vpop.f32.mrf.mxu1 }
0x3c45   :  { %v10272_v39 = vpop.f32.mrf.mxu1 }
0x3c46   :  { %v15625_v5 = vpack.i.bf16 %v10272_v39, %v10269_v51  ;;  %v10378_v51 = vsel %vm3010_vm4, %v10374_v48, %v15624_v34 }
0x3c47   :  { %v15109_v6 = vpop.f32.mrf.mxu1 }
0x3c48   :  { %15626 = vrot.lane.b32.xlu0 %v15625_v5, %s17207_s6  ;;  %v16165_v6 = vld [vmem:[#allocation13 + $0xb0] sm:$0xff]  }
0x3c50   :  { %v10316_v9 = vpop.f32.mrf.mxu0 }
0x3c52   :  { %v15114_v50 = vpop.f32.mrf.mxu0 }
0x3c53   :  { %v16170_v50 = vld [vmem:[#allocation13 + $0x88] sm:$0xff]  }
0x3c54   :  { %v10319_v37 = vpop.f32.mrf.mxu0 }
0x3c55   :  { %v15630_v19 = vpack.i.bf16 %v10319_v37, %v10316_v9  ;;  %v16169_v9 = vld [vmem:[#allocation13 + $0x90] sm:$0xff]   ;;  %v16171_v37 = vld [vmem:[#allocation13 + $0x80] sm:$0xff]  }
0x3c56   :  { %v15115_v24 = vpop.f32.mrf.mxu0 }
0x3c57   :  { %15631 = vrot.lane.b32.xlu1 %v15630_v19, %s17207_s6  ;;  %v16195_v19 = vld [vmem:[#allocation16 + $0x104] ss:$8 sps:$4 sm:$0xff]   ;;  %v16193_v24 = vld [vmem:[#allocation16 + $0x100] ss:$8 sps:$4 sm:$0xff]  }
0x3cba   :  { %v15627_v61 = vpop.permute.xlu0 %15626 }
0x3cbb   :  { %v15629_v31 = vunpack.i.h.bf16 %v15627_v61  ;;  %v15628_v15 = vunpack.i.l.bf16 %v15627_v61 }
0x3cbd   :  { %v10379_v8 = vsel %vm3015_vm5, %v10375_v18, %v15628_v15  ;;  %v10380_v20 = vsel %vm3015_vm5, %v10376_v16, %v15629_v31  ;;  %v13611_v16 = vld [vmem:[#allocation15 + $0x2] ss:$0 sm:$0xff] }
0x3cbe   :  { %v10383_v28 = vpack.c.bf16 %v10380_v20, %v10379_v8 }
0x3cc0   :  { %15132 = vmatprep.mubr.bf16.mxu1 %v10383_v28  ;;  %v10517_v28 = vrot.slane %v13594_v43, %v17492_v35 }
0x3cc9   :  { %v15632_v11 = vpop.permute.xlu1 %15631 }
0x3cca   :  { %v15634_v33 = vunpack.i.h.bf16 %v15632_v11  ;;  %v15633_v1 = vunpack.i.l.bf16 %v15632_v11 }
0x3ccc   :  { %v10381_v55 = vsel %vm3015_vm5, %v10377_v14, %v15633_v1  ;;  %v10382_v39 = vsel %vm3015_vm5, %v10378_v51, %v15634_v33 }
0x3ccd   :  { %v10384_v5 = vpack.c.bf16 %v10382_v39, %v10381_v55 }
0x3ccf   :  { %15133 = vmatmul.mubr.bf16.vlgmr.msra.gmra.mxu1 %v10384_v5 }
0x3cd0   :  { %15137 = vmatpush3.bf16.msra.mxu1 %v18714_v7  ;;  %15152 = vmatprep.mubr.bf16.mxu1 %v18513_v59  ;;  %v16192_v59 = vld [vmem:[#allocation16 + $0x114] ss:$8 sps:$4 sm:$0xff]   ;;  %v16190_v7 = vld [vmem:[#allocation16 + $0x110] ss:$8 sps:$4 sm:$0xff]  }
0x3cd1   :  { %15138 = vmatprep.subr.bf16.mxu1 %v16165_v6  ;;  %10612 = vmatprep.subr.bf16.mxu0 %v16192_v59 }
0x3cd2   :  { %10613 = vmatpush1.bf16.msra.mxu0 %v16190_v7 }
0x3cd3   :  { %10614 = vmatprep.subr.bf16.mxu0 %v16195_v19 }
0x3cd4   :  { %15139 = vmatpush3.bf16.msra.mxu1 %v16165_v6 }
0x3cd5   :  { %15140 = vmatprep.subr.bf16.mxu1 %v16166_v0 }
0x3cd6   :  { %10615 = vmatpush1.bf16.msra.mxu0 %v16193_v24 }
0x3cd7   :  { %15156 = vmatprep.subr.bf16.mxu0 %v17205_v38 }
0x3cd8   :  { %15141 = vmatpush3.bf16.msra.mxu1 %v16166_v0 }
0x3cd9   :  { %15142 = vmatprep.subr.bf16.mxu1 %v16167_v25 }
0x3cdc   :  { %15143 = vmatpush3.bf16.msra.mxu1 %v16167_v25 }
0x3cdd   :  { %15144 = vmatprep.subr.bf16.mxu1 %v16168_v29 }
0x3ce0   :  { %15145 = vmatpush3.bf16.msra.mxu1 %v16168_v29 }
0x3ce1   :  { %15146 = vmatprep.subr.bf16.mxu1 %v16169_v9 }
0x3ce4   :  { %15147 = vmatpush3.bf16.msra.mxu1 %v16169_v9 }
0x3ce5   :  { %15148 = vmatprep.subr.bf16.mxu1 %v16170_v50 }
0x3ce8   :  { %15149 = vmatpush3.bf16.msra.mxu1 %v16170_v50 }
0x3ce9   :  { %15150 = vmatprep.subr.bf16.mxu1 %v16171_v37 }
0x3cec   :  { %15151 = vmatpush3.bf16.msra.mxu1 %v16171_v37 }
0x3ced   :  { %15174 = vmatprep.subr.bf16.mxu1 %v17205_v38 }
0x3cef   :  { %15153 = vmatmul.mubr.bf16.vlgmr.msra.gmra.mxu1 %v18519_v17 }
0x3cf0   :  { %15176 = vmatprep.mubr.msk.bf16.mxu1 %vm17206_vm1, %v17205_v38 }
0x3d8f   :  { %v15134_v23 = vpop.f32.mrf.mxu1 }
0x3d90   :  { %v10482_v27 = vadd.f32 %v15134_v23, %v13585_v12 }
0x3d91   :  { %v10473_v36 = vpop.f32.mrf.mxu1 }
0x3d92   :  { %v10474_v17 = vadd.f32 %v13585_v12, %v10473_v36 }
0x3d93   :  { %v15135_v40 = vpop.f32.mrf.mxu1 }
0x3d94   :  { %v10485_v56 = vadd.f32 %v15135_v40, %v13585_v12 }
0x3d95   :  { %v10476_v57 = vpop.f32.mrf.mxu1 }
0x3d96   :  { %v10477_v2 = vadd.f32 %v13585_v12, %v10476_v57  ;;  %v10508_v42 = vpack.c.bf16 %v10485_v56, %v10482_v27 }
0x3d98   :  { %v10507_v60 = vpack.c.bf16 %v10477_v2, %v10474_v17 }
0x3d9a   :  { %10633 = vmatmul.mubr.bf16.vlgmr.msra.gmra.mxu0 %v10507_v60 }
0x3d9b   :  { %10642 = vmatprep.mubr.bf16.mxu0 %v17204_v32 }
0x3da2   :  { %10643 = vmatmul.mubr.bf16.gmra.mxu0 %v10508_v42 }
0x3da3   :  { %15158 = vmatprep.mubr.msk.bf16.mxu0 %vm17206_vm1, %v17205_v38 }
0x3daf   :  { %v15154_v26 = vpop.f32.mrf.mxu1 }
0x3db0   :  { %v10773_v14 = vadd.f32 %v15154_v26, %v13611_v16 }
0x3db1   :  { %v10764_v45 = vpop.f32.mrf.mxu1 }
0x3db2   :  { %v10765_v58 = vadd.f32 %v13611_v16, %v10764_v45 }
0x3db3   :  { %v15155_v30 = vpop.f32.mrf.mxu1 }
0x3db4   :  { %v10776_v35 = vadd.f32 %v15155_v30, %v13611_v16 }
0x3db5   :  { %v10767_v31 = vpop.f32.mrf.mxu1 }
0x3db6   :  { %v10768_v20 = vadd.f32 %v13611_v16, %v10767_v31  ;;  %v18767_v55 = vpack.c.bf16 %v10776_v35, %v10773_v14 }
0x3db8   :  { %v18752_v34 = vpack.c.bf16 %v10768_v20, %v10765_v58 }
0x3e5a   :  { %v10634_v22 = vpop.f32.mrf.mxu0 }
0x3e5b   :  { %v10635_v3 = vadd.f32 %v10634_v22, %v10513_v47 }
0x3e5c   :  { %v10636_v13 = vpop.f32.mrf.mxu0 }
0x3e5d   :  { %v10637_v51 = vadd.f32 %v10636_v13, %v10517_v28 }
0x3e5e   :  { %v10638_v62 = vpop.f32.mrf.mxu0 }
0x3e5f   :  { %v10639_v53 = vadd.f32 %v10638_v62, %v10513_v47 }
0x3e60   :  { %v10640_v61 = vpop.f32.mrf.mxu0 }
0x3e61   :  { %v18746_v32 = vpack.c.bf16 %v10639_v53, %v10635_v3  ;;  %v10641_v1 = vadd.f32 %v10640_v61, %v10517_v28 }
0x3e62   :  { %v10644_v15 = vpop.f32.mrf.mxu0 }
0x3e63   :  { %v10804_v18 = vsel %vm1996_vm2, %v18746_v32, 0  ;;  %v10645_v10 = vadd.f32 %v10644_v15, %v10513_v47  ;;  %v18769_v39 = vpack.c.bf16 %v10641_v1, %v10637_v51 }
0x3e64   :  { %v10646_v8 = vpop.f32.mrf.mxu0  ;;  %15157 = vmatpush3.bf16.xpose.msra.mxu0 %v10804_v18 }
0x3e65   :  { %15162 = vmatprep.subr.bf16.mxu0 %v17205_v38  ;;  %v10647_v4 = vadd.f32 %v10646_v8, %v10517_v28 }
0x3e66   :  { %v10648_v46 = vpop.f32.mrf.mxu0 }
0x3e67   :  { %v10649_v49 = vadd.f32 %v10648_v46, %v10513_v47 }
0x3e68   :  { %v10650_v41 = vpop.f32.mrf.mxu0 }
0x3e69   :  { %v18754_v11 = vpack.c.bf16 %v10649_v49, %v10645_v10  ;;  %v10651_v48 = vadd.f32 %v10650_v41, %v10517_v28 }
0x3e6b   :  { %v18756_v63 = vpack.c.bf16 %v10651_v48, %v10647_v4  ;;  %15159 = vmatmul.mubr.msk.bf16.vlgmr.msra.gmra.mxu0 %vm1996_vm2, %v18752_v34  ;;  %v10851_v33 = vsel %vm1996_vm2, %v18754_v11, 0 }
0x3e6c   :  { %15163 = vmatpush3.bf16.xpose.msra.mxu0 %v10851_v33  ;;  %15164 = vmatprep.mubr.msk.bf16.mxu0 %vm17206_vm1, %v17205_v38 }
0x3e6d   :  { %15175 = vmatpush3.bf16.msra.mxu1 %v18756_v63  ;;  %15168 = vmatprep.subr.bf16.mxu0 %v17205_v38 }
0x3e6e   :  { %15186 = vmatprep.subr.bf16.mxu1 %v17205_v38 }
0x3e73   :  { %15165 = vmatmul.mubr.msk.bf16.vlgmr.msra.gmra.mxu0 %vm1996_vm2, %v18767_v55 }
0x3e74   :  { %15169 = vmatpush3.bf16.msra.mxu0 %v18769_v39  ;;  %15170 = vmatprep.mubr.msk.bf16.mxu0 %vm17206_vm1, %v17205_v38 }
0x3e75   :  { %15180 = vmatprep.subr.bf16.mxu0 %v17205_v38 }
0x3f2b   :  { %v10840_v5 = vpop.f32.mrf.mxu0 }
0x3f2c   :  { %v10894_v6 = vsel %vm2091_vm3, %v10840_v5, -inf }
0x3f2d   :  { %10895 = vmax.xlane.f32.xlu0 %v10894_v6  ;;  %v15160_v0 = vpop.f32.mrf.mxu0 }
0x3f2f   :  { %v10843_v25 = vpop.f32.mrf.mxu0 }
0x3f30   :  { %v10897_v29 = vsel %vm2091_vm3, %v10843_v25, -inf }
0x3f31   :  { %10898 = vmax.xlane.f32.xlu1 %v10897_v29  ;;  %v15161_v9 = vpop.f32.mrf.mxu0 }
0x3f33   :  { %v10887_v50 = vpop.f32.mrf.mxu0 }
0x3f34   :  { %v10900_v37 = vsel %vm2091_vm3, %v10887_v50, -inf }
0x3f35   :  { %10901 = vmax.xlane.f32.xlu0 %v10900_v37  ;;  %v15166_v59 = vpop.f32.mrf.mxu0 }
0x3f37   :  { %v10890_v7 = vpop.f32.mrf.mxu0 }
0x3f38   :  { %v10903_v19 = vsel %vm2091_vm3, %v10890_v7, -inf }
0x3f39   :  { %10904 = vmax.xlane.f32.xlu0 %v10903_v19  ;;  %v15167_v24 = vpop.f32.mrf.mxu0 }
0x3fb6   :  { %v10896_v23 = vpop.xlane.xlu0 %10895 }
0x3fb7   :  { %v10906_v36 = vsub.f32 %v10840_v5, %v10896_v23 }
0x3fb9   :  { %v10910_v40 = vmul.f32 1.442695, %v10906_v36 }
0x3fba   :  { %v10899_v12 = vpop.xlane.xlu1 %10898 }
0x3fbb   :  { %16596 = vpow2.f32 %v10910_v40  ;;  %v10907_v57 = vsub.f32 %v10843_v25, %v10899_v12 }
0x3fbd   :  { %v10912_v17 = vmul.f32 1.442695, %v10907_v57 }
0x3fbe   :  { %v10902_v2 = vpop.xlane.xlu0 %10901 }
0x3fbf   :  { %16598 = vpow2.f32 %v10912_v17  ;;  %v10908_v60 = vsub.f32 %v10887_v50, %v10902_v2 }
0x3fc1   :  { %v10914_v56 = vmul.f32 1.442695, %v10908_v60 }
0x3fc2   :  { %v10905_v47 = vpop.xlane.xlu0 %10904 }
0x3fc3   :  { %16600 = vpow2.f32 %v10914_v56  ;;  %v10909_v13 = vsub.f32 %v10890_v7, %v10905_v47 }
0x3fc5   :  { %v10916_v30 = vmul.f32 1.442695, %v10909_v13 }
0x3fc7   :  { %16602 = vpow2.f32 %v10916_v30 }
0x3fc8   :  { %v16597_v27 = vpop.eup %16596 }
0x3fc9   :  { %v10918_v42 = vsel %vm2091_vm3, %v16597_v27, 0.0 }
0x3fca   :  { %10919 = vadd.xlane.f32.xlu0 %v10918_v42 }
0x3fcc   :  { %v16599_v26 = vpop.eup %16598 }
0x3fcd   :  { %v10921_v43 = vsel %vm2091_vm3, %v16599_v26, 0.0 }
0x3fce   :  { %10922 = vadd.xlane.f32.xlu1 %v10921_v43 }
0x3fd0   :  { %v16601_v45 = vpop.eup %16600 }
0x3fd1   :  { %v10924_v22 = vsel %vm2091_vm3, %v16601_v45, 0.0 }
0x3fd2   :  { %10925 = vadd.xlane.f32.xlu0 %v10924_v22 }
0x3fd4   :  { %v16603_v62 = vpop.eup %16602 }
0x3fd5   :  { %v10927_v3 = vsel %vm2091_vm3, %v16603_v62, 0.0 }
0x3fdf   :  { %11085 = vrot.lane.b32.xlu1 %v18754_v11, %s17207_s6 }
0x3fe8   :  { %11032 = vrot.lane.b32.xlu0 %v18746_v32, %s17207_s6 }
0x4003   :  { %10928 = vadd.xlane.f32.xlu1 %v10927_v3 }
0x4014   :  { %11029 = vrot.lane.b32.xlu1 %v18752_v34, %s17207_s6 }
0x4018   :  { %11082 = vrot.lane.b32.xlu1 %v18767_v55, %s17207_s6 }
0x4053   :  { %v10920_v53 = vpop.xlane.xlu0 %10919 }
0x4054   :  { %16604 = vrcp.f32 %v10920_v53 }
0x4057   :  { %v10923_v61 = vpop.xlane.xlu1 %10922 }
0x4058   :  { %16606 = vrcp.f32 %v10923_v61 }
0x405b   :  { %v10926_v31 = vpop.xlane.xlu0 %10925  ;;  %v11086_v28 = vpop.permute.xlu1 %11085 }
0x405c   :  { %16608 = vrcp.f32 %v10926_v31  ;;  %v11091_v1 = vsel %vm1996_vm2, %v11086_v28, 0 }
0x405f   :  { %v11033_v20 = vpop.permute.xlu0 %11032 }
0x4060   :  { %v11038_v58 = vsel %vm1996_vm2, %v11033_v20, 0 }
0x4061   :  { %v16605_v15 = vpop.eup %16604 }
0x4062   :  { %v10934_v16 = vmul.f32 %v16605_v15, %v16597_v27 }
0x4065   :  { %v16607_v18 = vpop.eup %16606 }
0x4066   :  { %v10935_v8 = vmul.f32 %v16607_v18, %v16599_v26 }
0x4068   :  { %v10938_v46 = vpack.c.bf16 %v10935_v8, %v10934_v16 }
0x4069   :  { %v16609_v41 = vpop.eup %16608 }
0x406a   :  { %15171 = vmatmul.mubr.msk.bf16.vlgmr.msra.gmra.mxu0 %vm2091_vm3, %v10938_v46  ;;  %v10936_v48 = vmul.f32 %v16609_v41, %v16601_v45 }
0x406b   :  { %15181 = vmatpush3.bf16.xpose.msra.mxu0 %v11038_v58  ;;  %15182 = vmatprep.mubr.msk.bf16.mxu0 %vm17206_vm1, %v17205_v38 }
0x406c   :  { %15192 = vmatprep.subr.bf16.mxu0 %v17205_v38 }
0x408c   :  { %v10929_v10 = vpop.xlane.xlu1 %10928 }
0x408d   :  { %16610 = vrcp.f32 %v10929_v10 }
0x4090   :  { %v11030_v49 = vpop.permute.xlu1 %11029 }
0x4091   :  { %15183 = vmatmul.mubr.msk.bf16.vlgmr.msra.gmra.mxu0 %vm1996_vm2, %v11030_v49 }
0x4092   :  { %15194 = vmatprep.mubr.msk.bf16.mxu0 %vm17206_vm1, %v17205_v38 }
0x4094   :  { %v11083_v14 = vpop.permute.xlu1 %11082 }
0x409a   :  { %v16611_v4 = vpop.eup %16610 }
0x409b   :  { %v10937_v33 = vmul.f32 %v16611_v4, %v16603_v62 }
0x409d   :  { %v10939_v35 = vpack.c.bf16 %v10937_v33, %v10936_v48 }
0x409f   :  { %15177 = vmatmul.mubr.msk.bf16.vlgmr.msra.gmra.mxu1 %vm2091_vm3, %v10939_v35 }
0x40a0   :  { %15187 = vmatpush3.bf16.xpose.msra.mxu1 %v11091_v1  ;;  %15188 = vmatprep.mubr.msk.bf16.mxu1 %vm17206_vm1, %v17205_v38 }
0x40a1   :  { %15198 = vmatprep.subr.bf16.mxu1 %v17205_v38 }
0x40a7   :  { %15189 = vmatmul.mubr.msk.bf16.vlgmr.msra.gmra.mxu1 %vm1996_vm2, %v11083_v14 }
0x40a8   :  { %15200 = vmatprep.mubr.msk.bf16.mxu1 %vm17206_vm1, %v17205_v38 }
0x412a   :  { %v18809_v51 = vpop.f32.mrf.mxu0 }
0x412c   :  { %v15172_v5 = vpop.f32.mrf.mxu0 }
0x412e   :  { %v18811_v6 = vpop.f32.mrf.mxu0 }
0x4130   :  { %v15173_v0 = vpop.f32.mrf.mxu0 }
0x4151   :  { %v11074_v25 = vpop.f32.mrf.mxu0 }
0x4152   :  { %v11134_v29 = vsel %vm2091_vm3, %v11074_v25, -inf }
0x4153   :  { %11135 = vmax.xlane.f32.xlu0 %v11134_v29  ;;  %v15184_v9 = vpop.f32.mrf.mxu0 }
0x4155   :  { %v11077_v50 = vpop.f32.mrf.mxu0 }
0x4156   :  { %v11137_v37 = vsel %vm2091_vm3, %v11077_v50, -inf }
0x4157   :  { %11138 = vmax.xlane.f32.xlu1 %v11137_v37  ;;  %v15185_v59 = vpop.f32.mrf.mxu0 }
0x415f   :  { %v18815_v7 = vpop.f32.mrf.mxu1 }
0x4161   :  { %v15178_v19 = vpop.f32.mrf.mxu1 }
0x4163   :  { %v18817_v24 = vpop.f32.mrf.mxu1 }
0x4165   :  { %v15179_v23 = vpop.f32.mrf.mxu1 }
0x4167   :  { %v11127_v36 = vpop.f32.mrf.mxu1 }
0x4168   :  { %v11140_v40 = vsel %vm2091_vm3, %v11127_v36, -inf }
0x4169   :  { %v15190_v12 = vpop.f32.mrf.mxu1  ;;  %11141 = vmax.xlane.f32.xlu0 %v11140_v40 }
0x416b   :  { %v11130_v57 = vpop.f32.mrf.mxu1 }
0x416c   :  { %v11143_v17 = vsel %vm2091_vm3, %v11130_v57, -inf }
0x416d   :  { %v15191_v2 = vpop.f32.mrf.mxu1  ;;  %11144 = vmax.xlane.f32.xlu0 %v11143_v17 }
0x41dc   :  { %v11136_v60 = vpop.xlane.xlu0 %11135 }
0x41dd   :  { %v11146_v56 = vsub.f32 %v11074_v25, %v11136_v60 }
0x41df   :  { %v11150_v27 = vmul.f32 1.442695, %v11146_v56 }
0x41e0   :  { %v11139_v42 = vpop.xlane.xlu1 %11138 }
0x41e1   :  { %16612 = vpow2.f32 %v11150_v27  ;;  %v11147_v26 = vsub.f32 %v11077_v50, %v11139_v42 }
0x41e3   :  { %v11152_v43 = vmul.f32 1.442695, %v11147_v26 }
0x41e5   :  { %16614 = vpow2.f32 %v11152_v43 }
0x41ee   :  { %v16613_v45 = vpop.eup %16612 }
0x41ef   :  { %v11158_v22 = vsel %vm2091_vm3, %v16613_v45, 0.0 }
0x41f0   :  { %11159 = vadd.xlane.f32.xlu0 %v11158_v22 }
0x41f2   :  { %v16615_v47 = vpop.eup %16614  ;;  %v11142_v13 = vpop.xlane.xlu0 %11141 }
0x41f3   :  { %v11148_v30 = vsub.f32 %v11127_v36, %v11142_v13  ;;  %v11161_v62 = vsel %vm2091_vm3, %v16615_v47, 0.0 }
0x41f4   :  { %11162 = vadd.xlane.f32.xlu1 %v11161_v62 }
0x41f5   :  { %v11154_v3 = vmul.f32 1.442695, %v11148_v30 }
0x41f6   :  { %v11145_v31 = vpop.xlane.xlu0 %11144 }
0x41f7   :  { %16616 = vpow2.f32 %v11154_v3  ;;  %v11149_v15 = vsub.f32 %v11130_v57, %v11145_v31 }
0x41f9   :  { %v11156_v18 = vmul.f32 1.442695, %v11149_v15 }
0x41fb   :  { %16618 = vpow2.f32 %v11156_v18 }
0x4204   :  { %v16617_v53 = vpop.eup %16616 }
0x4205   :  { %11229 = vrot.lane.b32.xlu1 %v18756_v63, %s17207_s6  ;;  %v11164_v61 = vsel %vm2091_vm3, %v16617_v53, 0.0 }
0x4206   :  { %11165 = vadd.xlane.f32.xlu0 %v11164_v61 }
0x4208   :  { %v16619_v16 = vpop.eup %16618 }
0x4209   :  { %11278 = vrot.lane.b32.xlu1 %v18746_v32, %s17173_s0  ;;  %v11167_v8 = vsel %vm2091_vm3, %v16619_v16, 0.0 }
0x421c   :  { %11181 = vrot.lane.b32.xlu0 %v18769_v39, %s17207_s6 }
0x4220   :  { %11276 = vrot.lane.b32.xlu0 %v18752_v34, %s17173_s0 }
0x422d   :  { %11168 = vadd.xlane.f32.xlu1 %v11167_v8 }
0x423e   :  { %11329 = vrot.lane.b32.xlu1 %v18754_v11, %s17173_s0 }
0x4242   :  { %11327 = vrot.lane.b32.xlu1 %v18767_v55, %s17173_s0 }
0x4279   :  { %v11160_v46 = vpop.xlane.xlu0 %11159 }
0x427d   :  { %v11163_v20 = vpop.xlane.xlu1 %11162 }
0x427e   :  { %16620 = vrcp.f32 %v11163_v20 }
0x427f   :  { %16622 = vrcp.f32 %v11160_v46 }
0x4281   :  { %v11230_v58 = vpop.permute.xlu1 %11229 }
0x4282   :  { %15199 = vmatpush3.bf16.msra.mxu1 %v11230_v58 }
0x4283   :  { %15210 = vmatprep.subr.bf16.mxu1 %v17205_v38 }
0x4285   :  { %v11279_v33 = vpop.permute.xlu1 %11278 }
0x4286   :  { %v11284_v1 = vsel %vm1996_vm2, %v11279_v33, 0 }
0x428b   :  { %v16621_v28 = vpop.eup %16620 }
0x428c   :  { %v16623_v49 = vpop.eup %16622  ;;  %v11175_v41 = vmul.f32 %v16621_v28, %v16615_v47 }
0x428d   :  { %v11174_v4 = vmul.f32 %v16623_v49, %v16613_v45 }
0x428f   :  { %v11166_v10 = vpop.xlane.xlu0 %11165  ;;  %v11178_v35 = vpack.c.bf16 %v11175_v41, %v11174_v4 }
0x4290   :  { %16624 = vrcp.f32 %v11166_v10 }
0x4293   :  { %v11182_v48 = vpop.permute.xlu0 %11181 }
0x4294   :  { %15193 = vmatpush3.bf16.msra.mxu0 %v11182_v48 }
0x4295   :  { %15204 = vmatprep.subr.bf16.mxu0 %v17205_v38 }
0x4297   :  { %15195 = vmatmul.mubr.msk.bf16.vlgmr.msra.gmra.mxu0 %vm2091_vm3, %v11178_v35  ;;  %v11277_v14 = vpop.permute.xlu0 %11276 }
0x4298   :  { %15205 = vmatpush3.bf16.xpose.msra.mxu0 %v11284_v1  ;;  %15206 = vmatprep.mubr.msk.bf16.mxu0 %vm17206_vm1, %v17205_v38 }
0x4299   :  { %15216 = vmatprep.subr.bf16.mxu0 %v17205_v38 }
0x429d   :  { %v16625_v0 = vpop.eup %16624 }
0x429e   :  { %v11176_v29 = vmul.f32 %v16625_v0, %v16617_v53 }
0x429f   :  { %15207 = vmatmul.mubr.msk.bf16.vlgmr.msra.gmra.mxu0 %vm1996_vm2, %v11277_v14 }
0x42a0   :  { %15218 = vmatprep.mubr.msk.bf16.mxu0 %vm17206_vm1, %v17205_v38 }
0x42b6   :  { %v11169_v5 = vpop.xlane.xlu1 %11168 }
0x42b7   :  { %16626 = vrcp.f32 %v11169_v5 }
0x42ba   :  { %v11330_v50 = vpop.permute.xlu1 %11329 }
0x42bb   :  { %v11335_v59 = vsel %vm1996_vm2, %v11330_v50, 0 }
0x42be   :  { %v11328_v19 = vpop.permute.xlu1 %11327 }
0x42c4   :  { %v16627_v25 = vpop.eup %16626 }
0x42c5   :  { %v11177_v9 = vmul.f32 %v16627_v25, %v16619_v16 }
0x42c7   :  { %v11179_v37 = vpack.c.bf16 %v11177_v9, %v11176_v29 }
0x42c9   :  { %15201 = vmatmul.mubr.msk.bf16.vlgmr.msra.gmra.mxu1 %vm2091_vm3, %v11179_v37 }
0x42ca   :  { %15211 = vmatpush3.bf16.xpose.msra.mxu1 %v11335_v59  ;;  %15212 = vmatprep.mubr.msk.bf16.mxu1 %vm17206_vm1, %v17205_v38 }
0x42cb   :  { %15222 = vmatprep.subr.bf16.mxu1 %v17205_v38 }
0x42d1   :  { %15213 = vmatmul.mubr.msk.bf16.vlgmr.msra.gmra.mxu1 %vm1996_vm2, %v11328_v19 }
0x42d2   :  { %15224 = vmatprep.mubr.msk.bf16.mxu1 %vm17206_vm1, %v17205_v38 }
0x4357   :  { %v18855_v23 = vpop.f32.mrf.mxu0 }
0x4359   :  { %v15196_v36 = vpop.f32.mrf.mxu0 }
0x435b   :  { %v18857_v40 = vpop.f32.mrf.mxu0 }
0x435c   :  { %v15635_v12 = vpack.i.bf16 %v18857_v40, %v18855_v23 }
0x435d   :  { %v15197_v57 = vpop.f32.mrf.mxu0 }
0x435f   :  { %v11320_v17 = vpop.f32.mrf.mxu0 }
0x4360   :  { %v11378_v2 = vsel %vm2091_vm3, %v11320_v17, -inf }
0x4361   :  { %11379 = vmax.xlane.f32.xlu0 %v11378_v2  ;;  %v15208_v60 = vpop.f32.mrf.mxu0 }
0x4363   :  { %v11323_v56 = vpop.f32.mrf.mxu0 }
0x4364   :  { %v11381_v27 = vsel %vm2091_vm3, %v11323_v56, -inf }
0x4365   :  { %11382 = vmax.xlane.f32.xlu1 %v11381_v27  ;;  %v15209_v42 = vpop.f32.mrf.mxu0 }
0x4389   :  { %v18863_v26 = vpop.f32.mrf.mxu1 }
0x438b   :  { %v15202_v43 = vpop.f32.mrf.mxu1 }
0x438d   :  { %v18865_v45 = vpop.f32.mrf.mxu1 }
0x438e   :  { %v15640_v22 = vpack.i.bf16 %v18865_v45, %v18863_v26 }
0x438f   :  { %v15203_v47 = vpop.f32.mrf.mxu1 }
0x4391   :  { %v11371_v13 = vpop.f32.mrf.mxu1 }
0x4392   :  { %v11384_v30 = vsel %vm2091_vm3, %v11371_v13, -inf }
0x4393   :  { %v15214_v62 = vpop.f32.mrf.mxu1  ;;  %11385 = vmax.xlane.f32.xlu0 %v11384_v30 }
0x4395   :  { %v11374_v3 = vpop.f32.mrf.mxu1 }
0x4396   :  { %v11387_v53 = vsel %vm2091_vm3, %v11374_v3, -inf }
0x4397   :  { %v15215_v61 = vpop.f32.mrf.mxu1  ;;  %11388 = vmax.xlane.f32.xlu0 %v11387_v53 }
0x43ea   :  { %v11380_v31 = vpop.xlane.xlu0 %11379 }
0x43eb   :  { %v11390_v15 = vsub.f32 %v11320_v17, %v11380_v31 }
0x43ed   :  { %v11394_v18 = vmul.f32 1.442695, %v11390_v15 }
0x43ee   :  { %v11383_v16 = vpop.xlane.xlu1 %11382 }
0x43ef   :  { %16628 = vpow2.f32 %v11394_v18  ;;  %v11391_v8 = vsub.f32 %v11323_v56, %v11383_v16 }
0x43f1   :  { %v11396_v20 = vmul.f32 1.442695, %v11391_v8 }
0x43f3   :  { %16630 = vpow2.f32 %v11396_v20 }
0x43fc   :  { %v16629_v46 = vpop.eup %16628 }
0x43fd   :  { %v11402_v58 = vsel %vm2091_vm3, %v16629_v46, 0.0 }
0x43fe   :  { %11403 = vadd.xlane.f32.xlu0 %v11402_v58 }
0x4400   :  { %v16631_v28 = vpop.eup %16630 }
0x4401   :  { %v11405_v10 = vsel %vm2091_vm3, %v16631_v28, 0.0 }
0x4402   :  { %11406 = vadd.xlane.f32.xlu1 %v11405_v10 }
0x4413   :  { %11471 = vrot.lane.b32.xlu1 %v18756_v63, %s17173_s0 }
0x4417   :  { %11520 = vrot.lane.b32.xlu1 %v18746_v32, %s17208_s4 }
0x441c   :  { %v11386_v49 = vpop.xlane.xlu0 %11385 }
0x441d   :  { %v11392_v41 = vsub.f32 %v11371_v13, %v11386_v49 }
0x441f   :  { %v11398_v4 = vmul.f32 1.442695, %v11392_v41 }
0x4420   :  { %v11389_v48 = vpop.xlane.xlu0 %11388 }
0x4421   :  { %16632 = vpow2.f32 %v11398_v4  ;;  %v11393_v33 = vsub.f32 %v11374_v3, %v11389_v48 }
0x4423   :  { %v11400_v35 = vmul.f32 1.442695, %v11393_v33 }
0x4425   :  { %16634 = vpow2.f32 %v11400_v35 }
0x442e   :  { %v16633_v1 = vpop.eup %16632 }
0x442f   :  { %v11408_v14 = vsel %vm2091_vm3, %v16633_v1, 0.0 }
0x4430   :  { %11409 = vadd.xlane.f32.xlu0 %v11408_v14 }
0x4432   :  { %v16635_v5 = vpop.eup %16634 }
0x4433   :  { %v11411_v0 = vsel %vm2091_vm3, %v16635_v5, 0.0 }
0x443b   :  { %11412 = vadd.xlane.f32.xlu1 %v11411_v0 }
0x4446   :  { %11424 = vrot.lane.b32.xlu0 %v18769_v39, %s17173_s0 }
0x444a   :  { %11518 = vrot.lane.b32.xlu0 %v18752_v34, %s17208_s4 }
0x444c   :  { %11571 = vrot.lane.b32.xlu1 %v18754_v11, %s17208_s4 }
0x4450   :  { %11569 = vrot.lane.b32.xlu1 %v18767_v55, %s17208_s4 }
0x4487   :  { %v11404_v29 = vpop.xlane.xlu0 %11403 }
0x448b   :  { %v11407_v32 = vpop.xlane.xlu1 %11406 }
0x448c   :  { %16636 = vrcp.f32 %v11407_v32 }
0x448d   :  { %16638 = vrcp.f32 %v11404_v29 }
0x448f   :  { %v11472_v25 = vpop.permute.xlu1 %11471 }
0x4490   :  { %15223 = vmatpush3.bf16.msra.mxu1 %v11472_v25 }
0x4491   :  { %15234 = vmatprep.subr.bf16.mxu1 %v17205_v38 }
0x4493   :  { %v11521_v36 = vpop.permute.xlu1 %11520 }
0x4494   :  { %v11526_v55 = vsel %vm1996_vm2, %v11521_v36, 0 }
0x4499   :  { %v16637_v9 = vpop.eup %16636 }
0x449a   :  { %v16639_v37 = vpop.eup %16638  ;;  %v11419_v59 = vmul.f32 %v16637_v9, %v16631_v28 }
0x449b   :  { %v11418_v19 = vmul.f32 %v16639_v37, %v16629_v46 }
0x449d   :  { %v11422_v11 = vpack.c.bf16 %v11419_v59, %v11418_v19 }
0x44b9   :  { %v11410_v50 = vpop.xlane.xlu0 %11409 }
0x44ba   :  { %16640 = vrcp.f32 %v11410_v50 }
0x44bd   :  { %v11425_v34 = vpop.permute.xlu0 %11424 }
0x44be   :  { %15217 = vmatpush3.bf16.msra.mxu0 %v11425_v34 }
0x44bf   :  { %15228 = vmatprep.subr.bf16.mxu0 %v17205_v38 }
0x44c1   :  { %15219 = vmatmul.mubr.msk.bf16.vlgmr.msra.gmra.mxu0 %vm2091_vm3, %v11422_v11  ;;  %v11519_v17 = vpop.permute.xlu0 %11518 }
0x44c2   :  { %15229 = vmatpush3.bf16.xpose.msra.mxu0 %v11526_v55  ;;  %15230 = vmatprep.mubr.msk.bf16.mxu0 %vm17206_vm1, %v17205_v38 }
0x44c3   :  { %15240 = vmatprep.subr.bf16.mxu0 %v17205_v38 }
0x44c4   :  { %v11413_v57 = vpop.xlane.xlu1 %11412 }
0x44c5   :  { %16642 = vrcp.f32 %v11413_v57 }
0x44c7   :  { %v16641_v2 = vpop.eup %16640 }
0x44c8   :  { %v11420_v56 = vmul.f32 %v16641_v2, %v16633_v1  ;;  %v11572_v42 = vpop.permute.xlu1 %11571 }
0x44c9   :  { %15231 = vmatmul.mubr.msk.bf16.vlgmr.msra.gmra.mxu0 %vm1996_vm2, %v11519_v17  ;;  %v11577_v47 = vsel %vm1996_vm2, %v11572_v42, 0 }
0x44ca   :  { %15242 = vmatprep.mubr.msk.bf16.mxu0 %vm17206_vm1, %v17205_v38 }
0x44cc   :  { %v11570_v13 = vpop.permute.xlu1 %11569 }
0x44d2   :  { %v16643_v60 = vpop.eup %16642 }
0x44d3   :  { %v11421_v27 = vmul.f32 %v16643_v60, %v16635_v5 }
0x44d5   :  { %v11423_v43 = vpack.c.bf16 %v11421_v27, %v11420_v56 }
0x44d7   :  { %15225 = vmatmul.mubr.msk.bf16.vlgmr.msra.gmra.mxu1 %vm2091_vm3, %v11423_v43 }
0x44d8   :  { %15235 = vmatpush3.bf16.xpose.msra.mxu1 %v11577_v47  ;;  %15236 = vmatprep.mubr.msk.bf16.mxu1 %vm17206_vm1, %v17205_v38 }
0x44d9   :  { %15246 = vmatprep.subr.bf16.mxu1 %v17205_v38 }
0x44df   :  { %15237 = vmatmul.mubr.msk.bf16.vlgmr.msra.gmra.mxu1 %vm1996_vm2, %v11570_v13 }
0x44e0   :  { %15248 = vmatprep.mubr.msk.bf16.mxu1 %vm17206_vm1, %v17205_v38 }
0x4581   :  { %v11464_v30 = vpop.f32.mrf.mxu0 }
0x4583   :  { %v15220_v62 = vpop.f32.mrf.mxu0 }
0x4585   :  { %v11467_v3 = vpop.f32.mrf.mxu0 }
0x4586   :  { %v15645_v53 = vpack.i.bf16 %v11467_v3, %v11464_v30 }
0x4587   :  { %v15221_v61 = vpop.f32.mrf.mxu0 }
0x4588   :  { %v16197_v61 = vld [vmem:[#allocation18 + $0xb0] sm:$0xff]  }
0x4589   :  { %v11562_v31 = vpop.f32.mrf.mxu0 }
0x458a   :  { %v11620_v15 = vsel %vm2091_vm3, %v11562_v31, -inf }
0x458b   :  { %11621 = vmax.xlane.f32.xlu0 %v11620_v15  ;;  %v15232_v18 = vpop.f32.mrf.mxu0  ;;  %v16199_v15 = vld [vmem:[#allocation18 + $0xa0] sm:$0xff]  }
0x458c   :  { %v16200_v18 = vld [vmem:[#allocation18 + $0x98] sm:$0xff]  }
0x458d   :  { %v11565_v16 = vpop.f32.mrf.mxu0 }
0x458e   :  { %v11623_v8 = vsel %vm2091_vm3, %v11565_v16, -inf }
0x458f   :  { %11624 = vmax.xlane.f32.xlu1 %v11623_v8  ;;  %v15233_v20 = vpop.f32.mrf.mxu0 }
0x4590   :  { %v16202_v20 = vld [vmem:[#allocation18 + $0x88] sm:$0xff]  }
0x4597   :  { %v11511_v46 = vpop.f32.mrf.mxu1 }
0x4599   :  { %v15226_v58 = vpop.f32.mrf.mxu1 }
0x459b   :  { %v11514_v28 = vpop.f32.mrf.mxu1 }
0x459c   :  { %v15650_v10 = vpack.i.bf16 %v11514_v28, %v11511_v46 }
0x459d   :  { %v15227_v49 = vpop.f32.mrf.mxu1 }
0x459e   :  { %v16203_v49 = vld [vmem:[#allocation18 + $0x80] sm:$0xff]  }
0x459f   :  { %v11613_v41 = vpop.f32.mrf.mxu1 }
0x45a0   :  { %v11626_v4 = vsel %vm2091_vm3, %v11613_v41, -inf }
0x45a1   :  { %v15238_v48 = vpop.f32.mrf.mxu1  ;;  %11627 = vmax.xlane.f32.xlu0 %v11626_v4 }
0x45a3   :  { %v11616_v33 = vpop.f32.mrf.mxu1 }
0x45a4   :  { %v11629_v35 = vsel %vm2091_vm3, %v11616_v33, -inf }
0x45a5   :  { %v15239_v1 = vpop.f32.mrf.mxu1  ;;  %11630 = vmax.xlane.f32.xlu0 %v11629_v35 }
0x4614   :  { %v11622_v14 = vpop.xlane.xlu0 %11621 }
0x4615   :  { %v11632_v5 = vsub.f32 %v11562_v31, %v11622_v14  ;;  %v16198_v31 = vld [vmem:[#allocation18 + $0xa8] sm:$0xff]  }
0x4617   :  { %v11636_v0 = vmul.f32 1.442695, %v11632_v5 }
0x4618   :  { %v11625_v32 = vpop.xlane.xlu1 %11624 }
0x4619   :  { %16644 = vpow2.f32 %v11636_v0  ;;  %v11633_v25 = vsub.f32 %v11565_v16, %v11625_v32  ;;  %v16201_v16 = vld [vmem:[#allocation18 + $0x90] sm:$0xff]  }
0x461b   :  { %v11638_v29 = vmul.f32 1.442695, %v11633_v25 }
0x461d   :  { %16646 = vpow2.f32 %v11638_v29 }
0x4626   :  { %v16645_v9 = vpop.eup %16644 }
0x4627   :  { %v11644_v50 = vsel %vm2091_vm3, %v16645_v9, 0.0 }
0x4628   :  { %11645 = vadd.xlane.f32.xlu0 %v11644_v50  ;;  %v16205_v50 = vld [vmem:[#allocation21 + $0xb0] sm:$0xff]  }
0x462a   :  { %v16647_v37 = vpop.eup %16646  ;;  %v11628_v59 = vpop.xlane.xlu0 %11627 }
0x462b   :  { %v11634_v19 = vsub.f32 %v11613_v41, %v11628_v59  ;;  %v11647_v34 = vsel %vm2091_vm3, %v16647_v37, 0.0 }
0x462c   :  { %11648 = vadd.xlane.f32.xlu1 %v11647_v34 }
0x462d   :  { %v11640_v36 = vmul.f32 1.442695, %v11634_v19 }
0x462e   :  { %v11631_v11 = vpop.xlane.xlu0 %11630 }
0x462f   :  { %16648 = vpow2.f32 %v11640_v36  ;;  %v11635_v55 = vsub.f32 %v11616_v33, %v11631_v11 }
0x4631   :  { %v11642_v57 = vmul.f32 1.442695, %v11635_v55 }
0x4633   :  { %16650 = vpow2.f32 %v11642_v57 }
0x463c   :  { %v16649_v17 = vpop.eup %16648 }
0x463d   :  { %v11650_v2 = vsel %vm2091_vm3, %v16649_v17, 0.0 }
0x463e   :  { %11651 = vadd.xlane.f32.xlu0 %v11650_v2 }
0x4640   :  { %v16651_v60 = vpop.eup %16650 }
0x4641   :  { %v11653_v56 = vsel %vm2091_vm3, %v16651_v60, 0.0 }
0x4642   :  { %11654 = vadd.xlane.f32.xlu1 %v11653_v56 }
0x4653   :  { %11713 = vrot.lane.b32.xlu1 %v18756_v63, %s17208_s4 }
0x4654   :  { %11666 = vrot.lane.b32.xlu0 %v18769_v39, %s17208_s4 }
0x4657   :  { %15636 = vrot.lane.b32.xlu1 %v15635_v12, %s17208_s4 }
0x4658   :  { %15646 = vrot.lane.b32.xlu0 %v15645_v53, %s17173_s0  ;;  %v16196_v53 = vld [vmem:[#allocation18 + $0xb8] sm:$0xff]  }
0x465b   :  { %15641 = vrot.lane.b32.xlu1 %v15640_v22, %s17208_s4 }
0x465f   :  { %15651 = vrot.lane.b32.xlu1 %v15650_v10, %s17173_s0  ;;  %s19172_s0 = sld [smem:[#allocation59_spill]] }
0x4665   :  { %v13460_v1 = vld [vmem:[%s19172_s0 + $0x1] ss:$0 sm:$0xff]  ;;  %v13294_v32 = vld [vmem:[%s19172_s0] ss:$0 sm:$0xff] }
0x4666   :  { %v18937_v14 = vadd.f32 %v13460_v1, %v18505_v21  ;;  %v18945_v25 = vadd.f32 %v13294_v32, %v17982_v52  ;;  %v16204_v21 = vld [vmem:[#allocation21 + $0xb8] sm:$0xff]  }
0x4668   :  { %v8299_v5 = vmax.f32 %v18937_v14, 0.0  ;;  %v4706_v29 = vmax.f32 %v18945_v25, 0.0 }
0x466a   :  { %v8304_v0 = vsel %vm4710_vm7, %v8299_v5, 0.0 }
0x46b1   :  { %v11646_v42 = vpop.xlane.xlu0 %11645 }
0x46b5   :  { %v11649_v27 = vpop.xlane.xlu1 %11648 }
0x46b6   :  { %16652 = vrcp.f32 %v11649_v27 }
0x46b7   :  { %16654 = vrcp.f32 %v11646_v42 }
0x46c3   :  { %v16653_v63 = vpop.eup %16652 }
0x46c4   :  { %v16655_v43 = vpop.eup %16654  ;;  %v11661_v47 = vmul.f32 %v16653_v63, %v16647_v37 }
0x46c5   :  { %v11660_v23 = vmul.f32 %v16655_v43, %v16645_v9  ;;  %v4711_v9 = vsel %vm4710_vm7, %v4706_v29, 0.0 }
0x46c7   :  { %v11652_v39 = vpop.xlane.xlu0 %11651  ;;  %v11664_v13 = vpack.c.bf16 %v11661_v47, %v11660_v23 }
0x46c8   :  { %16656 = vrcp.f32 %v11652_v39 }
0x46cb   :  { %v11667_v40 = vpop.permute.xlu0 %11666  ;;  %v11655_v12 = vpop.xlane.xlu1 %11654 }
0x46cc   :  { %16658 = vrcp.f32 %v11655_v12  ;;  %15241 = vmatpush3.bf16.msra.mxu0 %v11667_v40 }
0x46cd   :  { %15252 = vmatprep.subr.bf16.mxu0 %v16196_v53 }
0x46cf   :  { %15243 = vmatmul.mubr.msk.bf16.vlgmr.msra.gmra.mxu0 %vm2091_vm3, %v11664_v13  ;;  %v11714_v26 = vpop.permute.xlu1 %11713  ;;  %v15647_v52 = vpop.permute.xlu0 %15646 }
0x46d0   :  { %15247 = vmatpush3.bf16.msra.mxu1 %v11714_v26  ;;  %15253 = vmatpush3.bf16.msra.mxu0 %v16196_v53  ;;  %v15649_v11 = vunpack.i.h.bf16 %v15647_v52  ;;  %v15648_v55 = vunpack.i.l.bf16 %v15647_v52  ;;  %v16206_v53 = vld [vmem:[#allocation22 + $0xb8] sm:$0xff]  }
0x46d1   :  { %15272 = vmatprep.subr.bf16.mxu1 %v17205_v38  ;;  %15254 = vmatprep.subr.bf16.mxu0 %v16197_v61 }
0x46d3   :  { %v15637_v37 = vpop.permute.xlu1 %15636 }
0x46d4   :  { %15255 = vmatpush3.bf16.msra.mxu0 %v16197_v61  ;;  %v15639_v59 = vunpack.i.h.bf16 %v15637_v37  ;;  %v15638_v19 = vunpack.i.l.bf16 %v15637_v37 }
0x46d5   :  { %v16657_v45 = vpop.eup %16656  ;;  %15256 = vmatprep.subr.bf16.mxu0 %v16198_v31 }
0x46d6   :  { %v11662_v30 = vmul.f32 %v16657_v45, %v16649_v17  ;;  %v11809_v34 = vsel %vm1996_vm2, %v18811_v6, %v15639_v59  ;;  %v11808_v36 = vsel %vm1996_vm2, %v18809_v51, %v15638_v19 }
0x46d7   :  { %v11813_v56 = vsel %vm3010_vm4, %v11809_v34, %v15649_v11  ;;  %v15642_v63 = vpop.permute.xlu1 %15641 }
0x46d8   :  { %15257 = vmatpush3.bf16.msra.mxu0 %v16198_v31  ;;  %v15644_v43 = vunpack.i.h.bf16 %v15642_v63  ;;  %v15643_v47 = vunpack.i.l.bf16 %v15642_v63  ;;  %v16209_v31 = vld [vmem:[#allocation21 + $0xa0] sm:$0xff]  }
0x46d9   :  { %v16659_v22 = vpop.eup %16658  ;;  %15258 = vmatprep.subr.bf16.mxu0 %v16199_v15 }
0x46da   :  { %v11663_v62 = vmul.f32 %v16659_v22, %v16651_v60  ;;  %v11812_v60 = vsel %vm3010_vm4, %v11808_v36, %v15648_v55  ;;  %v11811_v12 = vsel %vm1996_vm2, %v18817_v24, %v15644_v43  ;;  %v11810_v13 = vsel %vm1996_vm2, %v18815_v7, %v15643_v47  ;;  %v16207_v7 = vld [vmem:[#allocation21 + $0xa8] sm:$0xff]   ;;  %v16208_v24 = vld [vmem:[#allocation22 + $0xb0] sm:$0xff]  }
0x46db   :  { %v15652_v6 = vpop.permute.xlu1 %15651 }
0x46dc   :  { %v11665_v3 = vpack.c.bf16 %v11663_v62, %v11662_v30  ;;  %15259 = vmatpush3.bf16.msra.mxu0 %v16199_v15  ;;  %v15654_v51 = vunpack.i.h.bf16 %v15652_v6  ;;  %v15653_v23 = vunpack.i.l.bf16 %v15652_v6  ;;  %v16210_v15 = vld [vmem:[#allocation22 + $0xa8] sm:$0xff]  }
0x46dd   :  { %15260 = vmatprep.subr.bf16.mxu0 %v16200_v18 }
0x46de   :  { %15249 = vmatmul.mubr.msk.bf16.vlgmr.msra.gmra.mxu1 %vm2091_vm3, %v11665_v3  ;;  %v11814_v22 = vsel %vm3010_vm4, %v11810_v13, %v15653_v23  ;;  %v11815_v30 = vsel %vm3010_vm4, %v11811_v12, %v15654_v51 }
0x46df   :  { %15288 = vmatprep.mubr.msk.bf16.mxu1 %vm17206_vm1, %v17205_v38  ;;  %15273 = vmatpush3.bf16.msra.mxu1 %v16204_v21 }
0x46e0   :  { %15261 = vmatpush3.bf16.msra.mxu0 %v16200_v18  ;;  %15274 = vmatprep.subr.bf16.mxu1 %v17205_v38  ;;  %v16211_v18 = vld [vmem:[#allocation21 + $0x98] sm:$0xff]  }
0x46e1   :  { %15262 = vmatprep.subr.bf16.mxu0 %v16201_v16 }
0x46e3   :  { %15275 = vmatpush3.bf16.msra.mxu1 %v16205_v50 }
0x46e4   :  { %15263 = vmatpush3.bf16.msra.mxu0 %v16201_v16  ;;  %15276 = vmatprep.subr.bf16.mxu1 %v17205_v38  ;;  %v16212_v16 = vld [vmem:[#allocation22 + $0xa0] sm:$0xff]  }
0x46e5   :  { %15264 = vmatprep.subr.bf16.mxu0 %v16202_v20 }
0x46e7   :  { %15277 = vmatpush3.bf16.msra.mxu1 %v16207_v7 }
0x46e8   :  { %15265 = vmatpush3.bf16.msra.mxu0 %v16202_v20  ;;  %15278 = vmatprep.subr.bf16.mxu1 %v17205_v38  ;;  %v16214_v20 = vld [vmem:[#allocation22 + $0x98] sm:$0xff]  }
0x46e9   :  { %15266 = vmatprep.subr.bf16.mxu0 %v16203_v49 }
0x46eb   :  { %15279 = vmatpush3.bf16.msra.mxu1 %v16209_v31 }
0x46ec   :  { %15267 = vmatpush3.bf16.msra.mxu0 %v16203_v49  ;;  %15280 = vmatprep.subr.bf16.mxu1 %v17205_v38  ;;  %v16219_v49 = vld [vmem:[#allocation22 + $0x80] sm:$0xff]  }
0x46ed   :  { %15292 = vmatprep.subr.bf16.mxu0 %v17205_v38 }
0x46ef   :  { %15281 = vmatpush3.bf16.msra.mxu1 %v16211_v18 }
0x46f0   :  { %15282 = vmatprep.subr.bf16.mxu1 %v17205_v38 }
0x478f   :  { %v11706_v8 = vpop.f32.mrf.mxu0 }
0x4791   :  { %v15244_v46 = vpop.f32.mrf.mxu0 }
0x4792   :  { %v16215_v46 = vld [vmem:[#allocation21 + $0x88] sm:$0xff]  }
0x4793   :  { %v11709_v58 = vpop.f32.mrf.mxu0 }
0x4794   :  { %v15655_v28 = vpack.i.bf16 %v11709_v58, %v11706_v8  ;;  %v16213_v8 = vld [vmem:[#allocation21 + $0x90] sm:$0xff]  }
0x4795   :  { %v15245_v10 = vpop.f32.mrf.mxu0  ;;  %15283 = vmatpush3.bf16.msra.mxu1 %v16213_v8  ;;  %v16216_v58 = vld [vmem:[#allocation22 + $0x90] sm:$0xff]  }
0x4796   :  { %15656 = vrot.lane.b32.xlu0 %v15655_v28, %s17207_s6  ;;  %15284 = vmatprep.subr.bf16.mxu1 %v17205_v38  ;;  %v16217_v28 = vld [vmem:[#allocation21 + $0x80] sm:$0xff]   ;;  %v16218_v10 = vld [vmem:[#allocation22 + $0x88] sm:$0xff]  }
0x4799   :  { %15285 = vmatpush3.bf16.msra.mxu1 %v16215_v46  ;;  %v13646_v46 = vld [vmem:[%s19172_s0 + $0x2] ss:$0 sm:$0xff] }
0x479a   :  { %15286 = vmatprep.subr.bf16.mxu1 %v17205_v38 }
0x479d   :  { %15287 = vmatpush3.bf16.msra.mxu1 %v16217_v28 }
0x479e   :  { %v11753_v41 = vpop.f32.mrf.mxu1 }
0x47a0   :  { %v15250_v4 = vpop.f32.mrf.mxu1 }
0x47a2   :  { %v11756_v48 = vpop.f32.mrf.mxu1 }
0x47a3   :  { %v15660_v33 = vpack.i.bf16 %v11756_v48, %v11753_v41  ;;  %v13636_v41 = vld [vmem:[#allocation19 + $0x2] ss:$0 sm:$0xff] }
0x47a4   :  { %v15251_v35 = vpop.f32.mrf.mxu1 }
0x47a5   :  { %15661 = vrot.lane.b32.xlu1 %v15660_v33, %s17207_s6 }
0x47b5   :  { %8305 = vadd.xlane.f32.xlu0 %v8304_v0 }
0x47c9   :  { %4712 = vadd.xlane.f32.xlu1 %v4711_v9 }
0x4808   :  { %v15657_v57 = vpop.permute.xlu0 %15656 }
0x4809   :  { %v15659_v17 = vunpack.i.h.bf16 %v15657_v57  ;;  %v15658_v2 = vunpack.i.l.bf16 %v15657_v57 }
0x480b   :  { %v11816_v27 = vsel %vm3015_vm5, %v11812_v60, %v15658_v2  ;;  %v11817_v42 = vsel %vm3015_vm5, %v11813_v56, %v15659_v17 }
0x480c   :  { %v11820_v39 = vpack.c.bf16 %v11817_v42, %v11816_v27 }
0x480e   :  { %15268 = vmatprep.mubr.bf16.mxu0 %v11820_v39 }
0x4817   :  { %v15662_v40 = vpop.permute.xlu1 %15661 }
0x4818   :  { %v15664_v26 = vunpack.i.h.bf16 %v15662_v40  ;;  %v15663_v45 = vunpack.i.l.bf16 %v15662_v40 }
0x481a   :  { %v11818_v62 = vsel %vm3015_vm5, %v11814_v22, %v15663_v45  ;;  %v11819_v3 = vsel %vm3015_vm5, %v11815_v30, %v15664_v26 }
0x481b   :  { %v11821_v61 = vpack.c.bf16 %v11819_v3, %v11818_v62 }
0x481d   :  { %15269 = vmatmul.mubr.bf16.vlgmr.msra.gmra.mxu0 %v11821_v61 }
0x481e   :  { %15293 = vmatpush3.bf16.msra.mxu0 %v16206_v53  ;;  %15308 = vmatprep.mubr.msk.bf16.mxu0 %vm17206_vm1, %v17205_v38 }
0x481f   :  { %15294 = vmatprep.subr.bf16.mxu0 %v17205_v38 }
0x4822   :  { %15295 = vmatpush3.bf16.msra.mxu0 %v16208_v24 }
0x4823   :  { %15296 = vmatprep.subr.bf16.mxu0 %v17205_v38 }
0x4826   :  { %15297 = vmatpush3.bf16.msra.mxu0 %v16210_v15 }
0x4827   :  { %15298 = vmatprep.subr.bf16.mxu0 %v17205_v38 }
0x482a   :  { %15299 = vmatpush3.bf16.msra.mxu0 %v16212_v16 }
0x482b   :  { %15300 = vmatprep.subr.bf16.mxu0 %v17205_v38 }
0x482e   :  { %15301 = vmatpush3.bf16.msra.mxu0 %v16214_v20 }
0x482f   :  { %15302 = vmatprep.subr.bf16.mxu0 %v17205_v38 }
0x4832   :  { %15303 = vmatpush3.bf16.msra.mxu0 %v16216_v58 }
0x4833   :  { %15304 = vmatprep.subr.bf16.mxu0 %v17205_v38 }
0x4836   :  { %15305 = vmatpush3.bf16.msra.mxu0 %v16218_v10 }
0x4837   :  { %15306 = vmatprep.subr.bf16.mxu0 %v17205_v38 }
0x483a   :  { %15307 = vmatpush3.bf16.msra.mxu0 %v16219_v49 }
0x483b   :  { %15312 = vmatprep.subr.bf16.mxu0 %v17205_v38 }
0x483e   :  { %v8306_v16 = vpop.xlane.xlu0 %8305 }
0x483f   :  { %v8307_v8 = vmul.f32 0.0078125, %v8306_v16 }
0x4841   :  { %v18991_v28 = vsub.f32 %v8299_v5, %v8307_v8  ;;  %v13306_v5 = vld [vmem:[%s19173_s25] ss:$0 sm:$0xff] }
0x4843   :  { %v8309_v14 = vmul.f32 %v18991_v28, %v18991_v28 }
0x4852   :  { %v4713_v20 = vpop.xlane.xlu1 %4712 }
0x4853   :  { %v4715_v10 = vmul.f32 0.0078125, %v4713_v20 }
0x48dd   :  { %v15270_v4 = vpop.f32.mrf.mxu0 }
0x48de   :  { %v11919_v48 = vadd.f32 %v15270_v4, %v13636_v41 }
0x48df   :  { %v11910_v33 = vpop.f32.mrf.mxu0 }
0x48e0   :  { %v11931_v35 = vrot.slane %v11919_v48, 4  ;;  %v11911_v1 = vadd.f32 %v13636_v41, %v11910_v33 }
0x48e1   :  { %v15271_v0 = vpop.f32.mrf.mxu0 }
0x48e2   :  { %v11932_v32 = vadd.f32 %v11931_v35, %v11919_v48  ;;  %v11925_v9 = vrot.slane %v11911_v1, 4  ;;  %v11922_v21 = vadd.f32 %v15271_v0, %v13636_v41  ;;  %v18998_v35 = vsub.f32 %v4706_v29, %v4715_v10  ;;  %v13660_v29 = vld [vmem:[%s19173_s25 + $0x2] ss:$0 sm:$0xff] }
0x48e3   :  { %v11913_v50 = vpop.f32.mrf.mxu0 }
0x48e4   :  { %v11933_v37 = vrot.slane %v11932_v32, 2  ;;  %v11926_v59 = vadd.f32 %v11925_v9, %v11911_v1  ;;  %v11945_v19 = vrot.slane %v11922_v21, 4  ;;  %v11914_v52 = vadd.f32 %v13636_v41, %v11913_v50 }
0x48e5   :  { %v8310_v50 = vsel %vm4710_vm7, %v8309_v14, 0.0  ;;  %v4717_v25 = vmul.f32 %v18998_v35, %v18998_v35 }
0x48e6   :  { %v11934_v34 = vadd.f32 %v11933_v37, %v11932_v32  ;;  %v11927_v36 = vrot.slane %v11926_v59, 2  ;;  %v11946_v11 = vadd.f32 %v11945_v19, %v11922_v21  ;;  %v11939_v55 = vrot.slane %v11914_v52, 4 }
0x48e7   :  { %v19007_v21 = vadd.f32 %v13306_v5, %v17984_v54 }
0x48e8   :  { %v11935_v57 = vrot.slane %v11934_v34, 1  ;;  %v11928_v17 = vadd.f32 %v11927_v36, %v11926_v59  ;;  %v11947_v2 = vrot.slane %v11946_v11, 2  ;;  %v11940_v60 = vadd.f32 %v11939_v55, %v11914_v52  ;;  %v16220_v36 = vld [vmem:[#allocation25 + $0x78] sm:$0xff]  }
0x48e9   :  { %v4859_v59 = vmax.f32 %v19007_v21, 0.0  ;;  %v4718_v52 = vsel %vm4710_vm7, %v4717_v25, 0.0  ;;  %14309 = vmatprep.subr.bf16.mxu1 %v16220_v36 }
0x48ea   :  { %v11936_v56 = vadd.f32 %v11935_v57, %v11934_v34  ;;  %v11929_v27 = vrot.slane %v11928_v17, 1  ;;  %v11948_v42 = vadd.f32 %v11947_v2, %v11946_v11  ;;  %v11941_v63 = vrot.slane %v11940_v60, 2  ;;  %v16221_v11 = vld [vmem:[#allocation25 + $0x38] sm:$0xff]   ;;  %v16222_v57 = vld [vmem:[#allocation25 + $0x70] sm:$0xff]   ;;  %v16224_v2 = vld [vmem:[#allocation25 + $0x68] sm:$0xff]  }
0x48eb   :  { %v4863_v54 = vsel %vm4710_vm7, %v4859_v59, 0.0 }
0x48ec   :  { %v11938_v39 = vmul.f32 0.125, %v11936_v56  ;;  %v11930_v6 = vadd.f32 %v11929_v27, %v11928_v17  ;;  %v11949_v43 = vrot.slane %v11948_v42, 1  ;;  %v11942_v47 = vadd.f32 %v11941_v63, %v11940_v60  ;;  %v16223_v17 = vld [vmem:[#allocation25 + $0x30] sm:$0xff]   ;;  %v16225_v60 = vld [vmem:[#allocation25 + $0x28] sm:$0xff]   ;;  %v16226_v56 = vld [vmem:[#allocation25 + $0x60] sm:$0xff]  }
0x48ed   :  { %v16227_v27 = vld [vmem:[#allocation25 + $0x20] sm:$0xff]   ;;  %v16229_v63 = vld [vmem:[#allocation25 + $0x18] sm:$0xff]  }
0x48ee   :  { %v11973_v51 = vpack.c.bf16 %v11938_v39, %v11938_v39  ;;  %v11937_v23 = vmul.f32 0.125, %v11930_v6  ;;  %v11950_v40 = vadd.f32 %v11949_v43, %v11948_v42  ;;  %v11943_v12 = vrot.slane %v11942_v47, 1  ;;  %v16228_v42 = vld [vmem:[#allocation25 + $0x58] sm:$0xff]   ;;  %v16230_v39 = vld [vmem:[#allocation25 + $0x50] sm:$0xff]   ;;  %v16232_v43 = vld [vmem:[#allocation25 + $0x48] sm:$0xff]  }
0x48ef   :  { %v16231_v6 = vld [vmem:[#allocation25 + $0x10] sm:$0xff]  }
0x48f0   :  { %v11972_v13 = vpack.c.bf16 %v11937_v23, %v11937_v23  ;;  %v11952_v26 = vmul.f32 0.125, %v11950_v40  ;;  %v11944_v45 = vadd.f32 %v11943_v12, %v11942_v47  ;;  %v11983_v22 = vunpack.c.l.b16 %v11973_v51  ;;  %v16233_v47 = vld [vmem:[#allocation25 + $0x8] sm:$0xff]   ;;  %v16234_v51 = vld [vmem:[#allocation25 + $0x40] sm:$0xff]   ;;  %v16236_v40 = vld [vmem:[#allocation25 + $0xb8] sm:$0xff]  }
0x48f1   :  { %v16235_v23 = vld [vmem:[#allocation25] sm:$0xff]   ;;  %v16237_v12 = vld [vmem:[#allocation25 + $0xb0] sm:$0xff]  }
0x48f2   :  { %v11982_v30 = vunpack.c.l.b16 %v11972_v13  ;;  %v12127_v62 = vpack.c.bf16 %v11952_v26, %v11952_v26  ;;  %v11951_v3 = vmul.f32 0.125, %v11944_v45  ;;  %v13474_v13 = vld [vmem:[%s19173_s25 + $0x1] ss:$0 sm:$0xff] }
0x48f4   :  { %v12126_v53 = vpack.c.bf16 %v11951_v3, %v11951_v3  ;;  %v11984_v61 = vsel %vm4614_vm6, %v11983_v22, %v11982_v30  ;;  %v12137_v24 = vunpack.c.l.b16 %v12127_v62  ;;  %v19029_v22 = vadd.f32 %v13474_v13, %v18507_v44  ;;  %v16245_v13 = vld [vmem:[#allocation27 + $0x30] sm:$0xff]  }
0x48f5   :  { %v11985_v7 = vpack.c.b16 %v11984_v61, %v11984_v61 }
0x48f6   :  { %v12136_v31 = vunpack.c.l.b16 %v12126_v53  ;;  %v8453_v61 = vmax.f32 %v19029_v22, 0.0  ;;  %v16248_v22 = vld [vmem:[#allocation27 + $0x18] sm:$0xff]  }
0x48f7   :  { %15289 = vmatmul.mubr.bf16.vlgmr.msra.gmra.mxu1 %v11985_v7 }
0x48f8   :  { %v12138_v15 = vsel %vm4614_vm6, %v12137_v24, %v12136_v31  ;;  %14310 = vmatpush3.bf16.msra.mxu1 %v16221_v11  ;;  %v16243_v11 = vld [vmem:[#allocation25 + $0x80] sm:$0xff]  }
0x48f9   :  { %v12139_v18 = vpack.c.b16 %v12138_v15, %v12138_v15  ;;  %14311 = vmatprep.subr.bf16.mxu1 %v16222_v57 }
0x48fb   :  { %15309 = vmatmul.mubr.bf16.vlgmr.msra.gmra.mxu0 %v12139_v18  ;;  %v8458_v18 = vsel %vm4710_vm7, %v8453_v61, 0.0 }
0x48fc   :  { %15328 = vmatprep.mubr.msk.bf16.mxu0 %vm17206_vm1, %v17205_v38  ;;  %14312 = vmatpush3.bf16.msra.mxu1 %v16223_v17 }
0x48fd   :  { %14313 = vmatprep.subr.bf16.mxu1 %v16224_v2  ;;  %15313 = vmatpush3.bf16.msra.mxu0 %v16236_v40 }
0x48fe   :  { %15314 = vmatprep.subr.bf16.mxu0 %v17205_v38 }
0x4900   :  { %14314 = vmatpush3.bf16.msra.mxu1 %v16225_v60 }
0x4901   :  { %14315 = vmatprep.subr.bf16.mxu1 %v16226_v56  ;;  %15315 = vmatpush3.bf16.msra.mxu0 %v16237_v12  ;;  %v16244_v12 = vld [vmem:[#allocation27 + $0x38] sm:$0xff]  }
0x4902   :  { %15316 = vmatprep.subr.bf16.mxu0 %v17205_v38 }
0x4904   :  { %14316 = vmatpush3.bf16.msra.mxu1 %v16227_v27 }
0x4905   :  { %14317 = vmatprep.subr.bf16.mxu1 %v16228_v42 }
0x4908   :  { %14318 = vmatpush3.bf16.msra.mxu1 %v16229_v63 }
0x4909   :  { %14319 = vmatprep.subr.bf16.mxu1 %v16230_v39  ;;  %v13657_v39 = vld [vmem:[%s19174_s21 + $0x4] ss:$0 sm:$0xff] }
0x490c   :  { %14320 = vmatpush3.bf16.msra.mxu1 %v16231_v6 }
0x490d   :  { %14321 = vmatprep.subr.bf16.mxu1 %v16232_v43  ;;  %v13658_v43 = vld [vmem:[%s19174_s21 + $0x5] ss:$0 sm:$0xff] }
0x4910   :  { %14322 = vmatpush3.bf16.msra.mxu1 %v16233_v47 }
0x4911   :  { %14323 = vmatprep.subr.bf16.mxu1 %v16234_v51 }
0x4914   :  { %14324 = vmatpush3.bf16.msra.mxu1 %v16235_v23 }
0x4915   :  { %15332 = vmatprep.subr.bf16.mxu1 %v17205_v38 }
0x49b7   :  { %v12069_v58 = vpop.f32.mrf.mxu1 }
0x49b8   :  { %v18993_v49 = vadd.f32 %v13646_v46, %v12069_v58 }
0x49b9   :  { %v15290_v41 = vpop.f32.mrf.mxu1 }
0x49ba   :  { %v12075_v4 = vmax.f32 %v18993_v49, 0.0 }
0x49bb   :  { %v12072_v48 = vpop.f32.mrf.mxu1  ;;  %v12223_v33 = vpop.f32.mrf.mxu0 }
0x49bc   :  { %v12080_v1 = vsel %vm4710_vm7, %v12075_v4, 0.0  ;;  %v19014_v19 = vadd.f32 %v13660_v29, %v12223_v33 }
0x49bd   :  { %v15310_v0 = vpop.f32.mrf.mxu0  ;;  %12081 = vadd.xlane.f32.xlu0 %v12080_v1  ;;  %v15291_v32 = vpop.f32.mrf.mxu1  ;;  %v13471_v1 = vld [vmem:[%s19174_s21 + $0x2] ss:$0 sm:$0xff] }
0x49be   :  { %v12229_v34 = vmax.f32 %v19014_v19, 0.0  ;;  %v13472_v0 = vld [vmem:[%s19174_s21 + $0x3] ss:$0 sm:$0xff] }
0x49bf   :  { %v12226_v9 = vpop.f32.mrf.mxu0  ;;  %v16239_v32 = vld [vmem:[#allocation25 + $0xa0] sm:$0xff]  }
0x49c0   :  { %v12234_v55 = vsel %vm4710_vm7, %v12229_v34, 0.0 }
0x49c1   :  { %v15311_v37 = vpop.f32.mrf.mxu0  ;;  %8311 = vadd.xlane.f32.xlu0 %v8310_v50  ;;  %v13304_v50 = vld [vmem:[%s19174_s21] ss:$0 sm:$0xff] }
0x49c2   :  { %v13305_v37 = vld [vmem:[%s19174_s21 + $0x1] ss:$0 sm:$0xff] }
0x49c5   :  { %4719 = vadd.xlane.f32.xlu0 %v4718_v52 }
0x49c9   :  { %4864 = vadd.xlane.f32.xlu0 %v4863_v54 }
0x49cd   :  { %12235 = vadd.xlane.f32.xlu0 %v12234_v55 }
0x4a46   :  { %v12082_v26 = vpop.xlane.xlu0 %12081 }
0x4a47   :  { %v12083_v45 = vmul.f32 0.0078125, %v12082_v26  ;;  %v16246_v26 = vld [vmem:[#allocation27 + $0x28] sm:$0xff]  }
0x4a49   :  { %v19033_v30 = vsub.f32 %v12075_v4, %v12083_v45  ;;  %v16238_v4 = vld [vmem:[#allocation25 + $0xa8] sm:$0xff]   ;;  %v16247_v45 = vld [vmem:[#allocation27 + $0x20] sm:$0xff]  }
0x4a4a   :  { %v8312_v62 = vpop.xlane.xlu0 %8311  ;;  %15317 = vmatpush3.bf16.msra.mxu0 %v16238_v4 }
0x4a4b   :  { %v8313_v3 = vmul.f32 0.0078125, %v8312_v62  ;;  %v12085_v53 = vmul.f32 %v19033_v30, %v19033_v30  ;;  %15318 = vmatprep.subr.bf16.mxu0 %v17205_v38  ;;  %v16250_v62 = vld [vmem:[#allocation27 + $0x8] sm:$0xff]  }
0x4a4d   :  { %v8314_v7 = vadd.f32 1e-05, %v8313_v3  ;;  %v12086_v24 = vsel %vm4710_vm7, %v12085_v53, 0.0 }
0x4a4e   :  { %12087 = vadd.xlane.f32.xlu1 %v12086_v24  ;;  %v4720_v31 = vpop.xlane.xlu0 %4719  ;;  %15319 = vmatpush3.bf16.msra.mxu0 %v16239_v32 }
0x4a4f   :  { %16660 = vrsqrt.f32 %v8314_v7  ;;  %v4721_v15 = vmul.f32 0.0078125, %v4720_v31  ;;  %15320 = vmatprep.subr.bf16.mxu0 %v17205_v38  ;;  %v16251_v31 = vld [vmem:[#allocation27] sm:$0xff]  }
0x4a51   :  { %v4722_v44 = vadd.f32 1e-05, %v4721_v15  ;;  %v16260_v15 = vld [vmem:[#allocation30 + $0x38] sm:$0xff]  }
0x4a52   :  { %8459 = vadd.xlane.f32.xlu1 %v8458_v18  ;;  %v4865_v16 = vpop.xlane.xlu0 %4864  ;;  %v16262_v18 = vld [vmem:[#allocation30 + $0x28] sm:$0xff]  }
0x4a53   :  { %16662 = vrsqrt.f32 %v4722_v44  ;;  %v4866_v8 = vmul.f32 0.0078125, %v4865_v16  ;;  %v16261_v44 = vld [vmem:[#allocation30 + $0x30] sm:$0xff]   ;;  %v16263_v16 = vld [vmem:[#allocation30 + $0x20] sm:$0xff]  }
0x4a55   :  { %v19044_v20 = vsub.f32 %v4859_v59, %v4866_v8  ;;  %v16240_v59 = vld [vmem:[#allocation25 + $0x98] sm:$0xff]  }
0x4a56   :  { %v12236_v46 = vpop.xlane.xlu0 %12235  ;;  %15321 = vmatpush3.bf16.msra.mxu0 %v16240_v59  ;;  %v16264_v8 = vld [vmem:[#allocation30 + $0x18] sm:$0xff]  }
0x4a57   :  { %v12237_v58 = vmul.f32 0.0078125, %v12236_v46  ;;  %v4868_v10 = vmul.f32 %v19044_v20, %v19044_v20  ;;  %15322 = vmatprep.subr.bf16.mxu0 %v17205_v38  ;;  %v16265_v46 = vld [vmem:[#allocation30 + $0x10] sm:$0xff]  }
0x4a59   :  { %v19050_v49 = vsub.f32 %v12229_v34, %v12237_v58  ;;  %v4869_v41 = vsel %vm4710_vm7, %v4868_v10, 0.0  ;;  %v16241_v34 = vld [vmem:[#allocation25 + $0x90] sm:$0xff]  }
0x4a5a   :  { %4870 = vadd.xlane.f32.xlu1 %v4869_v41  ;;  %15323 = vmatpush3.bf16.msra.mxu0 %v16241_v34  ;;  %v16266_v58 = vld [vmem:[#allocation30 + $0x8] sm:$0xff]  }
0x4a5b   :  { %v12239_v48 = vmul.f32 %v19050_v49, %v19050_v49  ;;  %15324 = vmatprep.subr.bf16.mxu0 %v17205_v38 }
0x4a5c   :  { %v16661_v33 = vpop.eup %16660 }
0x4a5d   :  { %v12240_v14 = vsel %vm4710_vm7, %v12239_v48, 0.0  ;;  %v8316_v5 = vmul.f32 %v16661_v33, %v18991_v28 }
0x4a5e   :  { %12241 = vadd.xlane.f32.xlu1 %v12240_v14 }
0x4a5f   :  { %v8323_v9 = vmul.f32 %v13471_v1, %v8316_v5 }
0x4a60   :  { %v16663_v21 = vpop.eup %16662 }
0x4a61   :  { %v4724_v25 = vmul.f32 %v16663_v21, %v18998_v35  ;;  %v8330_v29 = vadd.f32 %v13472_v0, %v8323_v9  ;;  %v16242_v35 = vld [vmem:[#allocation25 + $0x88] sm:$0xff]   ;;  %v13671_v0 = vld [vmem:[%s19175_s22] ss:$0 sm:$0xff] }
0x4a62   :  { %15325 = vmatpush3.bf16.msra.mxu0 %v16242_v35  ;;  %v13483_v35 = vld [vmem:[#allocation24 + $0x2] ss:$0 sm:$0xff] }
0x4a63   :  { %v4731_v19 = vmul.f32 %v13304_v50, %v4724_v25  ;;  %v12311_v52 = vpack.c.bf16 %v8330_v29, %v8330_v29  ;;  %15326 = vmatprep.subr.bf16.mxu0 %v17205_v38 }
0x4a65   :  { %v4738_v28 = vadd.f32 %v13305_v37, %v4731_v19  ;;  %12495 = vmatprep.mubr.bf16.mxu1 %v12311_v52  ;;  %v16253_v52 = vld [vmem:[#allocation33 + $0x30] sm:$0xff]  }
0x4a66   :  { %15327 = vmatpush3.bf16.msra.mxu0 %v16243_v11 }
0x4a67   :  { %v12768_v54 = vadd.f32 %v8330_v29, %v4738_v28  ;;  %v12310_v36 = vpack.c.bf16 %v4738_v28, %v4738_v28  ;;  %15352 = vmatprep.subr.bf16.mxu0 %v17205_v38  ;;  %v16252_v29 = vld [vmem:[#allocation33 + $0x38] sm:$0xff]  }
0x4a69   :  { %12496 = vmatmul.mubr.bf16.vlgmr.msra.gmra.mxu1 %v12310_v36 }
0x4a6a   :  { %15348 = vmatprep.mubr.msk.bf16.mxu1 %vm17206_vm1, %v17205_v38  ;;  %15333 = vmatpush3.bf16.msra.mxu1 %v16244_v12 }
0x4a6b   :  { %15334 = vmatprep.subr.bf16.mxu1 %v17205_v38 }
0x4a6e   :  { %15335 = vmatpush3.bf16.msra.mxu1 %v16245_v13  ;;  %v16258_v13 = vld [vmem:[#allocation33 + $0x8] sm:$0xff]  }
0x4a6f   :  { %15336 = vmatprep.subr.bf16.mxu1 %v17205_v38 }
0x4a72   :  { %15337 = vmatpush3.bf16.msra.mxu1 %v16246_v26 }
0x4a73   :  { %15338 = vmatprep.subr.bf16.mxu1 %v17205_v38 }
0x4a76   :  { %15339 = vmatpush3.bf16.msra.mxu1 %v16247_v45  ;;  %v16259_v45 = vld [vmem:[#allocation33] sm:$0xff]  }
0x4a77   :  { %15340 = vmatprep.subr.bf16.mxu1 %v17205_v38 }
0x4a7a   :  { %15341 = vmatpush3.bf16.msra.mxu1 %v16248_v22 }
0x4a7b   :  { %15342 = vmatprep.subr.bf16.mxu1 %v17205_v38 }
0x4ad7   :  { %v12088_v55 = vpop.xlane.xlu1 %12087 }
0x4ad8   :  { %v12089_v57 = vmul.f32 0.0078125, %v12088_v55 }
0x4ada   :  { %v12090_v17 = vadd.f32 1e-05, %v12089_v57  ;;  %v13315_v57 = vld [vmem:[#allocation24] ss:$0 sm:$0xff] }
0x4adb   :  { %v8460_v2 = vpop.xlane.xlu1 %8459 }
0x4adc   :  { %16664 = vrsqrt.f32 %v12090_v17  ;;  %v8461_v60 = vmul.f32 0.0078125, %v8460_v2  ;;  %v16255_v17 = vld [vmem:[#allocation33 + $0x20] sm:$0xff]  }
0x4ade   :  { %v19072_v56 = vsub.f32 %v8453_v61, %v8461_v60  ;;  %v13484_v60 = vld [vmem:[#allocation24 + $0x3] ss:$0 sm:$0xff] }
0x4ae0   :  { %v8463_v27 = vmul.f32 %v19072_v56, %v19072_v56 }
0x4ae2   :  { %v8464_v42 = vsel %vm4710_vm7, %v8463_v27, 0.0 }
0x4ae3   :  { %8465 = vadd.xlane.f32.xlu0 %v8464_v42  ;;  %v4871_v10 = vpop.xlane.xlu1 %4870 }
0x4ae4   :  { %v4872_v48 = vmul.f32 0.0078125, %v4871_v10  ;;  %v16274_v10 = vld [vmem:[#allocation34 + $0x8] sm:$0xff]  }
0x4ae6   :  { %v4873_v14 = vadd.f32 1e-05, %v4872_v48  ;;  %v16275_v48 = vld [vmem:[#allocation34] sm:$0xff]  }
0x4ae7   :  { %v12242_v33 = vpop.xlane.xlu1 %12241 }
0x4ae8   :  { %v12243_v5 = vmul.f32 0.0078125, %v12242_v33 }
0x4ae9   :  { %v16665_v63 = vpop.eup %16664 }
0x4aea   :  { %v12092_v6 = vmul.f32 %v16665_v63, %v19033_v30  ;;  %v16249_v30 = vld [vmem:[#allocation27 + $0x10] sm:$0xff]   ;;  %v12244_v32 = vadd.f32 1e-05, %v12243_v5  ;;  %v13669_v63 = vld [vmem:[#allocation24 + $0x4] ss:$0 sm:$0xff] }
0x4aeb   :  { %15343 = vmatpush3.bf16.msra.mxu1 %v16249_v30 }
0x4aec   :  { %v12099_v47 = vmul.f32 %v13657_v39, %v12092_v6  ;;  %15344 = vmatprep.subr.bf16.mxu1 %v17205_v38  ;;  %v16256_v39 = vld [vmem:[#allocation33 + $0x18] sm:$0xff]  }
0x4aee   :  { %v12106_v51 = vadd.f32 %v13658_v43, %v12099_v47  ;;  %v16257_v47 = vld [vmem:[#allocation33 + $0x10] sm:$0xff]  }
0x4aef   :  { %15345 = vmatpush3.bf16.msra.mxu1 %v16250_v62  ;;  %v16267_v62 = vld [vmem:[#allocation30] sm:$0xff]  }
0x4af0   :  { %v12312_v23 = vpack.c.bf16 %v12106_v51, %v12106_v51  ;;  %v19080_v40 = vadd.f32 %v12768_v54, %v12106_v51  ;;  %15346 = vmatprep.subr.bf16.mxu1 %v17205_v38  ;;  %v16254_v54 = vld [vmem:[#allocation33 + $0x28] sm:$0xff]   ;;  %v13670_v51 = vld [vmem:[#allocation24 + $0x5] ss:$0 sm:$0xff] }
0x4af2   :  { %15329 = vmatmul.mubr.bf16.vlgmr.msra.gmra.mxu0 %v12312_v23  ;;  %v12770_v26 = vmul.f32 0.33333334, %v19080_v40 }
0x4af3   :  { %15368 = vmatprep.mubr.msk.bf16.mxu0 %vm17206_vm1, %v17205_v38  ;;  %15347 = vmatpush3.bf16.msra.mxu1 %v16251_v31 }
0x4af4   :  { %15372 = vmatprep.subr.bf16.mxu1 %v17205_v38  ;;  %15353 = vmatpush3.bf16.msra.mxu0 %v16260_v15  ;;  %v16268_v15 = vld [vmem:[#allocation34 + $0x38] sm:$0xff]  }
0x4af5   :  { %15354 = vmatprep.subr.bf16.mxu0 %v17205_v38 }
0x4af8   :  { %15355 = vmatpush3.bf16.msra.mxu0 %v16261_v44 }
0x4af9   :  { %15356 = vmatprep.subr.bf16.mxu0 %v17205_v38 }
0x4afc   :  { %15357 = vmatpush3.bf16.msra.mxu0 %v16262_v18  ;;  %v16269_v18 = vld [vmem:[#allocation34 + $0x30] sm:$0xff]  }
0x4afd   :  { %15358 = vmatprep.subr.bf16.mxu0 %v17205_v38 }
0x4b00   :  { %15359 = vmatpush3.bf16.msra.mxu0 %v16263_v16  ;;  %v16270_v16 = vld [vmem:[#allocation34 + $0x28] sm:$0xff]  }
0x4b01   :  { %15360 = vmatprep.subr.bf16.mxu0 %v17205_v38 }
0x4b04   :  { %15361 = vmatpush3.bf16.msra.mxu0 %v16264_v8  ;;  %v16271_v8 = vld [vmem:[#allocation34 + $0x20] sm:$0xff]  }
0x4b05   :  { %15362 = vmatprep.subr.bf16.mxu0 %v17205_v38 }
0x4b08   :  { %15363 = vmatpush3.bf16.msra.mxu0 %v16265_v46  ;;  %v16272_v46 = vld [vmem:[#allocation34 + $0x18] sm:$0xff]  }
0x4b09   :  { %15364 = vmatprep.subr.bf16.mxu0 %v17205_v38 }
0x4b0c   :  { %15365 = vmatpush3.bf16.msra.mxu0 %v16266_v58  ;;  %v16273_v58 = vld [vmem:[#allocation34 + $0x10] sm:$0xff]  }
0x4b0d   :  { %15366 = vmatprep.subr.bf16.mxu0 %v17205_v38 }
0x4b10   :  { %15367 = vmatpush3.bf16.msra.mxu0 %v16267_v62 }
0x4b11   :  { %15392 = vmatprep.subr.bf16.mxu0 %v17205_v38 }
0x4b29   :  { %v14325_v3 = vpop.f32.mrf.mxu1 }
0x4b2b   :  { %v14326_v53 = vpop.f32.mrf.mxu1 }
0x4b2c   :  { %v14327_v61 = vadd.f32 %v14326_v53, %v14325_v3  ;;  %v13696_v3 = vld [vmem:[#allocation28] ss:$0 sm:$0xff] }
0x4b2d   :  { %v14328_v7 = vpop.f32.mrf.mxu1 }
0x4b2e   :  { %v12498_v9 = vadd.f32 %v14327_v61, %v13671_v0 }
0x4b2f   :  { %v14329_v24 = vpop.f32.mrf.mxu1 }
0x4b6c   :  { %v8466_v41 = vpop.xlane.xlu0 %8465 }
0x4b6d   :  { %v8467_v4 = vmul.f32 0.0078125, %v8466_v41  ;;  %v13714_v41 = vld [vmem:[%s17382_s17] ss:$0 sm:$0xff] }
0x4b6f   :  { %v8468_v1 = vadd.f32 1e-05, %v8467_v4 }
0x4b71   :  { %16666 = vrsqrt.f32 %v8468_v1 }
0x4b72   :  { %16668 = vrsqrt.f32 %v4873_v14 }
0x4b73   :  { %16670 = vrsqrt.f32 %v12244_v32 }
0x4b7e   :  { %v16667_v28 = vpop.eup %16666 }
0x4b7f   :  { %v16669_v34 = vpop.eup %16668  ;;  %v8470_v36 = vmul.f32 %v16667_v28, %v19072_v56  ;;  %v13316_v56 = vld [vmem:[#allocation24 + $0x1] ss:$0 sm:$0xff] }
0x4b80   :  { %v4875_v11 = vmul.f32 %v16669_v34, %v19044_v20  ;;  %v16671_v55 = vpop.eup %16670 }
0x4b81   :  { %v8477_v2 = vmul.f32 %v13483_v35, %v8470_v36  ;;  %v12246_v42 = vmul.f32 %v16671_v55, %v19050_v49 }
0x4b82   :  { %v4882_v27 = vmul.f32 %v13315_v57, %v4875_v11 }
0x4b83   :  { %v8484_v6 = vadd.f32 %v13484_v60, %v8477_v2  ;;  %v12253_v43 = vmul.f32 %v13669_v63, %v12246_v42 }
0x4b84   :  { %v4889_v20 = vadd.f32 %v13316_v56, %v4882_v27 }
0x4b85   :  { %v12260_v12 = vadd.f32 %v13670_v51, %v12253_v43 }
0x4b86   :  { %v12771_v23 = vadd.f32 %v8484_v6, %v4889_v20 }
0x4b88   :  { %v12772_v49 = vadd.f32 %v12771_v23, %v12260_v12 }
0x4b8a   :  { %v12773_v22 = vadd.f32 %v12772_v49, %v12770_v26 }
0x4b8c   :  { %v12791_v30 = vpack.c.bf16 %v12773_v22, %v12773_v22 }
0x4bb2   :  { %v12537_v21 = vpop.f32.mrf.mxu0 }
0x4bb3   :  { %v12538_v50 = vadd.f32 %v12537_v21, %v12498_v9  ;;  %v13705_v9 = vld [vmem:[#allocation31] ss:$0 sm:$0xff] }
0x4bb4   :  { %v15330_v25 = vpop.f32.mrf.mxu0 }
0x4bb5   :  { %v12560_v37 = vpack.c.bf16 %v12538_v50, %v12538_v50 }
0x4bb6   :  { %v12540_v59 = vpop.f32.mrf.mxu0 }
0x4bb7   :  { %15349 = vmatmul.mubr.bf16.vlgmr.msra.gmra.mxu1 %v12560_v37  ;;  %v13723_v59 = vld [vmem:[%s17392_s20] ss:$0 sm:$0xff] }
0x4bb8   :  { %15373 = vmatpush3.bf16.msra.mxu1 %v16252_v29  ;;  %v15331_v19 = vpop.f32.mrf.mxu0  ;;  %15388 = vmatprep.mubr.msk.bf16.mxu1 %vm17206_vm1, %v17205_v38 }
0x4bb9   :  { %15374 = vmatprep.subr.bf16.mxu1 %v17205_v38 }
0x4bbc   :  { %15375 = vmatpush3.bf16.msra.mxu1 %v16253_v52 }
0x4bbd   :  { %15376 = vmatprep.subr.bf16.mxu1 %v17205_v38 }
0x4bc0   :  { %15377 = vmatpush3.bf16.msra.mxu1 %v16254_v54 }
0x4bc1   :  { %15378 = vmatprep.subr.bf16.mxu1 %v17205_v38 }
0x4bc4   :  { %15379 = vmatpush3.bf16.msra.mxu1 %v16255_v17 }
0x4bc5   :  { %15380 = vmatprep.subr.bf16.mxu1 %v17205_v38 }
0x4bc8   :  { %15381 = vmatpush3.bf16.msra.mxu1 %v16256_v39 }
0x4bc9   :  { %15382 = vmatprep.subr.bf16.mxu1 %v17205_v38 }
0x4bcc   :  { %15383 = vmatpush3.bf16.msra.mxu1 %v16257_v47 }
0x4bcd   :  { %15384 = vmatprep.subr.bf16.mxu1 %v17205_v38 }
0x4bd0   :  { %15385 = vmatpush3.bf16.msra.mxu1 %v16258_v13 }
0x4bd1   :  { %15386 = vmatprep.subr.bf16.mxu1 %v17205_v38 }
0x4bd4   :  { %15387 = vmatpush3.bf16.msra.mxu1 %v16259_v45 }
0x4bd7   :  { %15389 = vmatmul.mubr.bf16.vlgmr.msra.gmra.mxu1 %v12791_v30 }
0x4c77   :  { %v12649_v53 = vpop.f32.mrf.mxu1 }
0x4c78   :  { %v12650_v61 = vadd.f32 %v13696_v3, %v12649_v53 }
0x4c79   :  { %v15350_v7 = vpop.f32.mrf.mxu1 }
0x4c7a   :  { %v12655_v24 = vmax.f32 %v12650_v61, 0.0 }
0x4c7b   :  { %v12652_v31 = vpop.f32.mrf.mxu1 }
0x4c7c   :  { %v12673_v40 = vpack.c.bf16 %v12655_v24, %v12655_v24 }
0x4c7d   :  { %v15351_v44 = vpop.f32.mrf.mxu1 }
0x4c7e   :  { %15369 = vmatmul.mubr.bf16.vlgmr.msra.gmra.mxu0 %v12673_v40 }
0x4c7f   :  { %15393 = vmatpush3.bf16.msra.mxu0 %v16268_v15  ;;  %15408 = vmatprep.mubr.msk.bf16.mxu0 %vm17206_vm1, %v17205_v38 }
0x4c80   :  { %15394 = vmatprep.subr.bf16.mxu0 %v17205_v38 }
0x4c83   :  { %15395 = vmatpush3.bf16.msra.mxu0 %v16269_v18 }
0x4c84   :  { %15396 = vmatprep.subr.bf16.mxu0 %v17205_v38 }
0x4c87   :  { %15397 = vmatpush3.bf16.msra.mxu0 %v16270_v16 }
0x4c88   :  { %15398 = vmatprep.subr.bf16.mxu0 %v17205_v38 }
0x4c8b   :  { %15399 = vmatpush3.bf16.msra.mxu0 %v16271_v8 }
0x4c8c   :  { %15400 = vmatprep.subr.bf16.mxu0 %v17205_v38 }
0x4c8f   :  { %15401 = vmatpush3.bf16.msra.mxu0 %v16272_v46 }
0x4c90   :  { %15402 = vmatprep.subr.bf16.mxu0 %v17205_v38 }
0x4c93   :  { %15403 = vmatpush3.bf16.msra.mxu0 %v16273_v58 }
0x4c94   :  { %15404 = vmatprep.subr.bf16.mxu0 %v17205_v38 }
0x4c97   :  { %v12880_v4 = vpop.f32.mrf.mxu1  ;;  %15405 = vmatpush3.bf16.msra.mxu0 %v16274_v10 }
0x4c98   :  { %v12881_v33 = vadd.f32 %v13714_v41, %v12880_v4  ;;  %15406 = vmatprep.subr.bf16.mxu0 %v17205_v38 }
0x4c99   :  { %v15390_v1 = vpop.f32.mrf.mxu1 }
0x4c9a   :  { %v12886_v14 = vmax.f32 %v12881_v33, 0.0 }
0x4c9b   :  { %v12883_v5 = vpop.f32.mrf.mxu1  ;;  %15407 = vmatpush3.bf16.msra.mxu0 %v16275_v48 }
0x4c9c   :  { %v12904_v0 = vpack.c.bf16 %v12886_v14, %v12886_v14 }
0x4c9d   :  { %v15391_v32 = vpop.f32.mrf.mxu1 }
0x4c9e   :  { %15409 = vmatmul.mubr.bf16.vlgmr.msra.gmra.mxu0 %v12904_v0 }
0x4d3e   :  { %v12762_v21 = vpop.f32.mrf.mxu0 }
0x4d3f   :  { %v12763_v50 = vadd.f32 %v13705_v9, %v12762_v21 }
0x4d40   :  { %v15370_v25 = vpop.f32.mrf.mxu0 }
0x4d41   :  { %13732 = vst [vmem:[%s17397_s9 + $0x2] sm:$0x3] %v12763_v50 }
0x4d42   :  { %v12765_v29 = vpop.f32.mrf.mxu0 }
0x4d44   :  { %v15371_v37 = vpop.f32.mrf.mxu0 }
0x4d5e   :  { %v12993_v19 = vpop.f32.mrf.mxu0 }
0x4d5f   :  { %v12994_v52 = vadd.f32 %v13723_v59, %v12993_v19 }
0x4d60   :  { %v15410_v28 = vpop.f32.mrf.mxu0 }
0x4d61   :  { %12999 = vst [vmem:[%s17397_s9] sm:$0x3] %v12994_v52 }
0x4d62   :  { %v12996_v38 = vpop.f32.mrf.mxu0 }
0x4d64   :  { %v15411_v34 = vpop.f32.mrf.mxu0 }
0x4d65   :  { %13006 = vsyncpa [#allocation3], 1 }
0x4d66   :  { %13007 = vsyncpa [#allocation5], 1 }
0x4d67   :  { %13008 = vsyncpa [#allocation8], 1 }
0x4d68   :  { %13009 = vsyncpa [#allocation11], 1 }
0x4d69   :  { %13010 = vsyncpa [#allocation14], 1 }
0x4d6a   :  { %13011 = vsyncpa [#allocation17], 1 }
0x4d6b   :  { %13012 = vsyncpa [#allocation20], 1 }
0x4d6c   :  { %13013 = vsyncpa [#allocation23], 1 }
0x4d6d   :  { %13014 = vsyncpa [#allocation26], 1 }
0x4d6e   :  { %13015 = vsyncpa [#allocation29], 1 }
0x4d6f   :  { %13016 = vsyncpa [#allocation32], 1 }
0x4d70   :  { %13017 = vsyncpa [#allocation35], 1 }

</bundles_post_ra>
